<compile_context>
chip_gen: v6e
topology: v6e:2x2x1
jax: 0.10.0
libtpu: 0.0.40
codegen_flags: <defaults>
</compile_context>

<pallas_src>
import functools

import jax
import jax.numpy as jnp
from jax import lax
from jax.experimental import pallas as pl
from jax.experimental.pallas import tpu as pltpu


def _basic_block_kernel(x_ref, w1_ref, s1_ref, b1_ref, w2_ref, s2_ref, b2_ref,
                        o_ref, pad_ref, patch_ref):
    """Fused BasicBlock forward for a tile of images (stride=1, no downsample).

    x_ref / o_ref blocks are (B, H, W*C) (lane-dense). pad_ref is a shared
    (B, H+2, W+2, C) bf16 scratch reused by both convs; patch_ref is the
    (B, H, W, 9C) bf16 im2col buffer (also reused).
    """
    B, Hp2, Wp2, C = pad_ref.shape
    H, W = Hp2 - 2, Wp2 - 2
    K = 9 * C

    # Zero only the 1-pixel border strips; the interior is fully overwritten
    # below.  (No full-scratch memset on the critical path, and no reliance on
    # program_id==0 — safe under megacore sharding of the parallel axis.)
    zrow = jnp.zeros((B, 1, Wp2, C), pad_ref.dtype)
    zcol = jnp.zeros((B, Hp2, 1, C), pad_ref.dtype)
    pad_ref[:, 0:1, :, :] = zrow
    pad_ref[:, H + 1:H + 2, :, :] = zrow
    pad_ref[:, :, 0:1, :] = zcol
    pad_ref[:, :, W + 1:W + 2, :] = zcol

    def conv3x3(w_ref):
        # im2col: gather the 9 shifted windows into (B, H, W, 9C) bf16, then a
        # single MXU contraction (rows, 9C) x (9C, C) with f32 accumulation.
        for dy in range(3):
            for dx in range(3):
                t = dy * 3 + dx
                patch_ref[:, :, :, t * C:(t + 1) * C] = (
                    pad_ref[:, dy:dy + H, dx:dx + W, :])
        lhs = patch_ref[...].reshape(B * H * W, K)
        acc = jnp.dot(lhs, w_ref[...], preferred_element_type=jnp.float32)
        return acc.reshape(B, H, W, C)

    x = x_ref[...].reshape(B, H, W, C)            # split lanes W*C -> (W, C)

    # ---- conv1 -> bn1 (folded) -> relu ----
    pad_ref[:, 1:H + 1, 1:W + 1, :] = x.astype(pad_ref.dtype)
    y = conv3x3(w1_ref) * s1_ref[...] + b1_ref[...]
    y = jnp.maximum(y, 0.0)

    # ---- conv2 -> bn2 (folded) -> + residual -> relu ----
    # Intermediate stays in VMEM; same padded scratch reused for conv2.
    pad_ref[:, 1:H + 1, 1:W + 1, :] = y.astype(pad_ref.dtype)
    z = conv3x3(w2_ref) * s2_ref[...] + b2_ref[...]
    z = jnp.maximum(z + x, 0.0)                   # residual add in f32
    o_ref[...] = z.reshape(B, H, W * C).astype(o_ref.dtype)


def _pick_batch_tile(n):
    """Largest divisor of n that still leaves >= 2 grid steps (v7x: 2 TCs)."""
    if n < 2:
        return max(n, 1)
    for bt in range(n // 2, 0, -1):
        if n % bt == 0:
            return bt
    return 1


def _fold_bn(gamma, beta, running_mean, running_var, eps=1e-5):
    scale = gamma / jnp.sqrt(running_var + eps)
    bias = beta - running_mean * scale
    return scale.reshape(1, -1), bias.reshape(1, -1)          # (1, C)


def prepare_params(raw):
    """Repack PyTorch-style params: OIHW conv weights -> bf16 (9*Cin, Cout),
    BatchNorm folded into f32 per-channel scale/bias."""
    c_out, c_in = raw["w1_oihw"].shape[:2]
    assert c_in == c_out, "identity residual requires Cin == Cout"

    def repack(w_oihw):
        w = jnp.transpose(w_oihw, (2, 3, 1, 0)).reshape(9 * c_in, c_out)
        return w.astype(jnp.bfloat16)             # MXU operand dtype

    s1, b1 = _fold_bn(raw["g1"], raw["b1"], raw["m1"], raw["v1"])
    s2, b2 = _fold_bn(raw["g2"], raw["b2"], raw["m2"], raw["v2"])
    return {"w1": repack(raw["w1_oihw"]), "w2": repack(raw["w2_oihw"]),
            "scale1": s1, "bias1": b1, "scale2": s2, "bias2": b2}


def basic_block_forward_nhwc(x_nhwc, params):
    """BasicBlock forward (stride=1, downsample=None). Input/Output: NHWC.

    Use this entry point when stacking blocks so activations stay NHWC and
    the NCHW<->NHWC transpose is paid once at the network boundary."""
    N, H, W, C = x_nhwc.shape
    KC = 9 * C
    assert params["w1"].shape == (KC, C)
    bt = _pick_batch_tile(N)
    grid = (N // bt,)

    # Lane-dense HBM layout for the kernel blocks: (N, H, W*C).
    x = x_nhwc.reshape(N, H, W * C)

    # Advisory cost for XLA scheduling around the custom call.
    flops = N * 2 * (2 * 9 * H * W * C * C)                   # two 3x3 convs
    bytes_accessed = (4 * 2 * N * H * W * C                   # f32 acts in+out
                      + 2 * 2 * KC * C                        # bf16 weights
                      + 4 * 4 * C)                            # f32 scale/bias
    cost = pl.CostEstimate(flops=flops, transcendentals=0,
                           bytes_accessed=bytes_accessed)

    const = lambda n: (0, 0)
    out = pl.pallas_call(
        _basic_block_kernel,
        out_shape=jax.ShapeDtypeStruct((N, H, W * C), x_nhwc.dtype),
        grid=grid,
        in_specs=[
            pl.BlockSpec((bt, H, W * C), lambda n: (n, 0, 0)),  # x tile
            pl.BlockSpec((KC, C), const),                       # w1 (bf16)
            pl.BlockSpec((1, C), const),                        # scale1
            pl.BlockSpec((1, C), const),                        # bias1
            pl.BlockSpec((KC, C), const),                       # w2 (bf16)
            pl.BlockSpec((1, C), const),                        # scale2
            pl.BlockSpec((1, C), const),                        # bias2
        ],
        out_specs=pl.BlockSpec((bt, H, W * C), lambda n: (n, 0, 0)),
        scratch_shapes=[
            pltpu.VMEM((bt, H + 2, W + 2, C), jnp.bfloat16),    # shared pad
            pltpu.VMEM((bt, H, W, KC), jnp.bfloat16),           # im2col buf
        ],
        compiler_params=pltpu.CompilerParams(
            dimension_semantics=("parallel",)),
        cost_estimate=cost,
    )(x, params["w1"], params["scale1"], params["bias1"],
      params["w2"], params["scale2"], params["bias2"])

    return out.reshape(N, H, W, C)


def basic_block_forward(x_nchw, params):
    """Module-facing NCHW wrapper (transpose once at the boundary)."""
    x = jnp.transpose(x_nchw, (0, 2, 3, 1))                    # NHWC
    y = basic_block_forward_nhwc(x, params)
    return jnp.transpose(y, (0, 3, 1, 2))                      # back to NCHW


def _reference_forward(x_nchw, raw):
    """Pure-JAX reference (lax.conv, f32) for correctness checking."""
    x = jnp.transpose(x_nchw, (0, 2, 3, 1))
    dn = ("NHWC", "HWIO", "NHWC")
    s1, b1 = _fold_bn(raw["g1"], raw["b1"], raw["m1"], raw["v1"])
    s2, b2 = _fold_bn(raw["g2"], raw["b2"], raw["m2"], raw["v2"])
    w1_hwio = jnp.transpose(raw["w1_oihw"], (2, 3, 1, 0))
    w2_hwio = jnp.transpose(raw["w2_oihw"], (2, 3, 1, 0))
    y = lax.conv_general_dilated(x, w1_hwio, (1, 1), "SAME",
                                 dimension_numbers=dn)
    y = jnp.maximum(y * s1 + b1, 0.0)
    y2 = lax.conv_general_dilated(y, w2_hwio, (1, 1), "SAME",
                                  dimension_numbers=dn)
    y2 = jnp.maximum(y2 * s2 + b2 + x, 0.0)
    return jnp.transpose(y2, (0, 3, 1, 2))


if __name__ == "__main__":
    # Small shapes consistent with the module: in_channels = out_channels = 4.
    N, C, H, W = 2, 4, 16, 16
    key = jax.random.PRNGKey(0)
    ks = jax.random.split(key, 11)

    x = jax.random.normal(ks[0], (N, C, H, W), jnp.float32)

    raw = {
        "w1_oihw": 0.1 * jax.random.normal(ks[1], (C, C, 3, 3), jnp.float32),
        "w2_oihw": 0.1 * jax.random.normal(ks[2], (C, C, 3, 3), jnp.float32),
        "g1": 1.0 + 0.1 * jax.random.normal(ks[3], (C,), jnp.float32),
        "b1": 0.1 * jax.random.normal(ks[4], (C,), jnp.float32),
        "m1": 0.1 * jax.random.normal(ks[5], (C,), jnp.float32),
        "v1": 1.0 + 0.1 * jnp.abs(jax.random.normal(ks[6], (C,), jnp.float32)),
        "g2": 1.0 + 0.1 * jax.random.normal(ks[7], (C,), jnp.float32),
        "b2": 0.1 * jax.random.normal(ks[8], (C,), jnp.float32),
        "m2": 0.1 * jax.random.normal(ks[9], (C,), jnp.float32),
        "v2": 1.0 + 0.1 * jnp.abs(jax.random.normal(ks[10], (C,), jnp.float32)),
    }

    params = prepare_params(raw)

    out = jax.jit(functools.partial(basic_block_forward, params=params))(x)
    out = jax.block_until_ready(out)

    ref = jax.block_until_ready(_reference_forward(x, raw))
    assert out.shape == (N, C, H, W)
    # bf16 MXU operands (f32 accumulation) vs. the f32 reference -> relaxed tol.
    assert jnp.allclose(out, ref, atol=5e-2, rtol=5e-2), "mismatch vs reference"

    print("KERNEL_OK")
</pallas_src>

<mosaic_0001>
module attributes {stable_mosaic.version = 11 : i64} {
  func.func @_basic_block_kernel(%arg0: i32, %arg1: memref<1x16x64xf32, #tpu.memory_space<vmem>>, %arg2: memref<36x4xbf16, #tpu.memory_space<vmem>>, %arg3: memref<1x4xf32, #tpu.memory_space<vmem>>, %arg4: memref<1x4xf32, #tpu.memory_space<vmem>>, %arg5: memref<36x4xbf16, #tpu.memory_space<vmem>>, %arg6: memref<1x4xf32, #tpu.memory_space<vmem>>, %arg7: memref<1x4xf32, #tpu.memory_space<vmem>>, %arg8: memref<1x16x64xf32, #tpu.memory_space<vmem>>, %arg9: memref<1x18x18x4xbf16, #tpu.memory_space<vmem>>, %arg10: memref<1x16x16x36xbf16, #tpu.memory_space<vmem>>) attributes {dimension_semantics = [#tpu.dimension_semantics<parallel>], iteration_bounds = array<i64: 2>, scalar_prefetch = 0 : i64, scratch_operands = 2 : i64, tpu.core_type = #tpu.core_type<tc>, window_params = [{transform_indices = @transform_0, window_bounds = array<i64: 1, 16, 64>}, {pipeline_mode = #tpu.pipeline_mode<synchronous>, transform_indices = @transform_1, window_bounds = array<i64: 36, 4>}, {pipeline_mode = #tpu.pipeline_mode<synchronous>, transform_indices = @transform_2, window_bounds = array<i64: 1, 4>}, {pipeline_mode = #tpu.pipeline_mode<synchronous>, transform_indices = @transform_3, window_bounds = array<i64: 1, 4>}, {pipeline_mode = #tpu.pipeline_mode<synchronous>, transform_indices = @transform_4, window_bounds = array<i64: 36, 4>}, {pipeline_mode = #tpu.pipeline_mode<synchronous>, transform_indices = @transform_5, window_bounds = array<i64: 1, 4>}, {pipeline_mode = #tpu.pipeline_mode<synchronous>, transform_indices = @transform_6, window_bounds = array<i64: 1, 4>}, {transform_indices = @transform_7, window_bounds = array<i64: 1, 16, 64>}]} {
    %cst = arith.constant 0.000000e+00 : bf16
    %0 = vector.broadcast %cst : bf16 to vector<1x1x18x4xbf16>
    %cst_0 = arith.constant 0.000000e+00 : bf16
    %1 = vector.broadcast %cst_0 : bf16 to vector<1x18x1x4xbf16>
    %c0 = arith.constant 0 : index
    %c0_1 = arith.constant 0 : index
    %c0_2 = arith.constant 0 : index
    %c0_3 = arith.constant 0 : index
    %2 = vector.load %arg9[%c0, %c0_1, %c0_2, %c0_3] : memref<1x18x18x4xbf16, #tpu.memory_space<vmem>>, vector<1x1x18x4xbf16>
    tpu.vector_store %arg9[%c0, %c0_1, %c0_2, %c0_3], %0 {strides = array<i32>} : memref<1x18x18x4xbf16, #tpu.memory_space<vmem>>, vector<1x1x18x4xbf16>,
    %c0_4 = arith.constant 0 : index
    %c17 = arith.constant 17 : index
    %c0_5 = arith.constant 0 : index
    %c0_6 = arith.constant 0 : index
    %3 = vector.load %arg9[%c0_4, %c17, %c0_5, %c0_6] : memref<1x18x18x4xbf16, #tpu.memory_space<vmem>>, vector<1x1x18x4xbf16>
    tpu.vector_store %arg9[%c0_4, %c17, %c0_5, %c0_6], %0 {strides = array<i32>} : memref<1x18x18x4xbf16, #tpu.memory_space<vmem>>, vector<1x1x18x4xbf16>,
    %c0_7 = arith.constant 0 : index
    %c0_8 = arith.constant 0 : index
    %c0_9 = arith.constant 0 : index
    %c0_10 = arith.constant 0 : index
    %4 = vector.load %arg9[%c0_7, %c0_8, %c0_9, %c0_10] : memref<1x18x18x4xbf16, #tpu.memory_space<vmem>>, vector<1x18x1x4xbf16>
    tpu.vector_store %arg9[%c0_7, %c0_8, %c0_9, %c0_10], %1 {strides = array<i32>} : memref<1x18x18x4xbf16, #tpu.memory_space<vmem>>, vector<1x18x1x4xbf16>,
    %c0_11 = arith.constant 0 : index
    %c0_12 = arith.constant 0 : index
    %c17_13 = arith.constant 17 : index
    %c0_14 = arith.constant 0 : index
    %5 = vector.load %arg9[%c0_11, %c0_12, %c17_13, %c0_14] : memref<1x18x18x4xbf16, #tpu.memory_space<vmem>>, vector<1x18x1x4xbf16>
    tpu.vector_store %arg9[%c0_11, %c0_12, %c17_13, %c0_14], %1 {strides = array<i32>} : memref<1x18x18x4xbf16, #tpu.memory_space<vmem>>, vector<1x18x1x4xbf16>,
    %c0_15 = arith.constant 0 : index
    %c0_16 = arith.constant 0 : index
    %c0_17 = arith.constant 0 : index
    %6 = vector.load %arg1[%c0_15, %c0_16, %c0_17] : memref<1x16x64xf32, #tpu.memory_space<vmem>>, vector<1x16x64xf32>
    %7 = vector.shape_cast %6 : vector<1x16x64xf32> to vector<1x16x16x4xf32>
    %8 = arith.truncf %7 : vector<1x16x16x4xf32> to vector<1x16x16x4xbf16>
    %c0_18 = arith.constant 0 : index
    %c1 = arith.constant 1 : index
    %c1_19 = arith.constant 1 : index
    %c0_20 = arith.constant 0 : index
    %9 = vector.load %arg9[%c0_18, %c1, %c1_19, %c0_20] : memref<1x18x18x4xbf16, #tpu.memory_space<vmem>>, vector<1x16x16x4xbf16>
    tpu.vector_store %arg9[%c0_18, %c1, %c1_19, %c0_20], %8 {strides = array<i32>} : memref<1x18x18x4xbf16, #tpu.memory_space<vmem>>, vector<1x16x16x4xbf16>,
    %c0_21 = arith.constant 0 : index
    %c0_22 = arith.constant 0 : index
    %c0_23 = arith.constant 0 : index
    %c0_24 = arith.constant 0 : index
    %10 = vector.load %arg9[%c0_21, %c0_22, %c0_23, %c0_24] : memref<1x18x18x4xbf16, #tpu.memory_space<vmem>>, vector<1x16x16x4xbf16>
    %c0_25 = arith.constant 0 : index
    %c0_26 = arith.constant 0 : index
    %c0_27 = arith.constant 0 : index
    %c0_28 = arith.constant 0 : index
    %11 = vector.load %arg10[%c0_25, %c0_26, %c0_27, %c0_28] : memref<1x16x16x36xbf16, #tpu.memory_space<vmem>>, vector<1x16x16x4xbf16>
    tpu.vector_store %arg10[%c0_25, %c0_26, %c0_27, %c0_28], %10 {strides = array<i32>} : memref<1x16x16x36xbf16, #tpu.memory_space<vmem>>, vector<1x16x16x4xbf16>,
    %c0_29 = arith.constant 0 : index
    %c0_30 = arith.constant 0 : index
    %c1_31 = arith.constant 1 : index
    %c0_32 = arith.constant 0 : index
    %12 = vector.load %arg9[%c0_29, %c0_30, %c1_31, %c0_32] : memref<1x18x18x4xbf16, #tpu.memory_space<vmem>>, vector<1x16x16x4xbf16>
    %c0_33 = arith.constant 0 : index
    %c0_34 = arith.constant 0 : index
    %c0_35 = arith.constant 0 : index
    %c4 = arith.constant 4 : index
    %13 = vector.load %arg10[%c0_33, %c0_34, %c0_35, %c4] : memref<1x16x16x36xbf16, #tpu.memory_space<vmem>>, vector<1x16x16x4xbf16>
    tpu.vector_store %arg10[%c0_33, %c0_34, %c0_35, %c4], %12 {strides = array<i32>} : memref<1x16x16x36xbf16, #tpu.memory_space<vmem>>, vector<1x16x16x4xbf16>,
    %c0_36 = arith.constant 0 : index
    %c0_37 = arith.constant 0 : index
    %c2 = arith.constant 2 : index
    %c0_38 = arith.constant 0 : index
    %14 = vector.load %arg9[%c0_36, %c0_37, %c2, %c0_38] : memref<1x18x18x4xbf16, #tpu.memory_space<vmem>>, vector<1x16x16x4xbf16>
    %c0_39 = arith.constant 0 : index
    %c0_40 = arith.constant 0 : index
    %c0_41 = arith.constant 0 : index
    %c8 = arith.constant 8 : index
    %15 = vector.load %arg10[%c0_39, %c0_40, %c0_41, %c8] : memref<1x16x16x36xbf16, #tpu.memory_space<vmem>>, vector<1x16x16x4xbf16>
    tpu.vector_store %arg10[%c0_39, %c0_40, %c0_41, %c8], %14 {strides = array<i32>} : memref<1x16x16x36xbf16, #tpu.memory_space<vmem>>, vector<1x16x16x4xbf16>,
    %c0_42 = arith.constant 0 : index
    %c1_43 = arith.constant 1 : index
    %c0_44 = arith.constant 0 : index
    %c0_45 = arith.constant 0 : index
    %16 = vector.load %arg9[%c0_42, %c1_43, %c0_44, %c0_45] : memref<1x18x18x4xbf16, #tpu.memory_space<vmem>>, vector<1x16x16x4xbf16>
    %c0_46 = arith.constant 0 : index
    %c0_47 = arith.constant 0 : index
    %c0_48 = arith.constant 0 : index
    %c12 = arith.constant 12 : index
    %17 = vector.load %arg10[%c0_46, %c0_47, %c0_48, %c12] : memref<1x16x16x36xbf16, #tpu.memory_space<vmem>>, vector<1x16x16x4xbf16>
    tpu.vector_store %arg10[%c0_46, %c0_47, %c0_48, %c12], %16 {strides = array<i32>} : memref<1x16x16x36xbf16, #tpu.memory_space<vmem>>, vector<1x16x16x4xbf16>,
    %c0_49 = arith.constant 0 : index
    %c1_50 = arith.constant 1 : index
    %c1_51 = arith.constant 1 : index
    %c0_52 = arith.constant 0 : index
    %18 = vector.load %arg9[%c0_49, %c1_50, %c1_51, %c0_52] : memref<1x18x18x4xbf16, #tpu.memory_space<vmem>>, vector<1x16x16x4xbf16>
    %c0_53 = arith.constant 0 : index
    %c0_54 = arith.constant 0 : index
    %c0_55 = arith.constant 0 : index
    %c16 = arith.constant 16 : index
    %19 = vector.load %arg10[%c0_53, %c0_54, %c0_55, %c16] : memref<1x16x16x36xbf16, #tpu.memory_space<vmem>>, vector<1x16x16x4xbf16>
    tpu.vector_store %arg10[%c0_53, %c0_54, %c0_55, %c16], %18 {strides = array<i32>} : memref<1x16x16x36xbf16, #tpu.memory_space<vmem>>, vector<1x16x16x4xbf16>,
    %c0_56 = arith.constant 0 : index
    %c1_57 = arith.constant 1 : index
    %c2_58 = arith.constant 2 : index
    %c0_59 = arith.constant 0 : index
    %20 = vector.load %arg9[%c0_56, %c1_57, %c2_58, %c0_59] : memref<1x18x18x4xbf16, #tpu.memory_space<vmem>>, vector<1x16x16x4xbf16>
    %c0_60 = arith.constant 0 : index
    %c0_61 = arith.constant 0 : index
    %c0_62 = arith.constant 0 : index
    %c20 = arith.constant 20 : index
    %21 = vector.load %arg10[%c0_60, %c0_61, %c0_62, %c20] : memref<1x16x16x36xbf16, #tpu.memory_space<vmem>>, vector<1x16x16x4xbf16>
    tpu.vector_store %arg10[%c0_60, %c0_61, %c0_62, %c20], %20 {strides = array<i32>} : memref<1x16x16x36xbf16, #tpu.memory_space<vmem>>, vector<1x16x16x4xbf16>,
    %c0_63 = arith.constant 0 : index
    %c2_64 = arith.constant 2 : index
    %c0_65 = arith.constant 0 : index
    %c0_66 = arith.constant 0 : index
    %22 = vector.load %arg9[%c0_63, %c2_64, %c0_65, %c0_66] : memref<1x18x18x4xbf16, #tpu.memory_space<vmem>>, vector<1x16x16x4xbf16>
    %c0_67 = arith.constant 0 : index
    %c0_68 = arith.constant 0 : index
    %c0_69 = arith.constant 0 : index
    %c24 = arith.constant 24 : index
    %23 = vector.load %arg10[%c0_67, %c0_68, %c0_69, %c24] : memref<1x16x16x36xbf16, #tpu.memory_space<vmem>>, vector<1x16x16x4xbf16>
    tpu.vector_store %arg10[%c0_67, %c0_68, %c0_69, %c24], %22 {strides = array<i32>} : memref<1x16x16x36xbf16, #tpu.memory_space<vmem>>, vector<1x16x16x4xbf16>,
    %c0_70 = arith.constant 0 : index
    %c2_71 = arith.constant 2 : index
    %c1_72 = arith.constant 1 : index
    %c0_73 = arith.constant 0 : index
    %24 = vector.load %arg9[%c0_70, %c2_71, %c1_72, %c0_73] : memref<1x18x18x4xbf16, #tpu.memory_space<vmem>>, vector<1x16x16x4xbf16>
    %c0_74 = arith.constant 0 : index
    %c0_75 = arith.constant 0 : index
    %c0_76 = arith.constant 0 : index
    %c28 = arith.constant 28 : index
    %25 = vector.load %arg10[%c0_74, %c0_75, %c0_76, %c28] : memref<1x16x16x36xbf16, #tpu.memory_space<vmem>>, vector<1x16x16x4xbf16>
    tpu.vector_store %arg10[%c0_74, %c0_75, %c0_76, %c28], %24 {strides = array<i32>} : memref<1x16x16x36xbf16, #tpu.memory_space<vmem>>, vector<1x16x16x4xbf16>,
    %c0_77 = arith.constant 0 : index
    %c2_78 = arith.constant 2 : index
    %c2_79 = arith.constant 2 : index
    %c0_80 = arith.constant 0 : index
    %26 = vector.load %arg9[%c0_77, %c2_78, %c2_79, %c0_80] : memref<1x18x18x4xbf16, #tpu.memory_space<vmem>>, vector<1x16x16x4xbf16>
    %c0_81 = arith.constant 0 : index
    %c0_82 = arith.constant 0 : index
    %c0_83 = arith.constant 0 : index
    %c32 = arith.constant 32 : index
    %27 = vector.load %arg10[%c0_81, %c0_82, %c0_83, %c32] : memref<1x16x16x36xbf16, #tpu.memory_space<vmem>>, vector<1x16x16x4xbf16>
    tpu.vector_store %arg10[%c0_81, %c0_82, %c0_83, %c32], %26 {strides = array<i32>} : memref<1x16x16x36xbf16, #tpu.memory_space<vmem>>, vector<1x16x16x4xbf16>,
    %c0_84 = arith.constant 0 : index
    %c0_85 = arith.constant 0 : index
    %c0_86 = arith.constant 0 : index
    %c0_87 = arith.constant 0 : index
    %28 = vector.load %arg10[%c0_84, %c0_85, %c0_86, %c0_87] : memref<1x16x16x36xbf16, #tpu.memory_space<vmem>>, vector<1x16x16x36xbf16>
    %29 = vector.shape_cast %28 : vector<1x16x16x36xbf16> to vector<256x36xbf16>
    %c0_88 = arith.constant 0 : index
    %c0_89 = arith.constant 0 : index
    %30 = vector.load %arg2[%c0_88, %c0_89] : memref<36x4xbf16, #tpu.memory_space<vmem>>, vector<36x4xbf16>
    %cst_90 = arith.constant dense<0.000000e+00> : vector<256x4xf32>
    %31 = tpu.matmul %29, %30, %cst_90 {dimension_numbers = #tpu.dot_dimension_numbers<[1], [0], [0], [1], [0, 0, 1, 1], [], []>} : vector<256x36xbf16>, vector<36x4xbf16>, vector<256x4xf32> -> vector<256x4xf32>
    %32 = vector.shape_cast %31 : vector<256x4xf32> to vector<1x16x16x4xf32>
    %c0_91 = arith.constant 0 : index
    %c0_92 = arith.constant 0 : index
    %33 = vector.load %arg3[%c0_91, %c0_92] : memref<1x4xf32, #tpu.memory_space<vmem>>, vector<1x4xf32>
    %34 = vector.shape_cast %33 : vector<1x4xf32> to vector<1x1x1x4xf32>
    %35 = vector.broadcast %34 : vector<1x1x1x4xf32> to vector<1x16x16x4xf32>
    %36 = arith.mulf %32, %35 : vector<1x16x16x4xf32>
    %c0_93 = arith.constant 0 : index
    %c0_94 = arith.constant 0 : index
    %37 = vector.load %arg4[%c0_93, %c0_94] : memref<1x4xf32, #tpu.memory_space<vmem>>, vector<1x4xf32>
    %38 = vector.shape_cast %37 : vector<1x4xf32> to vector<1x1x1x4xf32>
    %39 = vector.broadcast %38 : vector<1x1x1x4xf32> to vector<1x16x16x4xf32>
    %40 = arith.addf %36, %39 : vector<1x16x16x4xf32>
    %cst_95 = arith.constant 0.000000e+00 : f32
    %41 = vector.broadcast %cst_95 : f32 to vector<1x16x16x4xf32>
    %42 = arith.maximumf %40, %41 : vector<1x16x16x4xf32>
    %43 = arith.truncf %42 : vector<1x16x16x4xf32> to vector<1x16x16x4xbf16>
    %c0_96 = arith.constant 0 : index
    %c1_97 = arith.constant 1 : index
    %c1_98 = arith.constant 1 : index
    %c0_99 = arith.constant 0 : index
    %44 = vector.load %arg9[%c0_96, %c1_97, %c1_98, %c0_99] : memref<1x18x18x4xbf16, #tpu.memory_space<vmem>>, vector<1x16x16x4xbf16>
    tpu.vector_store %arg9[%c0_96, %c1_97, %c1_98, %c0_99], %43 {strides = array<i32>} : memref<1x18x18x4xbf16, #tpu.memory_space<vmem>>, vector<1x16x16x4xbf16>,
    %c0_100 = arith.constant 0 : index
    %c0_101 = arith.constant 0 : index
    %c0_102 = arith.constant 0 : index
    %c0_103 = arith.constant 0 : index
    %45 = vector.load %arg9[%c0_100, %c0_101, %c0_102, %c0_103] : memref<1x18x18x4xbf16, #tpu.memory_space<vmem>>, vector<1x16x16x4xbf16>
    %c0_104 = arith.constant 0 : index
    %c0_105 = arith.constant 0 : index
    %c0_106 = arith.constant 0 : index
    %c0_107 = arith.constant 0 : index
    %46 = vector.load %arg10[%c0_104, %c0_105, %c0_106, %c0_107] : memref<1x16x16x36xbf16, #tpu.memory_space<vmem>>, vector<1x16x16x4xbf16>
    tpu.vector_store %arg10[%c0_104, %c0_105, %c0_106, %c0_107], %45 {strides = array<i32>} : memref<1x16x16x36xbf16, #tpu.memory_space<vmem>>, vector<1x16x16x4xbf16>,
    %c0_108 = arith.constant 0 : index
    %c0_109 = arith.constant 0 : index
    %c1_110 = arith.constant 1 : index
    %c0_111 = arith.constant 0 : index
    %47 = vector.load %arg9[%c0_108, %c0_109, %c1_110, %c0_111] : memref<1x18x18x4xbf16, #tpu.memory_space<vmem>>, vector<1x16x16x4xbf16>
    %c0_112 = arith.constant 0 : index
    %c0_113 = arith.constant 0 : index
    %c0_114 = arith.constant 0 : index
    %c4_115 = arith.constant 4 : index
    %48 = vector.load %arg10[%c0_112, %c0_113, %c0_114, %c4_115] : memref<1x16x16x36xbf16, #tpu.memory_space<vmem>>, vector<1x16x16x4xbf16>
    tpu.vector_store %arg10[%c0_112, %c0_113, %c0_114, %c4_115], %47 {strides = array<i32>} : memref<1x16x16x36xbf16, #tpu.memory_space<vmem>>, vector<1x16x16x4xbf16>,
    %c0_116 = arith.constant 0 : index
    %c0_117 = arith.constant 0 : index
    %c2_118 = arith.constant 2 : index
    %c0_119 = arith.constant 0 : index
    %49 = vector.load %arg9[%c0_116, %c0_117, %c2_118, %c0_119] : memref<1x18x18x4xbf16, #tpu.memory_space<vmem>>, vector<1x16x16x4xbf16>
    %c0_120 = arith.constant 0 : index
    %c0_121 = arith.constant 0 : index
    %c0_122 = arith.constant 0 : index
    %c8_123 = arith.constant 8 : index
    %50 = vector.load %arg10[%c0_120, %c0_121, %c0_122, %c8_123] : memref<1x16x16x36xbf16, #tpu.memory_space<vmem>>, vector<1x16x16x4xbf16>
    tpu.vector_store %arg10[%c0_120, %c0_121, %c0_122, %c8_123], %49 {strides = array<i32>} : memref<1x16x16x36xbf16, #tpu.memory_space<vmem>>, vector<1x16x16x4xbf16>,
    %c0_124 = arith.constant 0 : index
    %c1_125 = arith.constant 1 : index
    %c0_126 = arith.constant 0 : index
    %c0_127 = arith.constant 0 : index
    %51 = vector.load %arg9[%c0_124, %c1_125, %c0_126, %c0_127] : memref<1x18x18x4xbf16, #tpu.memory_space<vmem>>, vector<1x16x16x4xbf16>
    %c0_128 = arith.constant 0 : index
    %c0_129 = arith.constant 0 : index
    %c0_130 = arith.constant 0 : index
    %c12_131 = arith.constant 12 : index
    %52 = vector.load %arg10[%c0_128, %c0_129, %c0_130, %c12_131] : memref<1x16x16x36xbf16, #tpu.memory_space<vmem>>, vector<1x16x16x4xbf16>
    tpu.vector_store %arg10[%c0_128, %c0_129, %c0_130, %c12_131], %51 {strides = array<i32>} : memref<1x16x16x36xbf16, #tpu.memory_space<vmem>>, vector<1x16x16x4xbf16>,
    %c0_132 = arith.constant 0 : index
    %c1_133 = arith.constant 1 : index
    %c1_134 = arith.constant 1 : index
    %c0_135 = arith.constant 0 : index
    %53 = vector.load %arg9[%c0_132, %c1_133, %c1_134, %c0_135] : memref<1x18x18x4xbf16, #tpu.memory_space<vmem>>, vector<1x16x16x4xbf16>
    %c0_136 = arith.constant 0 : index
    %c0_137 = arith.constant 0 : index
    %c0_138 = arith.constant 0 : index
    %c16_139 = arith.constant 16 : index
    %54 = vector.load %arg10[%c0_136, %c0_137, %c0_138, %c16_139] : memref<1x16x16x36xbf16, #tpu.memory_space<vmem>>, vector<1x16x16x4xbf16>
    tpu.vector_store %arg10[%c0_136, %c0_137, %c0_138, %c16_139], %53 {strides = array<i32>} : memref<1x16x16x36xbf16, #tpu.memory_space<vmem>>, vector<1x16x16x4xbf16>,
    %c0_140 = arith.constant 0 : index
    %c1_141 = arith.constant 1 : index
    %c2_142 = arith.constant 2 : index
    %c0_143 = arith.constant 0 : index
    %55 = vector.load %arg9[%c0_140, %c1_141, %c2_142, %c0_143] : memref<1x18x18x4xbf16, #tpu.memory_space<vmem>>, vector<1x16x16x4xbf16>
    %c0_144 = arith.constant 0 : index
    %c0_145 = arith.constant 0 : index
    %c0_146 = arith.constant 0 : index
    %c20_147 = arith.constant 20 : index
    %56 = vector.load %arg10[%c0_144, %c0_145, %c0_146, %c20_147] : memref<1x16x16x36xbf16, #tpu.memory_space<vmem>>, vector<1x16x16x4xbf16>
    tpu.vector_store %arg10[%c0_144, %c0_145, %c0_146, %c20_147], %55 {strides = array<i32>} : memref<1x16x16x36xbf16, #tpu.memory_space<vmem>>, vector<1x16x16x4xbf16>,
    %c0_148 = arith.constant 0 : index
    %c2_149 = arith.constant 2 : index
    %c0_150 = arith.constant 0 : index
    %c0_151 = arith.constant 0 : index
    %57 = vector.load %arg9[%c0_148, %c2_149, %c0_150, %c0_151] : memref<1x18x18x4xbf16, #tpu.memory_space<vmem>>, vector<1x16x16x4xbf16>
    %c0_152 = arith.constant 0 : index
    %c0_153 = arith.constant 0 : index
    %c0_154 = arith.constant 0 : index
    %c24_155 = arith.constant 24 : index
    %58 = vector.load %arg10[%c0_152, %c0_153, %c0_154, %c24_155] : memref<1x16x16x36xbf16, #tpu.memory_space<vmem>>, vector<1x16x16x4xbf16>
    tpu.vector_store %arg10[%c0_152, %c0_153, %c0_154, %c24_155], %57 {strides = array<i32>} : memref<1x16x16x36xbf16, #tpu.memory_space<vmem>>, vector<1x16x16x4xbf16>,
    %c0_156 = arith.constant 0 : index
    %c2_157 = arith.constant 2 : index
    %c1_158 = arith.constant 1 : index
    %c0_159 = arith.constant 0 : index
    %59 = vector.load %arg9[%c0_156, %c2_157, %c1_158, %c0_159] : memref<1x18x18x4xbf16, #tpu.memory_space<vmem>>, vector<1x16x16x4xbf16>
    %c0_160 = arith.constant 0 : index
    %c0_161 = arith.constant 0 : index
    %c0_162 = arith.constant 0 : index
    %c28_163 = arith.constant 28 : index
    %60 = vector.load %arg10[%c0_160, %c0_161, %c0_162, %c28_163] : memref<1x16x16x36xbf16, #tpu.memory_space<vmem>>, vector<1x16x16x4xbf16>
    tpu.vector_store %arg10[%c0_160, %c0_161, %c0_162, %c28_163], %59 {strides = array<i32>} : memref<1x16x16x36xbf16, #tpu.memory_space<vmem>>, vector<1x16x16x4xbf16>,
    %c0_164 = arith.constant 0 : index
    %c2_165 = arith.constant 2 : index
    %c2_166 = arith.constant 2 : index
    %c0_167 = arith.constant 0 : index
    %61 = vector.load %arg9[%c0_164, %c2_165, %c2_166, %c0_167] : memref<1x18x18x4xbf16, #tpu.memory_space<vmem>>, vector<1x16x16x4xbf16>
    %c0_168 = arith.constant 0 : index
    %c0_169 = arith.constant 0 : index
    %c0_170 = arith.constant 0 : index
    %c32_171 = arith.constant 32 : index
    %62 = vector.load %arg10[%c0_168, %c0_169, %c0_170, %c32_171] : memref<1x16x16x36xbf16, #tpu.memory_space<vmem>>, vector<1x16x16x4xbf16>
    tpu.vector_store %arg10[%c0_168, %c0_169, %c0_170, %c32_171], %61 {strides = array<i32>} : memref<1x16x16x36xbf16, #tpu.memory_space<vmem>>, vector<1x16x16x4xbf16>,
    %c0_172 = arith.constant 0 : index
    %c0_173 = arith.constant 0 : index
    %c0_174 = arith.constant 0 : index
    %c0_175 = arith.constant 0 : index
    %63 = vector.load %arg10[%c0_172, %c0_173, %c0_174, %c0_175] : memref<1x16x16x36xbf16, #tpu.memory_space<vmem>>, vector<1x16x16x36xbf16>
    %64 = vector.shape_cast %63 : vector<1x16x16x36xbf16> to vector<256x36xbf16>
    %c0_176 = arith.constant 0 : index
    %c0_177 = arith.constant 0 : index
    %65 = vector.load %arg5[%c0_176, %c0_177] : memref<36x4xbf16, #tpu.memory_space<vmem>>, vector<36x4xbf16>
    %cst_178 = arith.constant dense<0.000000e+00> : vector<256x4xf32>
    %66 = tpu.matmul %64, %65, %cst_178 {dimension_numbers = #tpu.dot_dimension_numbers<[1], [0], [0], [1], [0, 0, 1, 1], [], []>} : vector<256x36xbf16>, vector<36x4xbf16>, vector<256x4xf32> -> vector<256x4xf32>
    %67 = vector.shape_cast %66 : vector<256x4xf32> to vector<1x16x16x4xf32>
    %c0_179 = arith.constant 0 : index
    %c0_180 = arith.constant 0 : index
    %68 = vector.load %arg6[%c0_179, %c0_180] : memref<1x4xf32, #tpu.memory_space<vmem>>, vector<1x4xf32>
    %69 = vector.shape_cast %68 : vector<1x4xf32> to vector<1x1x1x4xf32>
    %70 = vector.broadcast %69 : vector<1x1x1x4xf32> to vector<1x16x16x4xf32>
    %71 = arith.mulf %67, %70 : vector<1x16x16x4xf32>
    %c0_181 = arith.constant 0 : index
    %c0_182 = arith.constant 0 : index
    %72 = vector.load %arg7[%c0_181, %c0_182] : memref<1x4xf32, #tpu.memory_space<vmem>>, vector<1x4xf32>
    %73 = vector.shape_cast %72 : vector<1x4xf32> to vector<1x1x1x4xf32>
    %74 = vector.broadcast %73 : vector<1x1x1x4xf32> to vector<1x16x16x4xf32>
    %75 = arith.addf %71, %74 : vector<1x16x16x4xf32>
    %76 = arith.addf %75, %7 : vector<1x16x16x4xf32>
    %cst_183 = arith.constant 0.000000e+00 : f32
    %77 = vector.broadcast %cst_183 : f32 to vector<1x16x16x4xf32>
    %78 = arith.maximumf %76, %77 : vector<1x16x16x4xf32>
    %79 = vector.shape_cast %78 : vector<1x16x16x4xf32> to vector<1x16x64xf32>
    %c0_184 = arith.constant 0 : index
    %c0_185 = arith.constant 0 : index
    %c0_186 = arith.constant 0 : index
    %80 = vector.load %arg8[%c0_184, %c0_185, %c0_186] : memref<1x16x64xf32, #tpu.memory_space<vmem>>, vector<1x16x64xf32>
    tpu.vector_store %arg8[%c0_184, %c0_185, %c0_186], %79 {strides = array<i32>} : memref<1x16x64xf32, #tpu.memory_space<vmem>>, vector<1x16x64xf32>,
    return
  }
  func.func @transform_0(%arg0: i32) -> (i32, i32, i32) {
    %c0_i32 = arith.constant 0 : i32
    %c0_i32_0 = arith.constant 0 : i32
    %c0_i32_1 = arith.constant 0 : i32
    return %arg0, %c0_i32, %c0_i32_0 : i32, i32, i32
  }
  func.func @transform_1(%arg0: i32) -> (i32, i32) {
    %c0_i32 = arith.constant 0 : i32
    %c0_i32_0 = arith.constant 0 : i32
    %c0_i32_1 = arith.constant 0 : i32
    return %c0_i32, %c0_i32_0 : i32, i32
  }
  func.func @transform_2(%arg0: i32) -> (i32, i32) {
    %c0_i32 = arith.constant 0 : i32
    %c0_i32_0 = arith.constant 0 : i32
    %c0_i32_1 = arith.constant 0 : i32
    return %c0_i32, %c0_i32_0 : i32, i32
  }
  func.func @transform_3(%arg0: i32) -> (i32, i32) {
    %c0_i32 = arith.constant 0 : i32
    %c0_i32_0 = arith.constant 0 : i32
    %c0_i32_1 = arith.constant 0 : i32
    return %c0_i32, %c0_i32_0 : i32, i32
  }
  func.func @transform_4(%arg0: i32) -> (i32, i32) {
    %c0_i32 = arith.constant 0 : i32
    %c0_i32_0 = arith.constant 0 : i32
    %c0_i32_1 = arith.constant 0 : i32
    return %c0_i32, %c0_i32_0 : i32, i32
  }
  func.func @transform_5(%arg0: i32) -> (i32, i32) {
    %c0_i32 = arith.constant 0 : i32
    %c0_i32_0 = arith.constant 0 : i32
    %c0_i32_1 = arith.constant 0 : i32
    return %c0_i32, %c0_i32_0 : i32, i32
  }
  func.func @transform_6(%arg0: i32) -> (i32, i32) {
    %c0_i32 = arith.constant 0 : i32
    %c0_i32_0 = arith.constant 0 : i32
    %c0_i32_1 = arith.constant 0 : i32
    return %c0_i32, %c0_i32_0 : i32, i32
  }
  func.func @transform_7(%arg0: i32) -> (i32, i32, i32) {
    %c0_i32 = arith.constant 0 : i32
    %c0_i32_0 = arith.constant 0 : i32
    %c0_i32_1 = arith.constant 0 : i32
    return %arg0, %c0_i32, %c0_i32_0 : i32, i32, i32
  }
}

</mosaic_0001>

<bundles_post_ra>
// kernel: basic_block_forward.1
= control target key start
LH: loop header
LB: loop body
LE: loop exit
PB: predicated region body
PF: predicated region fallthrough
CT: control target
= control target key end

     0   :  { %s10684_s24 = smov 0   ;;  %s13956_s0 = inlined_call_operand.vmem [shape: f32[2,16,64], index: 0, kind: input, shape index: {}]   ;;  %s13957_s1 = inlined_call_operand.vmem [shape: bf16[36,4], index: 1, kind: input, shape index: {}]   ;;  %s13958_s2 = inlined_call_operand.vmem [shape: f32[1,4], index: 2, kind: input, shape index: {}]   ;;  %s13959_s3 = inlined_call_operand.vmem [shape: f32[1,4], index: 3, kind: input, shape index: {}]   ;;  %s13960_s4 = inlined_call_operand.vmem [shape: bf16[36,4], index: 4, kind: input, shape index: {}]   ;;  %s13961_s5 = inlined_call_operand.vmem [shape: f32[1,4], index: 5, kind: input, shape index: {}]   ;;  %s13962_s6 = inlined_call_operand.vmem [shape: f32[1,4], index: 6, kind: input, shape index: {}]   ;;  %s13963_s7 = inlined_call_operand.vmem [shape: f32[2,16,64], index: 7, kind: output, shape index: {}]  }
   0x1 LB: > { %s10096_s25 = sadd.s32 4294967295, %s10609_s24   ;;  %p10100_p0 = scmp.ge.s32.totalorder %s10609_s24, 1  ;;  %s10609_s24 = sphi %s10684_s24, %s17_s24  }
   0x2   : > { %p237_p1 = scmp.lt.s32.totalorder %s10609_s24, 3 }
   0x4   : > { %p238_p2 = pnand %p10100_p0, %p237_p1 }
   0x6   : > { %241 = sbr.rel (%p238_p2) target bundleno = 2072 (0x818), region = 48 }
   0xb   : > { %p269_p3 = scmp.lt.s32.totalorder %s10096_s25, 1  ;;  %s10611_s30 = smov 120   ;;  %vm283_vm0 = vcmask 24576   ;;  %vm290_vm1 = vsmask.f32 256  ;;  %vm280_vm5 = vcmask 27648  }
   0xc   : > { %s10612_s8 = smov 124   ;;  %s10613_s9 = smov 116   ;;  %v319_v2 = vld [vmem:[#allocation2 + $0x6c] sm:$0x1]  ;;  %vm10712_vm2 = vmand %vm283_vm0, %vm290_vm1  ;;  %v322_v4 = vld [vmem:[#allocation2 + $0x78] sm:$0x1] }
   0xd   : > { %s14057_s25 = smov (!%p269_p3, %s10096_s25), 1  ;;  %v325_v5 = vld [vmem:[#allocation2 + $0x84] sm:$0x1]  ;;  %v320_v6 = vsel %vm10712_vm2, 0, %v319_v2  ;;  %v323_v7 = vsel %vm10712_vm2, 0, %v322_v4  ;;  %s10614_s10 = smov 112  }
   0xe   : > { %s10341_s26 = sshll.u32 %s14057_s25, 4  ;;  %v326_v8 = vsel %vm10712_vm2, 0, %v325_v5  ;;  %v328_v9 = vld [vmem:[#allocation2 + $0x90] sm:$0x1]  ;;  %321 = vst [vmem:[#allocation2 + $0x6c] sm:$0x1] %v320_v6 }
   0xf   : > { %s273_s29 = scalar_lea.vmem %s13956_s0, %s10341_s26  ;;  %324 = vst [vmem:[#allocation2 + $0x78] sm:$0x1] %v323_v7  ;;  %327 = vst [vmem:[#allocation2 + $0x84] sm:$0x1] %v326_v8  ;;  %v329_v10 = vsel %vm10712_vm2, 0, %v328_v9  ;;  %s10615_s11 = smov 108  }
  0x10   : > { %v10700_v0 = vld [vmem:[%s273_s29] sm:$0xff]  ;;  %v10704_v1 = vld [vmem:[%s273_s29 + $0x8] sm:$0xff]  ;;  %v331_v11 = vld [vmem:[#allocation2 + $0x9c] sm:$0x1]  ;;  %330 = vst [vmem:[#allocation2 + $0x90] sm:$0x1] %v329_v10 }
  0x11   : > { %412 = vrot.lane.b32.xlu1 %v10700_v0, %s10611_s30  ;;  %406 = vrot.lane.b32.xlu0 %v10700_v0, %s10612_s8  ;;  %v334_v12 = vld [vmem:[#allocation2 + $0xa8] sm:$0x1]  ;;  %v332_v13 = vsel %vm10712_vm2, 0, %v331_v11  ;;  %v337_v15 = vld [vmem:[#allocation2 + $0xb4] sm:$0x1]  ;;  %s10616_s12 = smov 104  }
  0x12   : > { %v335_v14 = vsel %vm10712_vm2, 0, %v334_v12  ;;  %v340_v16 = vld [vmem:[#allocation2 + $0xc0] sm:$0x1]  ;;  %333 = vst [vmem:[#allocation2 + $0x9c] sm:$0x1] %v332_v13  ;;  %v338_v17 = vsel %vm10712_vm2, 0, %v337_v15 }
  0x13   : > { %336 = vst [vmem:[#allocation2 + $0xa8] sm:$0x1] %v335_v14  ;;  %v341_v18 = vsel %vm10712_vm2, 0, %v340_v16  ;;  %339 = vst [vmem:[#allocation2 + $0xb4] sm:$0x1] %v338_v17  ;;  %s10617_s13 = smov 100  }
  0x14   : > { %342 = vst [vmem:[#allocation2 + $0xc0] sm:$0x1] %v341_v18  ;;  %v295_v19 = vld [vmem:[#allocation2 + $0xc] sm:$0x1]  ;;  %v298_v20 = vld [vmem:[#allocation2 + $0x18] sm:$0x1] }
  0x15   : > { %414 = vrot.lane.b32.xlu1 %v10704_v1, %s10611_s30  ;;  %408 = vrot.lane.b32.xlu0 %v10704_v1, %s10612_s8  ;;  %v301_v21 = vld [vmem:[#allocation2 + $0x24] sm:$0x1]  ;;  %v296_v22 = vsel %vm10712_vm2, 0, %v295_v19  ;;  %v299_v23 = vsel %vm10712_vm2, 0, %v298_v20  ;;  %v304_v25 = vld [vmem:[#allocation2 + $0x30] sm:$0x1] }
  0x16   : > { %v302_v24 = vsel %vm10712_vm2, 0, %v301_v21  ;;  %s10618_s14 = smov 96   ;;  %297 = vst [vmem:[#allocation2 + $0xc] sm:$0x1] %v296_v22  ;;  %300 = vst [vmem:[#allocation2 + $0x18] sm:$0x1] %v299_v23 }
  0x17   : > { %303 = vst [vmem:[#allocation2 + $0x24] sm:$0x1] %v302_v24  ;;  %v305_v26 = vsel %vm10712_vm2, 0, %v304_v25  ;;  %v307_v27 = vld [vmem:[#allocation2 + $0x3c] sm:$0x1]  ;;  %s10619_s15 = smov 92  }
  0x18   : > { %v310_v28 = vld [vmem:[#allocation2 + $0x48] sm:$0x1]  ;;  %306 = vst [vmem:[#allocation2 + $0x30] sm:$0x1] %v305_v26  ;;  %v308_v29 = vsel %vm10712_vm2, 0, %v307_v27  ;;  %s10620_s16 = smov 88  }
  0x19   : > { %420 = vrot.lane.b32.xlu1 %v10704_v1, %s10613_s9  ;;  %418 = vrot.lane.b32.xlu0 %v10700_v0, %s10613_s9  ;;  %v311_v30 = vsel %vm10712_vm2, 0, %v310_v28  ;;  %v313_v31 = vld [vmem:[#allocation2 + $0x54] sm:$0x1]  ;;  %v316_v32 = vld [vmem:[#allocation2 + $0x60] sm:$0x1]  ;;  %s10621_s17 = smov 84  }
  0x1a   : > { %309 = vst [vmem:[#allocation2 + $0x3c] sm:$0x1] %v308_v29  ;;  %312 = vst [vmem:[#allocation2 + $0x48] sm:$0x1] %v311_v30  ;;  %v314_v33 = vsel %vm10712_vm2, 0, %v313_v31  ;;  %v317_v34 = vsel %vm10712_vm2, 0, %v316_v32 }
  0x1b   : > { %315 = vst [vmem:[#allocation2 + $0x54] sm:$0x1] %v314_v33  ;;  %318 = vst [vmem:[#allocation2 + $0x60] sm:$0x1] %v317_v34  ;;  %s10622_s18 = smov 80   ;;  %s10623_s19 = smov 76  }
  0x1c   : > { %s10624_s20 = smov 72   ;;  %s10625_s21 = smov 68   ;;  %vm346_vm3 = vsmask.f32 7938  ;;  %v375_v36 = vld [vmem:[#allocation2 + $0x74] sm:$0x1] }
  0x1d   : > { %426 = vrot.lane.b32.xlu1 %v10704_v1, %s10614_s10  ;;  %424 = vrot.lane.b32.xlu0 %v10700_v0, %s10614_s10  ;;  %vm10774_vm4 = vmand %vm283_vm0, %vm346_vm3  ;;  %v378_v37 = vld [vmem:[#allocation2 + $0x80] sm:$0x1]  ;;  %v381_v40 = vld [vmem:[#allocation2 + $0x8c] sm:$0x1]  ;;  %v10626_v7 = vmov 0   ;;  %vm2297_vm9 = vcmask 1042432  }
  0x1e   : > { %v376_v38 = vsel %vm10774_vm4, 0, %v375_v36  ;;  %v379_v39 = vsel %vm10774_vm4, 0, %v378_v37  ;;  %v384_v41 = vld [vmem:[#allocation2 + $0x98] sm:$0x1]  ;;  %v382_v42 = vsel %vm10774_vm4, 0, %v381_v40  ;;  %vm2298_vm10 = vcmask 1046532   ;;  %vm10947_vm12 = vmand %vm280_vm5, %vm346_vm3 }
  0x1f   : > { %377 = vst [vmem:[#allocation2 + $0x74] sm:$0x1] %v376_v38  ;;  %380 = vst [vmem:[#allocation2 + $0x80] sm:$0x1] %v379_v39  ;;  %v385_v43 = vsel %vm10774_vm4, 0, %v384_v41  ;;  %s10627_s22 = smov 4  }
  0x20   : > { %v387_v44 = vld [vmem:[#allocation2 + $0xa4] sm:$0x1]  ;;  %v390_v45 = vld [vmem:[#allocation2 + $0xb0] sm:$0x1]  ;;  %383 = vst [vmem:[#allocation2 + $0x8c] sm:$0x1] %v382_v42  ;;  %vm10827_vm11 = vmor %vm2297_vm9, %vm2298_vm10 }
  0x21   : > { %432 = vrot.lane.b32.xlu1 %v10704_v1, %s10615_s11  ;;  %430 = vrot.lane.b32.xlu0 %v10700_v0, %s10615_s11  ;;  %386 = vst [vmem:[#allocation2 + $0x98] sm:$0x1] %v385_v43  ;;  %v388_v46 = vsel %vm10774_vm4, 0, %v387_v44  ;;  %v391_v47 = vsel %vm10774_vm4, 0, %v390_v45  ;;  %v393_v48 = vld [vmem:[#allocation2 + $0xbc] sm:$0x1] }
  0x22   : > { %v396_v49 = vld [vmem:[#allocation2 + $0xc8] sm:$0x1]  ;;  %389 = vst [vmem:[#allocation2 + $0xa4] sm:$0x1] %v388_v46  ;;  %392 = vst [vmem:[#allocation2 + $0xb0] sm:$0x1] %v391_v47 }
  0x23   : > { %v394_v50 = vsel %vm10774_vm4, 0, %v393_v48  ;;  %v397_v51 = vsel %vm10774_vm4, 0, %v396_v49  ;;  %v351_v52 = vld [vmem:[#allocation2 + $0x14] sm:$0x1]  ;;  %v354_v53 = vld [vmem:[#allocation2 + $0x20] sm:$0x1]  ;;  %v501_v49 = vlaneseq }
  0x24   : > { %395 = vst [vmem:[#allocation2 + $0xbc] sm:$0x1] %v394_v50  ;;  %398 = vst [vmem:[#allocation2 + $0xc8] sm:$0x1] %v397_v51  ;;  %v357_v54 = vld [vmem:[#allocation2 + $0x2c] sm:$0x1] }
  0x25   : > { %438 = vrot.lane.b32.xlu1 %v10704_v1, %s10616_s12  ;;  %436 = vrot.lane.b32.xlu0 %v10700_v0, %s10616_s12  ;;  %v352_v55 = vsel %vm10774_vm4, 0, %v351_v52  ;;  %v355_v56 = vsel %vm10774_vm4, 0, %v354_v53  ;;  %v358_v57 = vsel %vm10774_vm4, 0, %v357_v54  ;;  %v360_v58 = vld [vmem:[#allocation2 + $0x38] sm:$0x1]  ;;  %s10628_s23 = smov 8  }
  0x26   : > { %353 = vst [vmem:[#allocation2 + $0x14] sm:$0x1] %v352_v55  ;;  %356 = vst [vmem:[#allocation2 + $0x20] sm:$0x1] %v355_v56  ;;  %v361_v59 = vsel %vm10774_vm4, 0, %v360_v58  ;;  %v502_v53 = vshrl.u32 %v501_v49, 7 }
  0x27   : > { %359 = vst [vmem:[#allocation2 + $0x2c] sm:$0x1] %v358_v57  ;;  %v363_v60 = vld [vmem:[#allocation2 + $0x44] sm:$0x1]  ;;  %v366_v61 = vld [vmem:[#allocation2 + $0x50] sm:$0x1] }
  0x28   : > { %362 = vst [vmem:[#allocation2 + $0x38] sm:$0x1] %v361_v59  ;;  %v364_v62 = vsel %vm10774_vm4, 0, %v363_v60  ;;  %v367_v63 = vsel %vm10774_vm4, 0, %v366_v61  ;;  %v369_v2 = vld [vmem:[#allocation2 + $0x5c] sm:$0x1] }
  0x29   : > { %444 = vrot.lane.b32.xlu1 %v10704_v1, %s10617_s13  ;;  %442 = vrot.lane.b32.xlu0 %v10700_v0, %s10617_s13  ;;  %v372_v4 = vld [vmem:[#allocation2 + $0x68] sm:$0x1]  ;;  %365 = vst [vmem:[#allocation2 + $0x44] sm:$0x1] %v364_v62  ;;  %368 = vst [vmem:[#allocation2 + $0x50] sm:$0x1] %v367_v63 }
  0x2a   : > { %v370_v5 = vsel %vm10774_vm4, 0, %v369_v2  ;;  %v373_v6 = vsel %vm10774_vm4, 0, %v372_v4  ;;  %281 = vst.msk [vmem:[#allocation2] sm:$0xf] %vm280_vm5, %v10626_v7  ;;  %282 = vst.msk [vmem:[#allocation2 + $0x4] sm:$0xf] %vm280_vm5, %v10626_v7 }
  0x2b   : > { %371 = vst [vmem:[#allocation2 + $0x5c] sm:$0x1] %v370_v5  ;;  %374 = vst [vmem:[#allocation2 + $0x68] sm:$0x1] %v373_v6  ;;  %vm1685_vm6 = vsmask.f32 3328 }
  0x2c   : > { %284 = vst.msk [vmem:[#allocation2 + $0x8] sm:$0x1] %vm283_vm0, %v10626_v7  ;;  %288 = vst.msk [vmem:[#allocation2 + $0xd4] sm:$0x1] %vm283_vm0, %v10626_v7  ;;  %vm1686_vm7 = vsmask.f32 7440 }
  0x2d   : > { %450 = vrot.lane.b32.xlu1 %v10704_v1, %s10618_s14  ;;  %448 = vrot.lane.b32.xlu0 %v10700_v0, %s10618_s14  ;;  %286 = vst.msk [vmem:[#allocation2 + $0xcc] sm:$0xf] %vm280_vm5, %v10626_v7  ;;  %287 = vst.msk [vmem:[#allocation2 + $0xd0] sm:$0xf] %vm280_vm5, %v10626_v7  ;;  %v10629_v47 = vmov 1983009808  }
  0x2e   : > { %vm10820_vm8 = vmor %vm1685_vm6, %vm1686_vm7  ;;  %v499_v48 = vunpack.c.l.s4 %v10629_v47  ;;  %v10630_v56 = vmov 1934713408   ;;  %vm1136_vm13 = vsmask.f32 4368  ;;  %vm2168_vm15 = vcmask 60448   ;;  %s10631_s27 = smov 12  }
  0x2f   : > { %v563_v57 = vunpack.c.l.s4 %v10630_v56  ;;  %vm11225_vm14 = vmor %vm290_vm1, %vm1136_vm13  ;;  %vm2508_vm0 = vcmask 93248   ;;  %s10632_s28 = smov 16   ;;  %vm2701_vm1 = vcmask 126048   ;;  %s10633_s29 = smov 20   ;;  %vm3262_vm3 = vcmask 158848  }
  0x30   : > { %v500_v52 = vunpack.c.0.s8 %v499_v48  ;;  %s10634_s30 = smov 24   ;;  %s10635_s8 = smov 28   ;;  %vm3599_vm6 = vcmask 191648   ;;  %vm4905_vm7 = vcmask 1041408   ;;  %vm4354_vm9 = vcmask 257248  }
  0x31   : > { %456 = vrot.lane.b32.xlu1 %v10704_v1, %s10619_s15  ;;  %454 = vrot.lane.b32.xlu0 %v10700_v0, %s10619_s15  ;;  %v292_v8 = vld [vmem:[#allocation2] sm:$0x1]  ;;  %v1638_v15 = vld [vmem:[#allocation2 + $0x4] sm:$0xf]  ;;  %v2201_v28 = vld [vmem:[#allocation2] sm:$0xe]  ;;  %v564_v6 = vunpack.c.0.s8 %v563_v57 }
  0x32   : > { %v293_v9 = vsel %vm10712_vm2, 0, %v292_v8  ;;  %v1698_v18 = vshll.u32 %v1638_v15, 16  ;;  %v1702_v19 = vshrl.u32 %v1638_v15, 16  ;;  %v2202_v29 = vld [vmem:[#allocation2 + $0x4] sm:$0xf]  ;;  %v10137_v32 = vrot.slane %v2201_v28, 9 }
  0x33   : > { %294 = vst [vmem:[#allocation2] sm:$0x1] %v293_v9  ;;  %v348_v10 = vld [vmem:[#allocation2 + $0x8] sm:$0x1]  ;;  %v2302_v37 = vrot.slane %v2202_v29, 5  ;;  %v10842_v58 = vsub.s32 %v500_v52, %v502_v53  ;;  %s10636_s13 = smov 32  }
  0x34   : > { %v349_v11 = vsel %vm10774_vm4, 0, %v348_v10  ;;  %v1700_v21 = vrot.slane %v1698_v18, 5  ;;  %v1704_v22 = vrot.slane %v1702_v19, 4  ;;  %vm4691_vm10 = vcmask 290048   ;;  %s10637_s9 = smov 36   ;;  %s10638_s10 = smov 40  }
  0x35   : > { %462 = vrot.lane.b32.xlu1 %v10704_v1, %s10620_s16  ;;  %460 = vrot.lane.b32.xlu0 %v10700_v0, %s10620_s16  ;;  %350 = vst [vmem:[#allocation2 + $0x8] sm:$0x1] %v349_v11  ;;  %v2303_v40 = vsel %vm10827_vm11, %v10137_v32, %v2302_v37  ;;  %v2304_v41 = vrot.slane %v2302_v37, 4  ;;  %13995 = vst [vmem:[#allocation4_spill] sm:$0xff] %v10842_v58  ;;  %vm4856_vm13 = vcmask 293888   ;;  %s10639_s11 = smov 44  }
  0x36   : > { %v1705_v25 = vor.u32 %v1704_v22, %v1700_v21  ;;  %s10640_s12 = smov 48   ;;  %s10641_s14 = smov 52  }
  0x37   : > { %s10642_s15 = smov 56   ;;  %s10643_s16 = smov 60  }
  0x38   : > { %v1706_v31 = vrot.slane %v1705_v25, 4 }
  0x39   : > { %468 = vrot.lane.b32.xlu1 %v10704_v1, %s10621_s17  ;;  %466 = vrot.lane.b32.xlu0 %v10700_v0, %s10621_s17 }
  0x3a   : > { %v1637_v12 = vld [vmem:[#allocation2] sm:$0xf] }
  0x3b   : > { %v1689_v13 = vshrl.u32 %v1637_v12, 16  ;;  %v1692_v14 = vshll.u32 %v1637_v12, 16 }
  0x3c   : > { %v1639_v23 = vld [vmem:[#allocation2 + $0x8] sm:$0x1] }
  0x3d   : > { %474 = vrot.lane.b32.xlu1 %v10704_v1, %s10622_s18  ;;  %472 = vrot.lane.b32.xlu0 %v10700_v0, %s10622_s18  ;;  %v1691_v16 = vrot.slane %v1689_v13, 4  ;;  %v1694_v17 = vrot.slane %v1692_v14, 5  ;;  %v1708_v27 = vshll.u32 %v1639_v23, 16  ;;  %v2203_v33 = vld [vmem:[#allocation2 + $0x8] sm:$0x1] }
  0x3e   : > { %v2305_v38 = vrot.slane %v2203_v33, 5 }
  0x3f   : > { %v1695_v20 = vor.u32 %v1694_v17, %v1691_v16  ;;  %v1710_v34 = vrot.slane %v1708_v27, 5 }
  0x40   : > { %v2306_v44 = vsel %vm10827_vm11, %v2304_v41, %v2305_v38 }
  0x41   : > { %480 = vrot.lane.b32.xlu1 %v10704_v1, %s10623_s19  ;;  %478 = vrot.lane.b32.xlu0 %v10700_v0, %s10623_s19  ;;  %v1696_v24 = vrot.slane %v1695_v20, 4  ;;  %v1711_v39 = vsel %vm10820_vm8, %v1706_v31, %v1710_v34  ;;  %s13833_s19 = scalar_lea.vmem %s13963_s7, %s10341_s26 }
  0x43   : > { %v1701_v30 = vsel %vm10820_vm8, %v1696_v24, %v1700_v21 }
  0x45   : > { %486 = vrot.lane.b32.xlu1 %v10704_v1, %s10624_s20  ;;  %484 = vrot.lane.b32.xlu0 %v10700_v0, %s10624_s20 }
  0x49   : > { %492 = vrot.lane.b32.xlu1 %v10704_v1, %s10625_s21  ;;  %490 = vrot.lane.b32.xlu0 %v10700_v0, %s10625_s21 }
  0x4d   : > { %2072 = vrot.lane.b32.xlu0 %v1701_v30, %s10627_s22  ;;  %2074 = vrot.lane.b32.xlu1 %v1711_v39, %s10627_s22 }
  0x51   : > { %2412 = vrot.lane.b32.xlu0 %v2303_v40, %s10628_s23  ;;  %2414 = vrot.lane.b32.xlu1 %v2306_v44, %s10628_s23 }
  0x83   : > { %v413_v42 = vpop.permute.xlu1 %412  ;;  %v407_v43 = vpop.permute.xlu0 %406 }
  0x84   : > { %v496_v63 = vcombine.low %v10700_v0, %v413_v42  ;;  %v497_v7 = vcombine.high %v10700_v0, %v413_v42  ;;  %v10857_v0 = vsub.s32 %v564_v6, %v502_v53 }
  0x86   : > { %v10855_v18 = vrot.slane %v497_v7, %v10842_v58  ;;  %13996 = vst [vmem:[#allocation5_spill] sm:$0xff] %v10857_v0 }
  0x87   : > { %v415_v45 = vpop.permute.xlu1 %414  ;;  %v409_v46 = vpop.permute.xlu0 %408 }
  0x88   : > { %v768_v59 = vcombine.low %v10704_v1, %v415_v45  ;;  %v769_v61 = vcombine.high %v10704_v1, %v415_v45  ;;  %v504_v1 = vrot.slane %v496_v63, %v10842_v58 }
  0x8a   : > { %v776_v8 = vrot.slane %v768_v59, %v10842_v58  ;;  %v783_v11 = vrot.slane %v769_v61, %v10842_v58 }
  0x8b   : > { %v421_v50 = vpop.permute.xlu1 %420  ;;  %v419_v51 = vpop.permute.xlu0 %418 }
  0x8c   : > { %v784_v60 = vcombine.low %v409_v46, %v421_v50  ;;  %v785_v62 = vcombine.high %v409_v46, %v421_v50  ;;  %v512_v2 = vcombine.low %v407_v43, %v419_v51  ;;  %v513_v10 = vcombine.high %v407_v43, %v419_v51 }
  0x8e   : > { %v792_v9 = vrot.slane %v784_v60, %v10842_v58  ;;  %v799_v12 = vrot.slane %v785_v62, %v10842_v58  ;;  %v520_v13 = vrot.slane %v512_v2, %v10842_v58  ;;  %v10860_v20 = vrot.slane %v513_v10, %v10842_v58 }
  0x8f   : > { %v427_v54 = vpop.permute.xlu1 %426  ;;  %v10840_v55 = vpop.permute.xlu0 %424 }
  0x90   : > { %v832_v19 = vcombine.low %v776_v8, %v792_v9  ;;  %v833_v21 = vcombine.high %v776_v8, %v792_v9  ;;  %v848_v22 = vcombine.low %v783_v11, %v799_v12  ;;  %v849_v23 = vcombine.high %v783_v11, %v799_v12 }
  0x91   : > { %v560_v24 = vcombine.low %v504_v1, %v520_v13  ;;  %v561_v25 = vcombine.high %v504_v1, %v520_v13  ;;  %v576_v37 = vcombine.low %v10855_v18, %v10860_v20  ;;  %v577_v38 = vcombine.high %v10855_v18, %v10860_v20 }
  0x92   : > { %v840_v34 = vrot.slane %v832_v19, %v10857_v0  ;;  %v847_v40 = vrot.slane %v833_v21, %v10857_v0  ;;  %v856_v41 = vrot.slane %v848_v22, %v10857_v0  ;;  %v863_v44 = vrot.slane %v849_v23, %v10857_v0 }
  0x93   : > { %v433_v4 = vpop.permute.xlu1 %432  ;;  %v431_v5 = vpop.permute.xlu0 %430  ;;  %v10878_v52 = vrot.slane %v560_v24, %v10857_v0  ;;  %v10881_v53 = vrot.slane %v561_v25, %v10857_v0 }
  0x97   : > { %v439_v14 = vpop.permute.xlu1 %438  ;;  %v437_v15 = vpop.permute.xlu0 %436 }
  0x98   : > { %v800_v16 = vcombine.low %v427_v54, %v439_v14  ;;  %v801_v17 = vcombine.high %v427_v54, %v439_v14  ;;  %v528_v39 = vcombine.low %v10840_v55, %v437_v15  ;;  %v529_v45 = vcombine.high %v10840_v55, %v437_v15 }
  0x99   : > { %v10884_v54 = vrot.slane %v576_v37, %v10857_v0 }
  0x9a   : > { %v808_v27 = vrot.slane %v800_v16, %v10842_v58  ;;  %v815_v30 = vrot.slane %v801_v17, %v10842_v58  ;;  %v536_v56 = vrot.slane %v528_v39, %v10842_v58  ;;  %v10896_v63 = vrot.slane %v529_v45, %v10842_v58 }
  0x9b   : > { %v445_v28 = vpop.permute.xlu1 %444  ;;  %v443_v29 = vpop.permute.xlu0 %442 }
  0x9c   : > { %v816_v31 = vcombine.low %v433_v4, %v445_v28  ;;  %v817_v32 = vcombine.high %v433_v4, %v445_v28  ;;  %v544_v33 = vcombine.low %v431_v5, %v443_v29  ;;  %v545_v46 = vcombine.high %v431_v5, %v443_v29 }
  0x9e   : > { %v824_v42 = vrot.slane %v816_v31, %v10842_v58  ;;  %v831_v43 = vrot.slane %v817_v32, %v10842_v58  ;;  %v552_v47 = vrot.slane %v544_v33, %v10842_v58  ;;  %v559_v2 = vrot.slane %v545_v46, %v10842_v58  ;;  %v1517_v46 = vld [vmem:[#allocation2 + $0x6c] sm:$0xf] }
  0x9f   : > { %v10887_v57 = vpop.permute.xlu1 %450  ;;  %v10889_v55 = vpop.permute.xlu0 %448 }
  0xa0   : > { %v864_v48 = vcombine.low %v808_v27, %v824_v42  ;;  %v865_v49 = vcombine.high %v808_v27, %v824_v42  ;;  %v880_v50 = vcombine.low %v815_v30, %v831_v43  ;;  %v881_v51 = vcombine.high %v815_v30, %v831_v43 }
  0xa1   : > { %v592_v4 = vcombine.low %v536_v56, %v552_v47  ;;  %v593_v5 = vcombine.high %v536_v56, %v552_v47  ;;  %v608_v21 = vcombine.low %v10896_v63, %v559_v2  ;;  %v609_v22 = vcombine.high %v10896_v63, %v559_v2  ;;  %v1524_v47 = vld [vmem:[#allocation2 + $0x78] sm:$0xf]  ;;  %v1531_v56 = vld [vmem:[#allocation2 + $0x84] sm:$0xf] }
  0xa2   : > { %v872_v59 = vrot.slane %v864_v48, %v10857_v0  ;;  %v879_v60 = vrot.slane %v865_v49, %v10857_v0  ;;  %v888_v61 = vrot.slane %v880_v50, %v10857_v0  ;;  %v895_v62 = vrot.slane %v881_v51, %v10857_v0 }
  0xa3   : > { %v10929_v23 = vpop.permute.xlu1 %456  ;;  %v10931_v24 = vpop.permute.xlu0 %454  ;;  %v600_v50 = vrot.slane %v592_v4, %v10857_v0  ;;  %v607_v51 = vrot.slane %v593_v5, %v10857_v0  ;;  %v1545_v5 = vld [vmem:[#allocation2 + $0x9c] sm:$0xf] }
  0xa4   : > { %v10899_v6 = vcombine.low %v840_v34, %v872_v59  ;;  %v10901_v7 = vcombine.high %v840_v34, %v872_v59  ;;  %v10903_v8 = vcombine.low %v847_v40, %v879_v60  ;;  %v10905_v9 = vcombine.high %v847_v40, %v879_v60 }
  0xa5   : > { %v10907_v10 = vcombine.low %v856_v41, %v888_v61  ;;  %v10909_v11 = vcombine.high %v856_v41, %v888_v61  ;;  %v10911_v12 = vcombine.low %v863_v44, %v895_v62  ;;  %v10913_v1 = vcombine.high %v863_v44, %v895_v62 }
  0xa6   : > { %13997 = vst [vmem:[#allocation6_spill] sm:$0xff] %v10899_v6  ;;  %13998 = vst [vmem:[#allocation7_spill] sm:$0xff] %v10901_v7  ;;  %v10359_v13 = vpack.c.bf16 %v10899_v6, %v10899_v6  ;;  %v10361_v14 = vpack.c.bf16 %v10901_v7, %v10901_v7  ;;  %v10363_v15 = vpack.c.bf16 %v10903_v8, %v10903_v8  ;;  %v1496_v6 = vld [vmem:[#allocation2 + $0x48] sm:$0xf] }
  0xa7   : > { %13999 = vst [vmem:[#allocation8_spill] sm:$0xff] %v10903_v8  ;;  %14000 = vst [vmem:[#allocation9_spill] sm:$0xff] %v10905_v9  ;;  %v10365_v16 = vpack.c.bf16 %v10905_v9, %v10905_v9  ;;  %v10367_v17 = vpack.c.bf16 %v10907_v10, %v10907_v10  ;;  %v10369_v19 = vpack.c.bf16 %v10909_v11, %v10909_v11  ;;  %v10958_v63 = vpop.permute.xlu1 %462  ;;  %v10960_v2 = vpop.permute.xlu0 %460 }
  0xa8   : > { %14001 = vst [vmem:[#allocation10_spill] sm:$0xff] %v10907_v10  ;;  %14002 = vst [vmem:[#allocation11_spill] sm:$0xff] %v10909_v11  ;;  %v10371_v25 = vpack.c.bf16 %v10911_v12, %v10911_v12  ;;  %v10373_v27 = vpack.c.bf16 %v10913_v1, %v10913_v1  ;;  %v1275_v28 = vshrl.u32 %v10359_v13, 16  ;;  %v1292_v29 = vshrl.u32 %v10361_v14, 16 }
  0xa9   : > { %14003 = vst [vmem:[#allocation12_spill] sm:$0xff] %v10911_v12  ;;  %14004 = vst [vmem:[#allocation13_spill] sm:$0xff] %v10913_v1  ;;  %v1278_v30 = vshll.u32 %v10359_v13, 16  ;;  %v1295_v31 = vshll.u32 %v10361_v14, 16  ;;  %v1309_v32 = vshrl.u32 %v10363_v15, 16  ;;  %v1326_v33 = vshrl.u32 %v10365_v16, 16 }
  0xaa   : > { %v10937_v34 = vrot.slane %v1275_v28, 7  ;;  %v10939_v37 = vrot.slane %v1292_v29, 7  ;;  %v1312_v39 = vshll.u32 %v10363_v15, 16  ;;  %v1343_v40 = vshrl.u32 %v10367_v17, 16  ;;  %v1538_v13 = vld [vmem:[#allocation2 + $0x90] sm:$0xf] }
  0xab   : > { %v10941_v41 = vrot.slane %v1309_v32, 7  ;;  %v10943_v42 = vrot.slane %v1326_v33, 7  ;;  %v1329_v43 = vshll.u32 %v10365_v16, 16  ;;  %v1360_v44 = vshrl.u32 %v10369_v19, 16  ;;  %v1552_v28 = vld [vmem:[#allocation2 + $0xa8] sm:$0xf] }
  0xac   : > { %v1280_v48 = vor.u32 %v1278_v30, %v10937_v34  ;;  %v1297_v49 = vor.u32 %v1295_v31, %v10939_v37  ;;  %v1346_v61 = vshll.u32 %v10367_v17, 16  ;;  %v616_v62 = vrot.slane %v608_v21, %v10857_v0  ;;  %v1468_v12 = vld [vmem:[#allocation2 + $0x18] sm:$0xf] }
  0xad   : > { %v1314_v59 = vor.u32 %v1312_v39, %v10941_v41  ;;  %v1331_v60 = vor.u32 %v1329_v43, %v10943_v42  ;;  %v10962_v14 = vrot.slane %v1343_v40, 7  ;;  %v10964_v15 = vrot.slane %v1360_v44, 7 }
  0xae   : > { %v1363_v4 = vshll.u32 %v10369_v19, 16  ;;  %v1377_v16 = vshrl.u32 %v10371_v25, 16  ;;  %v1394_v29 = vshrl.u32 %v10373_v27, 16  ;;  %v1518_v30 = vsel %vm10947_vm12, %v1280_v48, %v1517_v46  ;;  %v1559_v46 = vld [vmem:[#allocation2 + $0xb4] sm:$0xf] }
  0xaf   : > { %v1525_v17 = vsel %vm10947_vm12, %v1297_v49, %v1524_v47  ;;  %v623_v21 = vrot.slane %v609_v22, %v10857_v0  ;;  %v1348_v31 = vor.u32 %v1346_v61, %v10962_v14  ;;  %v1380_v33 = vshll.u32 %v10371_v25, 16  ;;  %1519 = vst [vmem:[#allocation2 + $0x6c] sm:$0xf] %v1518_v30  ;;  %v1566_v22 = vld [vmem:[#allocation2 + $0xc0] sm:$0xf]  ;;  %v10999_v61 = vpop.permute.xlu0 %466 }
  0xb0   : > { %v1365_v32 = vor.u32 %v1363_v4, %v10964_v15  ;;  %v1397_v39 = vshll.u32 %v10373_v27, 16  ;;  %1526 = vst [vmem:[#allocation2 + $0x78] sm:$0xf] %v1525_v17  ;;  %v10973_v19 = vrot.slane %v1377_v16, 7  ;;  %v10975_v40 = vrot.slane %v1394_v29, 7 }
  0xb1   : > { %v1532_v43 = vsel %vm10947_vm12, %v1314_v59, %v1531_v56  ;;  %v1539_v44 = vsel %vm10947_vm12, %v1331_v60, %v1538_v13  ;;  %v1546_v25 = vsel %vm10947_vm12, %v1348_v31, %v1545_v5  ;;  %v10986_v47 = vcombine.low %v10878_v52, %v600_v50  ;;  %v10997_v60 = vpop.permute.xlu1 %468  ;;  %v1461_v5 = vld [vmem:[#allocation2 + $0xc] sm:$0xf] }
  0xb2   : > { %1533 = vst [vmem:[#allocation2 + $0x84] sm:$0xf] %v1532_v43  ;;  %1540 = vst [vmem:[#allocation2 + $0x90] sm:$0xf] %v1539_v44  ;;  %v1553_v27 = vsel %vm10947_vm12, %v1365_v32, %v1552_v28  ;;  %v10989_v48 = vcombine.high %v10878_v52, %v600_v50  ;;  %v591_v49 = vrot.slane %v577_v38, %v10857_v0 }
  0xb3   : > { %v1382_v56 = vor.u32 %v1380_v33, %v10973_v19  ;;  %v1399_v59 = vor.u32 %v1397_v39, %v10975_v40  ;;  %1547 = vst [vmem:[#allocation2 + $0x9c] sm:$0xf] %v1546_v25  ;;  %1554 = vst [vmem:[#allocation2 + $0xa8] sm:$0xf] %v1553_v27  ;;  %v11002_v13 = vcombine.low %v10881_v53, %v607_v51 }
  0xb4   : > { %v11005_v52 = vcombine.high %v10881_v53, %v607_v51  ;;  %v11008_v50 = vcombine.low %v10884_v54, %v616_v62  ;;  %v11011_v18 = vcombine.high %v10884_v54, %v616_v62  ;;  %v11017_v4 = vcombine.low %v591_v49, %v623_v21 }
  0xb5   : > { %v1560_v20 = vsel %vm10947_vm12, %v1382_v56, %v1559_v46  ;;  %v1567_v38 = vsel %vm10947_vm12, %v1399_v59, %v1566_v22  ;;  %v11019_v16 = vcombine.high %v591_v49, %v623_v21  ;;  %v10343_v53 = vpack.c.bf16 %v10986_v47, %v10986_v47  ;;  %v11038_v44 = vpop.permute.xlu1 %474  ;;  %v11040_v46 = vpop.permute.xlu0 %472 }
  0xb6   : > { %14007 = vst [vmem:[#allocation14_spill] sm:$0xff] %v11008_v50  ;;  %14008 = vst [vmem:[#allocation15_spill] sm:$0xff] %v11017_v4  ;;  %v10345_v51 = vpack.c.bf16 %v10989_v48, %v10989_v48  ;;  %v10347_v54 = vpack.c.bf16 %v11002_v13, %v11002_v13  ;;  %v10349_v62 = vpack.c.bf16 %v11005_v52, %v11005_v52 }
  0xb7   : > { %14009 = vst [vmem:[#allocation16_spill] sm:$0xff] %v11019_v16  ;;  %1561 = vst [vmem:[#allocation2 + $0xb4] sm:$0xf] %v1560_v20  ;;  %v10351_v28 = vpack.c.bf16 %v11008_v50, %v11008_v50  ;;  %v10353_v29 = vpack.c.bf16 %v11011_v18, %v11011_v18  ;;  %v10355_v30 = vpack.c.bf16 %v11017_v4, %v11017_v4  ;;  %v1139_v21 = vshrl.u32 %v10343_v53, 16 }
  0xb8   : > { %1568 = vst [vmem:[#allocation2 + $0xc0] sm:$0xf] %v1567_v38  ;;  %v10357_v17 = vpack.c.bf16 %v11019_v16, %v11019_v16  ;;  %v1156_v31 = vshrl.u32 %v10345_v51, 16  ;;  %v1142_v32 = vshll.u32 %v10343_v53, 16  ;;  %v1159_v33 = vshll.u32 %v10345_v51, 16 }
  0xb9   : > { %v1173_v39 = vshrl.u32 %v10347_v54, 16  ;;  %v1190_v43 = vshrl.u32 %v10349_v62, 16  ;;  %v11042_v22 = vrot.slane %v1139_v21, 7  ;;  %v1176_v27 = vshll.u32 %v10347_v54, 16  ;;  %v1475_v54 = vld [vmem:[#allocation2 + $0x24] sm:$0xf] }
  0xba   : > { %v11044_v25 = vrot.slane %v1156_v31, 7  ;;  %v1207_v49 = vshrl.u32 %v10351_v28, 16  ;;  %v1193_v20 = vshll.u32 %v10349_v62, 16  ;;  %v1224_v38 = vshrl.u32 %v10353_v29, 16  ;;  %v1482_v62 = vld [vmem:[#allocation2 + $0x30] sm:$0xf] }
  0xbb   : > { %v11046_v56 = vrot.slane %v1173_v39, 7  ;;  %v11048_v59 = vrot.slane %v1190_v43, 7  ;;  %v1144_v1 = vor.u32 %v1142_v32, %v11042_v22  ;;  %v1210_v10 = vshll.u32 %v10351_v28, 16  ;;  %v1489_v32 = vld [vmem:[#allocation2 + $0x3c] sm:$0xf]  ;;  %v11068_v28 = vpop.permute.xlu0 %478 }
  0xbc   : > { %v1161_v21 = vor.u32 %v1159_v33, %v11044_v25  ;;  %v11057_v11 = vrot.slane %v1207_v49, 7  ;;  %v11059_v53 = vrot.slane %v1224_v38, 7  ;;  %v1227_v51 = vshll.u32 %v10353_v29, 16 }
  0xbd   : > { %v1178_v39 = vor.u32 %v1176_v27, %v11046_v56  ;;  %v1195_v43 = vor.u32 %v1193_v20, %v11048_v59  ;;  %v1241_v7 = vshrl.u32 %v10355_v30, 16  ;;  %v1258_v33 = vshrl.u32 %v10357_v17, 16  ;;  %v11066_v20 = vpop.permute.xlu1 %480 }
  0xbe   : > { %v1462_v31 = vsel %vm10947_vm12, %v1144_v1, %v1461_v5  ;;  %v1469_v27 = vsel %vm10947_vm12, %v1161_v21, %v1468_v12  ;;  %v1212_v49 = vor.u32 %v1210_v10, %v11057_v11  ;;  %v1229_v29 = vor.u32 %v1227_v51, %v11059_v53  ;;  %v1503_v21 = vld [vmem:[#allocation2 + $0x54] sm:$0xf]  ;;  %v1510_v10 = vld [vmem:[#allocation2 + $0x60] sm:$0xf] }
  0xbf   : > { %v1244_v38 = vshll.u32 %v10355_v30, 16  ;;  %v1261_v8 = vshll.u32 %v10357_v17, 16  ;;  %1463 = vst [vmem:[#allocation2 + $0xc] sm:$0xf] %v1462_v31  ;;  %1470 = vst [vmem:[#allocation2 + $0x18] sm:$0xf] %v1469_v27  ;;  %v1476_v1 = vsel %vm10947_vm12, %v1178_v39, %v1475_v54  ;;  %v1483_v12 = vsel %vm10947_vm12, %v1195_v43, %v1482_v62 }
  0xc0   : > { %v11072_v9 = vrot.slane %v1241_v7, 7  ;;  %v11074_v4 = vrot.slane %v1258_v33, 7  ;;  %1477 = vst [vmem:[#allocation2 + $0x24] sm:$0xf] %v1476_v1  ;;  %1484 = vst [vmem:[#allocation2 + $0x30] sm:$0xf] %v1483_v12  ;;  %v1490_v30 = vsel %vm10947_vm12, %v1212_v49, %v1489_v32  ;;  %v1497_v7 = vsel %vm10947_vm12, %v1229_v29, %v1496_v6  ;;  %v485_v49 = vpop.permute.xlu0 %484 }
  0xc1   : > { %v904_v17 = vcombine.low %v10887_v57, %v10958_v63  ;;  %1491 = vst [vmem:[#allocation2 + $0x3c] sm:$0xf] %v1490_v30  ;;  %1498 = vst [vmem:[#allocation2 + $0x48] sm:$0xf] %v1497_v7  ;;  %v905_v39 = vcombine.high %v10887_v57, %v10958_v63  ;;  %v632_v32 = vcombine.low %v10889_v55, %v10960_v2  ;;  %v487_v63 = vpop.permute.xlu1 %486  ;;  %v1603_v43 = vld [vmem:[#allocation2 + $0xb4] sm:$0xf] }
  0xc2   : > { %v1246_v31 = vor.u32 %v1244_v38, %v11072_v9  ;;  %v1263_v54 = vor.u32 %v1261_v8, %v11074_v4  ;;  %v920_v27 = vcombine.low %v10929_v23, %v10997_v60  ;;  %v921_v57 = vcombine.high %v10929_v23, %v10997_v60  ;;  %1635 = vst.msk [vmem:[#allocation3 + $0x78] sm:$0xf] %vm280_vm5, %v1603_v43 }
  0xc3   : > { %v912_v6 = vrot.slane %v904_v17, %v10842_v58  ;;  %v633_v38 = vcombine.high %v10889_v55, %v10960_v2  ;;  %v648_v1 = vcombine.low %v10931_v24, %v10999_v61  ;;  %v649_v12 = vcombine.high %v10931_v24, %v10999_v61 }
  0xc4   : > { %v1504_v33 = vsel %vm10947_vm12, %v1246_v31, %v1503_v21  ;;  %v1511_v8 = vsel %vm10947_vm12, %v1263_v54, %v1510_v10  ;;  %v919_v10 = vrot.slane %v905_v39, %v10842_v58  ;;  %v928_v23 = vrot.slane %v920_v27, %v10842_v58 }
  0xc5   : > { %1505 = vst [vmem:[#allocation2 + $0x54] sm:$0xf] %v1504_v33  ;;  %1512 = vst [vmem:[#allocation2 + $0x60] sm:$0xf] %v1511_v8  ;;  %v935_v60 = vrot.slane %v921_v57, %v10842_v58  ;;  %v640_v7 = vrot.slane %v632_v32, %v10842_v58  ;;  %v656_v55 = vrot.slane %v648_v1, %v10842_v58  ;;  %v493_v30 = vpop.permute.xlu1 %492  ;;  %v14021_v50 = vrot.slane %v10939_v37, 4 }
  0xc6   : > { %v663_v2 = vrot.slane %v649_v12, %v10842_v58  ;;  %v968_v17 = vcombine.low %v912_v6, %v928_v23  ;;  %v969_v31 = vcombine.high %v912_v6, %v928_v23  ;;  %v936_v24 = vcombine.low %v11038_v44, %v487_v63  ;;  %v491_v12 = vpop.permute.xlu0 %490 }
  0xc7   : > { %v937_v61 = vcombine.high %v11038_v44, %v487_v63  ;;  %v647_v8 = vrot.slane %v633_v38, %v10842_v58  ;;  %v984_v27 = vcombine.low %v919_v10, %v935_v60  ;;  %v985_v32 = vcombine.high %v919_v10, %v935_v60 }
  0xc8   : > { %v696_v57 = vcombine.low %v640_v7, %v656_v55  ;;  %v697_v1 = vcombine.high %v640_v7, %v656_v55  ;;  %v664_v23 = vcombine.low %v11040_v46, %v485_v49  ;;  %v665_v44 = vcombine.high %v11040_v46, %v485_v49 }
  0xc9   : > { %v712_v21 = vcombine.low %v647_v8, %v663_v2  ;;  %v713_v6 = vcombine.high %v647_v8, %v663_v2  ;;  %v976_v63 = vrot.slane %v968_v17, %v10857_v0  ;;  %v983_v39 = vrot.slane %v969_v31, %v10857_v0 }
  0xca   : > { %v944_v33 = vrot.slane %v936_v24, %v10842_v58  ;;  %v951_v38 = vrot.slane %v937_v61, %v10842_v58  ;;  %v952_v10 = vcombine.low %v11066_v20, %v493_v30  ;;  %v953_v60 = vcombine.high %v11066_v20, %v493_v30  ;;  %v1575_v61 = vld [vmem:[#allocation2 + $0xc] sm:$0xf] }
  0xcb   : > { %v680_v7 = vcombine.low %v11068_v28, %v491_v12  ;;  %v681_v55 = vcombine.high %v11068_v28, %v491_v12  ;;  %v992_v2 = vrot.slane %v984_v27, %v10857_v0  ;;  %v999_v46 = vrot.slane %v985_v32, %v10857_v0  ;;  %v1577_v28 = vld [vmem:[#allocation2 + $0x18] sm:$0xf]  ;;  %1607 = vst.msk [vmem:[#allocation3 + $0x8] sm:$0xf] %vm280_vm5, %v1575_v61 }
  0xcc   : > { %v11139_v49 = vrot.slane %v696_v57, %v10857_v0  ;;  %v11142_v17 = vrot.slane %v697_v1, %v10857_v0  ;;  %v960_v31 = vrot.slane %v952_v10, %v10842_v58  ;;  %v967_v24 = vrot.slane %v953_v60, %v10842_v58  ;;  %1609 = vst.msk [vmem:[#allocation3 + $0x10] sm:$0xf] %vm280_vm5, %v1577_v28 }
  0xcd   : > { %v688_v20 = vrot.slane %v680_v7, %v10842_v58  ;;  %v695_v30 = vrot.slane %v681_v55, %v10842_v58  ;;  %v11149_v8 = vrot.slane %v712_v21, %v10857_v0  ;;  %v11152_v27 = vrot.slane %v713_v6, %v10857_v0  ;;  %v1579_v7 = vld [vmem:[#allocation2 + $0x24] sm:$0xf]  ;;  %v1581_v55 = vld [vmem:[#allocation2 + $0x30] sm:$0xf] }
  0xce   : > { %v672_v32 = vrot.slane %v664_v23, %v10842_v58  ;;  %v679_v57 = vrot.slane %v665_v44, %v10842_v58  ;;  %v1000_v1 = vcombine.low %v944_v33, %v960_v31  ;;  %v1001_v12 = vcombine.high %v944_v33, %v960_v31  ;;  %1611 = vst.msk [vmem:[#allocation3 + $0x18] sm:$0xf] %vm280_vm5, %v1579_v7  ;;  %v1583_v23 = vld [vmem:[#allocation2 + $0x3c] sm:$0xf]  ;;  %v1587_v31 = vld [vmem:[#allocation2 + $0x54] sm:$0xf] }
  0xcf   : > { %v1016_v10 = vcombine.low %v951_v38, %v967_v24  ;;  %v1017_v60 = vcombine.high %v951_v38, %v967_v24  ;;  %1613 = vst.msk [vmem:[#allocation3 + $0x20] sm:$0xf] %vm280_vm5, %v1581_v55  ;;  %1615 = vst.msk [vmem:[#allocation3 + $0x28] sm:$0xf] %vm280_vm5, %v1583_v23  ;;  %v1585_v38 = vld [vmem:[#allocation2 + $0x48] sm:$0xf] }
  0xd0   : > { %v728_v21 = vcombine.low %v672_v32, %v688_v20  ;;  %v729_v54 = vcombine.high %v672_v32, %v688_v20  ;;  %v744_v29 = vcombine.low %v679_v57, %v695_v30  ;;  %v745_v6 = vcombine.high %v679_v57, %v695_v30  ;;  %1617 = vst.msk [vmem:[#allocation3 + $0x30] sm:$0xf] %vm280_vm5, %v1585_v38  ;;  %v1589_v57 = vld [vmem:[#allocation2 + $0x60] sm:$0xf]  ;;  %v1521_v58 = vld [vmem:[#allocation2 + $0x74] sm:$0x1] }
  0xd1   : > { %v1008_v44 = vrot.slane %v1000_v1, %v10857_v0  ;;  %v1015_v61 = vrot.slane %v1001_v12, %v10857_v0  ;;  %v1024_v28 = vrot.slane %v1016_v10, %v10857_v0  ;;  %v1031_v33 = vrot.slane %v1017_v60, %v10857_v0  ;;  %1619 = vst.msk [vmem:[#allocation3 + $0x38] sm:$0xf] %vm280_vm5, %v1587_v31 }
  0xd2   : > { %v11166_v24 = vrot.slane %v728_v21, %v10857_v0  ;;  %v11169_v20 = vrot.slane %v729_v54, %v10857_v0  ;;  %v11172_v30 = vrot.slane %v744_v29, %v10857_v0  ;;  %v11175_v32 = vrot.slane %v745_v6, %v10857_v0  ;;  %1621 = vst.msk [vmem:[#allocation3 + $0x40] sm:$0xf] %vm280_vm5, %v1589_v57  ;;  %v1591_v29 = vld [vmem:[#allocation2 + $0x6c] sm:$0xf]  ;;  %v1593_v54 = vld [vmem:[#allocation2 + $0x78] sm:$0xf] }
  0xd3   : > { %v11179_v1 = vcombine.low %v976_v63, %v1008_v44  ;;  %v11181_v12 = vcombine.high %v976_v63, %v1008_v44  ;;  %v11183_v10 = vcombine.low %v983_v39, %v1015_v61  ;;  %v11185_v60 = vcombine.high %v983_v39, %v1015_v61  ;;  %1623 = vst.msk [vmem:[#allocation3 + $0x48] sm:$0xf] %vm280_vm5, %v1591_v29  ;;  %v1595_v63 = vld [vmem:[#allocation2 + $0x84] sm:$0xf]  ;;  %v1599_v61 = vld [vmem:[#allocation2 + $0x9c] sm:$0xf] }
  0xd4   : > { %v11188_v7 = vcombine.low %v992_v2, %v1024_v28  ;;  %v11190_v55 = vcombine.high %v992_v2, %v1024_v28  ;;  %v11192_v21 = vcombine.low %v999_v46, %v1031_v33  ;;  %v11194_v6 = vcombine.high %v999_v46, %v1031_v33  ;;  %1625 = vst.msk [vmem:[#allocation3 + $0x50] sm:$0xf] %vm280_vm5, %v1593_v54  ;;  %v1597_v46 = vld [vmem:[#allocation2 + $0x90] sm:$0xf]  ;;  %v1601_v57 = vld [vmem:[#allocation2 + $0xa8] sm:$0xf] }
  0xd5   : > { %14010 = vst [vmem:[#allocation17_spill] sm:$0xff] %v11179_v1  ;;  %14011 = vst [vmem:[#allocation18_spill] sm:$0xff] %v11181_v12  ;;  %v10360_v39 = vpack.c.bf16 %v11179_v1, %v11179_v1  ;;  %v10362_v23 = vpack.c.bf16 %v11181_v12, %v11181_v12  ;;  %v10364_v44 = vpack.c.bf16 %v11183_v10, %v11183_v10 }
  0xd6   : > { %14012 = vst [vmem:[#allocation19_spill] sm:$0xff] %v11183_v10  ;;  %14013 = vst [vmem:[#allocation20_spill] sm:$0xff] %v11185_v60  ;;  %v10366_v2 = vpack.c.bf16 %v11185_v60, %v11185_v60  ;;  %v10368_v28 = vpack.c.bf16 %v11188_v7, %v11188_v7  ;;  %v10370_v33 = vpack.c.bf16 %v11190_v55, %v11190_v55 }
  0xd7   : > { %14014 = vst [vmem:[#allocation21_spill] sm:$0xff] %v11188_v7  ;;  %14015 = vst [vmem:[#allocation22_spill] sm:$0xff] %v11190_v55  ;;  %v11213_v38 = vpack.c.bf16 %v11192_v21, %v11192_v21  ;;  %v11217_v31 = vpack.c.bf16 %v11194_v6, %v11194_v6  ;;  %v1283_v29 = vshrl.u32 %v10360_v39, 16  ;;  %v1286_v54 = vshll.u32 %v10360_v39, 16 }
  0xd8   : > { %14016 = vst [vmem:[#allocation23_spill] sm:$0xff] %v11192_v21  ;;  %14017 = vst [vmem:[#allocation24_spill] sm:$0xff] %v11194_v6  ;;  %v1303_v62 = vshll.u32 %v10362_v23, 16  ;;  %v1317_v51 = vshrl.u32 %v10364_v44, 16  ;;  %v1320_v5 = vshll.u32 %v10364_v44, 16  ;;  %v1334_v12 = vshrl.u32 %v10366_v2, 16 }
  0xd9   : > { %1627 = vst.msk [vmem:[#allocation3 + $0x58] sm:$0xf] %vm280_vm5, %v1595_v63  ;;  %1629 = vst.msk [vmem:[#allocation3 + $0x60] sm:$0xf] %vm280_vm5, %v1597_v46  ;;  %v1300_v63 = vshrl.u32 %v10362_v23, 16  ;;  %v1337_v55 = vshll.u32 %v10366_v2, 16 }
  0xda   : > { %1631 = vst.msk [vmem:[#allocation3 + $0x68] sm:$0xf] %vm280_vm5, %v1599_v61  ;;  %1633 = vst.msk [vmem:[#allocation3 + $0x70] sm:$0xf] %vm280_vm5, %v1601_v57  ;;  %v1285_v60 = vrot.slane %v1283_v29, 7  ;;  %v1351_v6 = vshrl.u32 %v10368_v28, 16 }
  0xdb   : > { %v1302_v1 = vrot.slane %v1300_v63, 7  ;;  %v1354_v46 = vshll.u32 %v10368_v28, 16  ;;  %v1319_v39 = vrot.slane %v1317_v51, 7  ;;  %v1336_v23 = vrot.slane %v1334_v12, 7 }
  0xdc   : > { %v1368_v57 = vshrl.u32 %v10370_v33, 16  ;;  %v1371_v7 = vshll.u32 %v10370_v33, 16  ;;  %v1288_v10 = vor.u32 %v1286_v54, %v1285_v60  ;;  %v1290_v44 = vrot.slane %v1285_v60, 4  ;;  %v1528_v60 = vld [vmem:[#allocation2 + $0x80] sm:$0x1] }
  0xdd   : > { %v1305_v21 = vor.u32 %v1303_v62, %v1302_v1  ;;  %v1307_v2 = vrot.slane %v1302_v1, 4  ;;  %v1322_v0 = vor.u32 %v1320_v5, %v1319_v39  ;;  %v1324_v43 = vrot.slane %v1319_v39, 4  ;;  %v1535_v62 = vld [vmem:[#allocation2 + $0x8c] sm:$0x1] }
  0xde   : > { %v1339_v29 = vor.u32 %v1337_v55, %v1336_v23  ;;  %v1341_v63 = vrot.slane %v1336_v23, 4  ;;  %v14020_v28 = vrot.slane %v10937_v34, 4  ;;  %v1353_v12 = vrot.slane %v1351_v6, 7 }
  0xdf   : > { %v1306_v51 = vsel %vm11225_vm14, %v14021_v50, %v1305_v21  ;;  %v1370_v33 = vrot.slane %v1368_v57, 7  ;;  %v14022_v5 = vrot.slane %v10941_v41, 4  ;;  %v14023_v55 = vrot.slane %v10943_v42, 4  ;;  %v1542_v50 = vld [vmem:[#allocation2 + $0x98] sm:$0x1] }
  0xe0   : > { %v1289_v16 = vsel %vm11225_vm14, %v14020_v28, %v1288_v10  ;;  %v1385_v10 = vshrl.u32 %v11213_v38, 16  ;;  %v1388_v37 = vshll.u32 %v11213_v38, 16  ;;  %1527 = vst.msk [vmem:[#allocation2 + $0x7c] sm:$0xf] %vm280_vm5, %v1306_v51  ;;  %v1549_v21 = vld [vmem:[#allocation2 + $0xa4] sm:$0x1]  ;;  %v1356_v6 = vor.u32 %v1354_v46, %v1353_v12 }
  0xe1   : > { %v1323_v1 = vsel %vm11225_vm14, %v14022_v5, %v1322_v0  ;;  %v1340_v34 = vsel %vm11225_vm14, %v14023_v55, %v1339_v29  ;;  %1520 = vst.msk [vmem:[#allocation2 + $0x70] sm:$0xf] %vm280_vm5, %v1289_v16  ;;  %v1358_v41 = vrot.slane %v1353_v12, 4  ;;  %v1373_v54 = vor.u32 %v1371_v7, %v1370_v33  ;;  %v1556_v0 = vld [vmem:[#allocation2 + $0xb0] sm:$0x1] }
  0xe2   : > { %v1375_v39 = vrot.slane %v1370_v33, 4  ;;  %1534 = vst.msk [vmem:[#allocation2 + $0x88] sm:$0xf] %vm280_vm5, %v1323_v1  ;;  %1541 = vst.msk [vmem:[#allocation2 + $0x94] sm:$0xf] %vm280_vm5, %v1340_v34  ;;  %v1387_v42 = vrot.slane %v1385_v10, 7  ;;  %v1522_v16 = vsel %vm10712_vm2, %v1290_v44, %v1521_v58  ;;  %v1529_v51 = vsel %vm10712_vm2, %v1307_v2, %v1528_v60 }
  0xe3   : > { %v1402_v23 = vshrl.u32 %v11217_v31, 16  ;;  %v1405_v38 = vshll.u32 %v11217_v31, 16  ;;  %v1563_v57 = vld [vmem:[#allocation2 + $0xbc] sm:$0x1]  ;;  %v14024_v29 = vrot.slane %v10962_v14, 4  ;;  %v14025_v46 = vrot.slane %v10964_v15, 4 }
  0xe4   : > { %1523 = vst [vmem:[#allocation2 + $0x74] sm:$0x1] %v1522_v16  ;;  %v1536_v31 = vsel %vm10712_vm2, %v1324_v43, %v1535_v62  ;;  %v1390_v12 = vor.u32 %v1388_v37, %v1387_v42  ;;  %v1392_v58 = vrot.slane %v1387_v42, 4  ;;  %1530 = vst [vmem:[#allocation2 + $0x80] sm:$0x1] %v1529_v51  ;;  %v1543_v14 = vsel %vm10712_vm2, %v1341_v63, %v1542_v50 }
  0xe5   : > { %v1357_v7 = vsel %vm11225_vm14, %v14024_v29, %v1356_v6  ;;  %v1374_v28 = vsel %vm11225_vm14, %v14025_v46, %v1373_v54  ;;  %v1404_v44 = vrot.slane %v1402_v23, 7  ;;  %1537 = vst [vmem:[#allocation2 + $0x8c] sm:$0x1] %v1536_v31  ;;  %v1570_v15 = vld [vmem:[#allocation2 + $0xc8] sm:$0x1]  ;;  %v1550_v2 = vsel %vm10712_vm2, %v1358_v41, %v1549_v21 }
  0xe6   : > { %1548 = vst.msk [vmem:[#allocation2 + $0xa0] sm:$0xf] %vm280_vm5, %v1357_v7  ;;  %1555 = vst.msk [vmem:[#allocation2 + $0xac] sm:$0xf] %vm280_vm5, %v1374_v28  ;;  %v1557_v43 = vsel %vm10712_vm2, %v1375_v39, %v1556_v0  ;;  %v11277_v33 = vcombine.low %v11139_v49, %v11166_v24  ;;  %v11281_v60 = vcombine.high %v11139_v49, %v11166_v24  ;;  %v14026_v63 = vrot.slane %v10973_v19, 4 }
  0xe7   : > { %1544 = vst [vmem:[#allocation2 + $0x98] sm:$0x1] %v1543_v14  ;;  %v1407_v5 = vor.u32 %v1405_v38, %v1404_v44  ;;  %v1409_v1 = vrot.slane %v1404_v44, 4  ;;  %1551 = vst [vmem:[#allocation2 + $0xa4] sm:$0x1] %v1550_v2  ;;  %v1564_v55 = vsel %vm10712_vm2, %v1392_v58, %v1563_v57  ;;  %v11292_v34 = vcombine.low %v11142_v17, %v11169_v20 }
  0xe8   : > { %v1391_v62 = vsel %vm11225_vm14, %v14026_v63, %v1390_v12  ;;  %1558 = vst [vmem:[#allocation2 + $0xb0] sm:$0x1] %v1557_v43  ;;  %1565 = vst [vmem:[#allocation2 + $0xbc] sm:$0x1] %v1564_v55  ;;  %v11296_v19 = vcombine.high %v11142_v17, %v11169_v20  ;;  %v11300_v49 = vcombine.low %v11149_v8, %v11172_v30  ;;  %v14027_v10 = vrot.slane %v10975_v40, 4 }
  0xe9   : > { %1562 = vst.msk [vmem:[#allocation2 + $0xb8] sm:$0xf] %vm280_vm5, %v1391_v62  ;;  %v11304_v24 = vcombine.high %v11149_v8, %v11172_v30  ;;  %v1571_v50 = vsel %vm10712_vm2, %v1409_v1, %v1570_v15  ;;  %v11314_v17 = vcombine.low %v11152_v27, %v11175_v32  ;;  %v11318_v20 = vcombine.high %v11152_v27, %v11175_v32  ;;  %v1573_v6 = vld [vmem:[#allocation2] sm:$0xf]  ;;  %v1574_v39 = vld [vmem:[#allocation2 + $0x4] sm:$0xf] }
  0xea   : > { %v1408_v37 = vsel %vm11225_vm14, %v14027_v10, %v1407_v5  ;;  %1572 = vst [vmem:[#allocation2 + $0xc8] sm:$0x1] %v1571_v50  ;;  %v10344_v40 = vpack.c.bf16 %v11277_v33, %v11277_v33  ;;  %v10346_v8 = vpack.c.bf16 %v11281_v60, %v11281_v60  ;;  %v10348_v30 = vpack.c.bf16 %v11292_v34, %v11292_v34  ;;  %v1465_v10 = vld [vmem:[#allocation2 + $0x14] sm:$0x1] }
  0xeb   : > { %1569 = vst.msk [vmem:[#allocation2 + $0xc4] sm:$0xf] %vm280_vm5, %v1408_v37  ;;  %v10350_v21 = vpack.c.bf16 %v11296_v19, %v11296_v19  ;;  %v10352_v27 = vpack.c.bf16 %v11300_v49, %v11300_v49  ;;  %v10354_v32 = vpack.c.bf16 %v11304_v24, %v11304_v24  ;;  %v10356_v41 = vpack.c.bf16 %v11314_v17, %v11314_v17 }
  0xec   : > { %v11337_v54 = vpack.c.bf16 %v11318_v20, %v11318_v20  ;;  %1605 = vst.msk [vmem:[#allocation3] sm:$0xf] %vm280_vm5, %v1573_v6  ;;  %v1147_v0 = vshrl.u32 %v10344_v40, 16  ;;  %v1150_v42 = vshll.u32 %v10344_v40, 16  ;;  %v1164_v23 = vshrl.u32 %v10346_v8, 16 }
  0xed   : > { %v1167_v38 = vshll.u32 %v10346_v8, 16  ;;  %1606 = vst.msk [vmem:[#allocation3 + $0x4] sm:$0xf] %vm280_vm5, %v1574_v39  ;;  %v1181_v16 = vshrl.u32 %v10348_v30, 16  ;;  %v1184_v57 = vshll.u32 %v10348_v30, 16  ;;  %v1198_v29 = vshrl.u32 %v10350_v21, 16 }
  0xee   : > { %v1201_v7 = vshll.u32 %v10350_v21, 16  ;;  %v1149_v46 = vrot.slane %v1147_v0, 7  ;;  %v1166_v28 = vrot.slane %v1164_v23, 7  ;;  %v1215_v51 = vshrl.u32 %v10352_v27, 16  ;;  %v1472_v6 = vld [vmem:[#allocation2 + $0x20] sm:$0x1] }
  0xef   : > { %v1218_v31 = vshll.u32 %v10352_v27, 16  ;;  %v1183_v12 = vrot.slane %v1181_v16, 7  ;;  %v1200_v58 = vrot.slane %v1198_v29, 7  ;;  %v1232_v44 = vshrl.u32 %v10354_v32, 16  ;;  %v1479_v27 = vld [vmem:[#allocation2 + $0x2c] sm:$0x1] }
  0xf0   : > { %v1235_v14 = vshll.u32 %v10354_v32, 16  ;;  %v1152_v15 = vor.u32 %v1150_v42, %v1149_v46  ;;  %v1154_v2 = vrot.slane %v1149_v46, 4  ;;  %v1169_v43 = vor.u32 %v1167_v38, %v1166_v28  ;;  %v1493_v38 = vld [vmem:[#allocation2 + $0x44] sm:$0x1] }
  0xf1   : > { %v1171_v63 = vrot.slane %v1166_v28, 4  ;;  %v1186_v62 = vor.u32 %v1184_v57, %v1183_v12  ;;  %v1188_v5 = vrot.slane %v1183_v12, 4  ;;  %v1203_v1 = vor.u32 %v1201_v7, %v1200_v58 }
  0xf2   : > { %v1205_v55 = vrot.slane %v1200_v58, 4  ;;  %v14028_v37 = vrot.slane %v11042_v22, 4  ;;  %v14029_v40 = vrot.slane %v11044_v25, 4  ;;  %v1217_v30 = vrot.slane %v1215_v51, 7  ;;  %v1486_v25 = vld [vmem:[#allocation2 + $0x38] sm:$0x1] }
  0xf3   : > { %v1234_v21 = vrot.slane %v1232_v44, 7  ;;  %v14030_v32 = vrot.slane %v11046_v56, 4  ;;  %v14031_v0 = vrot.slane %v11048_v59, 4  ;;  %v1249_v42 = vshrl.u32 %v10356_v41, 16  ;;  %v1500_v59 = vld [vmem:[#allocation2 + $0x50] sm:$0x1] }
  0xf4   : > { %v1153_v50 = vsel %vm11225_vm14, %v14028_v37, %v1152_v15  ;;  %v1170_v8 = vsel %vm11225_vm14, %v14029_v40, %v1169_v43  ;;  %v1252_v23 = vshll.u32 %v10356_v41, 16  ;;  %v1220_v16 = vor.u32 %v1218_v31, %v1217_v30  ;;  %v1507_v51 = vld [vmem:[#allocation2 + $0x5c] sm:$0x1] }
  0xf5   : > { %v1187_v39 = vsel %vm11225_vm14, %v14030_v32, %v1186_v62  ;;  %v1204_v22 = vsel %vm11225_vm14, %v14031_v0, %v1203_v1  ;;  %1464 = vst.msk [vmem:[#allocation2 + $0x10] sm:$0xf] %vm280_vm5, %v1153_v50  ;;  %1471 = vst.msk [vmem:[#allocation2 + $0x1c] sm:$0xf] %vm280_vm5, %v1170_v8  ;;  %v1222_v57 = vrot.slane %v1217_v30, 4  ;;  %v1237_v29 = vor.u32 %v1235_v14, %v1234_v21 }
  0xf6   : > { %v1239_v56 = vrot.slane %v1234_v21, 4  ;;  %1478 = vst.msk [vmem:[#allocation2 + $0x28] sm:$0xf] %vm280_vm5, %v1187_v39  ;;  %1485 = vst.msk [vmem:[#allocation2 + $0x34] sm:$0xf] %vm280_vm5, %v1204_v22  ;;  %v1251_v7 = vrot.slane %v1249_v42, 7  ;;  %v1466_v28 = vsel %vm10712_vm2, %v1154_v2, %v1465_v10  ;;  %v1473_v14 = vsel %vm10712_vm2, %v1171_v63, %v1472_v6 }
  0xf7   : > { %v1266_v46 = vshrl.u32 %v11337_v54, 16  ;;  %v1269_v41 = vshll.u32 %v11337_v54, 16  ;;  %v14032_v12 = vrot.slane %v11057_v11, 4  ;;  %v14033_v58 = vrot.slane %v11059_v53, 4  ;;  %1467 = vst [vmem:[#allocation2 + $0x14] sm:$0x1] %v1466_v28 }
  0xf8   : > { %v1480_v54 = vsel %vm10712_vm2, %v1188_v5, %v1479_v27  ;;  %v1254_v15 = vor.u32 %v1252_v23, %v1251_v7  ;;  %v1256_v2 = vrot.slane %v1251_v7, 4  ;;  %1474 = vst [vmem:[#allocation2 + $0x20] sm:$0x1] %v1473_v14  ;;  %v1487_v11 = vsel %vm10712_vm2, %v1205_v55, %v1486_v25  ;;  %v1514_v62 = vld [vmem:[#allocation2 + $0x68] sm:$0x1] }
  0xf9   : > { %v1221_v31 = vsel %vm11225_vm14, %v14032_v12, %v1220_v16  ;;  %v1238_v44 = vsel %vm11225_vm14, %v14033_v58, %v1237_v29  ;;  %v1268_v43 = vrot.slane %v1266_v46, 7  ;;  %1481 = vst [vmem:[#allocation2 + $0x2c] sm:$0x1] %v1480_v54  ;;  %v1264_v53 = vrot.slane %v11074_v4, 4  ;;  %1488 = vst [vmem:[#allocation2 + $0x38] sm:$0x1] %v1487_v11 }
  0xfa   : > { %1492 = vst.msk [vmem:[#allocation2 + $0x40] sm:$0xf] %vm280_vm5, %v1221_v31  ;;  %1499 = vst.msk [vmem:[#allocation2 + $0x4c] sm:$0xf] %vm280_vm5, %v1238_v44  ;;  %v1494_v63 = vsel %vm10712_vm2, %v1222_v57, %v1493_v38  ;;  %v1501_v5 = vsel %vm10712_vm2, %v1239_v56, %v1500_v59  ;;  %v2204_v1 = vld [vmem:[#allocation2 + $0xc] sm:$0xe]  ;;  %v1508_v4 = vsel %vm10712_vm2, %v1256_v2, %v1507_v51 }
  0xfb   : > { %v14034_v10 = vrot.slane %v11072_v9, 4  ;;  %v1271_v37 = vor.u32 %v1269_v41, %v1268_v43  ;;  %v1273_v50 = vrot.slane %v1268_v43, 4  ;;  %1495 = vst [vmem:[#allocation2 + $0x44] sm:$0x1] %v1494_v63  ;;  %1502 = vst [vmem:[#allocation2 + $0x50] sm:$0x1] %v1501_v5 }
  0xfc   : > { %1509 = vst [vmem:[#allocation2 + $0x5c] sm:$0x1] %v1508_v4  ;;  %v2205_v40 = vld [vmem:[#allocation2 + $0x10] sm:$0xf]  ;;  %v2208_v8 = vld [vmem:[#allocation2 + $0x1c] sm:$0xf] }
  0xfd   : > { %v1255_v55 = vsel %vm11225_vm14, %v14034_v10, %v1254_v15  ;;  %v1272_v30 = vsel %vm11225_vm14, %v1264_v53, %v1271_v37  ;;  %v1515_v9 = vsel %vm10712_vm2, %v1273_v50, %v1514_v62  ;;  %v10138_v21 = vrot.slane %v2204_v1, 9  ;;  %v2207_v27 = vld [vmem:[#allocation2 + $0x18] sm:$0xe]  ;;  %v2211_v42 = vld [vmem:[#allocation2 + $0x28] sm:$0xf] }
  0xfe   : > { %1506 = vst.msk [vmem:[#allocation2 + $0x58] sm:$0xf] %vm280_vm5, %v1255_v55  ;;  %v2309_v6 = vrot.slane %v2205_v40, 5  ;;  %1513 = vst.msk [vmem:[#allocation2 + $0x64] sm:$0xf] %vm280_vm5, %v1272_v30  ;;  %v2316_v32 = vrot.slane %v2208_v8, 5 }
  0xff   : > { %1516 = vst [vmem:[#allocation2 + $0x68] sm:$0x1] %v1515_v9  ;;  %v2206_v0 = vld [vmem:[#allocation2 + $0x14] sm:$0x1]  ;;  %v10139_v25 = vrot.slane %v2207_v27, 9  ;;  %v2323_v56 = vrot.slane %v2211_v42, 5 }
 0x100   : > { %v2310_v39 = vsel %vm10827_vm11, %v10138_v21, %v2309_v6  ;;  %v2311_v22 = vrot.slane %v2309_v6, 4  ;;  %v2312_v23 = vrot.slane %v2206_v0, 5  ;;  %v2209_v38 = vld [vmem:[#allocation2 + $0x20] sm:$0x1]  ;;  %v2318_v57 = vrot.slane %v2316_v32, 4 }
 0x101   : > { %2416 = vrot.lane.b32.xlu0 %v2310_v39, %s10628_s23  ;;  %v2210_v29 = vld [vmem:[#allocation2 + $0x24] sm:$0xe]  ;;  %v2317_v59 = vsel %vm10827_vm11, %v10139_v25, %v2316_v32  ;;  %v2214_v7 = vld [vmem:[#allocation2 + $0x34] sm:$0xf]  ;;  %v2319_v46 = vrot.slane %v2209_v38, 5  ;;  %v2325_v12 = vrot.slane %v2323_v56, 4 }
 0x102   : > { %v2313_v16 = vsel %vm10827_vm11, %v2311_v22, %v2312_v23  ;;  %v10140_v41 = vrot.slane %v2210_v29, 9  ;;  %v2212_v28 = vld [vmem:[#allocation2 + $0x2c] sm:$0x1]  ;;  %v2213_v31 = vld [vmem:[#allocation2 + $0x30] sm:$0xe]  ;;  %v2330_v58 = vrot.slane %v2214_v7, 5 }
 0x103   : > { %2418 = vrot.lane.b32.xlu1 %v2313_v16, %s10628_s23  ;;  %v2320_v51 = vsel %vm10827_vm11, %v2318_v57, %v2319_v46  ;;  %v2217_v14 = vld [vmem:[#allocation2 + $0x40] sm:$0xf]  ;;  %v2326_v54 = vrot.slane %v2212_v28, 5  ;;  %v2216_v15 = vld [vmem:[#allocation2 + $0x3c] sm:$0xe]  ;;  %v10141_v43 = vrot.slane %v2213_v31, 9 }
 0x104   : > { %v2324_v44 = vsel %vm10827_vm11, %v10140_v41, %v2323_v56  ;;  %v1640_v2 = vld [vmem:[#allocation2 + $0xc] sm:$0xf]  ;;  %v2215_v11 = vld [vmem:[#allocation2 + $0x38] sm:$0x1]  ;;  %v2332_v63 = vrot.slane %v2330_v58, 4  ;;  %v2337_v5 = vrot.slane %v2217_v14, 5 }
 0x105   : > { %2420 = vrot.lane.b32.xlu0 %v2317_v59, %s10628_s23  ;;  %v2220_v53 = vld [vmem:[#allocation2 + $0x4c] sm:$0xf]  ;;  %v2327_v62 = vsel %vm10827_vm11, %v2325_v12, %v2326_v54  ;;  %v2331_v1 = vsel %vm10827_vm11, %v10141_v43, %v2330_v58  ;;  %v1713_v10 = vshrl.u32 %v1640_v2, 16  ;;  %v1716_v55 = vshll.u32 %v1640_v2, 16  ;;  %v2219_v4 = vld [vmem:[#allocation2 + $0x48] sm:$0xe] }
 0x106   : > { %v2333_v37 = vrot.slane %v2215_v11, 5  ;;  %v10142_v50 = vrot.slane %v2216_v15, 9  ;;  %v2344_v40 = vrot.slane %v2220_v53, 5  ;;  %v1643_v8 = vld [vmem:[#allocation2 + $0x18] sm:$0xf]  ;;  %v2339_v32 = vrot.slane %v2337_v5, 4 }
 0x107   : > { %2422 = vrot.lane.b32.xlu1 %v2320_v51, %s10628_s23  ;;  %v2218_v30 = vld [vmem:[#allocation2 + $0x44] sm:$0x1]  ;;  %v2222_v9 = vld [vmem:[#allocation2 + $0x54] sm:$0xe]  ;;  %v2223_v21 = vld [vmem:[#allocation2 + $0x58] sm:$0xf] }
 0x108   : > { %v1641_v6 = vld [vmem:[#allocation2 + $0x10] sm:$0xf]  ;;  %v2334_v27 = vsel %vm10827_vm11, %v2332_v63, %v2333_v37  ;;  %v2225_v39 = vld [vmem:[#allocation2 + $0x60] sm:$0xe]  ;;  %v1644_v0 = vld [vmem:[#allocation2 + $0x1c] sm:$0xf]  ;;  %v2338_v22 = vsel %vm10827_vm11, %v10142_v50, %v2337_v5 }
 0x109   : > { %2424 = vrot.lane.b32.xlu0 %v2324_v44, %s10628_s23  ;;  %v10143_v42 = vrot.slane %v2219_v4, 9  ;;  %v2221_v23 = vld [vmem:[#allocation2 + $0x50] sm:$0x1]  ;;  %v1715_v25 = vrot.slane %v1713_v10, 4  ;;  %v1718_v38 = vrot.slane %v1716_v55, 5  ;;  %v2340_v16 = vrot.slane %v2218_v30, 5 }
 0x10a   : > { %v2346_v57 = vrot.slane %v2344_v40, 4  ;;  %v2351_v29 = vrot.slane %v2223_v21, 5  ;;  %v2224_v56 = vld [vmem:[#allocation2 + $0x5c] sm:$0x1]  ;;  %v1722_v59 = vshll.u32 %v1641_v6, 16  ;;  %v1726_v46 = vshrl.u32 %v1641_v6, 16 }
 0x10b   : > { %2426 = vrot.lane.b32.xlu1 %v2327_v62, %s10628_s23  ;;  %v2226_v7 = vld [vmem:[#allocation2 + $0x64] sm:$0xf]  ;;  %v1737_v41 = vshrl.u32 %v1643_v8, 16  ;;  %v1740_v28 = vshll.u32 %v1643_v8, 16  ;;  %v1746_v51 = vshll.u32 %v1644_v0, 16  ;;  %v2341_v12 = vsel %vm10827_vm11, %v2339_v32, %v2340_v16 }
 0x10c   : > { %v2347_v31 = vrot.slane %v2221_v23, 5  ;;  %v10144_v58 = vrot.slane %v2222_v9, 9  ;;  %v1750_v44 = vshrl.u32 %v1644_v0, 16  ;;  %v2345_v14 = vsel %vm10827_vm11, %v10143_v42, %v2344_v40  ;;  %v1646_v43 = vld [vmem:[#allocation2 + $0x24] sm:$0xf] }
 0x10d   : > { %2428 = vrot.lane.b32.xlu0 %v2331_v1, %s10628_s23  ;;  %v2354_v54 = vrot.slane %v2224_v56, 5  ;;  %v10145_v15 = vrot.slane %v2225_v39, 9  ;;  %v1719_v2 = vor.u32 %v1718_v38, %v1715_v25  ;;  %v1647_v11 = vld [vmem:[#allocation2 + $0x28] sm:$0xf]  ;;  %v2353_v62 = vrot.slane %v2351_v29, 4 }
 0x10e   : > { %v2348_v53 = vsel %vm10827_vm11, %v2346_v57, %v2347_v31  ;;  %v2358_v63 = vrot.slane %v2226_v7, 5  ;;  %v2227_v5 = vld [vmem:[#allocation2 + $0x68] sm:$0x1]  ;;  %v11433_v1 = vrot.slane %v1722_v59, 5  ;;  %v1642_v10 = vld [vmem:[#allocation2 + $0x14] sm:$0x1]  ;;  %v2352_v32 = vsel %vm10827_vm11, %v10144_v58, %v2351_v29 }
 0x10f   : > { %2430 = vrot.lane.b32.xlu1 %v2334_v27, %s10628_s23  ;;  %v1728_v55 = vrot.slane %v1726_v46, 4  ;;  %v1739_v37 = vrot.slane %v1737_v41, 4  ;;  %v1742_v50 = vrot.slane %v1740_v28, 5  ;;  %v11435_v4 = vrot.slane %v1746_v51, 5  ;;  %v1576_v40 = vld [vmem:[#allocation2 + $0x10] sm:$0xf] }
 0x110   : > { %v1645_v8 = vld [vmem:[#allocation2 + $0x20] sm:$0x1]  ;;  %v1752_v30 = vrot.slane %v1750_v44, 4  ;;  %v1761_v9 = vshrl.u32 %v1646_v43, 16  ;;  %v1764_v21 = vshll.u32 %v1646_v43, 16  ;;  %v1770_v6 = vshll.u32 %v1647_v11, 16 }
 0x111   : > { %2432 = vrot.lane.b32.xlu0 %v2338_v22, %s10628_s23  ;;  %v1649_v27 = vld [vmem:[#allocation2 + $0x30] sm:$0xf]  ;;  %1608 = vst.msk [vmem:[#allocation3 + $0xc] sm:$0xf] %vm280_vm5, %v1576_v40  ;;  %v1720_v39 = vrot.slane %v1719_v2, 4  ;;  %v1774_v0 = vshrl.u32 %v1647_v11, 16  ;;  %v2355_v23 = vsel %vm10827_vm11, %v2353_v62, %v2354_v54  ;;  %v2359_v25 = vsel %vm10827_vm11, %v10145_v15, %v2358_v63 }
 0x112   : > { %v11441_v22 = vld [vmem:[#allocation2 + $0x3c] sm:$0xf]  ;;  %v2360_v38 = vrot.slane %v2358_v63, 4  ;;  %v2361_v16 = vrot.slane %v2227_v5, 5  ;;  %v1650_v57 = vld [vmem:[#allocation2 + $0x34] sm:$0xf]  ;;  %v1729_v29 = vor.u32 %v1728_v55, %v11433_v1  ;;  %v1743_v7 = vor.u32 %v1742_v50, %v1739_v37 }
 0x113   : > { %2434 = vrot.lane.b32.xlu1 %v2341_v12, %s10628_s23  ;;  %v1578_v42 = vld [vmem:[#allocation2 + $0x1c] sm:$0xf]  ;;  %v1580_v56 = vld [vmem:[#allocation2 + $0x28] sm:$0xf]  ;;  %v1732_v59 = vshll.u32 %v1642_v10, 16  ;;  %v1756_v46 = vshll.u32 %v1645_v8, 16  ;;  %v1753_v12 = vor.u32 %v1752_v30, %v11435_v4  ;;  %v1725_v50 = vsel %vm10820_vm8, %v1720_v39, %v11433_v1 }
 0x114   : > { %1610 = vst.msk [vmem:[#allocation3 + $0x14] sm:$0xf] %vm280_vm5, %v1578_v42  ;;  %v1648_v41 = vld [vmem:[#allocation2 + $0x2c] sm:$0x1]  ;;  %1612 = vst.msk [vmem:[#allocation3 + $0x1c] sm:$0xf] %vm280_vm5, %v1580_v56  ;;  %v2362_v62 = vsel %vm10827_vm11, %v2360_v38, %v2361_v16 }
 0x115   : > { %2436 = vrot.lane.b32.xlu0 %v2345_v14, %s10628_s23  ;;  %v1582_v28 = vld [vmem:[#allocation2 + $0x34] sm:$0xf]  ;;  %v1584_v51 = vld [vmem:[#allocation2 + $0x40] sm:$0xf]  ;;  %v1763_v31 = vrot.slane %v1761_v9, 4  ;;  %v1766_v58 = vrot.slane %v1764_v21, 5 }
 0x116   : > { %v11452_v44 = vrot.slane %v1770_v6, 5  ;;  %1614 = vst.msk [vmem:[#allocation3 + $0x24] sm:$0xf] %vm280_vm5, %v1582_v28  ;;  %1616 = vst.msk [vmem:[#allocation3 + $0x2c] sm:$0xf] %vm280_vm5, %v1584_v51  ;;  %v1776_v54 = vrot.slane %v1774_v0, 4 }
 0x117   : > { %2438 = vrot.lane.b32.xlu1 %v2348_v53, %s10628_s23  ;;  %v1586_v14 = vld [vmem:[#allocation2 + $0x4c] sm:$0xf]  ;;  %v1785_v15 = vshrl.u32 %v1649_v27, 16  ;;  %v1788_v2 = vshll.u32 %v1649_v27, 16  ;;  %v1794_v43 = vshll.u32 %v1650_v57, 16  ;;  %v1798_v63 = vshrl.u32 %v1650_v57, 16 }
 0x118   : > { %v1653_v11 = vld [vmem:[#allocation2 + $0x40] sm:$0xf]  ;;  %1618 = vst.msk [vmem:[#allocation3 + $0x34] sm:$0xf] %vm280_vm5, %v1586_v14  ;;  %v1588_v53 = vld [vmem:[#allocation2 + $0x58] sm:$0xf]  ;;  %v1767_v27 = vor.u32 %v1766_v58, %v1763_v31 }
 0x119   : > { %2440 = vrot.lane.b32.xlu0 %v2352_v32, %s10628_s23  ;;  %v1809_v5 = vshrl.u32 %v11441_v22, 16  ;;  %v1812_v10 = vshll.u32 %v11441_v22, 16  ;;  %v1655_v55 = vld [vmem:[#allocation2 + $0x48] sm:$0xf]  ;;  %1620 = vst.msk [vmem:[#allocation3 + $0x3c] sm:$0xf] %vm280_vm5, %v1588_v53  ;;  %v1777_v22 = vor.u32 %v1776_v54, %v11452_v44 }
 0x11a   : > { %v1590_v37 = vld [vmem:[#allocation2 + $0x64] sm:$0xf]  ;;  %v1730_v40 = vrot.slane %v1729_v29, 4  ;;  %v1734_v8 = vrot.slane %v1732_v59, 5  ;;  %v1758_v30 = vrot.slane %v1756_v46, 5  ;;  %v1744_v21 = vrot.slane %v1743_v7, 4 }
 0x11b   : > { %2442 = vrot.lane.b32.xlu1 %v2355_v23, %s10628_s23  ;;  %v1656_v9 = vld [vmem:[#allocation2 + $0x4c] sm:$0xf]  ;;  %1622 = vst.msk [vmem:[#allocation3 + $0x44] sm:$0xf] %vm280_vm5, %v1590_v37  ;;  %v1754_v6 = vrot.slane %v1753_v12, 4  ;;  %v1780_v32 = vshll.u32 %v1648_v41, 16 }
 0x11c   : > { %v1592_v0 = vld [vmem:[#allocation2 + $0x70] sm:$0xf]  ;;  %v1787_v42 = vrot.slane %v1785_v15, 4  ;;  %v1790_v23 = vrot.slane %v1788_v2, 5  ;;  %v1594_v1 = vld [vmem:[#allocation2 + $0x7c] sm:$0xf]  ;;  %v1735_v29 = vsel %vm10820_vm8, %v1730_v40, %v1734_v8  ;;  %v1749_v28 = vsel %vm10820_vm8, %v1744_v21, %v11435_v4 }
 0x11d   : > { %2444 = vrot.lane.b32.xlu0 %v2359_v25, %s10628_s23  ;;  %v11470_v25 = vrot.slane %v1794_v43, 5  ;;  %1624 = vst.msk [vmem:[#allocation3 + $0x4c] sm:$0xf] %vm280_vm5, %v1592_v0  ;;  %v1651_v39 = vld [vmem:[#allocation2 + $0x38] sm:$0x1]  ;;  %v1800_v38 = vrot.slane %v1798_v63, 4  ;;  %v1759_v14 = vsel %vm10820_vm8, %v1754_v6, %v1758_v30 }
 0x11e   : > { %v1811_v16 = vrot.slane %v1809_v5, 4  ;;  %v1814_v57 = vrot.slane %v1812_v10, 5  ;;  %v1818_v56 = vshll.u32 %v1653_v11, 16  ;;  %1626 = vst.msk [vmem:[#allocation3 + $0x54] sm:$0xf] %vm280_vm5, %v1594_v1  ;;  %v1822_v59 = vshrl.u32 %v1653_v11, 16 }
 0x11f   : > { %2446 = vrot.lane.b32.xlu1 %v2362_v62, %s10628_s23  ;;  %v1833_v7 = vshrl.u32 %v1655_v55, 16  ;;  %v1836_v46 = vshll.u32 %v1655_v55, 16  ;;  %v1658_v41 = vld [vmem:[#allocation2 + $0x54] sm:$0xf]  ;;  %v1782_v51 = vrot.slane %v1780_v32, 5  ;;  %v1842_v12 = vshll.u32 %v1656_v9, 16 }
 0x120   : > { %v1846_v31 = vshrl.u32 %v1656_v9, 16  ;;  %v1596_v58 = vld [vmem:[#allocation2 + $0x88] sm:$0xf]  ;;  %v1768_v54 = vrot.slane %v1767_v27, 4  ;;  %v1778_v15 = vrot.slane %v1777_v22, 4  ;;  %v1804_v2 = vshll.u32 %v1651_v39, 16 }
 0x121   : > { %2076 = vrot.lane.b32.xlu0 %v1725_v50, %s10627_s22  ;;  %1628 = vst.msk [vmem:[#allocation3 + $0x5c] sm:$0xf] %vm280_vm5, %v1596_v58  ;;  %v1791_v43 = vor.u32 %v1790_v23, %v1787_v42  ;;  %v1801_v11 = vor.u32 %v1800_v38, %v11470_v25  ;;  %v1815_v4 = vor.u32 %v1814_v57, %v1811_v16  ;;  %v11486_v53 = vrot.slane %v1818_v56, 5  ;;  %v1659_v62 = vld [vmem:[#allocation2 + $0x58] sm:$0xf] }
 0x122   : > { %v1598_v63 = vld [vmem:[#allocation2 + $0x94] sm:$0xf]  ;;  %v1654_v5 = vld [vmem:[#allocation2 + $0x44] sm:$0x1]  ;;  %v1824_v10 = vrot.slane %v1822_v59, 4  ;;  %v1835_v55 = vrot.slane %v1833_v7, 4  ;;  %v1773_v8 = vsel %vm10820_vm8, %v1768_v54, %v11452_v44  ;;  %v1783_v27 = vsel %vm10820_vm8, %v1778_v15, %v1782_v51 }
 0x123   : > { %2078 = vrot.lane.b32.xlu1 %v1735_v29, %s10627_s22  ;;  %v1838_v37 = vrot.slane %v1836_v46, 5  ;;  %v1857_v50 = vshrl.u32 %v1658_v41, 16  ;;  %v1661_v40 = vld [vmem:[#allocation2 + $0x60] sm:$0xf]  ;;  %1630 = vst.msk [vmem:[#allocation3 + $0x64] sm:$0xf] %vm280_vm5, %v1598_v63 }
 0x124   : > { %v11492_v30 = vrot.slane %v1842_v12, 5  ;;  %v1657_v9 = vld [vmem:[#allocation2 + $0x50] sm:$0x1]  ;;  %v1848_v21 = vrot.slane %v1846_v31, 4  ;;  %v1860_v6 = vshll.u32 %v1658_v41, 16  ;;  %v1806_v32 = vrot.slane %v1804_v2, 5 }
 0x125   : > { %2080 = vrot.lane.b32.xlu0 %v1749_v28, %s10627_s22  ;;  %v1866_v0 = vshll.u32 %v1659_v62, 16  ;;  %v1870_v22 = vshrl.u32 %v1659_v62, 16  ;;  %v1600_v42 = vld [vmem:[#allocation2 + $0xa0] sm:$0xf]  ;;  %v1792_v23 = vrot.slane %v1791_v43, 4  ;;  %v1802_v1 = vrot.slane %v1801_v11, 4 }
 0x126   : > { %v1816_v39 = vrot.slane %v1815_v4, 4  ;;  %v1828_v44 = vshll.u32 %v1654_v5, 16  ;;  %v1662_v38 = vld [vmem:[#allocation2 + $0x64] sm:$0xf]  ;;  %1632 = vst.msk [vmem:[#allocation3 + $0x6c] sm:$0xf] %vm280_vm5, %v1600_v42  ;;  %v1825_v16 = vor.u32 %v1824_v10, %v11486_v53  ;;  %v1839_v57 = vor.u32 %v1838_v37, %v1835_v55 }
 0x127   : > { %2082 = vrot.lane.b32.xlu1 %v1759_v14, %s10627_s22  ;;  %v1852_v56 = vshll.u32 %v1657_v9, 16  ;;  %v1859_v29 = vrot.slane %v1857_v50, 4  ;;  %v1602_v59 = vld [vmem:[#allocation2 + $0xac] sm:$0xf]  ;;  %v1849_v7 = vor.u32 %v1848_v21, %v11492_v30  ;;  %v1862_v46 = vrot.slane %v1860_v6, 5 }
 0x128   : > { %v1660_v41 = vld [vmem:[#allocation2 + $0x5c] sm:$0x1]  ;;  %v1881_v28 = vshrl.u32 %v1661_v40, 16  ;;  %v1884_v51 = vshll.u32 %v1661_v40, 16  ;;  %1634 = vst.msk [vmem:[#allocation3 + $0x74] sm:$0xf] %vm280_vm5, %v1602_v59  ;;  %v1797_v12 = vsel %vm10820_vm8, %v1792_v23, %v11470_v25  ;;  %v1807_v15 = vsel %vm10820_vm8, %v1802_v1, %v1806_v32 }
 0x129   : > { %2084 = vrot.lane.b32.xlu0 %v1773_v8, %s10627_s22  ;;  %v11506_v31 = vrot.slane %v1866_v0, 5  ;;  %v1872_v58 = vrot.slane %v1870_v22, 4  ;;  %v1890_v14 = vshll.u32 %v1662_v38, 16  ;;  %v1604_v54 = vld [vmem:[#allocation2 + $0xb8] sm:$0xf]  ;;  %v1821_v2 = vsel %vm10820_vm8, %v1816_v39, %v11486_v53 }
 0x12a   : > { %v1830_v43 = vrot.slane %v1828_v44, 5  ;;  %v1894_v11 = vshrl.u32 %v1662_v38, 16  ;;  %v1664_v4 = vld [vmem:[#allocation2 + $0x6c] sm:$0xf]  ;;  %v1667_v62 = vld [vmem:[#allocation2 + $0x78] sm:$0xf]  ;;  %v1863_v50 = vor.u32 %v1862_v46, %v1859_v29 }
 0x12b   : > { %2086 = vrot.lane.b32.xlu1 %v1783_v27, %s10627_s22  ;;  %1636 = vst.msk [vmem:[#allocation3 + $0x7c] sm:$0xf] %vm280_vm5, %v1604_v54  ;;  %v1826_v25 = vrot.slane %v1825_v16, 4  ;;  %v1840_v63 = vrot.slane %v1839_v57, 4  ;;  %v1854_v5 = vrot.slane %v1852_v56, 5  ;;  %v1876_v10 = vshll.u32 %v1660_v41, 16 }
 0x12c   : > { %v1665_v55 = vld [vmem:[#allocation2 + $0x70] sm:$0xf]  ;;  %v1850_v37 = vrot.slane %v1849_v7, 4  ;;  %v1883_v40 = vrot.slane %v1881_v28, 4  ;;  %v1886_v8 = vrot.slane %v1884_v51, 5  ;;  %v1873_v9 = vor.u32 %v1872_v58, %v11506_v31 }
 0x12d   : > { %2088 = vrot.lane.b32.xlu0 %v1797_v12, %s10627_s22  ;;  %v11517_v53 = vrot.slane %v1890_v14, 5  ;;  %v1905_v21 = vshrl.u32 %v1664_v4, 16  ;;  %v1908_v6 = vshll.u32 %v1664_v4, 16  ;;  %v1663_v27 = vld [vmem:[#allocation2 + $0x68] sm:$0x1]  ;;  %v1896_v32 = vrot.slane %v1894_v11, 4 }
 0x12e   : > { %v1914_v0 = vshll.u32 %v1665_v55, 16  ;;  %v1918_v22 = vshrl.u32 %v1665_v55, 16  ;;  %v1929_v42 = vshrl.u32 %v1667_v62, 16  ;;  %v1831_v23 = vsel %vm10820_vm8, %v1826_v25, %v1830_v43  ;;  %v1668_v56 = vld [vmem:[#allocation2 + $0x7c] sm:$0xf] }
 0x12f   : > { %2090 = vrot.lane.b32.xlu1 %v1807_v15, %s10627_s22  ;;  %v1845_v1 = vsel %vm10820_vm8, %v1840_v63, %v11492_v30  ;;  %v1932_v39 = vshll.u32 %v1667_v62, 16  ;;  %v1855_v44 = vsel %vm10820_vm8, %v1850_v37, %v1854_v5  ;;  %v1864_v38 = vrot.slane %v1863_v50, 4  ;;  %v1670_v29 = vld [vmem:[#allocation2 + $0x84] sm:$0xf]  ;;  %v1671_v28 = vld [vmem:[#allocation2 + $0x88] sm:$0xf] }
 0x130   : > { %v1878_v16 = vrot.slane %v1876_v10, 5  ;;  %v1887_v57 = vor.u32 %v1886_v8, %v1883_v40  ;;  %v1874_v59 = vrot.slane %v1873_v9, 4  ;;  %v1900_v7 = vshll.u32 %v1663_v27, 16  ;;  %v1666_v14 = vld [vmem:[#allocation2 + $0x74] sm:$0x1] }
 0x131   : > { %2092 = vrot.lane.b32.xlu0 %v1821_v2, %s10627_s22  ;;  %v1907_v46 = vrot.slane %v1905_v21, 4  ;;  %v1910_v41 = vrot.slane %v1908_v6, 5  ;;  %v1897_v30 = vor.u32 %v1896_v32, %v11517_v53  ;;  %v1916_v51 = vrot.slane %v1914_v0, 5  ;;  %v1673_v37 = vld [vmem:[#allocation2 + $0x90] sm:$0xf] }
 0x132   : > { %v1920_v12 = vrot.slane %v1918_v22, 4  ;;  %v1931_v58 = vrot.slane %v1929_v42, 4  ;;  %v1934_v54 = vrot.slane %v1932_v39, 5  ;;  %v1938_v15 = vshll.u32 %v1668_v56, 16  ;;  %v1674_v21 = vld [vmem:[#allocation2 + $0x94] sm:$0xf] }
 0x133   : > { %2094 = vrot.lane.b32.xlu1 %v1831_v23, %s10627_s22  ;;  %v1942_v2 = vshrl.u32 %v1668_v56, 16  ;;  %v1953_v43 = vshrl.u32 %v1670_v29, 16  ;;  %v1888_v11 = vrot.slane %v1887_v57, 4  ;;  %v1956_v4 = vshll.u32 %v1670_v29, 16  ;;  %v1669_v32 = vld [vmem:[#allocation2 + $0x80] sm:$0x1] }
 0x134   : > { %v1962_v62 = vshll.u32 %v1671_v28, 16  ;;  %v1966_v25 = vshrl.u32 %v1671_v28, 16  ;;  %v1869_v63 = vsel %vm10820_vm8, %v1864_v38, %v11506_v31  ;;  %v1879_v5 = vsel %vm10820_vm8, %v1874_v59, %v1878_v16  ;;  %v1676_v59 = vld [vmem:[#allocation2 + $0x9c] sm:$0xf] }
 0x135   : > { %2096 = vrot.lane.b32.xlu0 %v1845_v1, %s10627_s22  ;;  %v1902_v10 = vrot.slane %v1900_v7, 5  ;;  %v1911_v55 = vor.u32 %v1910_v41, %v1907_v46  ;;  %v1893_v50 = vsel %vm10820_vm8, %v1888_v11, %v11517_v53  ;;  %v1898_v40 = vrot.slane %v1897_v30, 4  ;;  %v1677_v30 = vld [vmem:[#allocation2 + $0xa0] sm:$0xf] }
 0x136   : > { %v1921_v8 = vor.u32 %v1920_v12, %v1916_v51  ;;  %v1924_v9 = vshll.u32 %v1666_v14, 16  ;;  %v1935_v6 = vor.u32 %v1934_v54, %v1931_v58  ;;  %v1940_v27 = vrot.slane %v1938_v15, 5 }
 0x137   : > { %2098 = vrot.lane.b32.xlu1 %v1855_v44, %s10627_s22  ;;  %v1944_v31 = vrot.slane %v1942_v2, 4  ;;  %v1955_v0 = vrot.slane %v1953_v43, 4  ;;  %v1958_v22 = vrot.slane %v1956_v4, 5  ;;  %v11540_v42 = vrot.slane %v1962_v62, 5  ;;  %v1672_v44 = vld [vmem:[#allocation2 + $0x8c] sm:$0x1] }
 0x138   : > { %v1968_v23 = vrot.slane %v1966_v25, 4  ;;  %v1977_v1 = vshrl.u32 %v1673_v37, 16  ;;  %v1912_v39 = vrot.slane %v1911_v55, 4  ;;  %v1980_v38 = vshll.u32 %v1673_v37, 16  ;;  %v1675_v43 = vld [vmem:[#allocation2 + $0x98] sm:$0x1] }
 0x139   : > { %2100 = vrot.lane.b32.xlu0 %v1869_v63, %s10627_s22  ;;  %v1986_v53 = vshll.u32 %v1674_v21, 16  ;;  %v1990_v16 = vshrl.u32 %v1674_v21, 16  ;;  %v1903_v57 = vsel %vm10820_vm8, %v1898_v40, %v1902_v10  ;;  %v1926_v56 = vrot.slane %v1924_v9, 5  ;;  %v1679_v55 = vld [vmem:[#allocation2 + $0xa8] sm:$0xf]  ;;  %v2075_v21 = vpop.permute.xlu1 %2074 }
 0x13a   : > { %v1948_v29 = vshll.u32 %v1669_v32, 16  ;;  %v1917_v7 = vsel %vm10820_vm8, %v1912_v39, %v1916_v51  ;;  %v1922_v46 = vrot.slane %v1921_v8, 4  ;;  %v1936_v41 = vrot.slane %v1935_v6, 4  ;;  %v1680_v9 = vld [vmem:[#allocation2 + $0xac] sm:$0xf] }
 0x13b   : > { %2102 = vrot.lane.b32.xlu1 %v1879_v5, %s10627_s22  ;;  %v1945_v28 = vor.u32 %v1944_v31, %v1940_v27  ;;  %v1959_v12 = vor.u32 %v1958_v22, %v1955_v0  ;;  %v1969_v58 = vor.u32 %v1968_v23, %v11540_v42  ;;  %v1972_v14 = vshll.u32 %v1672_v44, 16  ;;  %v2073_v44 = vpop.permute.xlu0 %2072  ;;  %2170 = vst.msk [vmem:[#allocation3 + $0x4] sm:$0xf] %vm2168_vm15, %v2075_v21 }
 0x13c   : > { %v1979_v54 = vrot.slane %v1977_v1, 4  ;;  %v1982_v15 = vrot.slane %v1980_v38, 5  ;;  %v11550_v2 = vrot.slane %v1986_v53, 5  ;;  %v1992_v11 = vrot.slane %v1990_v16, 4  ;;  %2169 = vst.msk [vmem:[#allocation3] sm:$0xf] %vm2168_vm15, %v2073_v44 }
 0x13d   : > { %2104 = vrot.lane.b32.xlu0 %v1893_v50, %s10627_s22  ;;  %v2001_v4 = vshrl.u32 %v1676_v59, 16  ;;  %v2004_v51 = vshll.u32 %v1676_v59, 16  ;;  %v2010_v62 = vshll.u32 %v1677_v30, 16  ;;  %v2014_v25 = vshrl.u32 %v1677_v30, 16  ;;  %v1682_v59 = vld [vmem:[#allocation2 + $0xb4] sm:$0xf] }
 0x13e   : > { %v1927_v63 = vsel %vm10820_vm8, %v1922_v46, %v1926_v56  ;;  %v1941_v5 = vsel %vm10820_vm8, %v1936_v41, %v1940_v27  ;;  %v1950_v10 = vrot.slane %v1948_v29, 5  ;;  %v1946_v37 = vrot.slane %v1945_v28, 4  ;;  %v1678_v27 = vld [vmem:[#allocation2 + $0xa4] sm:$0x1]  ;;  %v1683_v30 = vld [vmem:[#allocation2 + $0xb8] sm:$0xf] }
 0x13f   : > { %2106 = vrot.lane.b32.xlu1 %v1903_v57, %s10627_s22  ;;  %v1960_v50 = vrot.slane %v1959_v12, 4  ;;  %v1974_v40 = vrot.slane %v1972_v14, 5  ;;  %v1996_v8 = vshll.u32 %v1675_v43, 16  ;;  %v1970_v6 = vrot.slane %v1969_v58, 4 }
 0x140   : > { %v1983_v32 = vor.u32 %v1982_v15, %v1979_v54  ;;  %v1993_v31 = vor.u32 %v1992_v11, %v11550_v2  ;;  %v2003_v0 = vrot.slane %v2001_v4, 4  ;;  %v2006_v22 = vrot.slane %v2004_v51, 5  ;;  %v2415_v54 = vpop.permute.xlu1 %2414  ;;  %v1681_v4 = vld [vmem:[#allocation2 + $0xb0] sm:$0x1] }
 0x141   : > { %2108 = vrot.lane.b32.xlu0 %v1917_v7, %s10627_s22  ;;  %v2012_v23 = vrot.slane %v2010_v62, 5  ;;  %v2016_v1 = vrot.slane %v2014_v25, 4  ;;  %v2025_v39 = vshrl.u32 %v1679_v55, 16  ;;  %v2028_v38 = vshll.u32 %v1679_v55, 16  ;;  %2510 = vst.msk [vmem:[#allocation3 + $0x4] sm:$0xf] %vm2508_vm0, %v2415_v54 }
 0x142   : > { %v2034_v53 = vshll.u32 %v1680_v9, 16  ;;  %v1951_v16 = vsel %vm10820_vm8, %v1946_v37, %v1950_v10  ;;  %v1965_v57 = vsel %vm10820_vm8, %v1960_v50, %v11540_v42  ;;  %v1998_v56 = vrot.slane %v1996_v8, 5 }
 0x143   : > { %2110 = vrot.lane.b32.xlu1 %v1927_v63, %s10627_s22  ;;  %v2038_v29 = vshrl.u32 %v1680_v9, 16  ;;  %v1975_v7 = vsel %vm10820_vm8, %v1970_v6, %v1974_v40  ;;  %v1984_v46 = vrot.slane %v1983_v32, 4  ;;  %v1994_v41 = vrot.slane %v1993_v31, 4  ;;  %v2413_v63 = vpop.permute.xlu0 %2412 }
 0x144   : > { %v2020_v28 = vshll.u32 %v1678_v27, 16  ;;  %v2007_v12 = vor.u32 %v2006_v22, %v2003_v0  ;;  %v2017_v58 = vor.u32 %v2016_v1, %v2012_v23  ;;  %v2027_v14 = vrot.slane %v2025_v39, 4  ;;  %2509 = vst.msk [vmem:[#allocation3] sm:$0xf] %vm2508_vm0, %v2413_v63  ;;  %v1684_v0 = vld [vmem:[#allocation2 + $0xbc] sm:$0x1] }
 0x145   : > { %2112 = vrot.lane.b32.xlu0 %v1941_v5, %s10627_s22  ;;  %v2030_v42 = vrot.slane %v2028_v38, 5  ;;  %v2036_v15 = vrot.slane %v2034_v53, 5  ;;  %v2049_v43 = vshrl.u32 %v1682_v59, 16  ;;  %v2052_v11 = vshll.u32 %v1682_v59, 16 }
 0x146   : > { %v2040_v51 = vrot.slane %v2038_v29, 4  ;;  %v2058_v62 = vshll.u32 %v1683_v30, 16  ;;  %v2062_v25 = vshrl.u32 %v1683_v30, 16  ;;  %v1989_v5 = vsel %vm10820_vm8, %v1984_v46, %v11550_v2  ;;  %v2232_v30 = vld [vmem:[#allocation2 + $0x7c] sm:$0xf] }
 0x147   : > { %2114 = vrot.lane.b32.xlu1 %v1951_v16, %s10627_s22  ;;  %v1999_v10 = vsel %vm10820_vm8, %v1994_v41, %v1998_v56  ;;  %v2008_v55 = vrot.slane %v2007_v12, 4  ;;  %v2022_v37 = vrot.slane %v2020_v28, 5  ;;  %v2031_v50 = vor.u32 %v2030_v42, %v2027_v14  ;;  %v2230_v28 = vld [vmem:[#allocation2 + $0x74] sm:$0x1]  ;;  %v2231_v42 = vld [vmem:[#allocation2 + $0x78] sm:$0xe] }
 0x148   : > { %v2044_v40 = vshll.u32 %v1681_v4, 16  ;;  %v2051_v8 = vrot.slane %v2049_v43, 4  ;;  %v2054_v9 = vrot.slane %v2052_v11, 5  ;;  %v2018_v21 = vrot.slane %v2017_v58, 4  ;;  %v2233_v11 = vld [vmem:[#allocation2 + $0x80] sm:$0x1] }
 0x149   : > { %2116 = vrot.lane.b32.xlu0 %v1965_v57, %s10627_s22  ;;  %v2041_v6 = vor.u32 %v2040_v51, %v2036_v15  ;;  %v2060_v32 = vrot.slane %v2058_v62, 5  ;;  %v2064_v31 = vrot.slane %v2062_v25, 4  ;;  %v2013_v2 = vsel %vm10820_vm8, %v2008_v55, %v2012_v23  ;;  %v2229_v57 = vld [vmem:[#allocation2 + $0x70] sm:$0xf]  ;;  %v2235_v4 = vld [vmem:[#allocation2 + $0x88] sm:$0xf] }
 0x14a   : > { %v2032_v22 = vrot.slane %v2031_v50, 4  ;;  %v2046_v27 = vrot.slane %v2044_v40, 5  ;;  %v2055_v1 = vor.u32 %v2054_v9, %v2051_v8  ;;  %v2023_v39 = vsel %vm10820_vm8, %v2018_v21, %v2022_v37  ;;  %v2236_v37 = vld [vmem:[#allocation2 + $0x8c] sm:$0x1]  ;;  %v2238_v50 = vld [vmem:[#allocation2 + $0x94] sm:$0xf] }
 0x14b   : > { %2118 = vrot.lane.b32.xlu1 %v1975_v7, %s10627_s22  ;;  %v2042_v44 = vrot.slane %v2041_v6, 4  ;;  %v2065_v38 = vor.u32 %v2064_v31, %v2060_v32  ;;  %v2068_v53 = vshll.u32 %v1684_v0, 16  ;;  %v2228_v7 = vld [vmem:[#allocation2 + $0x6c] sm:$0xe]  ;;  %v2365_v46 = vrot.slane %v2229_v57, 5 }
 0x14c   : > { %v2037_v16 = vsel %vm10820_vm8, %v2032_v22, %v2036_v15  ;;  %v2056_v23 = vrot.slane %v2055_v1, 4  ;;  %v10146_v12 = vrot.slane %v2228_v7, 9  ;;  %v2368_v54 = vrot.slane %v2230_v28, 5  ;;  %v2237_v6 = vld [vmem:[#allocation2 + $0x90] sm:$0xe] }
 0x14d   : > { %2120 = vrot.lane.b32.xlu0 %v1989_v5, %s10627_s22  ;;  %v2047_v56 = vsel %vm10820_vm8, %v2042_v44, %v2046_v27  ;;  %v2066_v29 = vrot.slane %v2065_v38, 4  ;;  %v2070_v59 = vrot.slane %v2068_v53, 5  ;;  %v2367_v14 = vrot.slane %v2365_v46, 4  ;;  %v2234_v5 = vld [vmem:[#allocation2 + $0x84] sm:$0xe] }
 0x14e   : > { %v2061_v41 = vsel %vm10820_vm8, %v2056_v23, %v2060_v32  ;;  %v2372_v15 = vrot.slane %v2232_v30, 5  ;;  %v2366_v43 = vsel %vm10827_vm11, %v10146_v12, %v2365_v46  ;;  %v10147_v51 = vrot.slane %v2231_v42, 9  ;;  %v2241_v0 = vld [vmem:[#allocation2 + $0xa0] sm:$0xf]  ;;  %v2240_v44 = vld [vmem:[#allocation2 + $0x9c] sm:$0xe] }
 0x14f   : > { %2122 = vrot.lane.b32.xlu1 %v1999_v10, %s10627_s22  ;;  %v2071_v58 = vsel %vm10820_vm8, %v2066_v29, %v2070_v59  ;;  %v2369_v62 = vsel %vm10827_vm11, %v2367_v14, %v2368_v54  ;;  %v2375_v63 = vrot.slane %v2233_v11, 5  ;;  %v2379_v10 = vrot.slane %v2235_v4, 5  ;;  %v2244_v57 = vld [vmem:[#allocation2 + $0xac] sm:$0xf]  ;;  %v2243_v7 = vld [vmem:[#allocation2 + $0xa8] sm:$0xe] }
 0x150   : > { %v2374_v25 = vrot.slane %v2372_v15, 4  ;;  %v2373_v55 = vsel %vm10827_vm11, %v10147_v51, %v2372_v15  ;;  %v10148_v40 = vrot.slane %v2234_v5, 9  ;;  %v2382_v21 = vrot.slane %v2236_v37, 5  ;;  %v2245_v28 = vld [vmem:[#allocation2 + $0xb0] sm:$0x1] }
 0x151   : > { %2124 = vrot.lane.b32.xlu0 %v2013_v2, %s10627_s22  ;;  %v2381_v9 = vrot.slane %v2379_v10, 4  ;;  %v2386_v32 = vrot.slane %v2238_v50, 5  ;;  %v2239_v2 = vld [vmem:[#allocation2 + $0x98] sm:$0x1]  ;;  %v10149_v22 = vrot.slane %v2237_v6, 9  ;;  %v2393_v38 = vrot.slane %v2241_v0, 5 }
 0x152   : > { %v2376_v8 = vsel %vm10827_vm11, %v2374_v25, %v2375_v63  ;;  %v2380_v31 = vsel %vm10827_vm11, %v10148_v40, %v2379_v10  ;;  %v10150_v23 = vrot.slane %v2240_v44, 9  ;;  %v2400_v46 = vrot.slane %v2244_v57, 5  ;;  %v2247_v30 = vld [vmem:[#allocation2 + $0xb8] sm:$0xf]  ;;  %v2246_v42 = vld [vmem:[#allocation2 + $0xb4] sm:$0xe] }
 0x153   : > { %2126 = vrot.lane.b32.xlu1 %v2023_v39, %s10627_s22  ;;  %v2383_v27 = vsel %vm10827_vm11, %v2381_v9, %v2382_v21  ;;  %v2388_v1 = vrot.slane %v2386_v32, 4  ;;  %v2389_v39 = vrot.slane %v2239_v2, 5  ;;  %v2387_v53 = vsel %vm10827_vm11, %v10149_v22, %v2386_v32  ;;  %v2248_v11 = vld [vmem:[#allocation2 + $0xbc] sm:$0x1]  ;;  %v2541_v50 = vld [vmem:[#allocation2 + $0xc] sm:$0xf] }
 0x154   : > { %v2395_v29 = vrot.slane %v2393_v38, 4  ;;  %v10151_v12 = vrot.slane %v2243_v7, 9  ;;  %v2402_v14 = vrot.slane %v2400_v46, 4  ;;  %v2403_v54 = vrot.slane %v2245_v28, 5  ;;  %v2543_v21 = vld [vmem:[#allocation2 + $0x18] sm:$0xf] }
 0x155   : > { %2128 = vrot.lane.b32.xlu0 %v2037_v16, %s10627_s22  ;;  %v2242_v16 = vld [vmem:[#allocation2 + $0xa4] sm:$0x1]  ;;  %v2407_v15 = vrot.slane %v2247_v30, 5  ;;  %v10152_v4 = vrot.slane %v2246_v42, 9  ;;  %v2410_v63 = vrot.slane %v2248_v11, 5 }
 0x156   : > { %v2396_v59 = vrot.slane %v2242_v16, 5  ;;  %v2404_v51 = vsel %vm10827_vm11, %v2402_v14, %v2403_v54  ;;  %v2544_v32 = vld [vmem:[#allocation2 + $0x1c] sm:$0xf]  ;;  %v2545_v2 = vld [vmem:[#allocation2 + $0x24] sm:$0xf] }
 0x157   : > { %2130 = vrot.lane.b32.xlu1 %v2047_v56, %s10627_s22  ;;  %v2390_v56 = vsel %vm10827_vm11, %v2388_v1, %v2389_v39  ;;  %v2409_v25 = vrot.slane %v2407_v15, 4  ;;  %v2408_v5 = vsel %vm10827_vm11, %v10152_v4, %v2407_v15  ;;  %v2546_v22 = vld [vmem:[#allocation2 + $0x28] sm:$0xf]  ;;  %v2547_v1 = vld [vmem:[#allocation2 + $0x30] sm:$0xf] }
 0x158   : > { %v2548_v44 = vld [vmem:[#allocation2 + $0x34] sm:$0xf]  ;;  %v2550_v57 = vld [vmem:[#allocation2 + $0x40] sm:$0xf]  ;;  %v2554_v28 = vld [vmem:[#allocation2 + $0x58] sm:$0xf] }
 0x159   : > { %2132 = vrot.lane.b32.xlu0 %v2061_v41, %s10627_s22  ;;  %v2394_v41 = vsel %vm10827_vm11, %v10150_v23, %v2393_v38  ;;  %v2556_v14 = vld [vmem:[#allocation2 + $0x64] sm:$0xf]  ;;  %v2557_v42 = vld [vmem:[#allocation2 + $0x6c] sm:$0xf]  ;;  %v2559_v4 = vld [vmem:[#allocation2 + $0x78] sm:$0xf] }
 0x15b   : > { %2134 = vrot.lane.b32.xlu1 %v2071_v58, %s10627_s22  ;;  %v2397_v58 = vsel %vm10827_vm11, %v2395_v29, %v2396_v59  ;;  %v2552_v59 = vld [vmem:[#allocation2 + $0x4c] sm:$0xf] }
 0x15d   : > { %2448 = vrot.lane.b32.xlu0 %v2366_v43, %s10628_s23  ;;  %v2401_v43 = vsel %vm10827_vm11, %v10151_v12, %v2400_v46  ;;  %v2553_v46 = vld [vmem:[#allocation2 + $0x54] sm:$0xf]  ;;  %v2555_v12 = vld [vmem:[#allocation2 + $0x60] sm:$0xf] }
 0x15f   : > { %2450 = vrot.lane.b32.xlu1 %v2369_v62, %s10628_s23 }
 0x161   : > { %2452 = vrot.lane.b32.xlu0 %v2373_v55, %s10628_s23  ;;  %v2411_v55 = vsel %vm10827_vm11, %v2409_v25, %v2410_v63  ;;  %v2561_v63 = vld [vmem:[#allocation2 + $0x84] sm:$0xf] }
 0x163   : > { %2454 = vrot.lane.b32.xlu1 %v2376_v8, %s10628_s23  ;;  %v2542_v8 = vld [vmem:[#allocation2 + $0x10] sm:$0xf] }
 0x165   : > { %2456 = vrot.lane.b32.xlu0 %v2380_v31, %s10628_s23 }
 0x167   : > { %2458 = vrot.lane.b32.xlu1 %v2383_v27, %s10628_s23 }
 0x169   : > { %2460 = vrot.lane.b32.xlu0 %v2387_v53, %s10628_s23  ;;  %v2549_v53 = vld [vmem:[#allocation2 + $0x3c] sm:$0xf] }
 0x16b   : > { %2462 = vrot.lane.b32.xlu1 %v2390_v56, %s10628_s23  ;;  %v2551_v56 = vld [vmem:[#allocation2 + $0x48] sm:$0xf] }
 0x16d   : > { %2464 = vrot.lane.b32.xlu0 %v2394_v41, %s10628_s23 }
 0x16f   : > { %2466 = vrot.lane.b32.xlu1 %v2397_v58, %s10628_s23 }
 0x171   : > { %2468 = vrot.lane.b32.xlu0 %v2401_v43, %s10628_s23  ;;  %v2558_v43 = vld [vmem:[#allocation2 + $0x70] sm:$0xf] }
 0x173   : > { %v2417_v62 = vpop.permute.xlu0 %2416  ;;  %2470 = vrot.lane.b32.xlu1 %v2404_v51, %s10628_s23 }
 0x175   : > { %2472 = vrot.lane.b32.xlu0 %v2408_v5, %s10628_s23  ;;  %v2419_v10 = vpop.permute.xlu1 %2418 }
 0x177   : > { %v2421_v37 = vpop.permute.xlu0 %2420  ;;  %2474 = vrot.lane.b32.xlu1 %v2411_v55, %s10628_s23 }
 0x179   : > { %2605 = vrot.lane.b32.xlu0 %v2541_v50, %s10631_s27  ;;  %v2423_v40 = vpop.permute.xlu1 %2422  ;;  %v2734_v50 = vld [vmem:[#allocation2 + $0xc] sm:$0xf] }
 0x17b   : > { %v2425_v9 = vpop.permute.xlu0 %2424  ;;  %2607 = vrot.lane.b32.xlu1 %v2542_v8, %s10631_s27  ;;  %v2564_v8 = vld [vmem:[#allocation2 + $0x94] sm:$0xf] }
 0x17d   : > { %2609 = vrot.lane.b32.xlu0 %v2543_v21, %s10631_s27  ;;  %v2427_v6 = vpop.permute.xlu1 %2426  ;;  %v2735_v21 = vld [vmem:[#allocation2 + $0x10] sm:$0xf] }
 0x17f   : > { %v11644_v31 = vpop.permute.xlu0 %2428  ;;  %2611 = vrot.lane.b32.xlu1 %v2544_v32, %s10631_s27  ;;  %v2786_v32 = vshll.u32 %v2734_v50, 16 }
 0x181   : > { %2613 = vrot.lane.b32.xlu0 %v2545_v2, %s10631_s27  ;;  %v11648_v0 = vpop.permute.xlu1 %2430  ;;  %v2738_v2 = vld [vmem:[#allocation2 + $0x1c] sm:$0xf] }
 0x183   : > { %v11650_v27 = vpop.permute.xlu0 %2432  ;;  %2615 = vrot.lane.b32.xlu1 %v2546_v22, %s10631_s27  ;;  %v2792_v22 = vshll.u32 %v2735_v21, 16 }
 0x185   : > { %2617 = vrot.lane.b32.xlu0 %v2547_v1, %s10631_s27  ;;  %v11654_v39 = vpop.permute.xlu1 %2434  ;;  %v2566_v1 = vld [vmem:[#allocation2 + $0xa0] sm:$0xf] }
 0x187   : > { %v11656_v38 = vpop.permute.xlu0 %2436  ;;  %2619 = vrot.lane.b32.xlu1 %v2548_v44, %s10631_s27 }
 0x189   : > { %2621 = vrot.lane.b32.xlu0 %v2549_v53, %s10631_s27  ;;  %v11660_v16 = vpop.permute.xlu1 %2438 }
 0x18b   : > { %v11662_v23 = vpop.permute.xlu0 %2440  ;;  %2623 = vrot.lane.b32.xlu1 %v2550_v57, %s10631_s27  ;;  %v2796_v57 = vshrl.u32 %v2735_v21, 16  ;;  %v2570_v21 = vld [vmem:[#allocation2 + $0xb8] sm:$0xf] }
 0x18d   : > { %2625 = vrot.lane.b32.xlu0 %v2551_v56, %s10631_s27  ;;  %v11666_v29 = vpop.permute.xlu1 %2442  ;;  %v2816_v56 = vshll.u32 %v2738_v2, 16 }
 0x18f   : > { %v11668_v7 = vpop.permute.xlu0 %2444  ;;  %2627 = vrot.lane.b32.xlu1 %v2552_v59, %s10631_s27  ;;  %v2820_v59 = vshrl.u32 %v2738_v2, 16 }
 0x191   : > { %2629 = vrot.lane.b32.xlu0 %v2553_v46, %s10631_s27  ;;  %v11672_v41 = vpop.permute.xlu1 %2446  ;;  %v2740_v46 = vld [vmem:[#allocation2 + $0x24] sm:$0xf] }
 0x193   : > { %v2077_v30 = vpop.permute.xlu0 %2076  ;;  %2631 = vrot.lane.b32.xlu1 %v2554_v28, %s10631_s27  ;;  %v2741_v28 = vld [vmem:[#allocation2 + $0x28] sm:$0xf] }
 0x194   : > { %2171 = vst.msk [vmem:[#allocation3 + $0x8] sm:$0xf] %vm2168_vm15, %v2077_v30 }
 0x195   : > { %2511 = vst.msk [vmem:[#allocation3 + $0x8] sm:$0xf] %vm2508_vm0, %v2417_v62  ;;  %2633 = vrot.lane.b32.xlu0 %v2555_v12, %s10631_s27  ;;  %v2079_v58 = vpop.permute.xlu1 %2078  ;;  %v2560_v62 = vld [vmem:[#allocation2 + $0x7c] sm:$0xf]  ;;  %v2569_v12 = vld [vmem:[#allocation2 + $0xb4] sm:$0xf] }
 0x196   : > { %2172 = vst.msk [vmem:[#allocation3 + $0xc] sm:$0xf] %vm2168_vm15, %v2079_v58  ;;  %v11721_v58 = vrot.slane %v2792_v22, 5 }
 0x197   : > { %v2081_v54 = vpop.permute.xlu0 %2080  ;;  %2512 = vst.msk [vmem:[#allocation3 + $0xc] sm:$0xf] %vm2508_vm0, %v2419_v10  ;;  %2635 = vrot.lane.b32.xlu1 %v2556_v14, %s10631_s27  ;;  %v2562_v10 = vld [vmem:[#allocation2 + $0x88] sm:$0xf] }
 0x198   : > { %2173 = vst.msk [vmem:[#allocation3 + $0x10] sm:$0xf] %vm2168_vm15, %v2081_v54 }
 0x199   : > { %2513 = vst.msk [vmem:[#allocation3 + $0x10] sm:$0xf] %vm2508_vm0, %v2421_v37  ;;  %2637 = vrot.lane.b32.xlu0 %v2557_v42, %s10631_s27  ;;  %v2083_v15 = vpop.permute.xlu1 %2082  ;;  %v2563_v37 = vld [vmem:[#allocation2 + $0x90] sm:$0xf]  ;;  %v2568_v42 = vld [vmem:[#allocation2 + $0xac] sm:$0xf] }
 0x19a   : > { %2174 = vst.msk [vmem:[#allocation3 + $0x14] sm:$0xf] %vm2168_vm15, %v2083_v15 }
 0x19b   : > { %v2085_v11 = vpop.permute.xlu0 %2084  ;;  %2514 = vst.msk [vmem:[#allocation3 + $0x14] sm:$0xf] %vm2508_vm0, %v2423_v40  ;;  %2639 = vrot.lane.b32.xlu1 %v2558_v43, %s10631_s27 }
 0x19c   : > { %2175 = vst.msk [vmem:[#allocation3 + $0x18] sm:$0xf] %vm2168_vm15, %v2085_v11  ;;  %v2798_v11 = vrot.slane %v2796_v57, 4 }
 0x19d   : > { %2515 = vst.msk [vmem:[#allocation3 + $0x18] sm:$0xf] %vm2508_vm0, %v2425_v9  ;;  %2641 = vrot.lane.b32.xlu0 %v2559_v4, %s10631_s27  ;;  %v2087_v51 = vpop.permute.xlu1 %2086  ;;  %v11724_v4 = vrot.slane %v2816_v56, 5 }
 0x19e   : > { %2176 = vst.msk [vmem:[#allocation3 + $0x1c] sm:$0xf] %vm2168_vm15, %v2087_v51  ;;  %v2831_v51 = vshrl.u32 %v2740_v46, 16 }
 0x19f   : > { %v2089_v25 = vpop.permute.xlu0 %2088  ;;  %2516 = vst.msk [vmem:[#allocation3 + $0x1c] sm:$0xf] %vm2508_vm0, %v2427_v6  ;;  %2643 = vrot.lane.b32.xlu1 %v2560_v62, %s10631_s27  ;;  %v2783_v6 = vshrl.u32 %v2734_v50, 16  ;;  %v2822_v62 = vrot.slane %v2820_v59, 4 }
 0x1a0   : > { %2177 = vst.msk [vmem:[#allocation3 + $0x20] sm:$0xf] %vm2168_vm15, %v2089_v25  ;;  %v2834_v25 = vshll.u32 %v2740_v46, 16 }
 0x1a1   : > { %2517 = vst.msk [vmem:[#allocation3 + $0x20] sm:$0xf] %vm2508_vm0, %v11644_v31  ;;  %2645 = vrot.lane.b32.xlu0 %v2561_v63, %s10631_s27  ;;  %v2091_v5 = vpop.permute.xlu1 %2090  ;;  %v2565_v31 = vld [vmem:[#allocation2 + $0x9c] sm:$0xf]  ;;  %v2785_v53 = vrot.slane %v2783_v6, 4  ;;  %v2840_v63 = vshll.u32 %v2741_v28, 16  ;;  %v2823_v22 = vor.u32 %v2822_v62, %v11724_v4 }
 0x1a2   : > { %2178 = vst.msk [vmem:[#allocation3 + $0x24] sm:$0xf] %vm2168_vm15, %v2091_v5  ;;  %v2844_v5 = vshrl.u32 %v2741_v28, 16  ;;  %v2749_v62 = vld [vmem:[#allocation2 + $0x48] sm:$0xf] }
 0x1a3   : > { %v2093_v55 = vpop.permute.xlu0 %2092  ;;  %2518 = vst.msk [vmem:[#allocation3 + $0x24] sm:$0xf] %vm2508_vm0, %v11648_v0  ;;  %2647 = vrot.lane.b32.xlu1 %v2562_v10, %s10631_s27  ;;  %v2746_v10 = vld [vmem:[#allocation2 + $0x3c] sm:$0xf] }
 0x1a4   : > { %2179 = vst.msk [vmem:[#allocation3 + $0x28] sm:$0xf] %vm2168_vm15, %v2093_v55  ;;  %v2879_v56 = vshrl.u32 %v2746_v10, 16 }
 0x1a5   : > { %2519 = vst.msk [vmem:[#allocation3 + $0x28] sm:$0xf] %vm2508_vm0, %v11650_v27  ;;  %2649 = vrot.lane.b32.xlu0 %v2563_v37, %s10631_s27  ;;  %v2095_v40 = vpop.permute.xlu1 %2094  ;;  %v2737_v27 = vld [vmem:[#allocation2 + $0x18] sm:$0xf]  ;;  %v2571_v37 = vld [vmem:[#allocation2 + $0xc0] sm:$0xf] }
 0x1a6   : > { %2180 = vst.msk [vmem:[#allocation3 + $0x2c] sm:$0xf] %vm2168_vm15, %v2095_v40  ;;  %v2807_v14 = vshrl.u32 %v2737_v27, 16  ;;  %v2810_v54 = vshll.u32 %v2737_v27, 16  ;;  %v2836_v27 = vrot.slane %v2834_v25, 5 }
 0x1a7   : > { %v2097_v9 = vpop.permute.xlu0 %2096  ;;  %2520 = vst.msk [vmem:[#allocation3 + $0x2c] sm:$0xf] %vm2508_vm0, %v11654_v39  ;;  %2651 = vrot.lane.b32.xlu1 %v2564_v8, %s10631_s27  ;;  %v2788_v39 = vrot.slane %v2786_v32, 5 }
 0x1a8   : > { %2181 = vst.msk [vmem:[#allocation3 + $0x30] sm:$0xf] %vm2168_vm15, %v2097_v9  ;;  %v2809_v50 = vrot.slane %v2807_v14, 4  ;;  %v2812_v40 = vrot.slane %v2810_v54, 5 }
 0x1a9   : > { %2521 = vst.msk [vmem:[#allocation3 + $0x30] sm:$0xf] %vm2508_vm0, %v11656_v38  ;;  %2653 = vrot.lane.b32.xlu0 %v2565_v31, %s10631_s27  ;;  %v2099_v0 = vpop.permute.xlu1 %2098  ;;  %v2567_v38 = vld [vmem:[#allocation2 + $0xa8] sm:$0xf]  ;;  %v2789_v43 = vor.u32 %v2788_v39, %v2785_v53  ;;  %v2799_v31 = vor.u32 %v2798_v11, %v11721_v58  ;;  %v2742_v53 = vld [vmem:[#allocation2 + $0x2c] sm:$0x1] }
 0x1aa   : > { %2182 = vst.msk [vmem:[#allocation3 + $0x34] sm:$0xf] %vm2168_vm15, %v2099_v0  ;;  %v11735_v0 = vrot.slane %v2831_v51, 4  ;;  %v2813_v46 = vor.u32 %v2812_v40, %v2809_v50 }
 0x1ab   : > { %v2101_v44 = vpop.permute.xlu0 %2100  ;;  %2522 = vst.msk [vmem:[#allocation3 + $0x34] sm:$0xf] %vm2508_vm0, %v11660_v16  ;;  %2655 = vrot.lane.b32.xlu1 %v2566_v1, %s10631_s27  ;;  %v2743_v16 = vld [vmem:[#allocation2 + $0x30] sm:$0xf]  ;;  %v2790_v32 = vrot.slane %v2789_v43, 4  ;;  %v11742_v1 = vrot.slane %v2840_v63, 5 }
 0x1ac   : > { %2183 = vst.msk [vmem:[#allocation3 + $0x38] sm:$0xf] %vm2168_vm15, %v2101_v44  ;;  %v2855_v8 = vshrl.u32 %v2743_v16, 16  ;;  %v2858_v9 = vshll.u32 %v2743_v16, 16  ;;  %v2846_v44 = vrot.slane %v2844_v5, 4  ;;  %v2800_v54 = vrot.slane %v2799_v31, 4 }
 0x1ad   : > { %2523 = vst.msk [vmem:[#allocation3 + $0x38] sm:$0xf] %vm2508_vm0, %v11662_v23  ;;  %2657 = vrot.lane.b32.xlu0 %v2567_v38, %s10631_s27  ;;  %v2103_v30 = vpop.permute.xlu1 %2102  ;;  %v2736_v23 = vld [vmem:[#allocation2 + $0x14] sm:$0x1]  ;;  %v2882_v38 = vshll.u32 %v2746_v10, 16  ;;  %v2795_v14 = vsel %vm10820_vm8, %v2790_v32, %v11721_v58  ;;  %v2824_v43 = vrot.slane %v2823_v22, 4  ;;  %v2837_v11 = vor.u32 %v2836_v27, %v11735_v0 }
 0x1ae   : > { %2184 = vst.msk [vmem:[#allocation3 + $0x3c] sm:$0xf] %vm2168_vm15, %v2103_v30  ;;  %v2802_v2 = vshll.u32 %v2736_v23, 16  ;;  %v2857_v28 = vrot.slane %v2855_v8, 4  ;;  %v2860_v30 = vrot.slane %v2858_v9, 5  ;;  %v2847_v51 = vor.u32 %v2846_v44, %v11742_v1 }
 0x1af   : > { %v2105_v15 = vpop.permute.xlu0 %2104  ;;  %2524 = vst.msk [vmem:[#allocation3 + $0x3c] sm:$0xf] %vm2508_vm0, %v11666_v29  ;;  %2659 = vrot.lane.b32.xlu1 %v2568_v42, %s10631_s27  ;;  %v2744_v29 = vld [vmem:[#allocation2 + $0x34] sm:$0xf]  ;;  %v2850_v23 = vshll.u32 %v2742_v53, 16  ;;  %v2881_v5 = vrot.slane %v2879_v56, 4 }
 0x1b0   : > { %2185 = vst.msk [vmem:[#allocation3 + $0x40] sm:$0xf] %vm2168_vm15, %v2105_v15  ;;  %v2864_v39 = vshll.u32 %v2744_v29, 16  ;;  %v2868_v57 = vshrl.u32 %v2744_v29, 16  ;;  %v2804_v16 = vrot.slane %v2802_v2, 5  ;;  %v2884_v10 = vrot.slane %v2882_v38, 5 }
 0x1b1   : > { %2525 = vst.msk [vmem:[#allocation3 + $0x40] sm:$0xf] %vm2508_vm0, %v11668_v7  ;;  %2661 = vrot.lane.b32.xlu0 %v2569_v12, %s10631_s27  ;;  %v2107_v55 = vpop.permute.xlu1 %2106  ;;  %v2739_v7 = vld [vmem:[#allocation2 + $0x20] sm:$0x1]  ;;  %v2745_v58 = vld [vmem:[#allocation2 + $0x38] sm:$0x1]  ;;  %v2861_v50 = vor.u32 %v2860_v30, %v2857_v28 }
 0x1b2   : > { %2186 = vst.msk [vmem:[#allocation3 + $0x44] sm:$0xf] %vm2168_vm15, %v2107_v55  ;;  %v2826_v42 = vshll.u32 %v2739_v7, 16  ;;  %v2747_v15 = vld [vmem:[#allocation2 + $0x40] sm:$0xf]  ;;  %v11754_v25 = vrot.slane %v2864_v39, 5  ;;  %v2805_v8 = vsel %vm10820_vm8, %v2800_v54, %v2804_v16 }
 0x1b3   : > { %v2109_v6 = vpop.permute.xlu0 %2108  ;;  %2526 = vst.msk [vmem:[#allocation3 + $0x44] sm:$0xf] %vm2508_vm0, %v11672_v41  ;;  %2663 = vrot.lane.b32.xlu1 %v2570_v21, %s10631_s27  ;;  %v2572_v41 = vld [vmem:[#allocation2 + $0xc4] sm:$0xf]  ;;  %v2870_v63 = vrot.slane %v2868_v57, 4  ;;  %v2888_v40 = vshll.u32 %v2747_v15, 16  ;;  %v2885_v57 = vor.u32 %v2884_v10, %v2881_v5 }
 0x1b4   : > { %2187 = vst.msk [vmem:[#allocation3 + $0x48] sm:$0xf] %vm2168_vm15, %v2109_v6  ;;  %v2892_v29 = vshrl.u32 %v2747_v15, 16  ;;  %v2828_v21 = vrot.slane %v2826_v42, 5  ;;  %v2750_v6 = vld [vmem:[#allocation2 + $0x4c] sm:$0xf] }
 0x1b5   : > { %2665 = vrot.lane.b32.xlu0 %v2571_v37, %s10631_s27  ;;  %v2111_v59 = vpop.permute.xlu1 %2110  ;;  %v2814_v37 = vrot.slane %v2813_v46, 4  ;;  %v2903_v32 = vshrl.u32 %v2749_v62, 16  ;;  %v2906_v31 = vshll.u32 %v2749_v62, 16  ;;  %v2848_v0 = vrot.slane %v2847_v51, 4  ;;  %v2753_v27 = vld [vmem:[#allocation2 + $0x58] sm:$0xf] }
 0x1b6   : > { %2188 = vst.msk [vmem:[#allocation3 + $0x4c] sm:$0xf] %vm2168_vm15, %v2111_v59  ;;  %v2852_v7 = vrot.slane %v2850_v23, 5  ;;  %v2874_v22 = vshll.u32 %v2745_v58, 16  ;;  %v2829_v44 = vsel %vm10820_vm8, %v2824_v43, %v2828_v21  ;;  %v2838_v53 = vrot.slane %v2837_v11, 4 }
 0x1b7   : > { %v2113_v12 = vpop.permute.xlu0 %2112  ;;  %2667 = vrot.lane.b32.xlu1 %v2572_v41, %s10631_s27  ;;  %v2819_v2 = vsel %vm10820_vm8, %v2814_v37, %v11724_v4  ;;  %v2871_v39 = vor.u32 %v2870_v63, %v11754_v25  ;;  %v2862_v38 = vrot.slane %v2861_v50, 4  ;;  %v11768_v59 = vrot.slane %v2888_v40, 5  ;;  %v2748_v41 = vld [vmem:[#allocation2 + $0x44] sm:$0x1]  ;;  %v2752_v54 = vld [vmem:[#allocation2 + $0x54] sm:$0xf] }
 0x1b8   : > { %2189 = vst.msk [vmem:[#allocation3 + $0x50] sm:$0xf] %vm2168_vm15, %v2113_v12  ;;  %v2894_v46 = vrot.slane %v2892_v29, 4  ;;  %v2912_v4 = vshll.u32 %v2750_v6, 16  ;;  %v2905_v30 = vrot.slane %v2903_v32, 4  ;;  %v2908_v12 = vrot.slane %v2906_v31, 5 }
 0x1b9   : > { %3166 = vrot.lane.b32.xlu0 %v2795_v14, %s10632_s28  ;;  %v2115_v55 = vpop.permute.xlu1 %2114  ;;  %v2916_v14 = vshrl.u32 %v2750_v6, 16  ;;  %v2936_v16 = vshll.u32 %v2753_v27, 16  ;;  %v2843_v42 = vsel %vm10820_vm8, %v2838_v53, %v11742_v1  ;;  %v2853_v15 = vsel %vm10820_vm8, %v2848_v0, %v2852_v7  ;;  %v2755_v51 = vld [vmem:[#allocation2 + $0x60] sm:$0xf]  ;;  %v2756_v5 = vld [vmem:[#allocation2 + $0x64] sm:$0xf] }
 0x1ba   : > { %2190 = vst.msk [vmem:[#allocation3 + $0x54] sm:$0xf] %vm2168_vm15, %v2115_v55  ;;  %v2876_v43 = vrot.slane %v2874_v22, 5  ;;  %v2940_v11 = vshrl.u32 %v2753_v27, 16  ;;  %v2867_v23 = vsel %vm10820_vm8, %v2862_v38, %v11754_v25  ;;  %v2872_v62 = vrot.slane %v2871_v39, 4 }
 0x1bb   : > { %v2117_v9 = vpop.permute.xlu0 %2116  ;;  %3168 = vrot.lane.b32.xlu1 %v2805_v8, %s10632_s28  ;;  %v2886_v58 = vrot.slane %v2885_v57, 4  ;;  %v2898_v63 = vshll.u32 %v2748_v41, 16  ;;  %v2895_v55 = vor.u32 %v2894_v46, %v11768_v59  ;;  %v11783_v1 = vrot.slane %v2912_v4, 5  ;;  %v2751_v37 = vld [vmem:[#allocation2 + $0x50] sm:$0x1] }
 0x1bc   : > { %2191 = vst.msk [vmem:[#allocation3 + $0x58] sm:$0xf] %vm2168_vm15, %v2117_v9  ;;  %v2927_v50 = vshrl.u32 %v2752_v54, 16  ;;  %v2930_v40 = vshll.u32 %v2752_v54, 16  ;;  %v2909_v8 = vor.u32 %v2908_v12, %v2905_v30  ;;  %v2918_v9 = vrot.slane %v2916_v14, 4 }
 0x1bd   : > { %3170 = vrot.lane.b32.xlu0 %v2819_v2, %s10632_s28  ;;  %v2119_v56 = vpop.permute.xlu1 %2118  ;;  %v11786_v21 = vrot.slane %v2936_v16, 5  ;;  %v2951_v25 = vshrl.u32 %v2755_v51, 16  ;;  %v2758_v6 = vld [vmem:[#allocation2 + $0x6c] sm:$0xf]  ;;  %v2942_v32 = vrot.slane %v2940_v11, 4  ;;  %v2954_v31 = vshll.u32 %v2755_v51, 16 }
 0x1be   : > { %2192 = vst.msk [vmem:[#allocation3 + $0x5c] sm:$0xf] %vm2168_vm15, %v2119_v56  ;;  %v2960_v2 = vshll.u32 %v2756_v5, 16  ;;  %v2964_v0 = vshrl.u32 %v2756_v5, 16  ;;  %v2877_v7 = vsel %vm10820_vm8, %v2872_v62, %v2876_v43  ;;  %v2891_v22 = vsel %vm10820_vm8, %v2886_v58, %v11768_v59  ;;  %v2759_v53 = vld [vmem:[#allocation2 + $0x70] sm:$0xf] }
 0x1bf   : > { %v2121_v28 = vpop.permute.xlu0 %2120  ;;  %3172 = vrot.lane.b32.xlu1 %v2829_v44, %s10632_s28  ;;  %v2900_v27 = vrot.slane %v2898_v63, 5  ;;  %v2922_v44 = vshll.u32 %v2751_v37, 16  ;;  %v2929_v57 = vrot.slane %v2927_v50, 4  ;;  %v2932_v56 = vrot.slane %v2930_v40, 5  ;;  %v2761_v46 = vld [vmem:[#allocation2 + $0x78] sm:$0xf] }
 0x1c0   : > { %2193 = vst.msk [vmem:[#allocation3 + $0x60] sm:$0xf] %vm2168_vm15, %v2121_v28  ;;  %v2975_v38 = vshrl.u32 %v2758_v6, 16  ;;  %v2978_v41 = vshll.u32 %v2758_v6, 16  ;;  %v2896_v28 = vrot.slane %v2895_v55, 4  ;;  %v2910_v30 = vrot.slane %v2909_v8, 4 }
 0x1c1   : > { %3174 = vrot.lane.b32.xlu0 %v2843_v42, %s10632_s28  ;;  %v2123_v10 = vpop.permute.xlu1 %2122  ;;  %v2919_v12 = vor.u32 %v2918_v9, %v11783_v1  ;;  %v2953_v14 = vrot.slane %v2951_v25, 4  ;;  %v2754_v59 = vld [vmem:[#allocation2 + $0x5c] sm:$0x1]  ;;  %v2943_v54 = vor.u32 %v2942_v32, %v11786_v21  ;;  %v2956_v16 = vrot.slane %v2954_v31, 5  ;;  %v2757_v43 = vld [vmem:[#allocation2 + $0x68] sm:$0x1] }
 0x1c2   : > { %2194 = vst.msk [vmem:[#allocation3 + $0x64] sm:$0xf] %vm2168_vm15, %v2123_v10  ;;  %v11801_v42 = vrot.slane %v2960_v2, 5  ;;  %v2984_v11 = vshll.u32 %v2759_v53, 16  ;;  %v2988_v51 = vshrl.u32 %v2759_v53, 16  ;;  %v3002_v62 = vshll.u32 %v2761_v46, 16 }
 0x1c3   : > { %v2125_v29 = vpop.permute.xlu0 %2124  ;;  %3176 = vrot.lane.b32.xlu1 %v2853_v15, %s10632_s28  ;;  %v2966_v15 = vrot.slane %v2964_v0, 4  ;;  %v2924_v63 = vrot.slane %v2922_v44, 5  ;;  %v2933_v5 = vor.u32 %v2932_v56, %v2929_v57  ;;  %v2977_v10 = vrot.slane %v2975_v38, 4  ;;  %v2762_v9 = vld [vmem:[#allocation2 + $0x7c] sm:$0xf] }
 0x1c4   : > { %2195 = vst.msk [vmem:[#allocation3 + $0x68] sm:$0xf] %vm2168_vm15, %v2125_v29  ;;  %v2980_v55 = vrot.slane %v2978_v41, 5  ;;  %v2901_v37 = vsel %vm10820_vm8, %v2896_v28, %v2900_v27  ;;  %v2915_v40 = vsel %vm10820_vm8, %v2910_v30, %v11783_v1  ;;  %v2920_v29 = vrot.slane %v2919_v12, 4  ;;  %v2764_v2 = vld [vmem:[#allocation2 + $0x84] sm:$0xf] }
 0x1c5   : > { %3178 = vrot.lane.b32.xlu0 %v2867_v23, %s10632_s28  ;;  %v2127_v39 = vpop.permute.xlu1 %2126  ;;  %v2999_v23 = vshrl.u32 %v2761_v46, 16  ;;  %v2946_v8 = vshll.u32 %v2754_v59, 16  ;;  %v2944_v25 = vrot.slane %v2943_v54, 4  ;;  %v2957_v6 = vor.u32 %v2956_v16, %v2953_v14  ;;  %v2768_v16 = vld [vmem:[#allocation2 + $0x94] sm:$0xf] }
 0x1c6   : > { %2196 = vst.msk [vmem:[#allocation3 + $0x6c] sm:$0xf] %vm2168_vm15, %v2127_v39  ;;  %v2967_v32 = vor.u32 %v2966_v15, %v11801_v42  ;;  %v2970_v31 = vshll.u32 %v2757_v43, 16  ;;  %v11814_v0 = vrot.slane %v2984_v11, 5  ;;  %v3004_v27 = vrot.slane %v3002_v62, 5 }
 0x1c7   : > { %v2129_v4 = vpop.permute.xlu0 %2128  ;;  %3180 = vrot.lane.b32.xlu1 %v2877_v7, %s10632_s28  ;;  %v2760_v7 = vld [vmem:[#allocation2 + $0x74] sm:$0x1]  ;;  %v3001_v1 = vrot.slane %v2999_v23, 4  ;;  %v2934_v53 = vrot.slane %v2933_v5, 4  ;;  %v2981_v39 = vor.u32 %v2980_v55, %v2977_v10  ;;  %v3008_v57 = vshll.u32 %v2762_v9, 16 }
 0x1c8   : > { %2197 = vst.msk [vmem:[#allocation3 + $0x70] sm:$0xf] %vm2168_vm15, %v2129_v4  ;;  %v3012_v56 = vshrl.u32 %v2762_v9, 16  ;;  %v2925_v38 = vsel %vm10820_vm8, %v2920_v29, %v2924_v63  ;;  %v2948_v46 = vrot.slane %v2946_v8, 5  ;;  %v2765_v4 = vld [vmem:[#allocation2 + $0x88] sm:$0xf] }
 0x1c9   : > { %3182 = vrot.lane.b32.xlu0 %v2891_v22, %s10632_s28  ;;  %v2131_v58 = vpop.permute.xlu1 %2130  ;;  %v2990_v22 = vrot.slane %v2988_v51, 4  ;;  %v3023_v28 = vshrl.u32 %v2764_v2, 16  ;;  %v3026_v30 = vshll.u32 %v2764_v2, 16  ;;  %v2939_v12 = vsel %vm10820_vm8, %v2934_v53, %v11786_v21  ;;  %v2763_v63 = vld [vmem:[#allocation2 + $0x80] sm:$0x1] }
 0x1ca   : > { %2198 = vst.msk [vmem:[#allocation3 + $0x74] sm:$0xf] %vm2168_vm15, %v2131_v58  ;;  %v2968_v14 = vrot.slane %v2967_v32, 4  ;;  %v2972_v59 = vrot.slane %v2970_v31, 5  ;;  %v2994_v54 = vshll.u32 %v2760_v7, 16  ;;  %v2949_v15 = vsel %vm10820_vm8, %v2944_v25, %v2948_v46 }
 0x1cb   : > { %v2133_v50 = vpop.permute.xlu0 %2132  ;;  %3184 = vrot.lane.b32.xlu1 %v2901_v37, %s10632_s28  ;;  %v2958_v43 = vrot.slane %v2957_v6, 4  ;;  %v2991_v11 = vor.u32 %v2990_v22, %v11814_v0  ;;  %v3005_v51 = vor.u32 %v3004_v27, %v3001_v1  ;;  %v2982_v62 = vrot.slane %v2981_v39, 4  ;;  %v2770_v32 = vld [vmem:[#allocation2 + $0x9c] sm:$0xf]  ;;  %v2771_v1 = vld [vmem:[#allocation2 + $0xa0] sm:$0xf] }
 0x1cc   : > { %2199 = vst.msk [vmem:[#allocation3 + $0x78] sm:$0xf] %vm2168_vm15, %v2133_v50  ;;  %v11828_v58 = vrot.slane %v3008_v57, 5  ;;  %v3014_v5 = vrot.slane %v3012_v56, 4  ;;  %v3032_v21 = vshll.u32 %v2765_v4, 16  ;;  %v3025_v55 = vrot.slane %v3023_v28, 4 }
 0x1cd   : > { %3186 = vrot.lane.b32.xlu0 %v2915_v40, %s10632_s28  ;;  %v2135_v44 = vpop.permute.xlu1 %2134  ;;  %v3028_v37 = vrot.slane %v3026_v30, 5  ;;  %v3036_v50 = vshrl.u32 %v2765_v4, 16  ;;  %v2767_v40 = vld [vmem:[#allocation2 + $0x90] sm:$0xf]  ;;  %v3056_v29 = vshll.u32 %v2768_v16, 16  ;;  %v2963_v8 = vsel %vm10820_vm8, %v2958_v43, %v11801_v42 }
 0x1ce   : > { %2200 = vst.msk [vmem:[#allocation3 + $0x7c] sm:$0xf] %vm2168_vm15, %v2135_v44  ;;  %v2973_v9 = vsel %vm10820_vm8, %v2968_v14, %v2972_v59  ;;  %v2996_v25 = vrot.slane %v2994_v54, 5  ;;  %v3060_v6 = vshrl.u32 %v2768_v16, 16  ;;  %v2987_v31 = vsel %vm10820_vm8, %v2982_v62, %v11814_v0  ;;  %v2766_v53 = vld [vmem:[#allocation2 + $0x8c] sm:$0x1] }
 0x1cf   : > { %v2449_v41 = vpop.permute.xlu0 %2448  ;;  %3188 = vrot.lane.b32.xlu1 %v2925_v38, %s10632_s28  ;;  %v2992_v2 = vrot.slane %v2991_v11, 4  ;;  %v3006_v7 = vrot.slane %v3005_v51, 4  ;;  %v3018_v22 = vshll.u32 %v2763_v63, 16  ;;  %v3015_v44 = vor.u32 %v3014_v5, %v11828_v58  ;;  %v2769_v4 = vld [vmem:[#allocation2 + $0x98] sm:$0x1] }
 0x1d0   : > { %2527 = vst.msk [vmem:[#allocation3 + $0x48] sm:$0xf] %vm2508_vm0, %v2449_v41  ;;  %v11843_v42 = vrot.slane %v3032_v21, 5  ;;  %v3047_v39 = vshrl.u32 %v2767_v40, 16  ;;  %v3050_v57 = vshll.u32 %v2767_v40, 16  ;;  %v3029_v38 = vor.u32 %v3028_v37, %v3025_v55 }
 0x1d1   : > { %3190 = vrot.lane.b32.xlu0 %v2939_v12, %s10632_s28  ;;  %v2451_v23 = vpop.permute.xlu1 %2450  ;;  %v3038_v41 = vrot.slane %v3036_v50, 4  ;;  %v11846_v46 = vrot.slane %v3056_v29, 5  ;;  %v3071_v0 = vshrl.u32 %v2770_v32, 16  ;;  %v3062_v28 = vrot.slane %v3060_v6, 4  ;;  %v2774_v63 = vld [vmem:[#allocation2 + $0xac] sm:$0xf] }
 0x1d2   : > { %2528 = vst.msk [vmem:[#allocation3 + $0x4c] sm:$0xf] %vm2508_vm0, %v2451_v23  ;;  %v3074_v30 = vshll.u32 %v2770_v32, 16  ;;  %v3080_v12 = vshll.u32 %v2771_v1, 16  ;;  %v3084_v14 = vshrl.u32 %v2771_v1, 16  ;;  %v2997_v59 = vsel %vm10820_vm8, %v2992_v2, %v2996_v25 }
 0x1d3   : > { %v2453_v10 = vpop.permute.xlu0 %2452  ;;  %3192 = vrot.lane.b32.xlu1 %v2949_v15, %s10632_s28  ;;  %v3020_v54 = vrot.slane %v3018_v22, 5  ;;  %v3042_v16 = vshll.u32 %v2766_v53, 16  ;;  %v2773_v15 = vld [vmem:[#allocation2 + $0xa8] sm:$0xf]  ;;  %v3011_v11 = vsel %vm10820_vm8, %v3006_v7, %v11828_v58  ;;  %v3016_v51 = vrot.slane %v3015_v44, 4 }
 0x1d4   : > { %2529 = vst.msk [vmem:[#allocation3 + $0x50] sm:$0xf] %vm2508_vm0, %v2453_v10  ;;  %v3049_v23 = vrot.slane %v3047_v39, 4  ;;  %v3052_v62 = vrot.slane %v3050_v57, 5  ;;  %v3030_v21 = vrot.slane %v3029_v38, 4  ;;  %v3039_v10 = vor.u32 %v3038_v41, %v11843_v42 }
 0x1d5   : > { %3194 = vrot.lane.b32.xlu0 %v2963_v8, %s10632_s28  ;;  %v2455_v27 = vpop.permute.xlu1 %2454  ;;  %v3066_v55 = vshll.u32 %v2769_v4, 16  ;;  %v3073_v37 = vrot.slane %v3071_v0, 4  ;;  %v3063_v50 = vor.u32 %v3062_v28, %v11846_v46  ;;  %v3076_v40 = vrot.slane %v3074_v30, 5  ;;  %v2772_v8 = vld [vmem:[#allocation2 + $0xa4] sm:$0x1] }
 0x1d6   : > { %2530 = vst.msk [vmem:[#allocation3 + $0x54] sm:$0xf] %vm2508_vm0, %v2455_v27  ;;  %v11861_v58 = vrot.slane %v3080_v12, 5  ;;  %v3086_v29 = vrot.slane %v3084_v14, 4  ;;  %v3098_v25 = vshll.u32 %v2773_v15, 16  ;;  %v3104_v6 = vshll.u32 %v2774_v63, 16 }
 0x1d7   : > { %v2457_v56 = vpop.permute.xlu0 %2456  ;;  %3196 = vrot.lane.b32.xlu1 %v2973_v9, %s10632_s28  ;;  %v3095_v9 = vshrl.u32 %v2773_v15, 16  ;;  %v3108_v32 = vshrl.u32 %v2774_v63, 16  ;;  %v3044_v2 = vrot.slane %v3042_v16, 5  ;;  %v3053_v7 = vor.u32 %v3052_v62, %v3049_v23  ;;  %v2776_v39 = vld [vmem:[#allocation2 + $0xb4] sm:$0xf] }
 0x1d8   : > { %2531 = vst.msk [vmem:[#allocation3 + $0x58] sm:$0xf] %vm2508_vm0, %v2457_v56  ;;  %v3021_v22 = vsel %vm10820_vm8, %v3016_v51, %v3020_v54  ;;  %v3035_v27 = vsel %vm10820_vm8, %v3030_v21, %v11843_v42  ;;  %v3040_v44 = vrot.slane %v3039_v10, 4  ;;  %v3068_v53 = vrot.slane %v3066_v55, 5  ;;  %v2777_v0 = vld [vmem:[#allocation2 + $0xb8] sm:$0xf] }
 0x1d9   : > { %3198 = vrot.lane.b32.xlu0 %v2987_v31, %s10632_s28  ;;  %v2459_v43 = vpop.permute.xlu1 %2458  ;;  %v3064_v57 = vrot.slane %v3063_v50, 4  ;;  %v3077_v56 = vor.u32 %v3076_v40, %v3073_v37  ;;  %v3087_v38 = vor.u32 %v3086_v29, %v11861_v58  ;;  %v3090_v41 = vshll.u32 %v2772_v8, 16  ;;  %v2779_v23 = vld [vmem:[#allocation2 + $0xc0] sm:$0xf]  ;;  %v2780_v10 = vld [vmem:[#allocation2 + $0xc4] sm:$0xf] }
 0x1da   : > { %2532 = vst.msk [vmem:[#allocation3 + $0x5c] sm:$0xf] %vm2508_vm0, %v2459_v43  ;;  %v3097_v4 = vrot.slane %v3095_v9, 4  ;;  %v3100_v28 = vrot.slane %v3098_v25, 5  ;;  %v3106_v30 = vrot.slane %v3104_v6, 5  ;;  %v3110_v12 = vrot.slane %v3108_v32, 4 }
 0x1db   : > { %v2461_v5 = vpop.permute.xlu0 %2460  ;;  %3200 = vrot.lane.b32.xlu1 %v2997_v59, %s10632_s28  ;;  %v3054_v14 = vrot.slane %v3053_v7, 4  ;;  %v2775_v59 = vld [vmem:[#allocation2 + $0xb0] sm:$0x1]  ;;  %v3119_v54 = vshrl.u32 %v2776_v39, 16  ;;  %v3122_v16 = vshll.u32 %v2776_v39, 16  ;;  %v3045_v15 = vsel %vm10820_vm8, %v3040_v44, %v3044_v2 }
 0x1dc   : > { %2533 = vst.msk [vmem:[#allocation3 + $0x60] sm:$0xf] %vm2508_vm0, %v2461_v5  ;;  %v3132_v51 = vshrl.u32 %v2777_v0, 16  ;;  %v3069_v63 = vsel %vm10820_vm8, %v3064_v57, %v3068_v53  ;;  %v3078_v5 = vrot.slane %v3077_v56, 4  ;;  %v3092_v21 = vrot.slane %v3090_v41, 5 }
 0x1dd   : > { %3202 = vrot.lane.b32.xlu0 %v3011_v11, %s10632_s28  ;;  %v2463_v31 = vpop.permute.xlu1 %2462  ;;  %v3128_v11 = vshll.u32 %v2777_v0, 16  ;;  %v3059_v62 = vsel %vm10820_vm8, %v3054_v14, %v11846_v46  ;;  %v3088_v55 = vrot.slane %v3087_v38, 4  ;;  %v3101_v37 = vor.u32 %v3100_v28, %v3097_v4  ;;  %v2781_v14 = vld [vmem:[#allocation2 + $0xc8] sm:$0x1] }
 0x1de   : > { %2534 = vst.msk [vmem:[#allocation3 + $0x64] sm:$0xf] %vm2508_vm0, %v2463_v31  ;;  %v3111_v50 = vor.u32 %v3110_v12, %v3106_v30  ;;  %v3114_v40 = vshll.u32 %v2775_v59, 16  ;;  %v3121_v8 = vrot.slane %v3119_v54, 4  ;;  %v3124_v9 = vrot.slane %v3122_v16, 5 }
 0x1df   : > { %v2465_v1 = vpop.permute.xlu0 %2464  ;;  %3204 = vrot.lane.b32.xlu1 %v3021_v22, %s10632_s28  ;;  %v3143_v25 = vshrl.u32 %v2779_v23, 16  ;;  %v3146_v6 = vshll.u32 %v2779_v23, 16  ;;  %v3130_v32 = vrot.slane %v3128_v11, 5  ;;  %v2778_v31 = vld [vmem:[#allocation2 + $0xbc] sm:$0x1]  ;;  %v3134_v2 = vrot.slane %v3132_v51, 4 }
 0x1e0   : > { %2535 = vst.msk [vmem:[#allocation3 + $0x68] sm:$0xf] %vm2508_vm0, %v2465_v1  ;;  %v3152_v7 = vshll.u32 %v2780_v10, 16  ;;  %v3156_v22 = vshrl.u32 %v2780_v10, 16  ;;  %v3083_v1 = vsel %vm10820_vm8, %v3078_v5, %v11861_v58  ;;  %v3102_v44 = vrot.slane %v3101_v37, 4 }
 0x1e1   : > { %3206 = vrot.lane.b32.xlu0 %v3035_v27, %s10632_s28  ;;  %v2467_v42 = vpop.permute.xlu1 %2466  ;;  %v3093_v27 = vsel %vm10820_vm8, %v3088_v55, %v3092_v21  ;;  %v3116_v53 = vrot.slane %v3114_v40, 5  ;;  %v3125_v57 = vor.u32 %v3124_v9, %v3121_v8  ;;  %v3138_v56 = vshll.u32 %v2778_v31, 16  ;;  %v3295_v40 = vld [vmem:[#allocation2 + $0xc] sm:$0xe]  ;;  %v3299_v9 = vld [vmem:[#allocation2 + $0x1c] sm:$0xf] }
 0x1e2   : > { %2536 = vst.msk [vmem:[#allocation3 + $0x6c] sm:$0xf] %vm2508_vm0, %v2467_v42  ;;  %v3145_v38 = vrot.slane %v3143_v25, 4  ;;  %v3148_v41 = vrot.slane %v3146_v6, 5  ;;  %v3112_v4 = vrot.slane %v3111_v50, 4  ;;  %v3135_v28 = vor.u32 %v3134_v2, %v3130_v32 }
 0x1e3   : > { %v2469_v43 = vpop.permute.xlu0 %2468  ;;  %3208 = vrot.lane.b32.xlu1 %v3045_v15, %s10632_s28  ;;  %v3154_v12 = vrot.slane %v3152_v7, 5  ;;  %v3158_v58 = vrot.slane %v3156_v22, 4  ;;  %v3107_v42 = vsel %vm10820_vm8, %v3102_v44, %v3106_v30  ;;  %v3126_v54 = vrot.slane %v3125_v57, 4  ;;  %v3298_v7 = vld [vmem:[#allocation2 + $0x18] sm:$0xe] }
 0x1e4   : > { %2537 = vst.msk [vmem:[#allocation3 + $0x70] sm:$0xf] %vm2508_vm0, %v2469_v43  ;;  %v3140_v16 = vrot.slane %v3138_v56, 5  ;;  %v3149_v15 = vor.u32 %v3148_v41, %v3145_v38  ;;  %v3117_v43 = vsel %vm10820_vm8, %v3112_v4, %v3116_v53  ;;  %v3136_v51 = vrot.slane %v3135_v28, 4  ;;  %v3300_v57 = vld [vmem:[#allocation2 + $0x20] sm:$0x1] }
 0x1e5   : > { %3210 = vrot.lane.b32.xlu0 %v3059_v62, %s10632_s28  ;;  %v2471_v29 = vpop.permute.xlu1 %2470  ;;  %v3159_v23 = vor.u32 %v3158_v58, %v3154_v12  ;;  %v3162_v62 = vshll.u32 %v2781_v14, 16  ;;  %v3131_v30 = vsel %vm10820_vm8, %v3126_v54, %v3130_v32  ;;  %v10153_v6 = vrot.slane %v3295_v40, 9 }
 0x1e6   : > { %2538 = vst.msk [vmem:[#allocation3 + $0x74] sm:$0xf] %vm2508_vm0, %v2471_v29  ;;  %v3150_v21 = vrot.slane %v3149_v15, 4  ;;  %v3141_v10 = vsel %vm10820_vm8, %v3136_v51, %v3140_v16  ;;  %v3400_v22 = vrot.slane %v3299_v9, 5  ;;  %v3403_v58 = vrot.slane %v3300_v57, 5 }
 0x1e7   : > { %v2473_v46 = vpop.permute.xlu0 %2472  ;;  %3212 = vrot.lane.b32.xlu1 %v3069_v63, %s10632_s28  ;;  %v3296_v63 = vld [vmem:[#allocation2 + $0x10] sm:$0xf]  ;;  %v3160_v37 = vrot.slane %v3159_v23, 4  ;;  %v3164_v50 = vrot.slane %v3162_v62, 5  ;;  %v3308_v23 = vld [vmem:[#allocation2 + $0x40] sm:$0xf] }
 0x1e8   : > { %2539 = vst.msk [vmem:[#allocation3 + $0x78] sm:$0xf] %vm2508_vm0, %v2473_v46  ;;  %v3393_v29 = vrot.slane %v3296_v63, 5  ;;  %v3155_v8 = vsel %vm10820_vm8, %v3150_v21, %v3154_v12  ;;  %v3297_v46 = vld [vmem:[#allocation2 + $0x14] sm:$0x1]  ;;  %v3402_v41 = vrot.slane %v3400_v22, 4 }
 0x1e9   : > { %3214 = vrot.lane.b32.xlu0 %v3083_v1, %s10632_s28  ;;  %v2475_v39 = vpop.permute.xlu1 %2474  ;;  %v3165_v32 = vsel %vm10820_vm8, %v3160_v37, %v3164_v50  ;;  %v3396_v44 = vrot.slane %v3297_v46, 5  ;;  %v3305_v12 = vld [vmem:[#allocation2 + $0x34] sm:$0xf]  ;;  %v3307_v37 = vld [vmem:[#allocation2 + $0x3c] sm:$0xe]  ;;  %v3421_v50 = vrot.slane %v3308_v23, 5 }
 0x1ea   : > { %2540 = vst.msk [vmem:[#allocation3 + $0x7c] sm:$0xf] %vm2508_vm0, %v2475_v39  ;;  %v3395_v2 = vrot.slane %v3393_v29, 4  ;;  %v3394_v1 = vsel %vm10827_vm11, %v10153_v6, %v3393_v29  ;;  %v10154_v39 = vrot.slane %v3298_v7, 9  ;;  %v3404_v54 = vsel %vm10827_vm11, %v3402_v41, %v3403_v58  ;;  %v3311_v29 = vld [vmem:[#allocation2 + $0x4c] sm:$0xf] }
 0x1eb   : > { %v2606_v0 = vpop.permute.xlu0 %2605  ;;  %3216 = vrot.lane.b32.xlu1 %v3093_v27, %s10632_s28  ;;  %v3302_v27 = vld [vmem:[#allocation2 + $0x28] sm:$0xf]  ;;  %v3309_v6 = vld [vmem:[#allocation2 + $0x44] sm:$0x1]  ;;  %v3428_v7 = vrot.slane %v3311_v29, 5 }
 0x1ec   : > { %2702 = vst.msk [vmem:[#allocation3] sm:$0xf] %vm2701_vm1, %v2606_v0  ;;  %v3397_v56 = vsel %vm10827_vm11, %v3395_v2, %v3396_v44  ;;  %v3301_v0 = vld [vmem:[#allocation2 + $0x24] sm:$0xe]  ;;  %v3407_v4 = vrot.slane %v3302_v27, 5  ;;  %v3401_v28 = vsel %vm10827_vm11, %v10154_v39, %v3400_v22  ;;  %v3424_v27 = vrot.slane %v3309_v6, 5 }
 0x1ed   : > { %3218 = vrot.lane.b32.xlu0 %v3107_v42, %s10632_s28  ;;  %v2608_v59 = vpop.permute.xlu1 %2607  ;;  %v10155_v14 = vrot.slane %v3301_v0, 9  ;;  %v3310_v2 = vld [vmem:[#allocation2 + $0x48] sm:$0xe]  ;;  %v3312_v39 = vld [vmem:[#allocation2 + $0x50] sm:$0x1] }
 0x1ee   : > { %2703 = vst.msk [vmem:[#allocation3 + $0x4] sm:$0xf] %vm2701_vm1, %v2608_v59  ;;  %v3303_v59 = vld [vmem:[#allocation2 + $0x2c] sm:$0x1]  ;;  %v3409_v15 = vrot.slane %v3407_v4, 4 }
 0x1ef   : > { %v2610_v11 = vpop.permute.xlu0 %2609  ;;  %3220 = vrot.lane.b32.xlu1 %v3117_v43, %s10632_s28  ;;  %v3304_v43 = vld [vmem:[#allocation2 + $0x30] sm:$0xe]  ;;  %v3408_v51 = vsel %vm10827_vm11, %v10155_v14, %v3407_v4  ;;  %v3410_v62 = vrot.slane %v3303_v59, 5  ;;  %v3313_v41 = vld [vmem:[#allocation2 + $0x54] sm:$0xe] }
 0x1f0   : > { %2704 = vst.msk [vmem:[#allocation3 + $0x8] sm:$0xf] %vm2701_vm1, %v2610_v11  ;;  %v3414_v11 = vrot.slane %v3305_v12, 5  ;;  %v10156_v63 = vrot.slane %v3304_v43, 9  ;;  %v3431_v12 = vrot.slane %v3312_v39, 5 }
 0x1f1   : > { %3222 = vrot.lane.b32.xlu0 %v3131_v30, %s10632_s28  ;;  %v2612_v5 = vpop.permute.xlu1 %2611  ;;  %v3411_v21 = vsel %vm10827_vm11, %v3409_v15, %v3410_v62  ;;  %v3315_v14 = vld [vmem:[#allocation2 + $0x5c] sm:$0x1]  ;;  %v3316_v15 = vld [vmem:[#allocation2 + $0x60] sm:$0xe] }
 0x1f2   : > { %2705 = vst.msk [vmem:[#allocation3 + $0xc] sm:$0xf] %vm2701_vm1, %v2612_v5  ;;  %v3306_v5 = vld [vmem:[#allocation2 + $0x38] sm:$0x1]  ;;  %v3415_v40 = vsel %vm10827_vm11, %v10156_v63, %v3414_v11  ;;  %v3438_v23 = vrot.slane %v3315_v14, 5 }
 0x1f3   : > { %v2614_v55 = vpop.permute.xlu0 %2613  ;;  %3224 = vrot.lane.b32.xlu1 %v3141_v10, %s10632_s28  ;;  %v3318_v63 = vld [vmem:[#allocation2 + $0x68] sm:$0x1]  ;;  %v3323_v29 = vld [vmem:[#allocation2 + $0x7c] sm:$0xf] }
 0x1f4   : > { %2706 = vst.msk [vmem:[#allocation3 + $0x10] sm:$0xf] %vm2701_vm1, %v2614_v55  ;;  %v3416_v55 = vrot.slane %v3414_v11, 4 }
 0x1f5   : > { %3226 = vrot.lane.b32.xlu0 %v3155_v8, %s10632_s28  ;;  %v2616_v25 = vpop.permute.xlu1 %2615  ;;  %v3417_v8 = vrot.slane %v3306_v5, 5 }
 0x1f6   : > { %2707 = vst.msk [vmem:[#allocation3 + $0x14] sm:$0xf] %vm2701_vm1, %v2616_v25  ;;  %v10157_v25 = vrot.slane %v3307_v37, 9 }
 0x1f7   : > { %v2618_v31 = vpop.permute.xlu0 %2617  ;;  %3228 = vrot.lane.b32.xlu1 %v3165_v32, %s10632_s28  ;;  %v3418_v46 = vsel %vm10827_vm11, %v3416_v55, %v3417_v8  ;;  %v3319_v55 = vld [vmem:[#allocation2 + $0x6c] sm:$0xe]  ;;  %v3445_v8 = vrot.slane %v3318_v63, 5 }
 0x1f8   : > { %2708 = vst.msk [vmem:[#allocation3 + $0x18] sm:$0xf] %vm2701_vm1, %v2618_v31  ;;  %v3423_v31 = vrot.slane %v3421_v50, 4  ;;  %v3422_v22 = vsel %vm10827_vm11, %v10157_v25, %v3421_v50  ;;  %v10161_v25 = vrot.slane %v3319_v55, 9  ;;  %v3331_v55 = vld [vmem:[#allocation2 + $0x9c] sm:$0xe] }
 0x1f9   : > { %3503 = vrot.lane.b32.xlu0 %v3394_v1, %s10633_s29  ;;  %v2620_v53 = vpop.permute.xlu1 %2619  ;;  %v3314_v1 = vld [vmem:[#allocation2 + $0x58] sm:$0xf] }
 0x1fa   : > { %2709 = vst.msk [vmem:[#allocation3 + $0x1c] sm:$0xf] %vm2701_vm1, %v2620_v53  ;;  %v10158_v53 = vrot.slane %v3310_v2, 9  ;;  %v3425_v57 = vsel %vm10827_vm11, %v3423_v31, %v3424_v27  ;;  %v3435_v0 = vrot.slane %v3314_v1, 5  ;;  %v3322_v2 = vld [vmem:[#allocation2 + $0x78] sm:$0xe] }
 0x1fb   : > { %v2622_v38 = vpop.permute.xlu0 %2621  ;;  %3505 = vrot.lane.b32.xlu1 %v3397_v56, %s10633_s29  ;;  %v3324_v1 = vld [vmem:[#allocation2 + $0x80] sm:$0x1]  ;;  %v3326_v27 = vld [vmem:[#allocation2 + $0x88] sm:$0xf] }
 0x1fc   : > { %2710 = vst.msk [vmem:[#allocation3 + $0x20] sm:$0xf] %vm2701_vm1, %v2622_v38  ;;  %v3430_v38 = vrot.slane %v3428_v7, 4  ;;  %v3429_v4 = vsel %vm10827_vm11, %v10158_v53, %v3428_v7  ;;  %v3456_v7 = vrot.slane %v3323_v29, 5  ;;  %v10162_v53 = vrot.slane %v3322_v2, 9 }
 0x1fd   : > { %3507 = vrot.lane.b32.xlu0 %v3401_v28, %s10633_s29  ;;  %v2624_v42 = vpop.permute.xlu1 %2623  ;;  %v3317_v28 = vld [vmem:[#allocation2 + $0x64] sm:$0xf]  ;;  %v3335_v29 = vld [vmem:[#allocation2 + $0xac] sm:$0xf] }
 0x1fe   : > { %2711 = vst.msk [vmem:[#allocation3 + $0x24] sm:$0xf] %vm2701_vm1, %v2624_v42  ;;  %v10159_v42 = vrot.slane %v3313_v41, 9  ;;  %v3432_v59 = vsel %vm10827_vm11, %v3430_v38, %v3431_v12  ;;  %v3442_v43 = vrot.slane %v3317_v28, 5  ;;  %v3459_v38 = vrot.slane %v3324_v1, 5 }
 0x1ff   : > { %v2626_v16 = vpop.permute.xlu0 %2625  ;;  %3509 = vrot.lane.b32.xlu1 %v3404_v54, %s10633_s29  ;;  %v3325_v41 = vld [vmem:[#allocation2 + $0x84] sm:$0xe]  ;;  %v3327_v28 = vld [vmem:[#allocation2 + $0x8c] sm:$0x1]  ;;  %v3329_v12 = vld [vmem:[#allocation2 + $0x94] sm:$0xf] }
 0x200   : > { %2712 = vst.msk [vmem:[#allocation3 + $0x28] sm:$0xf] %vm2701_vm1, %v2626_v16  ;;  %v3437_v16 = vrot.slane %v3435_v0, 4  ;;  %v3436_v11 = vsel %vm10827_vm11, %v10159_v42, %v3435_v0  ;;  %v3463_v0 = vrot.slane %v3326_v27, 5  ;;  %v10163_v42 = vrot.slane %v3325_v41, 9 }
 0x201   : > { %3511 = vrot.lane.b32.xlu0 %v3408_v51, %s10633_s29  ;;  %v2628_v30 = vpop.permute.xlu1 %2627  ;;  %v3320_v51 = vld [vmem:[#allocation2 + $0x70] sm:$0xf]  ;;  %v3484_v2 = vrot.slane %v3335_v29, 5  ;;  %v3338_v1 = vld [vmem:[#allocation2 + $0xb8] sm:$0xf] }
 0x202   : > { %2713 = vst.msk [vmem:[#allocation3 + $0x2c] sm:$0xf] %vm2701_vm1, %v2628_v30  ;;  %v10160_v30 = vrot.slane %v3316_v15, 9  ;;  %v3439_v5 = vsel %vm10827_vm11, %v3437_v16, %v3438_v23  ;;  %v3449_v37 = vrot.slane %v3320_v51, 5  ;;  %v3466_v16 = vrot.slane %v3327_v28, 5 }
 0x203   : > { %v2630_v10 = vpop.permute.xlu0 %2629  ;;  %3513 = vrot.lane.b32.xlu1 %v3411_v21, %s10633_s29  ;;  %v3328_v15 = vld [vmem:[#allocation2 + $0x90] sm:$0xe]  ;;  %v3330_v51 = vld [vmem:[#allocation2 + $0x98] sm:$0x1]  ;;  %v3332_v23 = vld [vmem:[#allocation2 + $0xa0] sm:$0xf] }
 0x204   : > { %2714 = vst.msk [vmem:[#allocation3 + $0x30] sm:$0xf] %vm2701_vm1, %v2630_v10  ;;  %v3444_v10 = vrot.slane %v3442_v43, 4  ;;  %v3443_v50 = vsel %vm10827_vm11, %v10160_v30, %v3442_v43  ;;  %v3470_v43 = vrot.slane %v3329_v12, 5  ;;  %v10164_v30 = vrot.slane %v3328_v15, 9 }
 0x205   : > { %3515 = vrot.lane.b32.xlu0 %v3415_v40, %s10633_s29  ;;  %v2632_v9 = vpop.permute.xlu1 %2631  ;;  %v3321_v40 = vld [vmem:[#allocation2 + $0x74] sm:$0x1]  ;;  %v3491_v41 = vrot.slane %v3338_v1, 5  ;;  %v3341_v28 = vld [vmem:[#allocation2 + $0xc4] sm:$0xf] }
 0x206   : > { %2715 = vst.msk [vmem:[#allocation3 + $0x34] sm:$0xf] %vm2701_vm1, %v2632_v9  ;;  %v3446_v6 = vsel %vm10827_vm11, %v3444_v10, %v3445_v8  ;;  %v3452_v31 = vrot.slane %v3321_v40, 5  ;;  %v3473_v10 = vrot.slane %v3330_v51, 5  ;;  %v3333_v40 = vld [vmem:[#allocation2 + $0xa4] sm:$0x1] }
 0x207   : > { %v2634_v32 = vpop.permute.xlu0 %2633  ;;  %3517 = vrot.lane.b32.xlu1 %v3418_v46, %s10633_s29  ;;  %v3498_v15 = vrot.slane %v3341_v28, 5  ;;  %v3634_v29 = vld [vmem:[#allocation2 + $0x1c] sm:$0xf]  ;;  %v3645_v28 = vld [vmem:[#allocation2 + $0x60] sm:$0xf] }
 0x208   : > { %2716 = vst.msk [vmem:[#allocation3 + $0x38] sm:$0xf] %vm2701_vm1, %v2634_v32  ;;  %v3451_v32 = vrot.slane %v3449_v37, 4 }
 0x209   : > { %3519 = vrot.lane.b32.xlu0 %v3422_v22, %s10633_s29  ;;  %v2636_v44 = vpop.permute.xlu1 %2635  ;;  %v3450_v22 = vsel %vm10827_vm11, %v10161_v25, %v3449_v37  ;;  %v3477_v37 = vrot.slane %v3332_v23, 5 }
 0x20a   : > { %2717 = vst.msk [vmem:[#allocation3 + $0x3c] sm:$0xf] %vm2701_vm1, %v2636_v44  ;;  %v3453_v39 = vsel %vm10827_vm11, %v3451_v32, %v3452_v31  ;;  %v3480_v32 = vrot.slane %v3333_v40, 5  ;;  %v3334_v31 = vld [vmem:[#allocation2 + $0xa8] sm:$0xe] }
 0x20b   : > { %v2638_v56 = vpop.permute.xlu0 %2637  ;;  %3521 = vrot.lane.b32.xlu1 %v3425_v57, %s10633_s29 }
 0x20c   : > { %2718 = vst.msk [vmem:[#allocation3 + $0x40] sm:$0xf] %vm2701_vm1, %v2638_v56  ;;  %v3458_v56 = vrot.slane %v3456_v7, 4 }
 0x20d   : > { %3523 = vrot.lane.b32.xlu0 %v3429_v4, %s10633_s29  ;;  %v2640_v58 = vpop.permute.xlu1 %2639  ;;  %v3457_v4 = vsel %vm10827_vm11, %v10162_v53, %v3456_v7 }
 0x20e   : > { %2719 = vst.msk [vmem:[#allocation3 + $0x44] sm:$0xf] %vm2701_vm1, %v2640_v58  ;;  %v3460_v14 = vsel %vm10827_vm11, %v3458_v56, %v3459_v38  ;;  %v3337_v38 = vld [vmem:[#allocation2 + $0xb4] sm:$0xe] }
 0x20f   : > { %v2642_v54 = vpop.permute.xlu0 %2641  ;;  %3525 = vrot.lane.b32.xlu1 %v3432_v59, %s10633_s29 }
 0x210   : > { %2720 = vst.msk [vmem:[#allocation3 + $0x48] sm:$0xf] %vm2701_vm1, %v2642_v54  ;;  %v3465_v54 = vrot.slane %v3463_v0, 4 }
 0x211   : > { %3527 = vrot.lane.b32.xlu0 %v3436_v11, %s10633_s29  ;;  %v2644_v62 = vpop.permute.xlu1 %2643  ;;  %v3464_v11 = vsel %vm10827_vm11, %v10163_v42, %v3463_v0 }
 0x212   : > { %2721 = vst.msk [vmem:[#allocation3 + $0x4c] sm:$0xf] %vm2701_vm1, %v2644_v62  ;;  %v3467_v63 = vsel %vm10827_vm11, %v3465_v54, %v3466_v16  ;;  %v3340_v16 = vld [vmem:[#allocation2 + $0xc0] sm:$0xe] }
 0x213   : > { %v2646_v21 = vpop.permute.xlu0 %2645  ;;  %3529 = vrot.lane.b32.xlu1 %v3439_v5, %s10633_s29  ;;  %v10168_v23 = vrot.slane %v3340_v16, 9 }
 0x214   : > { %2722 = vst.msk [vmem:[#allocation3 + $0x50] sm:$0xf] %vm2701_vm1, %v2646_v21  ;;  %v3472_v21 = vrot.slane %v3470_v43, 4 }
 0x215   : > { %3531 = vrot.lane.b32.xlu0 %v3443_v50, %s10633_s29  ;;  %v2648_v9 = vpop.permute.xlu1 %2647  ;;  %v3471_v50 = vsel %vm10827_vm11, %v10164_v30, %v3470_v43 }
 0x216   : > { %2723 = vst.msk [vmem:[#allocation3 + $0x54] sm:$0xf] %vm2701_vm1, %v2648_v9  ;;  %v10165_v9 = vrot.slane %v3331_v55, 9  ;;  %v3474_v25 = vsel %vm10827_vm11, %v3472_v21, %v3473_v10  ;;  %v3499_v21 = vsel %vm10827_vm11, %v10168_v23, %v3498_v15 }
 0x217   : > { %v2650_v46 = vpop.permute.xlu0 %2649  ;;  %3533 = vrot.lane.b32.xlu1 %v3446_v6, %s10633_s29 }
 0x218   : > { %2724 = vst.msk [vmem:[#allocation3 + $0x58] sm:$0xf] %vm2701_vm1, %v2650_v46  ;;  %v3479_v46 = vrot.slane %v3477_v37, 4  ;;  %v3478_v7 = vsel %vm10827_vm11, %v10165_v9, %v3477_v37  ;;  %v3635_v9 = vld [vmem:[#allocation2 + $0x24] sm:$0xf] }
 0x219   : > { %3535 = vrot.lane.b32.xlu0 %v3450_v22, %s10633_s29  ;;  %v2652_v44 = vpop.permute.xlu1 %2651  ;;  %v3336_v22 = vld [vmem:[#allocation2 + $0xb0] sm:$0x1] }
 0x21a   : > { %2725 = vst.msk [vmem:[#allocation3 + $0x5c] sm:$0xf] %vm2701_vm1, %v2652_v44  ;;  %v10166_v44 = vrot.slane %v3334_v31, 9  ;;  %v3481_v53 = vsel %vm10827_vm11, %v3479_v46, %v3480_v32  ;;  %v3487_v56 = vrot.slane %v3336_v22, 5  ;;  %v3637_v32 = vld [vmem:[#allocation2 + $0x30] sm:$0xf] }
 0x21b   : > { %v2654_v57 = vpop.permute.xlu0 %2653  ;;  %3537 = vrot.lane.b32.xlu1 %v3453_v39, %s10633_s29  ;;  %v3639_v22 = vld [vmem:[#allocation2 + $0x3c] sm:$0xf] }
 0x21c   : > { %2726 = vst.msk [vmem:[#allocation3 + $0x60] sm:$0xf] %vm2701_vm1, %v2654_v57  ;;  %v3486_v57 = vrot.slane %v3484_v2, 4  ;;  %v3485_v0 = vsel %vm10827_vm11, %v10166_v44, %v3484_v2  ;;  %v3638_v2 = vld [vmem:[#allocation2 + $0x34] sm:$0xf] }
 0x21d   : > { %3539 = vrot.lane.b32.xlu0 %v3457_v4, %s10633_s29  ;;  %v2656_v58 = vpop.permute.xlu1 %2655  ;;  %v3339_v4 = vld [vmem:[#allocation2 + $0xbc] sm:$0x1] }
 0x21e   : > { %2727 = vst.msk [vmem:[#allocation3 + $0x64] sm:$0xf] %vm2701_vm1, %v2656_v58  ;;  %v10167_v58 = vrot.slane %v3337_v38, 9  ;;  %v3488_v42 = vsel %vm10827_vm11, %v3486_v57, %v3487_v56  ;;  %v3494_v54 = vrot.slane %v3339_v4, 5  ;;  %v3642_v57 = vld [vmem:[#allocation2 + $0x4c] sm:$0xf] }
 0x21f   : > { %v2658_v59 = vpop.permute.xlu0 %2657  ;;  %3541 = vrot.lane.b32.xlu1 %v3460_v14, %s10633_s29  ;;  %v3643_v38 = vld [vmem:[#allocation2 + $0x54] sm:$0xf] }
 0x220   : > { %2728 = vst.msk [vmem:[#allocation3 + $0x68] sm:$0xf] %vm2701_vm1, %v2658_v59  ;;  %v3493_v59 = vrot.slane %v3491_v41, 4  ;;  %v3492_v43 = vsel %vm10827_vm11, %v10167_v58, %v3491_v41  ;;  %v3646_v58 = vld [vmem:[#allocation2 + $0x64] sm:$0xf] }
 0x221   : > { %3543 = vrot.lane.b32.xlu0 %v3464_v11, %s10633_s29  ;;  %v2660_v62 = vpop.permute.xlu1 %2659  ;;  %v3342_v11 = vld [vmem:[#allocation2 + $0xc8] sm:$0x1] }
 0x222   : > { %2729 = vst.msk [vmem:[#allocation3 + $0x6c] sm:$0xf] %vm2701_vm1, %v2660_v62  ;;  %v3495_v62 = vsel %vm10827_vm11, %v3493_v59, %v3494_v54  ;;  %v3647_v59 = vld [vmem:[#allocation2 + $0x6c] sm:$0xf]  ;;  %v3827_v54 = vld [vmem:[#allocation2 + $0x1c] sm:$0xf] }
 0x223   : > { %v2662_v5 = vpop.permute.xlu0 %2661  ;;  %3545 = vrot.lane.b32.xlu1 %v3467_v63, %s10633_s29  ;;  %v3500_v63 = vrot.slane %v3498_v15, 4  ;;  %v3884_v23 = vshll.u32 %v3827_v54, 16 }
 0x224   : > { %2730 = vst.msk [vmem:[#allocation3 + $0x70] sm:$0xf] %vm2701_vm1, %v2662_v5  ;;  %v3501_v5 = vrot.slane %v3342_v11, 5  ;;  %v3648_v11 = vld [vmem:[#allocation2 + $0x70] sm:$0xf] }
 0x225   : > { %3547 = vrot.lane.b32.xlu0 %v3471_v50, %s10633_s29  ;;  %v2664_v8 = vpop.permute.xlu1 %2663  ;;  %v3633_v50 = vld [vmem:[#allocation2 + $0x18] sm:$0xf] }
 0x226   : > { %2731 = vst.msk [vmem:[#allocation3 + $0x74] sm:$0xf] %vm2701_vm1, %v2664_v8  ;;  %v3502_v55 = vsel %vm10827_vm11, %v3500_v63, %v3501_v5  ;;  %v3649_v63 = vld [vmem:[#allocation2 + $0x78] sm:$0xf]  ;;  %v3830_v5 = vld [vmem:[#allocation2 + $0x28] sm:$0xf] }
 0x227   : > { %v2666_v6 = vpop.permute.xlu0 %2665  ;;  %3549 = vrot.lane.b32.xlu1 %v3474_v25, %s10633_s29 }
 0x228   : > { %2732 = vst.msk [vmem:[#allocation3 + $0x78] sm:$0xf] %vm2701_vm1, %v2666_v6  ;;  %v3636_v6 = vld [vmem:[#allocation2 + $0x28] sm:$0xf] }
 0x229   : > { %3551 = vrot.lane.b32.xlu0 %v3478_v7, %s10633_s29  ;;  %v2668_v27 = vpop.permute.xlu1 %2667 }
 0x22a   : > { %2733 = vst.msk [vmem:[#allocation3 + $0x7c] sm:$0xf] %vm2701_vm1, %v2668_v27  ;;  %v3640_v27 = vld [vmem:[#allocation2 + $0x40] sm:$0xf] }
 0x22b   : > { %v3167_v39 = vpop.permute.xlu0 %3166  ;;  %3553 = vrot.lane.b32.xlu1 %v3481_v53, %s10633_s29  ;;  %v3641_v53 = vld [vmem:[#allocation2 + $0x48] sm:$0xf] }
 0x22c   : > { %3263 = vst.msk [vmem:[#allocation3] sm:$0xf] %vm3262_vm3, %v3167_v39 }
 0x22d   : > { %3555 = vrot.lane.b32.xlu0 %v3485_v0, %s10633_s29  ;;  %v3169_v12 = vpop.permute.xlu1 %3168  ;;  %v3644_v0 = vld [vmem:[#allocation2 + $0x58] sm:$0xf] }
 0x22e   : > { %3264 = vst.msk [vmem:[#allocation3 + $0x4] sm:$0xf] %vm3262_vm3, %v3169_v12 }
 0x22f   : > { %v3171_v14 = vpop.permute.xlu0 %3170  ;;  %3557 = vrot.lane.b32.xlu1 %v3488_v42, %s10633_s29 }
 0x230   : > { %3265 = vst.msk [vmem:[#allocation3 + $0x8] sm:$0xf] %vm3262_vm3, %v3171_v14  ;;  %v3826_v14 = vld [vmem:[#allocation2 + $0x18] sm:$0xf] }
 0x231   : > { %3559 = vrot.lane.b32.xlu0 %v3492_v43, %s10633_s29  ;;  %v3173_v51 = vpop.permute.xlu1 %3172  ;;  %v3875_v15 = vshrl.u32 %v3826_v14, 16  ;;  %v3878_v43 = vshll.u32 %v3826_v14, 16 }
 0x232   : > { %3266 = vst.msk [vmem:[#allocation3 + $0xc] sm:$0xf] %vm3262_vm3, %v3173_v51 }
 0x233   : > { %v3175_v30 = vpop.permute.xlu0 %3174  ;;  %3561 = vrot.lane.b32.xlu1 %v3495_v62, %s10633_s29  ;;  %v3888_v62 = vshrl.u32 %v3827_v54, 16 }
 0x234   : > { %3267 = vst.msk [vmem:[#allocation3 + $0x10] sm:$0xf] %vm3262_vm3, %v3175_v30  ;;  %v3829_v30 = vld [vmem:[#allocation2 + $0x24] sm:$0xf] }
 0x235   : > { %3563 = vrot.lane.b32.xlu0 %v3499_v21, %s10633_s29  ;;  %v3177_v10 = vpop.permute.xlu1 %3176 }
 0x236   : > { %3268 = vst.msk [vmem:[#allocation3 + $0x14] sm:$0xf] %vm3262_vm3, %v3177_v10  ;;  %v3877_v10 = vrot.slane %v3875_v15, 4 }
 0x237   : > { %v3179_v37 = vpop.permute.xlu0 %3178  ;;  %3565 = vrot.lane.b32.xlu1 %v3502_v55, %s10633_s29  ;;  %v3880_v55 = vrot.slane %v3878_v43, 5  ;;  %v4387_v43 = vld [vmem:[#allocation2 + $0x18] sm:$0xe] }
 0x238   : > { %3269 = vst.msk [vmem:[#allocation3 + $0x18] sm:$0xf] %vm3262_vm3, %v3179_v37  ;;  %v3899_v37 = vshrl.u32 %v3829_v30, 16 }
 0x239   : > { %3697 = vrot.lane.b32.xlu0 %v3633_v50, %s10634_s30  ;;  %v3181_v40 = vpop.permute.xlu1 %3180  ;;  %v3902_v50 = vshll.u32 %v3829_v30, 16 }
 0x23a   : > { %3270 = vst.msk [vmem:[#allocation3 + $0x1c] sm:$0xf] %vm3262_vm3, %v3181_v40  ;;  %v3650_v40 = vld [vmem:[#allocation2 + $0x7c] sm:$0xf] }
 0x23b   : > { %v3183_v8 = vpop.permute.xlu0 %3182  ;;  %3699 = vrot.lane.b32.xlu1 %v3634_v29, %s10634_s30 }
 0x23c   : > { %3271 = vst.msk [vmem:[#allocation3 + $0x20] sm:$0xf] %vm3262_vm3, %v3183_v8  ;;  %v3886_v8 = vrot.slane %v3884_v23, 5 }
 0x23d   : > { %3701 = vrot.lane.b32.xlu0 %v3635_v9, %s10634_s30  ;;  %v3185_v25 = vpop.permute.xlu1 %3184  ;;  %v3890_v9 = vrot.slane %v3888_v62, 4  ;;  %v12099_v62 = vld [vmem:[#allocation2 + $0x28] sm:$0xf] }
 0x23e   : > { %3272 = vst.msk [vmem:[#allocation3 + $0x24] sm:$0xf] %vm3262_vm3, %v3185_v25  ;;  %v3908_v25 = vshll.u32 %v3830_v5, 16 }
 0x23f   : > { %v3187_v46 = vpop.permute.xlu0 %3186  ;;  %3703 = vrot.lane.b32.xlu1 %v3636_v6, %s10634_s30  ;;  %v3912_v6 = vshrl.u32 %v3830_v5, 16 }
 0x240   : > { %3273 = vst.msk [vmem:[#allocation3 + $0x28] sm:$0xf] %vm3262_vm3, %v3187_v46  ;;  %v3651_v46 = vld [vmem:[#allocation2 + $0x84] sm:$0xf] }
 0x241   : > { %3705 = vrot.lane.b32.xlu0 %v3637_v32, %s10634_s30  ;;  %v3189_v31 = vpop.permute.xlu1 %3188 }
 0x242   : > { %3274 = vst.msk [vmem:[#allocation3 + $0x2c] sm:$0xf] %vm3262_vm3, %v3189_v31  ;;  %v3881_v31 = vor.u32 %v3880_v55, %v3877_v10  ;;  %v3836_v55 = vld [vmem:[#allocation2 + $0x40] sm:$0xf] }
 0x243   : > { %v3191_v7 = vpop.permute.xlu0 %3190  ;;  %3707 = vrot.lane.b32.xlu1 %v3638_v2, %s10634_s30  ;;  %v3828_v2 = vld [vmem:[#allocation2 + $0x20] sm:$0x1] }
 0x244   : > { %3275 = vst.msk [vmem:[#allocation3 + $0x30] sm:$0xf] %vm3262_vm3, %v3191_v7  ;;  %v3901_v7 = vrot.slane %v3899_v37, 4 }
 0x245   : > { %3709 = vrot.lane.b32.xlu0 %v3639_v22, %s10634_s30  ;;  %v3193_v1 = vpop.permute.xlu1 %3192  ;;  %v3904_v22 = vrot.slane %v3902_v50, 5 }
 0x246   : > { %3276 = vst.msk [vmem:[#allocation3 + $0x34] sm:$0xf] %vm3262_vm3, %v3193_v1  ;;  %v3652_v1 = vld [vmem:[#allocation2 + $0x88] sm:$0xf] }
 0x247   : > { %v3195_v44 = vpop.permute.xlu0 %3194  ;;  %3711 = vrot.lane.b32.xlu1 %v3640_v27, %s10634_s30 }
 0x248   : > { %3277 = vst.msk [vmem:[#allocation3 + $0x38] sm:$0xf] %vm3262_vm3, %v3195_v44  ;;  %v3891_v44 = vor.u32 %v3890_v9, %v3886_v8  ;;  %v3835_v9 = vld [vmem:[#allocation2 + $0x3c] sm:$0xf] }
 0x249   : > { %3713 = vrot.lane.b32.xlu0 %v3641_v53, %s10634_s30  ;;  %v3197_v39 = vpop.permute.xlu1 %3196  ;;  %v3910_v53 = vrot.slane %v3908_v25, 5 }
 0x24a   : > { %3278 = vst.msk [vmem:[#allocation3 + $0x3c] sm:$0xf] %vm3262_vm3, %v3197_v39  ;;  %v3914_v39 = vrot.slane %v3912_v6, 4  ;;  %v3892_v14 = vrot.slane %v3891_v44, 4  ;;  %v4389_v6 = vld [vmem:[#allocation2 + $0x20] sm:$0x1] }
 0x24b   : > { %v3199_v56 = vpop.permute.xlu0 %3198  ;;  %3715 = vrot.lane.b32.xlu1 %v3642_v57, %s10634_s30  ;;  %v3653_v57 = vld [vmem:[#allocation2 + $0x90] sm:$0xf] }
 0x24c   : > { %3279 = vst.msk [vmem:[#allocation3 + $0x40] sm:$0xf] %vm3262_vm3, %v3199_v56  ;;  %v3831_v56 = vld [vmem:[#allocation2 + $0x2c] sm:$0x1] }
 0x24d   : > { %3717 = vrot.lane.b32.xlu0 %v3643_v38, %s10634_s30  ;;  %v3201_v41 = vpop.permute.xlu1 %3200  ;;  %v3894_v38 = vshll.u32 %v3828_v2, 16  ;;  %v3918_v54 = vshll.u32 %v3831_v56, 16  ;;  %v4390_v2 = vld [vmem:[#allocation2 + $0x24] sm:$0xe]  ;;  %v3950_v56 = vshll.u32 %v3835_v9, 16 }
 0x24e   : > { %3280 = vst.msk [vmem:[#allocation3 + $0x44] sm:$0xf] %vm3262_vm3, %v3201_v41  ;;  %v12090_v41 = vld [vmem:[#allocation2 + $0x1c] sm:$0xf] }
 0x24f   : > { %v3203_v4 = vpop.permute.xlu0 %3202  ;;  %3719 = vrot.lane.b32.xlu1 %v3644_v0, %s10634_s30  ;;  %v3832_v0 = vld [vmem:[#allocation2 + $0x30] sm:$0xf]  ;;  %v3896_v23 = vrot.slane %v3894_v38, 5 }
 0x250   : > { %3281 = vst.msk [vmem:[#allocation3 + $0x48] sm:$0xf] %vm3262_vm3, %v3203_v4  ;;  %v3926_v30 = vshll.u32 %v3832_v0, 16 }
 0x251   : > { %3721 = vrot.lane.b32.xlu0 %v3645_v28, %s10634_s30  ;;  %v3205_v12 = vpop.permute.xlu1 %3204  ;;  %v3882_v28 = vrot.slane %v3881_v31, 4  ;;  %v3897_v37 = vsel %vm10820_vm8, %v3892_v14, %v3896_v23  ;;  %v3952_v23 = vrot.slane %v3950_v56, 5 }
 0x252   : > { %3282 = vst.msk [vmem:[#allocation3 + $0x4c] sm:$0xf] %vm3262_vm3, %v3205_v12  ;;  %v3905_v12 = vor.u32 %v3904_v22, %v3901_v7  ;;  %v3928_v7 = vrot.slane %v3926_v30, 5  ;;  %v3956_v22 = vshll.u32 %v3836_v55, 16 }
 0x253   : > { %v3207_v42 = vpop.permute.xlu0 %3206  ;;  %3723 = vrot.lane.b32.xlu1 %v3646_v58, %s10634_s30  ;;  %v3654_v58 = vld [vmem:[#allocation2 + $0x94] sm:$0xf]  ;;  %v3887_v15 = vsel %vm10820_vm8, %v3882_v28, %v3886_v8  ;;  %v10169_v8 = vrot.slane %v4387_v43, 9 }
 0x254   : > { %3283 = vst.msk [vmem:[#allocation3 + $0x50] sm:$0xf] %vm3262_vm3, %v3207_v42  ;;  %v3906_v5 = vrot.slane %v3905_v12, 4  ;;  %v10565_v12 = vld [vmem:[%s13957_s1 + $0x8] sm:$0xff]   ;;  %v12128_v14 = vrot.slane %v3956_v22, 5 }
 0x255   : > { %3725 = vrot.lane.b32.xlu0 %v3647_v59, %s10634_s30  ;;  %v3209_v16 = vpop.permute.xlu1 %3208  ;;  %v3915_v59 = vor.u32 %v3914_v39, %v3910_v53 }
 0x256   : > { %3284 = vst.msk [vmem:[#allocation3 + $0x54] sm:$0xf] %vm3262_vm3, %v3209_v16  ;;  %v3833_v16 = vld [vmem:[#allocation2 + $0x34] sm:$0xf]  ;;  %v3911_v25 = vsel %vm10820_vm8, %v3906_v5, %v3910_v53 }
 0x257   : > { %v3211_v51 = vpop.permute.xlu0 %3210  ;;  %3727 = vrot.lane.b32.xlu1 %v3648_v11, %s10634_s30  ;;  %v4485_v11 = vrot.slane %v12090_v41, 5  ;;  %v3936_v10 = vshrl.u32 %v3833_v16, 16  ;;  %v10564_v41 = vld [vmem:[%s13957_s1 + $0x10] ss:$0 sps:$4 sm:$0x33]  }
 0x258   : > { %3285 = vst.msk [vmem:[#allocation3 + $0x58] sm:$0xf] %vm3262_vm3, %v3211_v51  ;;  %v3923_v51 = vshrl.u32 %v3832_v0, 16  ;;  %v343_v0 = vld [vmem:[#allocation2 + $0xcc] sm:$0x1]  ;;  %10521 = vmatprep.subr.msk.bf16.mxu0 %vm4905_vm7, %v10564_v41 }
 0x259   : > { %3729 = vrot.lane.b32.xlu0 %v3649_v63, %s10634_s30  ;;  %v3213_v21 = vpop.permute.xlu1 %3212  ;;  %v3938_v39 = vrot.slane %v3936_v10, 4  ;;  %v344_v28 = vsel %vm10712_vm2, 0, %v343_v0  ;;  %v399_v10 = vld [vmem:[#allocation2 + $0xd4] sm:$0x1] }
 0x25a   : > { %3286 = vst.msk [vmem:[#allocation3 + $0x5c] sm:$0xf] %vm3262_vm3, %v3213_v21  ;;  %v3932_v21 = vshll.u32 %v3833_v16, 16  ;;  %v3925_v31 = vrot.slane %v3923_v51, 4  ;;  %345 = vst [vmem:[#allocation2 + $0xcc] sm:$0x1] %v344_v28 }
 0x25b   : > { %v3215_v29 = vpop.permute.xlu0 %3214  ;;  %3731 = vrot.lane.b32.xlu1 %v3650_v40, %s10634_s30  ;;  %v3916_v40 = vrot.slane %v3915_v59, 4 }
 0x25c   : > { %3287 = vst.msk [vmem:[#allocation3 + $0x60] sm:$0xf] %vm3262_vm3, %v3215_v29  ;;  %v3920_v29 = vrot.slane %v3918_v54, 5  ;;  %v12110_v44 = vrot.slane %v3932_v21, 5  ;;  %v4907_v54 = vsel %vm4905_vm7, %v10564_v41, 0  ;;  %v3929_v43 = vor.u32 %v3928_v7, %v3925_v31  ;;  %v10566_v21 = vld [vmem:[%s13957_s1] sm:$0xff]  }
 0x25d   : > { %3733 = vrot.lane.b32.xlu0 %v3651_v46, %s10634_s30  ;;  %v3217_v32 = vpop.permute.xlu1 %3216  ;;  %v4487_v46 = vrot.slane %v4485_v11, 4  ;;  %10446 = vmatpush3.bf16.msra.mxu0 %v4907_v54  ;;  %v3838_v7 = vld [vmem:[#allocation2 + $0x48] sm:$0xf]  ;;  %v4397_v41 = vld [vmem:[#allocation2 + $0x40] sm:$0xf] }
 0x25e   : > { %3288 = vst.msk [vmem:[#allocation3 + $0x64] sm:$0xf] %vm3262_vm3, %v3217_v32  ;;  %v4492_v32 = vrot.slane %v12099_v62, 5  ;;  %v3921_v53 = vsel %vm10820_vm8, %v3916_v40, %v3920_v29  ;;  %v3939_v5 = vor.u32 %v3938_v39, %v12110_v44  ;;  %10447 = vmatprep.subr.bf16.mxu0 %v10565_v12  ;;  %v3971_v0 = vshrl.u32 %v3838_v7, 16 }
 0x25f   : > { %v3219_v27 = vpop.permute.xlu0 %3218  ;;  %3735 = vrot.lane.b32.xlu1 %v3652_v1, %s10634_s30  ;;  %v3960_v1 = vshrl.u32 %v3836_v55, 16 }
 0x260   : > { %3289 = vst.msk [vmem:[#allocation3 + $0x68] sm:$0xf] %vm3262_vm3, %v3219_v27  ;;  %v3940_v35 = vrot.slane %v3939_v5, 4 }
 0x261   : > { %3737 = vrot.lane.b32.xlu0 %v3653_v57, %s10634_s30  ;;  %v3221_v4 = vpop.permute.xlu1 %3220  ;;  %v3947_v57 = vshrl.u32 %v3835_v9, 16  ;;  %v3962_v59 = vrot.slane %v3960_v1, 4  ;;  %10448 = vmatpush3.bf16.msra.mxu0 %v10565_v12  ;;  %v3839_v1 = vld [vmem:[#allocation2 + $0x4c] sm:$0xf] }
 0x262   : > { %3290 = vst.msk [vmem:[#allocation3 + $0x6c] sm:$0xf] %vm3262_vm3, %v3221_v4  ;;  %v4486_v4 = vsel %vm10827_vm11, %v10169_v8, %v4485_v11  ;;  %v3834_v11 = vld [vmem:[#allocation2 + $0x38] sm:$0x1]  ;;  %10449 = vmatprep.subr.bf16.mxu0 %v10566_v21 }
 0x263   : > { %v3223_v42 = vpop.permute.xlu0 %3222  ;;  %3739 = vrot.lane.b32.xlu1 %v3654_v58, %s10634_s30  ;;  %v4488_v58 = vrot.slane %v4389_v6, 5  ;;  %v3949_v51 = vrot.slane %v3947_v57, 4  ;;  %v3942_v29 = vshll.u32 %v3834_v11, 16  ;;  %v3963_v8 = vor.u32 %v3962_v59, %v12128_v14  ;;  %v4393_v57 = vld [vmem:[#allocation2 + $0x30] sm:$0xe] }
 0x264   : > { %3291 = vst.msk [vmem:[#allocation3 + $0x70] sm:$0xf] %vm3262_vm3, %v3223_v42  ;;  %v4392_v42 = vld [vmem:[#allocation2 + $0x2c] sm:$0x1]  ;;  %v3841_v59 = vld [vmem:[#allocation2 + $0x54] sm:$0xf] }
 0x265   : > { %4258 = vrot.lane.b32.xlu0 %v3887_v15, %s10635_s8  ;;  %v3225_v63 = vpop.permute.xlu1 %3224  ;;  %v10170_v15 = vrot.slane %v4390_v2, 9  ;;  %v4489_v62 = vsel %vm10827_vm11, %v4487_v46, %v4488_v58  ;;  %v4495_v40 = vrot.slane %v4392_v42, 5  ;;  %v3953_v6 = vor.u32 %v3952_v23, %v3949_v51  ;;  %v4394_v46 = vld [vmem:[#allocation2 + $0x34] sm:$0xf]  ;;  %10450 = vmatpush3.bf16.msra.mxu0 %v10566_v21  ;;  %v4395_v11 = vld [vmem:[#allocation2 + $0x38] sm:$0x1] }
 0x266   : > { %3292 = vst.msk [vmem:[#allocation3 + $0x74] sm:$0xf] %vm3262_vm3, %v3225_v63  ;;  %v4494_v63 = vrot.slane %v4492_v32, 4  ;;  %v3964_v39 = vrot.slane %v3963_v8, 4  ;;  %v4499_v56 = vrot.slane %v4394_v46, 5  ;;  %v3980_v58 = vshll.u32 %v3839_v1, 16 }
 0x267   : > { %v3227_v50 = vpop.permute.xlu0 %3226  ;;  %4260 = vrot.lane.b32.xlu1 %v3897_v37, %s10635_s8  ;;  %v4493_v55 = vsel %vm10827_vm11, %v10170_v15, %v4492_v32  ;;  %v3837_v37 = vld [vmem:[#allocation2 + $0x44] sm:$0x1]  ;;  %v3984_v42 = vshrl.u32 %v3839_v1, 16  ;;  %v4506_v23 = vrot.slane %v4397_v41, 5  ;;  %v3995_v21 = vshrl.u32 %v3841_v59, 16 }
 0x268   : > { %3293 = vst.msk [vmem:[#allocation3 + $0x78] sm:$0xf] %vm3262_vm3, %v3227_v50  ;;  %v400_v50 = vsel %vm10774_vm4, 0, %v399_v10  ;;  %v4496_v32 = vsel %vm10827_vm11, %v4494_v63, %v4495_v40  ;;  %v3966_v2 = vshll.u32 %v3837_v37, 16  ;;  %v4501_v51 = vrot.slane %v4499_v56, 4 }
 0x269   : > { %4262 = vrot.lane.b32.xlu0 %v3911_v25, %s10635_s8  ;;  %v3229_v27 = vpop.permute.xlu1 %3228  ;;  %401 = vst [vmem:[#allocation2 + $0xd4] sm:$0x1] %v400_v50  ;;  %v3930_v25 = vrot.slane %v3929_v43, 4  ;;  %v10171_v43 = vrot.slane %v4393_v57, 9  ;;  %v3973_v63 = vrot.slane %v3971_v0, 4  ;;  %v3998_v10 = vshll.u32 %v3841_v59, 16 }
 0x26a   : > { %3294 = vst.msk [vmem:[#allocation3 + $0x7c] sm:$0xf] %vm3262_vm3, %v3229_v27  ;;  %v3944_v27 = vrot.slane %v3942_v29, 5  ;;  %v3986_v37 = vrot.slane %v3984_v42, 4  ;;  %v4502_v8 = vrot.slane %v4395_v11, 5  ;;  %vm3793_vm4 = vcmask 224448  }
 0x26b   : > { %v3504_v38 = vpop.permute.xlu0 %3503  ;;  %4264 = vrot.lane.b32.xlu1 %v3921_v53, %s10635_s8  ;;  %v3935_v22 = vsel %vm10820_vm8, %v3930_v25, %v12110_v44  ;;  %v3968_v44 = vrot.slane %v3966_v2, 5  ;;  %v4500_v29 = vsel %vm10827_vm11, %v10171_v43, %v4499_v56  ;;  %v4398_v46 = vld [vmem:[#allocation2 + $0x44] sm:$0x1]  ;;  %v4000_v2 = vrot.slane %v3998_v10, 5  ;;  %v3844_v59 = vld [vmem:[#allocation2 + $0x60] sm:$0xf] }
 0x26c   : > { %3600 = vst.msk [vmem:[#allocation3] sm:$0xf] %vm3599_vm6, %v3504_v38  ;;  %v3954_v38 = vrot.slane %v3953_v6, 4  ;;  %v3945_v28 = vsel %vm10820_vm8, %v3940_v35, %v3944_v27  ;;  %v4503_v6 = vsel %vm10827_vm11, %v4501_v51, %v4502_v8  ;;  %v3997_v35 = vrot.slane %v3995_v21, 4  ;;  %v4399_v11 = vld [vmem:[#allocation2 + $0x48] sm:$0xe] }
 0x26d   : > { %4595 = vrot.lane.b32.xlu0 %v4486_v4, %s10636_s13  ;;  %v3506_v16 = vpop.permute.xlu1 %3505  ;;  %v3974_v4 = vshll.u32 %v3838_v7, 16  ;;  %v3969_v15 = vsel %vm10820_vm8, %v3964_v39, %v3968_v44  ;;  %v4509_v56 = vrot.slane %v4398_v46, 5  ;;  %v4403_v8 = vld [vmem:[#allocation2 + $0x58] sm:$0xf] }
 0x26e   : > { %3601 = vst.msk [vmem:[#allocation3 + $0x4] sm:$0xf] %vm3599_vm6, %v3506_v16  ;;  %v3959_v54 = vsel %vm10820_vm8, %v3954_v38, %v12128_v14  ;;  %v3842_v16 = vld [vmem:[#allocation2 + $0x58] sm:$0xf]  ;;  %v3982_v14 = vrot.slane %v3980_v58, 5  ;;  %v4001_v0 = vor.u32 %v4000_v2, %v3997_v35 }
 0x26f   : > { %v3508_v30 = vpop.permute.xlu0 %3507  ;;  %4597 = vrot.lane.b32.xlu1 %v4489_v62, %s10636_s13  ;;  %v3976_v5 = vrot.slane %v3974_v4, 5  ;;  %v4004_v50 = vshll.u32 %v3842_v16, 16  ;;  %v4008_v40 = vshrl.u32 %v3842_v16, 16  ;;  %v3843_v4 = vld [vmem:[#allocation2 + $0x5c] sm:$0x1] }
 0x270   : > { %3602 = vst.msk [vmem:[#allocation3 + $0x8] sm:$0xf] %vm3599_vm6, %v3508_v30  ;;  %v4396_v30 = vld [vmem:[#allocation2 + $0x3c] sm:$0xe]  ;;  %v3987_v1 = vor.u32 %v3986_v37, %v3982_v14  ;;  %v3845_v16 = vld [vmem:[#allocation2 + $0x64] sm:$0xf] }
 0x271   : > { %4599 = vrot.lane.b32.xlu0 %v4493_v55, %s10636_s13  ;;  %v3510_v9 = vpop.permute.xlu1 %3509  ;;  %v4006_v27 = vrot.slane %v4004_v50, 5  ;;  %v4010_v39 = vrot.slane %v4008_v40, 4  ;;  %v4014_v43 = vshll.u32 %v3843_v4, 16  ;;  %v4032_v37 = vshrl.u32 %v3845_v16, 16  ;;  %v3847_v50 = vld [vmem:[#allocation2 + $0x6c] sm:$0xf] }
 0x272   : > { %3603 = vst.msk [vmem:[#allocation3 + $0xc] sm:$0xf] %vm3599_vm6, %v3510_v9  ;;  %v10172_v9 = vrot.slane %v4396_v30, 9  ;;  %v3988_v58 = vrot.slane %v3987_v1, 4  ;;  %v4019_v30 = vshrl.u32 %v3844_v59, 16 }
 0x273   : > { %v3512_v31 = vpop.permute.xlu0 %3511  ;;  %4601 = vrot.lane.b32.xlu1 %v4496_v32, %s10636_s13  ;;  %v3977_v32 = vor.u32 %v3976_v5, %v3973_v63  ;;  %v4011_v42 = vor.u32 %v4010_v39, %v4006_v27  ;;  %v4022_v63 = vshll.u32 %v3844_v59, 16  ;;  %v3848_v5 = vld [vmem:[#allocation2 + $0x70] sm:$0xf]  ;;  %v4402_v39 = vld [vmem:[#allocation2 + $0x54] sm:$0xe] }
 0x274   : > { %3604 = vst.msk [vmem:[#allocation3 + $0x10] sm:$0xf] %vm3599_vm6, %v3512_v31  ;;  %v3840_v31 = vld [vmem:[#allocation2 + $0x50] sm:$0x1]  ;;  %v4507_v57 = vsel %vm10827_vm11, %v10172_v9, %v4506_v23  ;;  %v4016_v9 = vrot.slane %v4014_v43, 5  ;;  %v4056_v46 = vshrl.u32 %v3848_v5, 16 }
 0x275   : > { %4266 = vrot.lane.b32.xlu0 %v3935_v22, %s10635_s8  ;;  %v3514_v53 = vpop.permute.xlu1 %3513  ;;  %v4508_v22 = vrot.slane %v4506_v23, 4  ;;  %v3978_v41 = vrot.slane %v3977_v32, 4  ;;  %v4021_v35 = vrot.slane %v4019_v30, 4  ;;  %v4024_v2 = vrot.slane %v4022_v63, 5  ;;  %v3846_v4 = vld [vmem:[#allocation2 + $0x68] sm:$0x1] }
 0x276   : > { %3605 = vst.msk [vmem:[#allocation3 + $0x14] sm:$0xf] %vm3599_vm6, %v3514_v53  ;;  %v3990_v53 = vshll.u32 %v3840_v31, 16  ;;  %v4401_v31 = vld [vmem:[#allocation2 + $0x50] sm:$0x1]  ;;  %v4038_v30 = vshll.u32 %v3846_v4, 16 }
 0x277   : > { %v3516_v12 = vpop.permute.xlu0 %3515  ;;  %4268 = vrot.lane.b32.xlu1 %v3945_v28, %s10635_s8  ;;  %v4400_v28 = vld [vmem:[#allocation2 + $0x4c] sm:$0xf]  ;;  %v3854_v4 = vld [vmem:[#allocation2 + $0x88] sm:$0xf] }
 0x278   : > { %3606 = vst.msk [vmem:[#allocation3 + $0x18] sm:$0xf] %vm3599_vm6, %v3516_v12  ;;  %v4510_v12 = vsel %vm10827_vm11, %v4508_v22, %v4509_v56  ;;  %v4513_v51 = vrot.slane %v4400_v28, 5  ;;  %v4046_v22 = vshll.u32 %v3847_v50, 16 }
 0x279   : > { %4270 = vrot.lane.b32.xlu0 %v3959_v54, %s10635_s8  ;;  %v3518_v62 = vpop.permute.xlu1 %3517  ;;  %v3983_v54 = vsel %vm10820_vm8, %v3978_v41, %v3982_v14  ;;  %v4028_v14 = vshll.u32 %v3845_v16, 16  ;;  %v4404_v41 = vld [vmem:[#allocation2 + $0x5c] sm:$0x1]  ;;  %v3849_v16 = vld [vmem:[#allocation2 + $0x74] sm:$0x1] }
 0x27a   : > { %3607 = vst.msk [vmem:[#allocation3 + $0x1c] sm:$0xf] %vm3599_vm6, %v3518_v62  ;;  %v4002_v62 = vrot.slane %v4001_v0, 4  ;;  %v4516_v0 = vrot.slane %v4401_v31, 5 }
 0x27b   : > { %v3520_v55 = vpop.permute.xlu0 %3519  ;;  %4272 = vrot.lane.b32.xlu1 %v3969_v15, %s10635_s8  ;;  %v3992_v15 = vrot.slane %v3990_v53, 5  ;;  %v4030_v56 = vrot.slane %v4028_v14, 5  ;;  %v4034_v53 = vrot.slane %v4032_v37, 4  ;;  %v4406_v14 = vld [vmem:[#allocation2 + $0x64] sm:$0xf] }
 0x27c   : > { %3608 = vst.msk [vmem:[#allocation3 + $0x20] sm:$0xf] %vm3599_vm6, %v3520_v55  ;;  %v4012_v55 = vrot.slane %v4011_v42, 4  ;;  %v4007_v40 = vsel %vm10820_vm8, %v4002_v62, %v4006_v27  ;;  %v4025_v42 = vor.u32 %v4024_v2, %v4021_v35  ;;  %v4523_v62 = vrot.slane %v4404_v41, 5  ;;  %v4407_v35 = vld [vmem:[#allocation2 + $0x68] sm:$0x1] }
 0x27d   : > { %4603 = vrot.lane.b32.xlu0 %v4500_v29, %s10636_s13  ;;  %v3522_v25 = vpop.permute.xlu1 %3521  ;;  %v3993_v21 = vsel %vm10820_vm8, %v3988_v58, %v3992_v15  ;;  %v10173_v29 = vrot.slane %v4399_v11, 9  ;;  %v10174_v58 = vrot.slane %v4402_v39, 9  ;;  %v4527_v31 = vrot.slane %v4406_v14, 5 }
 0x27e   : > { %3609 = vst.msk [vmem:[#allocation3 + $0x24] sm:$0xf] %vm3599_vm6, %v3522_v25  ;;  %v4515_v25 = vrot.slane %v4513_v51, 4  ;;  %v4017_v1 = vsel %vm10820_vm8, %v4012_v55, %v4016_v9  ;;  %v4405_v9 = vld [vmem:[#allocation2 + $0x60] sm:$0xe] }
 0x27f   : > { %v3524_v7 = vpop.permute.xlu0 %3523  ;;  %4605 = vrot.lane.b32.xlu1 %v4503_v6, %s10636_s13  ;;  %v4052_v6 = vshll.u32 %v3848_v5, 16  ;;  %v4062_v5 = vshll.u32 %v3849_v16, 16  ;;  %v4410_v16 = vld [vmem:[#allocation2 + $0x74] sm:$0x1] }
 0x280   : > { %3610 = vst.msk [vmem:[#allocation3 + $0x28] sm:$0xf] %vm3599_vm6, %v3524_v7  ;;  %v4043_v7 = vshrl.u32 %v3847_v50, 16  ;;  %v4517_v15 = vsel %vm10827_vm11, %v4515_v25, %v4516_v0  ;;  %v3851_v25 = vld [vmem:[#allocation2 + $0x7c] sm:$0xf]  ;;  %v10175_v0 = vrot.slane %v4405_v9, 9 }
 0x281   : > { %4607 = vrot.lane.b32.xlu0 %v4507_v57, %s10636_s13  ;;  %v3526_v38 = vpop.permute.xlu1 %3525  ;;  %v4520_v57 = vrot.slane %v4403_v8, 5  ;;  %v4054_v28 = vrot.slane %v4052_v6, 5  ;;  %v4040_v6 = vrot.slane %v4038_v30, 5  ;;  %v4100_v30 = vshll.u32 %v3854_v4, 16 }
 0x282   : > { %3611 = vst.msk [vmem:[#allocation3 + $0x2c] sm:$0xf] %vm3599_vm6, %v3526_v38  ;;  %v4514_v38 = vsel %vm10827_vm11, %v10173_v29, %v4513_v51  ;;  %v4045_v59 = vrot.slane %v4043_v7, 4  ;;  %v4035_v51 = vor.u32 %v4034_v53, %v4030_v56  ;;  %v3850_v29 = vld [vmem:[#allocation2 + $0x78] sm:$0xf]  ;;  %v4080_v53 = vshrl.u32 %v3851_v25, 16 }
 0x283   : > { %v3528_v44 = vpop.permute.xlu0 %3527  ;;  %4609 = vrot.lane.b32.xlu1 %v4510_v12, %s10636_s13  ;;  %v4058_v12 = vrot.slane %v4056_v46, 4  ;;  %v4522_v11 = vrot.slane %v4520_v57, 4  ;;  %v4537_v14 = vrot.slane %v4410_v16, 5 }
 0x284   : > { %3612 = vst.msk [vmem:[#allocation3 + $0x30] sm:$0xf] %vm3599_vm6, %v3528_v44 }
 0x285   : > { %4274 = vrot.lane.b32.xlu0 %v3983_v54, %s10635_s8  ;;  %v3530_v23 = vpop.permute.xlu1 %3529  ;;  %v4048_v54 = vrot.slane %v4046_v22, 5  ;;  %v4059_v63 = vor.u32 %v4058_v12, %v4054_v28  ;;  %v4524_v37 = vsel %vm10827_vm11, %v4522_v11, %v4523_v62  ;;  %v4409_v22 = vld [vmem:[#allocation2 + $0x70] sm:$0xf]  ;;  %v4082_v62 = vrot.slane %v4080_v53, 4 }
 0x286   : > { %3613 = vst.msk [vmem:[#allocation3 + $0x34] sm:$0xf] %vm3599_vm6, %v3530_v23  ;;  %v4521_v23 = vsel %vm10827_vm11, %v10174_v58, %v4520_v57  ;;  %v4530_v58 = vrot.slane %v4407_v35, 5  ;;  %v3855_v35 = vld [vmem:[#allocation2 + $0x8c] sm:$0x1] }
 0x287   : > { %v3532_v10 = vpop.permute.xlu0 %3531  ;;  %4276 = vrot.lane.b32.xlu1 %v3993_v21, %s10635_s8  ;;  %v4049_v55 = vor.u32 %v4048_v54, %v4045_v59  ;;  %v4060_v46 = vrot.slane %v4059_v63, 4  ;;  %v4534_v59 = vrot.slane %v4409_v22, 5  ;;  %v4104_v63 = vshrl.u32 %v3854_v4, 16 }
 0x288   : > { %3614 = vst.msk [vmem:[#allocation3 + $0x38] sm:$0xf] %vm3599_vm6, %v3532_v10  ;;  %v4026_v10 = vrot.slane %v4025_v42, 4  ;;  %v4408_v42 = vld [vmem:[#allocation2 + $0x6c] sm:$0xe] }
 0x289   : > { %4278 = vrot.lane.b32.xlu0 %v4007_v40, %s10635_s8  ;;  %v3534_v32 = vpop.permute.xlu1 %3533  ;;  %v4036_v40 = vrot.slane %v4035_v51, 4  ;;  %v4050_v7 = vrot.slane %v4049_v55, 4  ;;  %v10176_v55 = vrot.slane %v4408_v42, 9 }
 0x28a   : > { %3615 = vst.msk [vmem:[#allocation3 + $0x3c] sm:$0xf] %vm3599_vm6, %v3534_v32  ;;  %v4031_v8 = vsel %vm10820_vm8, %v4026_v10, %v4030_v56  ;;  %v4064_v32 = vrot.slane %v4062_v5, 5  ;;  %v4076_v56 = vshll.u32 %v3851_v25, 16  ;;  %v4528_v5 = vsel %vm10827_vm11, %v10175_v0, %v4527_v31 }
 0x28b   : > { %v3536_v27 = vpop.permute.xlu0 %3535  ;;  %4280 = vrot.lane.b32.xlu1 %v4017_v1, %s10635_s8  ;;  %v4067_v1 = vshrl.u32 %v3850_v29, 16  ;;  %v4041_v39 = vsel %vm10820_vm8, %v4036_v40, %v4040_v6  ;;  %v4055_v41 = vsel %vm10820_vm8, %v4050_v7, %v4054_v28 }
 0x28c   : > { %3616 = vst.msk [vmem:[#allocation3 + $0x40] sm:$0xf] %vm3599_vm6, %v3536_v27  ;;  %v4070_v27 = vshll.u32 %v3850_v29, 16  ;;  %v4065_v12 = vsel %vm10820_vm8, %v4060_v46, %v4064_v32  ;;  %v4102_v46 = vrot.slane %v4100_v30, 5  ;;  %v4106_v32 = vrot.slane %v4104_v63, 4 }
 0x28d   : > { %4611 = vrot.lane.b32.xlu0 %v4514_v38, %s10636_s13  ;;  %v3538_v44 = vpop.permute.xlu1 %3537  ;;  %v3853_v38 = vld [vmem:[#allocation2 + $0x84] sm:$0xf] }
 0x28e   : > { %3617 = vst.msk [vmem:[#allocation3 + $0x44] sm:$0xf] %vm3599_vm6, %v3538_v44  ;;  %v4529_v44 = vrot.slane %v4527_v31, 4  ;;  %v4091_v11 = vshrl.u32 %v3853_v38, 16  ;;  %v4094_v51 = vshll.u32 %v3853_v38, 16  ;;  %v4535_v31 = vsel %vm10827_vm11, %v10176_v55, %v4534_v59 }
 0x28f   : > { %v3540_v43 = vpop.permute.xlu0 %3539  ;;  %4613 = vrot.lane.b32.xlu1 %v4517_v15, %s10636_s13  ;;  %v4069_v15 = vrot.slane %v4067_v1, 4  ;;  %v4107_v53 = vor.u32 %v4106_v32, %v4102_v46  ;;  %v4110_v38 = vshll.u32 %v3855_v35, 16 }
 0x290   : > { %3618 = vst.msk [vmem:[#allocation3 + $0x48] sm:$0xf] %vm3599_vm6, %v3540_v43  ;;  %v4072_v43 = vrot.slane %v4070_v27, 5  ;;  %v4531_v10 = vsel %vm10827_vm11, %v4529_v44, %v4530_v58  ;;  %v4093_v29 = vrot.slane %v4091_v11, 4  ;;  %v4412_v27 = vld [vmem:[#allocation2 + $0x7c] sm:$0xf] }
 0x291   : > { %4615 = vrot.lane.b32.xlu0 %v4521_v23, %s10636_s13  ;;  %v3542_v21 = vpop.permute.xlu1 %3541  ;;  %v4078_v23 = vrot.slane %v4076_v56, 5  ;;  %v4541_v0 = vrot.slane %v4412_v27, 5  ;;  %v4413_v44 = vld [vmem:[#allocation2 + $0x80] sm:$0x1]  ;;  %v4415_v58 = vld [vmem:[#allocation2 + $0x88] sm:$0xf] }
 0x292   : > { %3619 = vst.msk [vmem:[#allocation3 + $0x4c] sm:$0xf] %vm3599_vm6, %v3542_v21  ;;  %v3852_v21 = vld [vmem:[#allocation2 + $0x80] sm:$0x1]  ;;  %v4073_v40 = vor.u32 %v4072_v43, %v4069_v15  ;;  %v4112_v16 = vrot.slane %v4110_v38, 5  ;;  %v4548_v30 = vrot.slane %v4415_v58, 5 }
 0x293   : > { %v3544_v50 = vpop.permute.xlu0 %3543  ;;  %4617 = vrot.lane.b32.xlu1 %v4524_v37, %s10636_s13  ;;  %v4083_v25 = vor.u32 %v4082_v62, %v4078_v23  ;;  %v4086_v6 = vshll.u32 %v3852_v21, 16  ;;  %v4411_v15 = vld [vmem:[#allocation2 + $0x78] sm:$0xe]  ;;  %v3856_v43 = vld [vmem:[#allocation2 + $0x90] sm:$0xf] }
 0x294   : > { %3620 = vst.msk [vmem:[#allocation3 + $0x50] sm:$0xf] %vm3599_vm6, %v3544_v50  ;;  %v4536_v50 = vrot.slane %v4534_v59, 4  ;;  %v4074_v22 = vrot.slane %v4073_v40, 4  ;;  %v4414_v62 = vld [vmem:[#allocation2 + $0x84] sm:$0xe] }
 0x295   : > { %4282 = vrot.lane.b32.xlu0 %v4031_v8, %s10635_s8  ;;  %v3546_v2 = vpop.permute.xlu1 %3545  ;;  %v4096_v8 = vrot.slane %v4094_v51, 5  ;;  %v4088_v56 = vrot.slane %v4086_v6, 5  ;;  %v3857_v51 = vld [vmem:[#allocation2 + $0x94] sm:$0xf]  ;;  %v4416_v21 = vld [vmem:[#allocation2 + $0x8c] sm:$0x1] }
 0x296   : > { %3621 = vst.msk [vmem:[#allocation3 + $0x54] sm:$0xf] %vm3599_vm6, %v3546_v2  ;;  %v4538_v7 = vsel %vm10827_vm11, %v4536_v50, %v4537_v14  ;;  %v4118_v55 = vshll.u32 %v3856_v43, 16  ;;  %v4124_v50 = vshll.u32 %v3857_v51, 16  ;;  %v4128_v40 = vshrl.u32 %v3857_v51, 16 }
 0x297   : > { %v3548_v57 = vpop.permute.xlu0 %3547  ;;  %4284 = vrot.lane.b32.xlu1 %v4041_v39, %s10635_s8  ;;  %v4097_v1 = vor.u32 %v4096_v8, %v4093_v29  ;;  %v3859_v29 = vld [vmem:[#allocation2 + $0x9c] sm:$0xf]  ;;  %v10178_v6 = vrot.slane %v4414_v62, 9  ;;  %v4551_v32 = vrot.slane %v4416_v21, 5  ;;  %v3858_v38 = vld [vmem:[#allocation2 + $0x98] sm:$0x1] }
 0x298   : > { %3622 = vst.msk [vmem:[#allocation3 + $0x58] sm:$0xf] %vm3599_vm6, %v3548_v57  ;;  %v4084_v57 = vrot.slane %v4083_v25, 4  ;;  %v4126_v27 = vrot.slane %v4124_v50, 5  ;;  %v4417_v50 = vld [vmem:[#allocation2 + $0x90] sm:$0xe] }
 0x299   : > { %4286 = vrot.lane.b32.xlu0 %v4055_v41, %s10635_s8  ;;  %v3550_v54 = vpop.permute.xlu1 %3549  ;;  %v4079_v41 = vsel %vm10820_vm8, %v4074_v22, %v4078_v23  ;;  %v4544_v23 = vrot.slane %v4413_v44, 5  ;;  %v4142_v22 = vshll.u32 %v3859_v29, 16 }
 0x29a   : > { %3623 = vst.msk [vmem:[#allocation3 + $0x5c] sm:$0xf] %vm3599_vm6, %v3550_v54  ;;  %v4089_v42 = vsel %vm10820_vm8, %v4084_v57, %v4088_v56  ;;  %v4108_v54 = vrot.slane %v4107_v53, 4  ;;  %v4549_v53 = vsel %vm10827_vm11, %v10178_v6, %v4548_v30  ;;  %v4421_v6 = vld [vmem:[#allocation2 + $0xa0] sm:$0xf] }
 0x29b   : > { %v3552_v28 = vpop.permute.xlu0 %3551  ;;  %4288 = vrot.lane.b32.xlu1 %v4065_v12, %s10635_s8  ;;  %v4098_v12 = vrot.slane %v4097_v1, 4  ;;  %v4144_v44 = vrot.slane %v4142_v22, 5 }
 0x29c   : > { %3624 = vst.msk [vmem:[#allocation3 + $0x60] sm:$0xf] %vm3599_vm6, %v3552_v28  ;;  %v4543_v28 = vrot.slane %v4541_v0, 4  ;;  %v4113_v14 = vsel %vm10820_vm8, %v4108_v54, %v4112_v16 }
 0x29d   : > { %4619 = vrot.lane.b32.xlu0 %v4528_v5, %s10636_s13  ;;  %v3554_v37 = vpop.permute.xlu1 %3553  ;;  %v4103_v11 = vsel %vm10820_vm8, %v4098_v12, %v4102_v46  ;;  %v10177_v5 = vrot.slane %v4411_v15, 9  ;;  %v4550_v46 = vrot.slane %v4548_v30, 4  ;;  %v3655_v15 = vld [vmem:[#allocation2 + $0x9c] sm:$0xf] }
 0x29e   : > { %3625 = vst.msk [vmem:[#allocation3 + $0x64] sm:$0xf] %vm3599_vm6, %v3554_v37  ;;  %v4545_v25 = vsel %vm10827_vm11, %v4543_v28, %v4544_v23  ;;  %v3656_v23 = vld [vmem:[#allocation2 + $0xa0] sm:$0xf] }
 0x29f   : > { %v3556_v9 = vpop.permute.xlu0 %3555  ;;  %4621 = vrot.lane.b32.xlu1 %v4531_v10, %s10636_s13  ;;  %v4115_v10 = vshrl.u32 %v3856_v43, 16  ;;  %v4542_v8 = vsel %vm10827_vm11, %v10177_v5, %v4541_v0  ;;  %v4552_v0 = vsel %vm10827_vm11, %v4550_v46, %v4551_v32  ;;  %v3861_v43 = vld [vmem:[#allocation2 + $0xa4] sm:$0x1]  ;;  %v4419_v32 = vld [vmem:[#allocation2 + $0x98] sm:$0x1] }
 0x2a0   : > { %3626 = vst.msk [vmem:[#allocation3 + $0x68] sm:$0xf] %vm3599_vm6, %v3556_v9  ;;  %v3860_v9 = vld [vmem:[#allocation2 + $0xa0] sm:$0xf]  ;;  %v4158_v21 = vshll.u32 %v3861_v43, 16 }
 0x2a1   : > { %4623 = vrot.lane.b32.xlu0 %v4535_v31, %s10636_s13  ;;  %v3558_v2 = vpop.permute.xlu1 %3557  ;;  %v4117_v35 = vrot.slane %v4115_v10, 4  ;;  %v4148_v57 = vshll.u32 %v3860_v9, 16  ;;  %v4152_v56 = vshrl.u32 %v3860_v9, 16 }
 0x2a2   : > { %3627 = vst.msk [vmem:[#allocation3 + $0x6c] sm:$0xf] %vm3599_vm6, %v3558_v2  ;;  %v4120_v2 = vrot.slane %v4118_v55, 5  ;;  %v4418_v55 = vld [vmem:[#allocation2 + $0x94] sm:$0xf]  ;;  %v4160_v9 = vrot.slane %v4158_v21, 5 }
 0x2a3   : > { %v3560_v39 = vpop.permute.xlu0 %3559  ;;  %4625 = vrot.lane.b32.xlu1 %v4538_v7, %s10636_s13  ;;  %v4139_v7 = vshrl.u32 %v3859_v29, 16  ;;  %v4150_v54 = vrot.slane %v4148_v57, 5  ;;  %v4154_v16 = vrot.slane %v4152_v56, 4  ;;  %v4420_v57 = vld [vmem:[#allocation2 + $0x9c] sm:$0xe] }
 0x2a4   : > { %3628 = vst.msk [vmem:[#allocation3 + $0x70] sm:$0xf] %vm3599_vm6, %v3560_v39  ;;  %v4130_v39 = vrot.slane %v4128_v40, 4  ;;  %v4422_v56 = vld [vmem:[#allocation2 + $0xa4] sm:$0x1] }
 0x2a5   : > { %4290 = vrot.lane.b32.xlu0 %v4079_v41, %s10635_s8  ;;  %v3562_v4 = vpop.permute.xlu1 %3561  ;;  %v4141_v12 = vrot.slane %v4139_v7, 4  ;;  %v4155_v5 = vor.u32 %v4154_v16, %v4150_v54  ;;  %v3862_v7 = vld [vmem:[#allocation2 + $0xa8] sm:$0xf] }
 0x2a6   : > { %3629 = vst.msk [vmem:[#allocation3 + $0x74] sm:$0xf] %vm3599_vm6, %v3562_v4  ;;  %v4121_v4 = vor.u32 %v4120_v2, %v4117_v35  ;;  %v10179_v35 = vrot.slane %v4417_v50, 9  ;;  %v4562_v2 = vrot.slane %v4421_v6, 5  ;;  %v3864_v50 = vld [vmem:[#allocation2 + $0xb0] sm:$0x1] }
 0x2a7   : > { %v3564_v59 = vpop.permute.xlu0 %3563  ;;  %4292 = vrot.lane.b32.xlu1 %v4089_v42, %s10635_s8  ;;  %v4131_v42 = vor.u32 %v4130_v39, %v4126_v27  ;;  %v4145_v28 = vor.u32 %v4144_v44, %v4141_v12  ;;  %v4558_v39 = vrot.slane %v4419_v32, 5  ;;  %v4565_v44 = vrot.slane %v4422_v56, 5 }
 0x2a8   : > { %3630 = vst.msk [vmem:[#allocation3 + $0x78] sm:$0xf] %vm3599_vm6, %v3564_v59  ;;  %v4134_v59 = vshll.u32 %v3858_v38, 16  ;;  %v4122_v51 = vrot.slane %v4121_v4, 4  ;;  %v3863_v38 = vld [vmem:[#allocation2 + $0xac] sm:$0xf] }
 0x2a9   : > { %4294 = vrot.lane.b32.xlu0 %v4103_v11, %s10635_s8  ;;  %v3566_v63 = vpop.permute.xlu1 %3565  ;;  %v4132_v30 = vrot.slane %v4131_v42, 4  ;;  %v10180_v4 = vrot.slane %v4420_v57, 9  ;;  %v4564_v12 = vrot.slane %v4562_v2, 4  ;;  %v4176_v16 = vshrl.u32 %v3863_v38, 16  ;;  %v3660_v57 = vld [vmem:[#allocation2 + $0xb8] sm:$0xf] }
 0x2aa   : > { %3631 = vst.msk [vmem:[#allocation3 + $0x7c] sm:$0xf] %vm3599_vm6, %v3566_v63  ;;  %v4136_v63 = vrot.slane %v4134_v59, 5  ;;  %v4127_v10 = vsel %vm10820_vm8, %v4122_v51, %v4126_v27  ;;  %v4182_v32 = vshll.u32 %v3864_v50, 16  ;;  %v4428_v50 = vld [vmem:[#allocation2 + $0xbc] sm:$0x1] }
 0x2ab   : > { %v3698_v37 = vpop.permute.xlu0 %3697  ;;  %4296 = vrot.lane.b32.xlu1 %v4113_v14, %s10635_s8  ;;  %v4563_v43 = vsel %vm10827_vm11, %v10180_v4, %v4562_v2  ;;  %v3659_v2 = vld [vmem:[#allocation2 + $0xb4] sm:$0xf] }
 0x2ac   : > { %3794 = vst.msk [vmem:[#allocation3] sm:$0xf] %vm3793_vm4, %v3698_v37  ;;  %v4146_v37 = vrot.slane %v4145_v28, 4  ;;  %v4137_v40 = vsel %vm10820_vm8, %v4132_v30, %v4136_v63 }
 0x2ad   : > { %4627 = vrot.lane.b32.xlu0 %v4542_v8, %s10636_s13  ;;  %v3700_v31 = vpop.permute.xlu1 %3699  ;;  %v4156_v8 = vrot.slane %v4155_v5, 4 }
 0x2ae   : > { %3795 = vst.msk [vmem:[#allocation3 + $0x4] sm:$0xf] %vm3793_vm4, %v3700_v31  ;;  %v4151_v46 = vsel %vm10820_vm8, %v4146_v37, %v4150_v54  ;;  %v4172_v54 = vshll.u32 %v3863_v38, 16  ;;  %v3657_v37 = vld [vmem:[#allocation2 + $0xa8] sm:$0xf]  ;;  %v4184_v38 = vrot.slane %v4182_v32, 5 }
 0x2af   : > { %v3702_v1 = vpop.permute.xlu0 %3701  ;;  %4629 = vrot.lane.b32.xlu1 %v4545_v25, %s10636_s13  ;;  %v4555_v25 = vrot.slane %v4418_v55, 5  ;;  %v4161_v22 = vsel %vm10820_vm8, %v4156_v8, %v4160_v9 }
 0x2b0   : > { %3796 = vst.msk [vmem:[#allocation3 + $0x8] sm:$0xf] %vm3793_vm4, %v3702_v1  ;;  %v4174_v21 = vrot.slane %v4172_v54, 5 }
 0x2b1   : > { %4631 = vrot.lane.b32.xlu0 %v4549_v53, %s10636_s13  ;;  %v3704_v41 = vpop.permute.xlu1 %3703  ;;  %v4557_v27 = vrot.slane %v4555_v25, 4  ;;  %v4556_v53 = vsel %vm10827_vm11, %v10179_v35, %v4555_v25  ;;  %v3658_v25 = vld [vmem:[#allocation2 + $0xac] sm:$0xf] }
 0x2b2   : > { %3797 = vst.msk [vmem:[#allocation3 + $0xc] sm:$0xf] %vm3793_vm4, %v3704_v41  ;;  %v4163_v41 = vshrl.u32 %v3862_v7, 16 }
 0x2b3   : > { %v3706_v58 = vpop.permute.xlu0 %3705  ;;  %4633 = vrot.lane.b32.xlu1 %v4552_v0, %s10636_s13  ;;  %v4559_v42 = vsel %vm10827_vm11, %v4557_v27, %v4558_v39  ;;  %v4424_v39 = vld [vmem:[#allocation2 + $0xac] sm:$0xf] }
 0x2b4   : > { %3798 = vst.msk [vmem:[#allocation3 + $0x10] sm:$0xf] %vm3793_vm4, %v3706_v58  ;;  %v4166_v58 = vshll.u32 %v3862_v7, 16  ;;  %v4165_v51 = vrot.slane %v4163_v41, 4  ;;  %v3867_v7 = vld [vmem:[#allocation2 + $0xbc] sm:$0x1] }
 0x2b5   : > { %3741 = vrot.lane.b32.xlu0 %v3655_v15, %s10634_s30  ;;  %v3708_v11 = vpop.permute.xlu1 %3707  ;;  %v3865_v15 = vld [vmem:[#allocation2 + $0xb4] sm:$0xf] }
 0x2b6   : > { %3799 = vst.msk [vmem:[#allocation3 + $0x14] sm:$0xf] %vm3793_vm4, %v3708_v11  ;;  %v3866_v11 = vld [vmem:[#allocation2 + $0xb8] sm:$0xf]  ;;  %v4187_v30 = vshrl.u32 %v3865_v15, 16  ;;  %v4190_v63 = vshll.u32 %v3865_v15, 16 }
 0x2b7   : > { %v3710_v62 = vpop.permute.xlu0 %3709  ;;  %3743 = vrot.lane.b32.xlu1 %v3656_v23, %s10634_s30  ;;  %v4566_v23 = vsel %vm10827_vm11, %v4564_v12, %v4565_v44  ;;  %v4196_v55 = vshll.u32 %v3866_v11, 16  ;;  %v4569_v12 = vrot.slane %v4424_v39, 5 }
 0x2b8   : > { %3800 = vst.msk [vmem:[#allocation3 + $0x18] sm:$0xf] %vm3793_vm4, %v3710_v62  ;;  %v4168_v62 = vrot.slane %v4166_v58, 5  ;;  %v4189_v8 = vrot.slane %v4187_v30, 4  ;;  %v4192_v9 = vrot.slane %v4190_v63, 5 }
 0x2b9   : > { %4298 = vrot.lane.b32.xlu0 %v4127_v10, %s10635_s8  ;;  %v3712_v14 = vpop.permute.xlu1 %3711  ;;  %v4178_v10 = vrot.slane %v4176_v16, 4  ;;  %v4426_v63 = vld [vmem:[#allocation2 + $0xb4] sm:$0xe] }
 0x2ba   : > { %3801 = vst.msk [vmem:[#allocation3 + $0x1c] sm:$0xf] %vm3793_vm4, %v3712_v14  ;;  %v4200_v14 = vshrl.u32 %v3866_v11, 16  ;;  %v4193_v27 = vor.u32 %v4192_v9, %v4189_v8  ;;  %v10182_v8 = vrot.slane %v4426_v63, 9 }
 0x2bb   : > { %v3714_v29 = vpop.permute.xlu0 %3713  ;;  %4300 = vrot.lane.b32.xlu1 %v4137_v40, %s10635_s8 }
 0x2bc   : > { %3802 = vst.msk [vmem:[#allocation3 + $0x20] sm:$0xf] %vm3793_vm4, %v3714_v29  ;;  %v4169_v29 = vor.u32 %v4168_v62, %v4165_v51  ;;  %v4202_v35 = vrot.slane %v4200_v14, 4  ;;  %v4194_v58 = vrot.slane %v4193_v27, 4  ;;  %v4427_v51 = vld [vmem:[#allocation2 + $0xb8] sm:$0xf] }
 0x2bd   : > { %4302 = vrot.lane.b32.xlu0 %v4151_v46, %s10635_s8  ;;  %v3716_v31 = vpop.permute.xlu1 %3715  ;;  %v4179_v46 = vor.u32 %v4178_v10, %v4174_v21  ;;  %v4576_v10 = vrot.slane %v4427_v51, 5  ;;  %v3871_v14 = vld [vmem:[#allocation2 + $0xcc] sm:$0xf] }
 0x2be   : > { %3803 = vst.msk [vmem:[#allocation3 + $0x24] sm:$0xf] %vm3793_vm4, %v3716_v31  ;;  %v4198_v31 = vrot.slane %v4196_v55, 5  ;;  %v3868_v55 = vld [vmem:[#allocation2 + $0xc0] sm:$0xf]  ;;  %v4235_v32 = vshrl.u32 %v3871_v14, 16 }
 0x2bf   : > { %v3718_v1 = vpop.permute.xlu0 %3717  ;;  %4304 = vrot.lane.b32.xlu1 %v4161_v22, %s10635_s8  ;;  %v4577_v27 = vsel %vm10827_vm11, %v10182_v8, %v4576_v10 }
 0x2c0   : > { %3804 = vst.msk [vmem:[#allocation3 + $0x28] sm:$0xf] %vm3793_vm4, %v3718_v1  ;;  %v4170_v1 = vrot.slane %v4169_v29, 4  ;;  %v4203_v41 = vor.u32 %v4202_v35, %v4198_v31  ;;  %v4199_v11 = vsel %vm10820_vm8, %v4194_v58, %v4198_v31  ;;  %v4238_v31 = vshll.u32 %v3871_v14, 16 }
 0x2c1   : > { %4635 = vrot.lane.b32.xlu0 %v4556_v53, %s10636_s13  ;;  %v3720_v0 = vpop.permute.xlu1 %3719  ;;  %v4180_v53 = vrot.slane %v4179_v46, 4  ;;  %v3872_v46 = vld [vmem:[#allocation2 + $0xd0] sm:$0xf] }
 0x2c2   : > { %3805 = vst.msk [vmem:[#allocation3 + $0x2c] sm:$0xf] %vm3793_vm4, %v3720_v0  ;;  %v4206_v0 = vshll.u32 %v3867_v7, 16  ;;  %v4175_v4 = vsel %vm10820_vm8, %v4170_v1, %v4174_v21  ;;  %v4204_v16 = vrot.slane %v4203_v41, 4  ;;  %v4579_v7 = vrot.slane %v4428_v50, 5 }
 0x2c3   : > { %v3722_v59 = vpop.permute.xlu0 %3721  ;;  %4637 = vrot.lane.b32.xlu1 %v4559_v42, %s10636_s13  ;;  %v4425_v42 = vld [vmem:[#allocation2 + $0xb0] sm:$0x1]  ;;  %v4244_v39 = vshll.u32 %v3872_v46, 16  ;;  %v4237_v41 = vrot.slane %v4235_v32, 4 }
 0x2c4   : > { %3806 = vst.msk [vmem:[#allocation3 + $0x30] sm:$0xf] %vm3793_vm4, %v3722_v59  ;;  %v4185_v59 = vsel %vm10820_vm8, %v4180_v53, %v4184_v38  ;;  %v4208_v15 = vrot.slane %v4206_v0, 5  ;;  %v4240_v0 = vrot.slane %v4238_v31, 5 }
 0x2c5   : > { %4639 = vrot.lane.b32.xlu0 %v4563_v43, %s10636_s13  ;;  %v3724_v28 = vpop.permute.xlu1 %3723  ;;  %v4423_v43 = vld [vmem:[#allocation2 + $0xa8] sm:$0xe] }
 0x2c6   : > { %3807 = vst.msk [vmem:[#allocation3 + $0x34] sm:$0xf] %vm3793_vm4, %v3724_v28  ;;  %v4571_v28 = vrot.slane %v4569_v12, 4  ;;  %v10181_v30 = vrot.slane %v4423_v43, 9  ;;  %v3663_v43 = vld [vmem:[#allocation2 + $0xcc] sm:$0xf]  ;;  %v4241_v51 = vor.u32 %v4240_v0, %v4237_v41 }
 0x2c7   : > { %v3726_v5 = vpop.permute.xlu0 %3725  ;;  %4641 = vrot.lane.b32.xlu1 %v4566_v23, %s10636_s13  ;;  %v4572_v23 = vrot.slane %v4425_v42, 5  ;;  %v3661_v42 = vld [vmem:[#allocation2 + $0xc0] sm:$0xf] }
 0x2c8   : > { %3808 = vst.msk [vmem:[#allocation3 + $0x38] sm:$0xf] %vm3793_vm4, %v3726_v5  ;;  %v4209_v5 = vsel %vm10820_vm8, %v4204_v16, %v4208_v15  ;;  %v4242_v50 = vrot.slane %v4241_v51, 4 }
 0x2c9   : > { %3745 = vrot.lane.b32.xlu0 %v3657_v37, %s10634_s30  ;;  %v3728_v40 = vpop.permute.xlu1 %3727  ;;  %v4570_v37 = vsel %vm10827_vm11, %v10181_v30, %v4569_v12  ;;  %v4573_v29 = vsel %vm10827_vm11, %v4571_v28, %v4572_v23  ;;  %v3873_v28 = vld [vmem:[#allocation2 + $0xd4] sm:$0x1]  ;;  %v3662_v23 = vld [vmem:[#allocation2 + $0xc4] sm:$0xf] }
 0x2ca   : > { %3809 = vst.msk [vmem:[#allocation3 + $0x3c] sm:$0xf] %vm3793_vm4, %v3728_v40  ;;  %v3869_v40 = vld [vmem:[#allocation2 + $0xc4] sm:$0xf] }
 0x2cb   : > { %v3730_v6 = vpop.permute.xlu0 %3729  ;;  %3747 = vrot.lane.b32.xlu1 %v3658_v25, %s10634_s30  ;;  %v4211_v25 = vshrl.u32 %v3868_v55, 16  ;;  %v4224_v1 = vshrl.u32 %v3869_v40, 16 }
 0x2cc   : > { %3810 = vst.msk [vmem:[#allocation3 + $0x40] sm:$0xf] %vm3793_vm4, %v3730_v6  ;;  %v4214_v6 = vshll.u32 %v3868_v55, 16  ;;  %v4254_v55 = vshll.u32 %v3873_v28, 16 }
 0x2cd   : > { %3749 = vrot.lane.b32.xlu0 %v3659_v2, %s10634_s30  ;;  %v3732_v22 = vpop.permute.xlu1 %3731  ;;  %v4578_v2 = vrot.slane %v4576_v10, 4  ;;  %v4213_v53 = vrot.slane %v4211_v25, 4  ;;  %v4226_v58 = vrot.slane %v4224_v1, 4  ;;  %v5709_v25 = vld [vmem:[#allocation2 + $0x4] sm:$0xf] }
 0x2ce   : > { %3811 = vst.msk [vmem:[#allocation3 + $0x44] sm:$0xf] %vm3793_vm4, %v3732_v22  ;;  %v4220_v22 = vshll.u32 %v3869_v40, 16  ;;  %v4216_v38 = vrot.slane %v4214_v6, 5  ;;  %v4256_v31 = vrot.slane %v4254_v55, 5 }
 0x2cf   : > { %v3734_v56 = vpop.permute.xlu0 %3733  ;;  %3751 = vrot.lane.b32.xlu1 %v3660_v57, %s10634_s30  ;;  %v4248_v57 = vshrl.u32 %v3872_v46, 16  ;;  %v4430_v46 = vld [vmem:[#allocation2 + $0xc4] sm:$0xf]  ;;  %v4433_v1 = vld [vmem:[#allocation2 + $0xd0] sm:$0xf] }
 0x2d0   : > { %3812 = vst.msk [vmem:[#allocation3 + $0x48] sm:$0xf] %vm3793_vm4, %v3734_v56 }
 0x2d1   : > { %4306 = vrot.lane.b32.xlu0 %v4175_v4, %s10635_s8  ;;  %v3736_v44 = vpop.permute.xlu1 %3735  ;;  %v4580_v4 = vsel %vm10827_vm11, %v4578_v2, %v4579_v7  ;;  %v4250_v16 = vrot.slane %v4248_v57, 4 }
 0x2d2   : > { %3813 = vst.msk [vmem:[#allocation3 + $0x4c] sm:$0xf] %vm3793_vm4, %v3736_v44  ;;  %v4222_v44 = vrot.slane %v4220_v22, 5 }
 0x2d3   : > { %v3738_v54 = vpop.permute.xlu0 %3737  ;;  %4308 = vrot.lane.b32.xlu1 %v4185_v59, %s10635_s8  ;;  %v3870_v59 = vld [vmem:[#allocation2 + $0xc8] sm:$0x1] }
 0x2d4   : > { %3814 = vst.msk [vmem:[#allocation3 + $0x50] sm:$0xf] %vm3793_vm4, %v3738_v54  ;;  %v4246_v54 = vrot.slane %v4244_v39, 5  ;;  %v4227_v30 = vor.u32 %v4226_v58, %v4222_v44  ;;  %v4230_v63 = vshll.u32 %v3870_v59, 16  ;;  %v4434_v58 = vld [vmem:[#allocation2 + $0xd4] sm:$0x1] }
 0x2d5   : > { %4310 = vrot.lane.b32.xlu0 %v4199_v11, %s10635_s8  ;;  %v3740_v62 = vpop.permute.xlu1 %3739  ;;  %v4217_v11 = vor.u32 %v4216_v38, %v4213_v53  ;;  %v4432_v53 = vld [vmem:[#allocation2 + $0xcc] sm:$0xe]  ;;  %v4431_v38 = vld [vmem:[#allocation2 + $0xc8] sm:$0x1] }
 0x2d6   : > { %3815 = vst.msk [vmem:[#allocation3 + $0x54] sm:$0xf] %vm3793_vm4, %v3740_v62  ;;  %v4251_v10 = vor.u32 %v4250_v16, %v4246_v54  ;;  %v4228_v8 = vrot.slane %v4227_v30, 4  ;;  %v4247_v22 = vsel %vm10820_vm8, %v4242_v50, %v4246_v54  ;;  %v4586_v16 = vrot.slane %v4431_v38, 5 }
 0x2d7   : > { %v4259_v21 = vpop.permute.xlu0 %4258  ;;  %4312 = vrot.lane.b32.xlu1 %v4209_v5, %s10635_s8  ;;  %v5708_v5 = vld [vmem:[#allocation2] sm:$0xf] }
 0x2d8   : > { %4355 = vst.msk [vmem:[#allocation3] sm:$0xf] %vm4354_vm9, %v4259_v21  ;;  %v3664_v21 = vld [vmem:[#allocation2 + $0xd0] sm:$0xf]  ;;  %v4252_v32 = vrot.slane %v4251_v10, 4 }
 0x2d9   : > { %4643 = vrot.lane.b32.xlu0 %v4570_v37, %s10636_s13  ;;  %v4261_v9 = vpop.permute.xlu1 %4260  ;;  %v4218_v37 = vrot.slane %v4217_v11, 4  ;;  %v4593_v11 = vrot.slane %v4434_v58, 5 }
 0x2da   : > { %4356 = vst.msk [vmem:[#allocation3 + $0x4] sm:$0xf] %vm4354_vm9, %v4261_v9  ;;  %v4232_v9 = vrot.slane %v4230_v63, 5  ;;  %v4257_v41 = vsel %vm10820_vm8, %v4252_v32, %v4256_v31 }
 0x2db   : > { %v4263_v35 = vpop.permute.xlu0 %4262  ;;  %4645 = vrot.lane.b32.xlu1 %v4573_v29, %s10636_s13  ;;  %v4223_v6 = vsel %vm10820_vm8, %v4218_v37, %v4222_v44 }
 0x2dc   : > { %4357 = vst.msk [vmem:[#allocation3 + $0x8] sm:$0xf] %vm4354_vm9, %v4263_v35  ;;  %v4429_v35 = vld [vmem:[#allocation2 + $0xc0] sm:$0xe] }
 0x2dd   : > { %4647 = vrot.lane.b32.xlu0 %v4577_v27, %s10636_s13  ;;  %v4265_v56 = vpop.permute.xlu1 %4264  ;;  %v4233_v27 = vsel %vm10820_vm8, %v4228_v8, %v4232_v9  ;;  %v10183_v0 = vrot.slane %v4429_v35, 9 }
 0x2de   : > { %4358 = vst.msk [vmem:[#allocation3 + $0xc] sm:$0xf] %vm4354_vm9, %v4265_v56  ;;  %v4583_v56 = vrot.slane %v4430_v46, 5 }
 0x2df   : > { %v4596_v12 = vpop.permute.xlu0 %4595  ;;  %4649 = vrot.lane.b32.xlu1 %v4580_v4, %s10636_s13  ;;  %v4590_v4 = vrot.slane %v4433_v1, 5 }
 0x2e0   : > { %4692 = vst.msk [vmem:[#allocation3] sm:$0xf] %vm4691_vm10, %v4596_v12  ;;  %v4585_v54 = vrot.slane %v4583_v56, 4 }
 0x2e1   : > { %3753 = vrot.lane.b32.xlu0 %v3661_v42, %s10634_s30  ;;  %v4598_v15 = vpop.permute.xlu1 %4597  ;;  %v10184_v42 = vrot.slane %v4432_v53, 9 }
 0x2e2   : > { %4693 = vst.msk [vmem:[#allocation3 + $0x4] sm:$0xf] %vm4691_vm10, %v4598_v15  ;;  %v4584_v15 = vsel %vm10827_vm11, %v10183_v0, %v4583_v56 }
 0x2e3   : > { %v4600_v62 = vpop.permute.xlu0 %4599  ;;  %3755 = vrot.lane.b32.xlu1 %v3662_v23, %s10634_s30  ;;  %v4591_v28 = vsel %vm10827_vm11, %v10184_v42, %v4590_v4  ;;  %v4587_v23 = vsel %vm10827_vm11, %v4585_v54, %v4586_v16 }
 0x2e4   : > { %4694 = vst.msk [vmem:[#allocation3 + $0x8] sm:$0xf] %vm4691_vm10, %v4600_v62 }
 0x2e5   : > { %3757 = vrot.lane.b32.xlu0 %v3663_v43, %s10634_s30  ;;  %v4602_v14 = vpop.permute.xlu1 %4601  ;;  %v4592_v43 = vrot.slane %v4590_v4, 4 }
 0x2e6   : > { %4695 = vst.msk [vmem:[#allocation3 + $0xc] sm:$0xf] %vm4691_vm10, %v4602_v14 }
 0x2e7   : > { %v4724_v40 = vld [vmem:[#allocation3] sm:$0xf]  ;;  %v4267_v29 = vpop.permute.xlu0 %4266  ;;  %3759 = vrot.lane.b32.xlu1 %v3664_v21, %s10634_s30  ;;  %v4594_v30 = vsel %vm10827_vm11, %v4592_v43, %v4593_v11 }
 0x2e8   : > { %5740 = vst.msk [vmem:[#allocation3] sm:$0xf] %vm280_vm5, %v5708_v5 }
 0x2e9   : > { %4359 = vst.msk [vmem:[#allocation3 + $0x10] sm:$0xf] %vm4354_vm9, %v4267_v29  ;;  %4314 = vrot.lane.b32.xlu0 %v4223_v6, %s10635_s8  ;;  %v4725_v2 = vld [vmem:[#allocation3 + $0x4] sm:$0xf]  ;;  %v4269_v7 = vpop.permute.xlu1 %4268 }
 0x2ea   : > { %5741 = vst.msk [vmem:[#allocation3 + $0x4] sm:$0xf] %vm280_vm5, %v5709_v25  ;;  %v10185_v57 = vcombine.low %v4724_v40, %v4725_v2 }
 0x2eb   : > { %4360 = vst.msk [vmem:[#allocation3 + $0x14] sm:$0xf] %vm4354_vm9, %v4269_v7  ;;  %v4271_v39 = vpop.permute.xlu0 %4270  ;;  %4316 = vrot.lane.b32.xlu1 %v4233_v27, %s10635_s8 }
 0x2ec   : > { %4361 = vst.msk [vmem:[#allocation3 + $0x18] sm:$0xf] %vm4354_vm9, %v4271_v39  ;;  %10451 = vmatprep.mubr.msk.bf16.mxu0 %vm4856_vm13, %v10185_v57 }
 0x2ed   : > { %4318 = vrot.lane.b32.xlu0 %v4247_v22, %s10635_s8  ;;  %v4273_v12 = vpop.permute.xlu1 %4272  ;;  %v10567_v44 = vld [vmem:[#allocation3 + $0x8] sm:$0xff]  }
 0x2ee   : > { %4362 = vst.msk [vmem:[#allocation3 + $0x1c] sm:$0xf] %vm4354_vm9, %v4273_v12  ;;  %10452 = vmatmul.mubr.msk.bf16.vlgmr.msra.gmra.mxu0 %vm4856_vm13, %v10567_v44 }
 0x2ef   : > { %v4604_v59 = vpop.permute.xlu0 %4603  ;;  %4320 = vrot.lane.b32.xlu1 %v4257_v41, %s10635_s8 }
 0x2f0   : > { %4696 = vst.msk [vmem:[#allocation3 + $0x10] sm:$0xf] %vm4691_vm10, %v4604_v59 }
 0x2f1   : > { %4651 = vrot.lane.b32.xlu0 %v4584_v15, %s10636_s13  ;;  %v4606_v51 = vpop.permute.xlu1 %4605 }
 0x2f2   : > { %4697 = vst.msk [vmem:[#allocation3 + $0x14] sm:$0xf] %vm4691_vm10, %v4606_v51 }
 0x2f3   : > { %v4608_v62 = vpop.permute.xlu0 %4607  ;;  %4653 = vrot.lane.b32.xlu1 %v4587_v23, %s10636_s13 }
 0x2f4   : > { %4698 = vst.msk [vmem:[#allocation3 + $0x18] sm:$0xf] %vm4691_vm10, %v4608_v62 }
 0x2f5   : > { %4655 = vrot.lane.b32.xlu0 %v4591_v28, %s10636_s13  ;;  %v4610_v63 = vpop.permute.xlu1 %4609 }
 0x2f6   : > { %4699 = vst.msk [vmem:[#allocation3 + $0x1c] sm:$0xf] %vm4691_vm10, %v4610_v63 }
 0x2f7   : > { %v4275_v5 = vpop.permute.xlu0 %4274  ;;  %4657 = vrot.lane.b32.xlu1 %v4594_v30, %s10636_s13 }
 0x2f8   : > { %4363 = vst.msk [vmem:[#allocation3 + $0x20] sm:$0xf] %vm4354_vm9, %v4275_v5 }
 0x2f9   : > { %v4277_v21 = vpop.permute.xlu1 %4276  ;;  %v10568_v10 = vld [vmem:[#allocation3 + $0x10] sm:$0xff]  }
 0x2fa   : > { %4364 = vst.msk [vmem:[#allocation3 + $0x24] sm:$0xf] %vm4354_vm9, %v4277_v21  ;;  %10455 = vmatprep.mubr.msk.bf16.mxu0 %vm4856_vm13, %v10568_v10 }
 0x2fb   : > { %v4279_v55 = vpop.permute.xlu0 %4278 }
 0x2fc   : > { %4365 = vst.msk [vmem:[#allocation3 + $0x28] sm:$0xf] %vm4354_vm9, %v4279_v55 }
 0x2fd   : > { %v4281_v14 = vpop.permute.xlu1 %4280  ;;  %v10569_v37 = vld [vmem:[#allocation3 + $0x18] sm:$0xff]  }
 0x2fe   : > { %4366 = vst.msk [vmem:[#allocation3 + $0x2c] sm:$0xf] %vm4354_vm9, %v4281_v14  ;;  %10456 = vmatmul.mubr.msk.bf16.gmra.mxu0 %vm4856_vm13, %v10569_v37 }
 0x2ff   : > { %v4612_v50 = vpop.permute.xlu0 %4611 }
 0x300   : > { %4700 = vst.msk [vmem:[#allocation3 + $0x20] sm:$0xf] %vm4691_vm10, %v4612_v50 }
 0x301   : > { %v4614_v40 = vpop.permute.xlu1 %4613 }
 0x302   : > { %4701 = vst.msk [vmem:[#allocation3 + $0x24] sm:$0xf] %vm4691_vm10, %v4614_v40 }
 0x303   : > { %v4616_v29 = vpop.permute.xlu0 %4615 }
 0x304   : > { %4702 = vst.msk [vmem:[#allocation3 + $0x28] sm:$0xf] %vm4691_vm10, %v4616_v29 }
 0x305   : > { %v4618_v8 = vpop.permute.xlu1 %4617 }
 0x306   : > { %4703 = vst.msk [vmem:[#allocation3 + $0x2c] sm:$0xf] %vm4691_vm10, %v4618_v8 }
 0x307   : > { %v4283_v9 = vpop.permute.xlu0 %4282 }
 0x308   : > { %4367 = vst.msk [vmem:[#allocation3 + $0x30] sm:$0xf] %vm4354_vm9, %v4283_v9 }
 0x309   : > { %v4285_v25 = vpop.permute.xlu1 %4284  ;;  %v10570_v6 = vld [vmem:[#allocation3 + $0x20] sm:$0xff]  }
 0x30a   : > { %4368 = vst.msk [vmem:[#allocation3 + $0x34] sm:$0xf] %vm4354_vm9, %v4285_v25  ;;  %10459 = vmatprep.mubr.msk.bf16.mxu0 %vm4856_vm13, %v10570_v6 }
 0x30b   : > { %v4287_v46 = vpop.permute.xlu0 %4286 }
 0x30c   : > { %4369 = vst.msk [vmem:[#allocation3 + $0x38] sm:$0xf] %vm4354_vm9, %v4287_v46 }
 0x30d   : > { %v4289_v32 = vpop.permute.xlu1 %4288  ;;  %v10571_v31 = vld [vmem:[#allocation3 + $0x28] sm:$0xff]  }
 0x30e   : > { %4370 = vst.msk [vmem:[#allocation3 + $0x3c] sm:$0xf] %vm4354_vm9, %v4289_v32  ;;  %10460 = vmatmul.mubr.msk.bf16.gmra.mxu0 %vm4856_vm13, %v10571_v31  ;;  %v5772_v32 = vld [vmem:[#allocation2] sm:$0xf]  ;;  %v5773_v31 = vld [vmem:[#allocation2 + $0x4] sm:$0xf] }
 0x30f   : > { %v4620_v35 = vpop.permute.xlu0 %4619 }
 0x310   : > { %4704 = vst.msk [vmem:[#allocation3 + $0x30] sm:$0xf] %vm4691_vm10, %v4620_v35  ;;  %v5821_v35 = vshrl.u32 %v5772_v32, 16 }
 0x311   : > { %v4622_v2 = vpop.permute.xlu1 %4621 }
 0x312   : > { %4705 = vst.msk [vmem:[#allocation3 + $0x34] sm:$0xf] %vm4691_vm10, %v4622_v2  ;;  %v5824_v2 = vshll.u32 %v5772_v32, 16 }
 0x313   : > { %v4624_v7 = vpop.permute.xlu0 %4623 }
 0x314   : > { %4706 = vst.msk [vmem:[#allocation3 + $0x38] sm:$0xf] %vm4691_vm10, %v4624_v7  ;;  %v5830_v7 = vshll.u32 %v5773_v31, 16 }
 0x315   : > { %v4626_v22 = vpop.permute.xlu1 %4625 }
 0x316   : > { %4707 = vst.msk [vmem:[#allocation3 + $0x3c] sm:$0xf] %vm4691_vm10, %v4626_v22 }
 0x317   : > { %v4291_v1 = vpop.permute.xlu0 %4290 }
 0x318   : > { %4371 = vst.msk [vmem:[#allocation3 + $0x40] sm:$0xf] %vm4354_vm9, %v4291_v1 }
 0x319   : > { %v4293_v27 = vpop.permute.xlu1 %4292  ;;  %v10572_v39 = vld [vmem:[#allocation3 + $0x30] sm:$0xff]  }
 0x31a   : > { %4372 = vst.msk [vmem:[#allocation3 + $0x44] sm:$0xf] %vm4354_vm9, %v4293_v27  ;;  %10463 = vmatprep.mubr.msk.bf16.mxu0 %vm4856_vm13, %v10572_v39  ;;  %v5823_v27 = vrot.slane %v5821_v35, 4  ;;  %v5826_v39 = vrot.slane %v5824_v2, 5 }
 0x31b   : > { %v4295_v57 = vpop.permute.xlu0 %4294 }
 0x31c   : > { %4373 = vst.msk [vmem:[#allocation3 + $0x48] sm:$0xf] %vm4354_vm9, %v4295_v57 }
 0x31d   : > { %v4297_v56 = vpop.permute.xlu1 %4296  ;;  %v10573_v53 = vld [vmem:[#allocation3 + $0x38] sm:$0xff]  }
 0x31e   : > { %4374 = vst.msk [vmem:[#allocation3 + $0x4c] sm:$0xf] %vm4354_vm9, %v4297_v56  ;;  %10464 = vmatmul.mubr.msk.bf16.gmra.mxu0 %vm4856_vm13, %v10573_v53  ;;  %v5827_v56 = vor.u32 %v5826_v39, %v5823_v27  ;;  %v5832_v53 = vrot.slane %v5830_v7, 5 }
 0x31f   : > { %v4628_v38 = vpop.permute.xlu0 %4627 }
 0x320   : > { %4708 = vst.msk [vmem:[#allocation3 + $0x40] sm:$0xf] %vm4691_vm10, %v4628_v38 }
 0x321   : > { %v4630_v41 = vpop.permute.xlu1 %4629 }
 0x322   : > { %4709 = vst.msk [vmem:[#allocation3 + $0x44] sm:$0xf] %vm4691_vm10, %v4630_v41  ;;  %v5828_v41 = vrot.slane %v5827_v56, 4 }
 0x323   : > { %v4632_v0 = vpop.permute.xlu0 %4631 }
 0x324   : > { %4710 = vst.msk [vmem:[#allocation3 + $0x48] sm:$0xf] %vm4691_vm10, %v4632_v0  ;;  %v5834_v0 = vshrl.u32 %v5773_v31, 16 }
 0x325   : > { %v4634_v4 = vpop.permute.xlu1 %4633 }
 0x326   : > { %4711 = vst.msk [vmem:[#allocation3 + $0x4c] sm:$0xf] %vm4691_vm10, %v4634_v4 }
 0x327   : > { %v3742_v12 = vpop.permute.xlu0 %3741 }
 0x328   : > { %3816 = vst.msk [vmem:[#allocation3 + $0x58] sm:$0xf] %vm3793_vm4, %v3742_v12  ;;  %v5833_v12 = vsel %vm10820_vm8, %v5828_v41, %v5832_v53 }
 0x329   : > { %v3744_v44 = vpop.permute.xlu1 %3743  ;;  %v10574_v58 = vld [vmem:[#allocation3 + $0x40] sm:$0xff]   ;;  %6204 = vrot.lane.b32.xlu0 %v5833_v12, %s10627_s22 }
 0x32a   : > { %3817 = vst.msk [vmem:[#allocation3 + $0x5c] sm:$0xf] %vm3793_vm4, %v3744_v44  ;;  %10467 = vmatprep.mubr.msk.bf16.mxu0 %vm4856_vm13, %v10574_v58  ;;  %v5774_v58 = vld [vmem:[#allocation2 + $0x8] sm:$0x1] }
 0x32b   : > { %v4299_v42 = vpop.permute.xlu0 %4298 }
 0x32c   : > { %4375 = vst.msk [vmem:[#allocation3 + $0x50] sm:$0xf] %vm4354_vm9, %v4299_v42  ;;  %v5836_v42 = vrot.slane %v5834_v0, 4  ;;  %v5603_v0 = vld [vmem:[#allocation2 + $0x18] sm:$0xf] }
 0x32d   : > { %v4301_v59 = vpop.permute.xlu1 %4300  ;;  %v10575_v54 = vld [vmem:[#allocation3 + $0x48] sm:$0xff]  }
 0x32e   : > { %4376 = vst.msk [vmem:[#allocation3 + $0x54] sm:$0xf] %vm4354_vm9, %v4301_v59  ;;  %10468 = vmatmul.mubr.msk.bf16.gmra.mxu0 %vm4856_vm13, %v10575_v54  ;;  %v5840_v54 = vshll.u32 %v5774_v58, 16 }
 0x32f   : > { %v4303_v16 = vpop.permute.xlu0 %4302 }
 0x330   : > { %4377 = vst.msk [vmem:[#allocation3 + $0x58] sm:$0xf] %vm4354_vm9, %v4303_v16  ;;  %v5837_v16 = vor.u32 %v5836_v42, %v5832_v53 }
 0x331   : > { %v4305_v15 = vpop.permute.xlu1 %4304 }
 0x332   : > { %4378 = vst.msk [vmem:[#allocation3 + $0x5c] sm:$0xf] %vm4354_vm9, %v4305_v15  ;;  %v5842_v15 = vrot.slane %v5840_v54, 5  ;;  %v5596_v54 = vld [vmem:[#allocation2 + $0xc] sm:$0xf] }
 0x333   : > { %v4636_v43 = vpop.permute.xlu0 %4635 }
 0x334   : > { %4712 = vst.msk [vmem:[#allocation3 + $0x50] sm:$0xf] %vm4691_vm10, %v4636_v43 }
 0x335   : > { %v4638_v11 = vpop.permute.xlu1 %4637 }
 0x336   : > { %4713 = vst.msk [vmem:[#allocation3 + $0x54] sm:$0xf] %vm4691_vm10, %v4638_v11  ;;  %v5838_v11 = vrot.slane %v5837_v16, 4 }
 0x337   : > { %v4640_v51 = vpop.permute.xlu0 %4639 }
 0x338   : > { %4714 = vst.msk [vmem:[#allocation3 + $0x58] sm:$0xf] %vm4691_vm10, %v4640_v51 }
 0x339   : > { %v4642_v28 = vpop.permute.xlu1 %4641 }
 0x33a   : > { %4715 = vst.msk [vmem:[#allocation3 + $0x5c] sm:$0xf] %vm4691_vm10, %v4642_v28  ;;  %v5843_v28 = vsel %vm10820_vm8, %v5838_v11, %v5842_v15 }
 0x33b   : > { %v3746_v23 = vpop.permute.xlu0 %3745  ;;  %6206 = vrot.lane.b32.xlu1 %v5843_v28, %s10627_s22 }
 0x33c   : > { %3818 = vst.msk [vmem:[#allocation3 + $0x60] sm:$0xf] %vm3793_vm4, %v3746_v23 }
 0x33d   : > { %v3748_v62 = vpop.permute.xlu1 %3747  ;;  %v10576_v30 = vld [vmem:[#allocation3 + $0x50] sm:$0xff]  }
 0x33e   : > { %3819 = vst.msk [vmem:[#allocation3 + $0x64] sm:$0xf] %vm3793_vm4, %v3748_v62  ;;  %10471 = vmatprep.mubr.msk.bf16.mxu0 %vm4856_vm13, %v10576_v30 }
 0x33f   : > { %v3750_v63 = vpop.permute.xlu0 %3749 }
 0x340   : > { %3820 = vst.msk [vmem:[#allocation3 + $0x68] sm:$0xf] %vm3793_vm4, %v3750_v63  ;;  %v12482_v63 = vld [vmem:[%s13958_s2] ss:$0 sm:$0xff] }
 0x341   : > { %v3752_v5 = vpop.permute.xlu1 %3751  ;;  %v10577_v21 = vld [vmem:[#allocation3 + $0x58] sm:$0xff]  }
 0x342   : > { %3821 = vst.msk [vmem:[#allocation3 + $0x6c] sm:$0xf] %vm3793_vm4, %v3752_v5  ;;  %10472 = vmatmul.mubr.msk.bf16.gmra.mxu0 %vm4856_vm13, %v10577_v21  ;;  %v12487_v21 = vld [vmem:[%s13959_s3] ss:$0 sm:$0xff] }
 0x343   : > { %v4307_v10 = vpop.permute.xlu0 %4306 }
 0x344   : > { %4379 = vst.msk [vmem:[#allocation3 + $0x60] sm:$0xf] %vm4354_vm9, %v4307_v10 }
 0x345   : > { %v4309_v55 = vpop.permute.xlu1 %4308 }
 0x346   : > { %4380 = vst.msk [vmem:[#allocation3 + $0x64] sm:$0xf] %vm4354_vm9, %v4309_v55 }
 0x347   : > { %v4311_v14 = vpop.permute.xlu0 %4310 }
 0x348   : > { %4381 = vst.msk [vmem:[#allocation3 + $0x68] sm:$0xf] %vm4354_vm9, %v4311_v14 }
 0x349   : > { %v4313_v37 = vpop.permute.xlu1 %4312 }
 0x34a   : > { %4382 = vst.msk [vmem:[#allocation3 + $0x6c] sm:$0xf] %vm4354_vm9, %v4313_v37 }
 0x34b   : > { %v4644_v50 = vpop.permute.xlu0 %4643 }
 0x34c   : > { %4716 = vst.msk [vmem:[#allocation3 + $0x60] sm:$0xf] %vm4691_vm10, %v4644_v50 }
 0x34d   : > { %v4646_v40 = vpop.permute.xlu1 %4645 }
 0x34e   : > { %4717 = vst.msk [vmem:[#allocation3 + $0x64] sm:$0xf] %vm4691_vm10, %v4646_v40 }
 0x34f   : > { %v4648_v29 = vpop.permute.xlu0 %4647 }
 0x350   : > { %4718 = vst.msk [vmem:[#allocation3 + $0x68] sm:$0xf] %vm4691_vm10, %v4648_v29 }
 0x351   : > { %v4650_v8 = vpop.permute.xlu1 %4649 }
 0x352   : > { %4719 = vst.msk [vmem:[#allocation3 + $0x6c] sm:$0xf] %vm4691_vm10, %v4650_v8 }
 0x353   : > { %v3754_v9 = vpop.permute.xlu0 %3753 }
 0x354   : > { %3822 = vst.msk [vmem:[#allocation3 + $0x70] sm:$0xf] %vm3793_vm4, %v3754_v9 }
 0x355   : > { %v3756_v25 = vpop.permute.xlu1 %3755  ;;  %v10578_v6 = vld [vmem:[#allocation3 + $0x60] sm:$0xff]  }
 0x356   : > { %3823 = vst.msk [vmem:[#allocation3 + $0x74] sm:$0xf] %vm3793_vm4, %v3756_v25  ;;  %10475 = vmatprep.mubr.msk.bf16.mxu0 %vm4856_vm13, %v10578_v6 }
 0x357   : > { %v3758_v46 = vpop.permute.xlu0 %3757 }
 0x358   : > { %3824 = vst.msk [vmem:[#allocation3 + $0x78] sm:$0xf] %vm3793_vm4, %v3758_v46 }
 0x359   : > { %v3760_v22 = vpop.permute.xlu1 %3759  ;;  %v10579_v1 = vld [vmem:[#allocation3 + $0x68] sm:$0xff]  }
 0x35a   : > { %3825 = vst.msk [vmem:[#allocation3 + $0x7c] sm:$0xf] %vm3793_vm4, %v3760_v22  ;;  %10476 = vmatmul.mubr.msk.bf16.gmra.mxu0 %vm4856_vm13, %v10579_v1 }
 0x35b   : > { %v4315_v57 = vpop.permute.xlu0 %4314 }
 0x35c   : > { %4383 = vst.msk [vmem:[#allocation3 + $0x70] sm:$0xf] %vm4354_vm9, %v4315_v57 }
 0x35d   : > { %v4317_v38 = vpop.permute.xlu1 %4316 }
 0x35e   : > { %4384 = vst.msk [vmem:[#allocation3 + $0x74] sm:$0xf] %vm4354_vm9, %v4317_v38 }
 0x35f   : > { %v4319_v4 = vpop.permute.xlu0 %4318 }
 0x360   : > { %4385 = vst.msk [vmem:[#allocation3 + $0x78] sm:$0xf] %vm4354_vm9, %v4319_v4 }
 0x361   : > { %v4321_v44 = vpop.permute.xlu1 %4320 }
 0x362   : > { %4386 = vst.msk [vmem:[#allocation3 + $0x7c] sm:$0xf] %vm4354_vm9, %v4321_v44 }
 0x363   : > { %v4652_v59 = vpop.permute.xlu0 %4651 }
 0x364   : > { %4720 = vst.msk [vmem:[#allocation3 + $0x70] sm:$0xf] %vm4691_vm10, %v4652_v59 }
 0x365   : > { %v4654_v43 = vpop.permute.xlu1 %4653 }
 0x366   : > { %4721 = vst.msk [vmem:[#allocation3 + $0x74] sm:$0xf] %vm4691_vm10, %v4654_v43 }
 0x367   : > { %v4656_v51 = vpop.permute.xlu0 %4655 }
 0x368   : > { %4722 = vst.msk [vmem:[#allocation3 + $0x78] sm:$0xf] %vm4691_vm10, %v4656_v51 }
 0x369   : > { %v4658_v23 = vpop.permute.xlu1 %4657 }
 0x36a   : > { %4723 = vst.msk [vmem:[#allocation3 + $0x7c] sm:$0xf] %vm4691_vm10, %v4658_v23  ;;  %v5607_v23 = vld [vmem:[#allocation2 + $0x20] sm:$0x1] }
 0x36d   : > { %v10580_v62 = vld [vmem:[#allocation3 + $0x70] sm:$0xff]  }
 0x36e   : > { %10479 = vmatprep.mubr.msk.bf16.mxu0 %vm4856_vm13, %v10580_v62 }
 0x371   : > { %v10581_v30 = vld [vmem:[#allocation3 + $0x78] sm:$0xff]  }
 0x372   : > { %10480 = vmatmul.mubr.msk.bf16.gmra.mxu0 %vm4856_vm13, %v10581_v30 }
 0x3ae   : > { %v10453_v5 = vpop.f32.mrf.mxu0 }
 0x3af   : > { %v5079_v10 = vmul.f32 %v10453_v5, %v12482_v63 }
 0x3b0   : > { %v4943_v55 = vpop.f32.mrf.mxu0 }
 0x3b1   : > { %v5118_v14 = vadd.f32 %v12487_v21, %v5079_v10  ;;  %v5077_v37 = vmul.f32 %v12482_v63, %v4943_v55 }
 0x3b2   : > { %v10454_v50 = vpop.f32.mrf.mxu0 }
 0x3b3   : > { %v5150_v40 = vmax.f32 %v5118_v14, 0.0  ;;  %v5116_v29 = vadd.f32 %v12487_v21, %v5077_v37  ;;  %v5080_v8 = vmul.f32 %v10454_v50, %v12482_v63 }
 0x3b4   : > { %v4946_v9 = vpop.f32.mrf.mxu0 }
 0x3b5   : > { %v10377_v25 = vpack.c.bf16 %v5150_v40, %v5150_v40  ;;  %v5148_v6 = vmax.f32 %v5116_v29, 0.0  ;;  %v5119_v46 = vadd.f32 %v12487_v21, %v5080_v8  ;;  %v5078_v32 = vmul.f32 %v12482_v63, %v4946_v9  ;;  %v5600_v9 = vld [vmem:[#allocation2 + $0x14] sm:$0x1] }
 0x3b7   : > { %v5294_v31 = vshrl.u32 %v10377_v25, 16  ;;  %v10375_v35 = vpack.c.bf16 %v5148_v6, %v5148_v6  ;;  %v5151_v2 = vmax.f32 %v5119_v46, 0.0  ;;  %v5117_v7 = vadd.f32 %v12487_v21, %v5078_v32 }
 0x3b8   : > { %v5297_v1 = vshll.u32 %v10377_v25, 16 }
 0x3b9   : > { %v5296_v22 = vrot.slane %v5294_v31, 7  ;;  %v5277_v27 = vshrl.u32 %v10375_v35, 16  ;;  %v10378_v39 = vpack.c.bf16 %v5151_v2, %v5151_v2  ;;  %v5149_v57 = vmax.f32 %v5117_v7, 0.0 }
 0x3ba   : > { %v5280_v38 = vshll.u32 %v10375_v35, 16 }
 0x3bb   : > { %v5299_v56 = vor.u32 %v5297_v1, %v5296_v22  ;;  %v5279_v53 = vrot.slane %v5277_v27, 7  ;;  %v5302_v41 = vshrl.u32 %v10378_v39, 16  ;;  %v10376_v4 = vpack.c.bf16 %v5149_v57, %v5149_v57 }
 0x3bc   : > { %v5305_v42 = vshll.u32 %v10378_v39, 16  ;;  %v5300_v59 = vrot.slane %v5296_v22, 4 }
 0x3bd   : > { %v5604_v12 = vsel %vm10947_vm12, %v5299_v56, %v5603_v0  ;;  %v5282_v44 = vor.u32 %v5280_v38, %v5279_v53  ;;  %v5304_v58 = vrot.slane %v5302_v41, 7  ;;  %v5285_v16 = vshrl.u32 %v10376_v4, 16 }
 0x3be   : > { %5605 = vst [vmem:[#allocation2 + $0x18] sm:$0xf] %v5604_v12  ;;  %v10457_v15 = vpop.f32.mrf.mxu0  ;;  %v5288_v30 = vshll.u32 %v10376_v4, 16  ;;  %v5283_v50 = vrot.slane %v5279_v53, 4 }
 0x3bf   : > { %v5597_v43 = vsel %vm10947_vm12, %v5282_v44, %v5596_v54  ;;  %v5307_v11 = vor.u32 %v5305_v42, %v5304_v58  ;;  %v5309_v51 = vrot.slane %v5304_v58, 4  ;;  %v5083_v28 = vmul.f32 %v10457_v15, %v12482_v63  ;;  %v5617_v15 = vld [vmem:[#allocation2 + $0x30] sm:$0xf] }
 0x3c0   : > { %5598 = vst [vmem:[#allocation2 + $0xc] sm:$0xf] %v5597_v43  ;;  %v5287_v62 = vrot.slane %v5285_v16, 7  ;;  %v4959_v5 = vpop.f32.mrf.mxu0 }
 0x3c1   : > { %v5308_v10 = vsel %vm11225_vm14, %v5300_v59, %v5307_v11  ;;  %v5608_v55 = vsel %vm10712_vm2, %v5309_v51, %v5607_v23  ;;  %v5122_v14 = vadd.f32 %v12487_v21, %v5083_v28  ;;  %v5081_v37 = vmul.f32 %v12482_v63, %v4959_v5 }
 0x3c2   : > { %5606 = vst.msk [vmem:[#allocation2 + $0x1c] sm:$0xf] %vm280_vm5, %v5308_v10  ;;  %5609 = vst [vmem:[#allocation2 + $0x20] sm:$0x1] %v5608_v55  ;;  %v5290_v40 = vor.u32 %v5288_v30, %v5287_v62  ;;  %v5292_v29 = vrot.slane %v5287_v62, 4  ;;  %v10458_v8 = vpop.f32.mrf.mxu0 }
 0x3c3   : > { %v5154_v25 = vmax.f32 %v5122_v14, 0.0  ;;  %v5120_v6 = vadd.f32 %v12487_v21, %v5081_v37  ;;  %v5084_v46 = vmul.f32 %v10458_v8, %v12482_v63  ;;  %v5610_v55 = vld [vmem:[#allocation2 + $0x24] sm:$0xf] }
 0x3c4   : > { %v5291_v32 = vsel %vm11225_vm14, %v5283_v50, %v5290_v40  ;;  %v5601_v31 = vsel %vm10712_vm2, %v5292_v29, %v5600_v9  ;;  %v4962_v35 = vpop.f32.mrf.mxu0 }
 0x3c5   : > { %5599 = vst.msk [vmem:[#allocation2 + $0x10] sm:$0xf] %vm280_vm5, %v5291_v32  ;;  %5602 = vst [vmem:[#allocation2 + $0x14] sm:$0x1] %v5601_v31  ;;  %v10381_v2 = vpack.c.bf16 %v5154_v25, %v5154_v25  ;;  %v5152_v7 = vmax.f32 %v5120_v6, 0.0  ;;  %v5123_v22 = vadd.f32 %v12487_v21, %v5084_v46  ;;  %v5082_v1 = vmul.f32 %v12482_v63, %v4962_v35 }
 0x3c6   : > { %v5778_v27 = vld [vmem:[#allocation2 + $0x18] sm:$0xf] }
 0x3c7   : > { %v5869_v39 = vshrl.u32 %v5778_v27, 16  ;;  %v5872_v57 = vshll.u32 %v5778_v27, 16  ;;  %v5328_v56 = vshrl.u32 %v10381_v2, 16  ;;  %v5331_v53 = vshll.u32 %v10381_v2, 16  ;;  %v5775_v0 = vld [vmem:[#allocation2 + $0xc] sm:$0xf] }
 0x3c8   : > { %v10379_v38 = vpack.c.bf16 %v5152_v7, %v5152_v7  ;;  %v5155_v41 = vmax.f32 %v5123_v22, 0.0  ;;  %v5121_v4 = vadd.f32 %v12487_v21, %v5082_v1  ;;  %v5845_v12 = vshrl.u32 %v5775_v0, 16  ;;  %v5710_v10 = vld [vmem:[#allocation2 + $0xc] sm:$0xf]  ;;  %v5712_v31 = vld [vmem:[#allocation2 + $0x18] sm:$0xf] }
 0x3c9   : > { %v5848_v44 = vshll.u32 %v5775_v0, 16  ;;  %v12519_v58 = vrot.slane %v5869_v39, 4  ;;  %v5330_v42 = vrot.slane %v5328_v56, 7  ;;  %v12521_v28 = vrot.slane %v5872_v57, 5  ;;  %5742 = vst.msk [vmem:[#allocation3 + $0x8] sm:$0xf] %vm280_vm5, %v5710_v10 }
 0x3ca   : > { %v5311_v59 = vshrl.u32 %v10379_v38, 16  ;;  %v5314_v54 = vshll.u32 %v10379_v38, 16  ;;  %v10382_v16 = vpack.c.bf16 %v5155_v41, %v5155_v41  ;;  %v5153_v43 = vmax.f32 %v5121_v4, 0.0  ;;  %5744 = vst.msk [vmem:[#allocation3 + $0x10] sm:$0xf] %vm280_vm5, %v5712_v31 }
 0x3cb   : > { %v5847_v11 = vrot.slane %v5845_v12, 4  ;;  %v5850_v51 = vrot.slane %v5848_v44, 5  ;;  %v5333_v23 = vor.u32 %v5331_v53, %v5330_v42  ;;  %v5334_v62 = vrot.slane %v5330_v42, 4  ;;  %v5713_v27 = vld [vmem:[#allocation2 + $0x1c] sm:$0xf] }
 0x3cc   : > { %v5313_v30 = vrot.slane %v5311_v59, 7  ;;  %v5336_v5 = vshrl.u32 %v10382_v16, 16  ;;  %v5339_v14 = vshll.u32 %v10382_v16, 16  ;;  %v10380_v37 = vpack.c.bf16 %v5153_v43, %v5153_v43  ;;  %v5776_v50 = vld [vmem:[#allocation2 + $0x10] sm:$0xf]  ;;  %v6205_v16 = vpop.permute.xlu0 %6204 }
 0x3cd   : > { %v5851_v40 = vor.u32 %v5850_v51, %v5847_v11  ;;  %v5777_v29 = vld [vmem:[#allocation2 + $0x14] sm:$0x1]  ;;  %v5875_v8 = vor.u32 %v12521_v28, %v12519_v58  ;;  %v5618_v9 = vsel %vm10947_vm12, %v5333_v23, %v5617_v15  ;;  %v5711_v32 = vld [vmem:[#allocation2 + $0x10] sm:$0xf]  ;;  %v5854_v1 = vshll.u32 %v5776_v50, 16 }
 0x3ce   : > { %v5316_v25 = vor.u32 %v5314_v54, %v5313_v30  ;;  %v5317_v6 = vrot.slane %v5313_v30, 4  ;;  %v5338_v46 = vrot.slane %v5336_v5, 7  ;;  %5619 = vst [vmem:[#allocation2 + $0x30] sm:$0xf] %v5618_v9  ;;  %v5319_v35 = vshrl.u32 %v10380_v37, 16  ;;  %v10461_v7 = vpop.f32.mrf.mxu0 }
 0x3cf   : > { %v5322_v2 = vshll.u32 %v10380_v37, 16  ;;  %v5852_v22 = vrot.slane %v5851_v40, 4  ;;  %5743 = vst.msk [vmem:[#allocation3 + $0xc] sm:$0xf] %vm280_vm5, %v5711_v32  ;;  %v5087_v53 = vmul.f32 %v10461_v7, %v12482_v63  ;;  %5745 = vst.msk [vmem:[#allocation3 + $0x14] sm:$0xf] %vm280_vm5, %v5713_v27 }
 0x3d0   : > { %v5611_v39 = vsel %vm10947_vm12, %v5316_v25, %v5610_v55  ;;  %v5341_v57 = vor.u32 %v5339_v14, %v5338_v46  ;;  %v5343_v56 = vrot.slane %v5338_v46, 4  ;;  %v5621_v38 = vld [vmem:[#allocation2 + $0x38] sm:$0x1]  ;;  %v5321_v41 = vrot.slane %v5319_v35, 7  ;;  %v4975_v0 = vpop.f32.mrf.mxu0  ;;  %v5614_v11 = vld [vmem:[#allocation2 + $0x2c] sm:$0x1] }
 0x3d1   : > { %5612 = vst [vmem:[#allocation2 + $0x24] sm:$0xf] %v5611_v39  ;;  %v5856_v4 = vrot.slane %v5854_v1, 5  ;;  %v5858_v12 = vshrl.u32 %v5776_v50, 16  ;;  %v5864_v44 = vshll.u32 %v5777_v29, 16  ;;  %v5126_v59 = vadd.f32 %v12487_v21, %v5087_v53 }
 0x3d2   : > { %v5342_v58 = vsel %vm11225_vm14, %v5334_v62, %v5341_v57  ;;  %v5622_v42 = vsel %vm10712_vm2, %v5343_v56, %v5621_v38  ;;  %v5085_v54 = vmul.f32 %v12482_v63, %v4975_v0  ;;  %v5324_v15 = vor.u32 %v5322_v2, %v5321_v41  ;;  %v10462_v28 = vpop.f32.mrf.mxu0  ;;  %6300 = vst.msk [vmem:[#allocation3] sm:$0xf] %vm2168_vm15, %v6205_v16  ;;  %v5779_v55 = vld [vmem:[#allocation2 + $0x1c] sm:$0xf]  ;;  %v5780_v14 = vld [vmem:[#allocation2 + $0x20] sm:$0x1] }
 0x3d3   : > { %5620 = vst.msk [vmem:[#allocation2 + $0x34] sm:$0xf] %vm280_vm5, %v5342_v58  ;;  %5623 = vst [vmem:[#allocation2 + $0x38] sm:$0x1] %v5622_v42  ;;  %v5326_v43 = vrot.slane %v5321_v41, 4  ;;  %v5857_v51 = vsel %vm10820_vm8, %v5852_v22, %v5856_v4  ;;  %v5860_v23 = vrot.slane %v5858_v12, 4  ;;  %v5088_v5 = vmul.f32 %v10462_v28, %v12482_v63  ;;  %v6207_v58 = vpop.permute.xlu1 %6206 }
 0x3d4   : > { %v5158_v62 = vmax.f32 %v5126_v59, 0.0  ;;  %v5124_v30 = vadd.f32 %v12487_v21, %v5085_v54  ;;  %6208 = vrot.lane.b32.xlu0 %v5857_v51, %s10627_s22  ;;  %v5866_v10 = vrot.slane %v5864_v44, 5  ;;  %v5325_v37 = vsel %vm11225_vm14, %v5317_v6, %v5324_v15  ;;  %v4978_v40 = vpop.f32.mrf.mxu0  ;;  %6301 = vst.msk [vmem:[#allocation3 + $0x4] sm:$0xf] %vm2168_vm15, %v6207_v58 }
 0x3d5   : > { %v5615_v50 = vsel %vm10712_vm2, %v5326_v43, %v5614_v11  ;;  %v5861_v29 = vor.u32 %v5860_v23, %v5856_v4  ;;  %v5876_v9 = vrot.slane %v5875_v8, 4  ;;  %5613 = vst.msk [vmem:[#allocation2 + $0x28] sm:$0xf] %vm280_vm5, %v5325_v37  ;;  %v5127_v32 = vadd.f32 %v12487_v21, %v5088_v5  ;;  %v5631_v11 = vld [vmem:[#allocation2 + $0x48] sm:$0xf] }
 0x3d6   : > { %5616 = vst [vmem:[#allocation2 + $0x2c] sm:$0x1] %v5615_v50  ;;  %v10385_v25 = vpack.c.bf16 %v5158_v62, %v5158_v62  ;;  %v5156_v46 = vmax.f32 %v5124_v30, 0.0  ;;  %v5086_v31 = vmul.f32 %v12482_v63, %v4978_v40  ;;  %v5878_v2 = vshll.u32 %v5779_v55, 16  ;;  %v5624_v23 = vld [vmem:[#allocation2 + $0x3c] sm:$0xf] }
 0x3d7   : > { %v5862_v35 = vrot.slane %v5861_v29, 4  ;;  %v5882_v7 = vshrl.u32 %v5779_v55, 16  ;;  %v5888_v22 = vshll.u32 %v5780_v14, 16  ;;  %v5159_v39 = vmax.f32 %v5127_v32, 0.0 }
 0x3d8   : > { %v5362_v6 = vshrl.u32 %v10385_v25, 16  ;;  %v5365_v1 = vshll.u32 %v10385_v25, 16  ;;  %v10383_v27 = vpack.c.bf16 %v5156_v46, %v5156_v46  ;;  %v5125_v57 = vadd.f32 %v12487_v21, %v5086_v31  ;;  %v5714_v38 = vld [vmem:[#allocation2 + $0x24] sm:$0xf] }
 0x3d9   : > { %v5867_v8 = vsel %vm10820_vm8, %v5862_v35, %v5866_v10  ;;  %v5880_v56 = vrot.slane %v5878_v2, 5  ;;  %v5884_v53 = vrot.slane %v5882_v7, 4  ;;  %v10386_v12 = vpack.c.bf16 %v5159_v39, %v5159_v39  ;;  %v5781_v44 = vld [vmem:[#allocation2 + $0x24] sm:$0xf]  ;;  %5746 = vst.msk [vmem:[#allocation3 + $0x18] sm:$0xf] %vm280_vm5, %v5714_v38 }
 0x3da   : > { %v5364_v41 = vrot.slane %v5362_v6, 7  ;;  %v5345_v0 = vshrl.u32 %v10383_v27, 16  ;;  %v5348_v4 = vshll.u32 %v10383_v27, 16  ;;  %6210 = vrot.lane.b32.xlu1 %v5867_v8, %s10627_s22  ;;  %v5157_v42 = vmax.f32 %v5125_v57, 0.0  ;;  %v5716_v35 = vld [vmem:[#allocation2 + $0x30] sm:$0xf] }
 0x3db   : > { %v5881_v59 = vsel %vm10820_vm8, %v5876_v9, %v5880_v56  ;;  %v5885_v54 = vor.u32 %v5884_v53, %v5880_v56  ;;  %v5890_v16 = vrot.slane %v5888_v22, 5  ;;  %v5370_v28 = vshrl.u32 %v10386_v12, 16  ;;  %5748 = vst.msk [vmem:[#allocation3 + $0x20] sm:$0xf] %vm280_vm5, %v5716_v35 }
 0x3dc   : > { %v5367_v15 = vor.u32 %v5365_v1, %v5364_v41  ;;  %v5368_v43 = vrot.slane %v5364_v41, 4  ;;  %v5347_v51 = vrot.slane %v5345_v0, 7  ;;  %6212 = vrot.lane.b32.xlu0 %v5881_v59, %s10627_s22  ;;  %v5373_v62 = vshll.u32 %v10386_v12, 16  ;;  %v5782_v40 = vld [vmem:[#allocation2 + $0x28] sm:$0xf] }
 0x3dd   : > { %v10384_v30 = vpack.c.bf16 %v5157_v42, %v5157_v42  ;;  %v5886_v5 = vrot.slane %v5885_v54, 4  ;;  %v5893_v10 = vshrl.u32 %v5781_v44, 16  ;;  %v5372_v50 = vrot.slane %v5370_v28, 7  ;;  %v5715_v29 = vld [vmem:[#allocation2 + $0x28] sm:$0xf] }
 0x3de   : > { %v5632_v55 = vsel %vm10947_vm12, %v5367_v15, %v5631_v11  ;;  %v5350_v14 = vor.u32 %v5348_v4, %v5347_v51  ;;  %v5351_v37 = vrot.slane %v5347_v51, 4  ;;  %v10465_v32 = vpop.f32.mrf.mxu0  ;;  %5747 = vst.msk [vmem:[#allocation3 + $0x1c] sm:$0xf] %vm280_vm5, %v5715_v29  ;;  %v5635_v1 = vld [vmem:[#allocation2 + $0x50] sm:$0x1]  ;;  %v5896_v57 = vshll.u32 %v5781_v44, 16 }
 0x3df   : > { %5633 = vst [vmem:[#allocation2 + $0x48] sm:$0xf] %v5632_v55  ;;  %v5353_v9 = vshrl.u32 %v10384_v30, 16  ;;  %v5356_v25 = vshll.u32 %v10384_v30, 16  ;;  %v5891_v46 = vsel %vm10820_vm8, %v5886_v5, %v5890_v16  ;;  %v5895_v31 = vrot.slane %v5893_v10, 4 }
 0x3e0   : > { %v5625_v2 = vsel %vm10947_vm12, %v5350_v14, %v5624_v23  ;;  %v5375_v7 = vor.u32 %v5373_v62, %v5372_v50  ;;  %v5377_v22 = vrot.slane %v5372_v50, 4  ;;  %6214 = vrot.lane.b32.xlu1 %v5891_v46, %s10627_s22  ;;  %v5091_v6 = vmul.f32 %v10465_v32, %v12482_v63  ;;  %v4991_v39 = vpop.f32.mrf.mxu0  ;;  %v5783_v4 = vld [vmem:[#allocation2 + $0x2c] sm:$0x1]  ;;  %v5628_v54 = vld [vmem:[#allocation2 + $0x44] sm:$0x1] }
 0x3e1   : > { %5626 = vst [vmem:[#allocation2 + $0x3c] sm:$0xf] %v5625_v2  ;;  %v5355_v27 = vrot.slane %v5353_v9, 7  ;;  %v5902_v8 = vshll.u32 %v5782_v40, 16  ;;  %v5906_v56 = vshrl.u32 %v5782_v40, 16  ;;  %v5089_v0 = vmul.f32 %v12482_v63, %v4991_v39 }
 0x3e2   : > { %v5376_v53 = vsel %vm11225_vm14, %v5368_v43, %v5375_v7  ;;  %v5636_v38 = vsel %vm10712_vm2, %v5377_v22, %v5635_v1  ;;  %v5130_v41 = vadd.f32 %v12487_v21, %v5091_v6  ;;  %v5898_v42 = vrot.slane %v5896_v57, 5  ;;  %v10466_v59 = vpop.f32.mrf.mxu0  ;;  %v5784_v51 = vld [vmem:[#allocation2 + $0x30] sm:$0xf]  ;;  %v5717_v1 = vld [vmem:[#allocation2 + $0x34] sm:$0xf] }
 0x3e3   : > { %5634 = vst.msk [vmem:[#allocation2 + $0x4c] sm:$0xf] %vm280_vm5, %v5376_v53  ;;  %5637 = vst [vmem:[#allocation2 + $0x50] sm:$0x1] %v5636_v38  ;;  %v5358_v12 = vor.u32 %v5356_v25, %v5355_v27  ;;  %v5360_v58 = vrot.slane %v5355_v27, 4  ;;  %v5904_v44 = vrot.slane %v5902_v8, 5  ;;  %v5128_v15 = vadd.f32 %v12487_v21, %v5089_v0 }
 0x3e4   : > { %v5162_v16 = vmax.f32 %v5130_v41, 0.0  ;;  %v5092_v43 = vmul.f32 %v10466_v59, %v12482_v63  ;;  %v5908_v11 = vrot.slane %v5906_v56, 4  ;;  %v5899_v62 = vor.u32 %v5898_v42, %v5895_v31  ;;  %v4994_v30 = vpop.f32.mrf.mxu0  ;;  %v5785_v31 = vld [vmem:[#allocation2 + $0x34] sm:$0xf]  ;;  %5749 = vst.msk [vmem:[#allocation3 + $0x24] sm:$0xf] %vm280_vm5, %v5717_v1 }
 0x3e5   : > { %v5359_v28 = vsel %vm11225_vm14, %v5351_v37, %v5358_v12  ;;  %v5629_v23 = vsel %vm10712_vm2, %v5360_v58, %v5628_v54  ;;  %v5912_v5 = vshll.u32 %v5783_v4, 16  ;;  %v5160_v55 = vmax.f32 %v5128_v15, 0.0  ;;  %v5645_v12 = vld [vmem:[#allocation2 + $0x60] sm:$0xf]  ;;  %v5786_v15 = vld [vmem:[#allocation2 + $0x38] sm:$0x1] }
 0x3e6   : > { %5627 = vst.msk [vmem:[#allocation2 + $0x40] sm:$0xf] %vm280_vm5, %v5359_v28  ;;  %5630 = vst [vmem:[#allocation2 + $0x44] sm:$0x1] %v5629_v23  ;;  %v10389_v10 = vpack.c.bf16 %v5162_v16, %v5162_v16  ;;  %v5131_v14 = vadd.f32 %v12487_v21, %v5092_v43  ;;  %v5090_v50 = vmul.f32 %v12482_v63, %v4994_v30  ;;  %v5900_v40 = vrot.slane %v5899_v62, 4 }
 0x3e7   : > { %v5909_v29 = vor.u32 %v5908_v11, %v5904_v44  ;;  %v5914_v9 = vrot.slane %v5912_v5, 5  ;;  %v5917_v25 = vshrl.u32 %v5784_v51, 16  ;;  %v10387_v32 = vpack.c.bf16 %v5160_v55, %v5160_v55 }
 0x3e8   : > { %v5396_v37 = vshrl.u32 %v10389_v10, 16  ;;  %v5399_v46 = vshll.u32 %v10389_v10, 16  ;;  %v5163_v35 = vmax.f32 %v5131_v14, 0.0  ;;  %v5905_v2 = vsel %vm10820_vm8, %v5900_v40, %v5904_v44 }
 0x3e9   : > { %v5129_v7 = vadd.f32 %v12487_v21, %v5090_v50  ;;  %v5910_v22 = vrot.slane %v5909_v29, 4  ;;  %v5919_v6 = vrot.slane %v5917_v25, 4  ;;  %v5379_v39 = vshrl.u32 %v10387_v32, 16  ;;  %6216 = vrot.lane.b32.xlu0 %v5905_v2, %s10627_s22  ;;  %v5649_v29 = vld [vmem:[#allocation2 + $0x68] sm:$0x1] }
 0x3ea   : > { %v5398_v27 = vrot.slane %v5396_v37, 7  ;;  %v5382_v57 = vshll.u32 %v10387_v32, 16  ;;  %v10390_v8 = vpack.c.bf16 %v5163_v35, %v5163_v35  ;;  %v5920_v38 = vshll.u32 %v5784_v51, 16  ;;  %v5638_v51 = vld [vmem:[#allocation2 + $0x54] sm:$0xf] }
 0x3eb   : > { %v5161_v56 = vmax.f32 %v5129_v7, 0.0  ;;  %v5915_v53 = vsel %vm10820_vm8, %v5910_v22, %v5914_v9  ;;  %v5926_v41 = vshll.u32 %v5785_v31, 16  ;;  %v5381_v58 = vrot.slane %v5379_v39, 7  ;;  %v5787_v2 = vld [vmem:[#allocation2 + $0x3c] sm:$0xf] }
 0x3ec   : > { %v5401_v0 = vor.u32 %v5399_v46, %v5398_v27  ;;  %v5402_v4 = vrot.slane %v5398_v27, 4  ;;  %v5404_v42 = vshrl.u32 %v10390_v8, 16  ;;  %6218 = vrot.lane.b32.xlu1 %v5915_v53, %s10627_s22  ;;  %v5407_v44 = vshll.u32 %v10390_v8, 16  ;;  %v5718_v27 = vld [vmem:[#allocation2 + $0x3c] sm:$0xf] }
 0x3ed   : > { %v10388_v59 = vpack.c.bf16 %v5161_v56, %v5161_v56  ;;  %v5922_v54 = vrot.slane %v5920_v38, 5  ;;  %v5928_v16 = vrot.slane %v5926_v41, 5  ;;  %v5384_v11 = vor.u32 %v5382_v57, %v5381_v58  ;;  %v5788_v1 = vld [vmem:[#allocation2 + $0x40] sm:$0xf]  ;;  %v5642_v8 = vld [vmem:[#allocation2 + $0x5c] sm:$0x1] }
 0x3ee   : > { %v5646_v43 = vsel %vm10947_vm12, %v5401_v0, %v5645_v12  ;;  %v5385_v28 = vrot.slane %v5381_v58, 4  ;;  %v5406_v23 = vrot.slane %v5404_v42, 7  ;;  %v5930_v10 = vshrl.u32 %v5785_v31, 16  ;;  %v10469_v55 = vpop.f32.mrf.mxu0  ;;  %5750 = vst.msk [vmem:[#allocation3 + $0x28] sm:$0xf] %vm280_vm5, %v5718_v27 }
 0x3ef   : > { %5647 = vst [vmem:[#allocation2 + $0x60] sm:$0xf] %v5646_v43  ;;  %v5387_v62 = vshrl.u32 %v10388_v59, 16  ;;  %v5390_v30 = vshll.u32 %v10388_v59, 16  ;;  %v5923_v5 = vor.u32 %v5922_v54, %v5919_v6  ;;  %v5639_v14 = vsel %vm10947_vm12, %v5384_v11, %v5638_v51  ;;  %v5719_v58 = vld [vmem:[#allocation2 + $0x40] sm:$0xf] }
 0x3f0   : > { %v5409_v50 = vor.u32 %v5407_v44, %v5406_v23  ;;  %v5411_v40 = vrot.slane %v5406_v23, 4  ;;  %v5936_v9 = vshll.u32 %v5786_v15, 16  ;;  %5640 = vst [vmem:[#allocation2 + $0x54] sm:$0xf] %v5639_v14  ;;  %v5932_v46 = vrot.slane %v5930_v10, 4  ;;  %v5007_v35 = vpop.f32.mrf.mxu0 }
 0x3f1   : > { %v5389_v25 = vrot.slane %v5387_v62, 7  ;;  %v5924_v37 = vrot.slane %v5923_v5, 4  ;;  %v5095_v32 = vmul.f32 %v10469_v55, %v12482_v63  ;;  %v5093_v6 = vmul.f32 %v12482_v63, %v5007_v35  ;;  %v5720_v42 = vld [vmem:[#allocation2 + $0x48] sm:$0xf]  ;;  %5751 = vst.msk [vmem:[#allocation3 + $0x2c] sm:$0xf] %vm280_vm5, %v5719_v58 }
 0x3f2   : > { %v5410_v7 = vsel %vm11225_vm14, %v5402_v4, %v5409_v50  ;;  %v5650_v31 = vsel %vm10712_vm2, %v5411_v40, %v5649_v29  ;;  %v5938_v22 = vrot.slane %v5936_v9, 5  ;;  %v5933_v53 = vor.u32 %v5932_v46, %v5928_v16  ;;  %v10470_v38 = vpop.f32.mrf.mxu0  ;;  %v12618_v43 = vld [vmem:[#allocation2 + $0x48] sm:$0xf]  ;;  %5752 = vst.msk [vmem:[#allocation3 + $0x30] sm:$0xf] %vm280_vm5, %v5720_v42 }
 0x3f3   : > { %5648 = vst.msk [vmem:[#allocation2 + $0x64] sm:$0xf] %vm280_vm5, %v5410_v7  ;;  %5651 = vst [vmem:[#allocation2 + $0x68] sm:$0x1] %v5650_v31  ;;  %v5392_v39 = vor.u32 %v5390_v30, %v5389_v25  ;;  %v5394_v57 = vrot.slane %v5389_v25, 4  ;;  %v5929_v56 = vsel %vm10820_vm8, %v5924_v37, %v5928_v16  ;;  %v5134_v41 = vadd.f32 %v12487_v21, %v5095_v32 }
 0x3f4   : > { %6220 = vrot.lane.b32.xlu0 %v5929_v56, %s10627_s22  ;;  %v5132_v0 = vadd.f32 %v12487_v21, %v5093_v6  ;;  %v5941_v4 = vshrl.u32 %v5787_v2, 16  ;;  %v5944_v12 = vshll.u32 %v5787_v2, 16  ;;  %v5934_v54 = vrot.slane %v5933_v53, 4  ;;  %v5010_v15 = vpop.f32.mrf.mxu0  ;;  %v5659_v56 = vld [vmem:[#allocation2 + $0x78] sm:$0xf] }
 0x3f5   : > { %v5393_v44 = vsel %vm11225_vm14, %v5385_v28, %v5392_v39  ;;  %v5643_v59 = vsel %vm10712_vm2, %v5394_v57, %v5642_v8  ;;  %v5950_v16 = vshll.u32 %v5788_v1, 16  ;;  %v5166_v11 = vmax.f32 %v5134_v41, 0.0  ;;  %v5789_v28 = vld [vmem:[#allocation2 + $0x44] sm:$0x1] }
 0x3f6   : > { %5641 = vst.msk [vmem:[#allocation2 + $0x58] sm:$0xf] %vm280_vm5, %v5393_v44  ;;  %5644 = vst [vmem:[#allocation2 + $0x5c] sm:$0x1] %v5643_v59  ;;  %v5164_v23 = vmax.f32 %v5132_v0, 0.0  ;;  %v5943_v51 = vrot.slane %v5941_v4, 4  ;;  %v5939_v30 = vsel %vm10820_vm8, %v5934_v54, %v5938_v22  ;;  %v5096_v55 = vmul.f32 %v10470_v38, %v12482_v63 }
 0x3f7   : > { %v5946_v62 = vrot.slane %v5944_v12, 5  ;;  %v5952_v5 = vrot.slane %v5950_v16, 5  ;;  %v5954_v10 = vshrl.u32 %v5788_v1, 16  ;;  %6222 = vrot.lane.b32.xlu1 %v5939_v30, %s10627_s22  ;;  %v10393_v14 = vpack.c.bf16 %v5166_v11, %v5166_v11  ;;  %v5791_v4 = vld [vmem:[#allocation2 + $0x4c] sm:$0xf] }
 0x3f8   : > { %v10391_v50 = vpack.c.bf16 %v5164_v23, %v5164_v23  ;;  %v5094_v29 = vmul.f32 %v12482_v63, %v5010_v15  ;;  %v5135_v9 = vadd.f32 %v12487_v21, %v5096_v55  ;;  %v5960_v37 = vshll.u32 %v5789_v28, 16  ;;  %v5652_v59 = vld [vmem:[#allocation2 + $0x6c] sm:$0xf]  ;;  %v5792_v54 = vld [vmem:[#allocation2 + $0x50] sm:$0x1] }
 0x3f9   : > { %v5947_v40 = vor.u32 %v5946_v62, %v5943_v51  ;;  %v5956_v25 = vrot.slane %v5954_v10, 4  ;;  %v5965_v46 = vshrl.u32 %v12618_v43, 16  ;;  %v5430_v32 = vshrl.u32 %v10393_v14, 16  ;;  %v5793_v51 = vld [vmem:[#allocation2 + $0x54] sm:$0xf] }
 0x3fa   : > { %v5433_v35 = vshll.u32 %v10393_v14, 16  ;;  %v5413_v2 = vshrl.u32 %v10391_v50, 16  ;;  %v5416_v7 = vshll.u32 %v10391_v50, 16  ;;  %v5167_v22 = vmax.f32 %v5135_v9, 0.0  ;;  %v5721_v62 = vld [vmem:[#allocation2 + $0x4c] sm:$0xf] }
 0x3fb   : > { %v5948_v31 = vrot.slane %v5947_v40, 4  ;;  %v5133_v6 = vadd.f32 %v12487_v21, %v5094_v29  ;;  %v5957_v1 = vor.u32 %v5956_v25, %v5952_v5  ;;  %v5432_v27 = vrot.slane %v5430_v32, 7  ;;  %5753 = vst.msk [vmem:[#allocation3 + $0x34] sm:$0xf] %vm280_vm5, %v5721_v62  ;;  %v5663_v29 = vld [vmem:[#allocation2 + $0x80] sm:$0x1] }
 0x3fc   : > { %v12631_v39 = vrot.slane %v5413_v2, 7  ;;  %v5962_v57 = vrot.slane %v5960_v37, 5  ;;  %v5967_v8 = vrot.slane %v5965_v46, 4  ;;  %v10394_v38 = vpack.c.bf16 %v5167_v22, %v5167_v22  ;;  %v5724_v62 = vld [vmem:[#allocation2 + $0x60] sm:$0xf] }
 0x3fd   : > { %v5953_v53 = vsel %vm10820_vm8, %v5948_v31, %v5952_v5  ;;  %v5165_v41 = vmax.f32 %v5133_v6, 0.0  ;;  %v5958_v0 = vrot.slane %v5957_v1, 4  ;;  %v5435_v12 = vor.u32 %v5433_v35, %v5432_v27  ;;  %v5794_v31 = vld [vmem:[#allocation2 + $0x58] sm:$0xf]  ;;  %5756 = vst.msk [vmem:[#allocation3 + $0x40] sm:$0xf] %vm280_vm5, %v5724_v62 }
 0x3fe   : > { %v5436_v58 = vrot.slane %v5432_v27, 4  ;;  %v5418_v42 = vor.u32 %v5416_v7, %v12631_v39  ;;  %v5419_v44 = vrot.slane %v12631_v39, 4  ;;  %6224 = vrot.lane.b32.xlu0 %v5953_v53, %s10627_s22  ;;  %v5438_v16 = vshrl.u32 %v10394_v38, 16  ;;  %v5722_v39 = vld [vmem:[#allocation2 + $0x54] sm:$0xf] }
 0x3ff   : > { %v5441_v15 = vshll.u32 %v10394_v38, 16  ;;  %v10392_v11 = vpack.c.bf16 %v5165_v41, %v5165_v41  ;;  %v5963_v23 = vsel %vm10820_vm8, %v5958_v0, %v5962_v57  ;;  %v5660_v28 = vsel %vm10947_vm12, %v5435_v12, %v5659_v56  ;;  %v5656_v41 = vld [vmem:[#allocation2 + $0x74] sm:$0x1]  ;;  %5754 = vst.msk [vmem:[#allocation3 + $0x38] sm:$0xf] %vm280_vm5, %v5722_v39 }
 0x400   : > { %v5653_v30 = vsel %vm10947_vm12, %v5418_v42, %v5652_v59  ;;  %6226 = vrot.lane.b32.xlu1 %v5963_v23, %s10627_s22  ;;  %v5968_v5 = vshll.u32 %v12618_v43, 16  ;;  %v5974_v10 = vshll.u32 %v5791_v4, 16  ;;  %5661 = vst [vmem:[#allocation2 + $0x78] sm:$0xf] %v5660_v28  ;;  %v5440_v55 = vrot.slane %v5438_v16, 7 }
 0x401   : > { %5654 = vst [vmem:[#allocation2 + $0x6c] sm:$0xf] %v5653_v30  ;;  %v5421_v14 = vshrl.u32 %v10392_v11, 16  ;;  %v5424_v50 = vshll.u32 %v10392_v11, 16  ;;  %v5978_v40 = vshrl.u32 %v5791_v4, 16  ;;  %v5984_v37 = vshll.u32 %v5792_v54, 16 }
 0x402   : > { %v5970_v9 = vrot.slane %v5968_v5, 5  ;;  %v5976_v25 = vrot.slane %v5974_v10, 5  ;;  %v5989_v46 = vshrl.u32 %v5793_v51, 16  ;;  %v5443_v32 = vor.u32 %v5441_v15, %v5440_v55  ;;  %v10473_v43 = vpop.f32.mrf.mxu0  ;;  %v5796_v4 = vld [vmem:[#allocation2 + $0x60] sm:$0xf] }
 0x403   : > { %v5445_v35 = vrot.slane %v5440_v55, 4  ;;  %v5423_v2 = vrot.slane %v5421_v14, 7  ;;  %v5980_v7 = vrot.slane %v5978_v40, 4  ;;  %v5986_v6 = vrot.slane %v5984_v37, 5  ;;  %v5795_v54 = vld [vmem:[#allocation2 + $0x5c] sm:$0x1] }
 0x404   : > { %v5971_v22 = vor.u32 %v5970_v9, %v5967_v8  ;;  %v5991_v1 = vrot.slane %v5989_v46, 4  ;;  %v5992_v27 = vshll.u32 %v5793_v51, 16  ;;  %v5444_v57 = vsel %vm11225_vm14, %v5436_v58, %v5443_v32  ;;  %v5023_v0 = vpop.f32.mrf.mxu0  ;;  %v5723_v51 = vld [vmem:[#allocation2 + $0x58] sm:$0xf]  ;;  %v5797_v40 = vld [vmem:[#allocation2 + $0x64] sm:$0xf] }
 0x405   : > { %v5664_v56 = vsel %vm10712_vm2, %v5445_v35, %v5663_v29  ;;  %v5426_v53 = vor.u32 %v5424_v50, %v5423_v2  ;;  %v5428_v38 = vrot.slane %v5423_v2, 4  ;;  %5662 = vst.msk [vmem:[#allocation2 + $0x7c] sm:$0xf] %vm280_vm5, %v5444_v57  ;;  %v5981_v12 = vor.u32 %v5980_v7, %v5976_v25  ;;  %5755 = vst.msk [vmem:[#allocation3 + $0x3c] sm:$0xf] %vm280_vm5, %v5723_v51 }
 0x406   : > { %5665 = vst [vmem:[#allocation2 + $0x80] sm:$0x1] %v5664_v56  ;;  %v5972_v8 = vrot.slane %v5971_v22, 4  ;;  %v5994_v42 = vrot.slane %v5992_v27, 5  ;;  %v5998_v59 = vshll.u32 %v5794_v31, 16  ;;  %v6002_v15 = vshrl.u32 %v5794_v31, 16  ;;  %v10474_v23 = vpop.f32.mrf.mxu0 }
 0x407   : > { %v5427_v58 = vsel %vm11225_vm14, %v5419_v44, %v5426_v53  ;;  %v5657_v16 = vsel %vm10712_vm2, %v5428_v38, %v5656_v41  ;;  %v5099_v11 = vmul.f32 %v10473_v43, %v12482_v63  ;;  %v5982_v30 = vrot.slane %v5981_v12, 4  ;;  %v5725_v31 = vld [vmem:[#allocation2 + $0x64] sm:$0xf] }
 0x408   : > { %5655 = vst.msk [vmem:[#allocation2 + $0x70] sm:$0xf] %vm280_vm5, %v5427_v58  ;;  %5658 = vst [vmem:[#allocation2 + $0x74] sm:$0x1] %v5657_v16  ;;  %v5977_v28 = vsel %vm10820_vm8, %v5972_v8, %v5976_v25  ;;  %v5995_v5 = vor.u32 %v5994_v42, %v5991_v1  ;;  %v6000_v10 = vrot.slane %v5998_v59, 5  ;;  %v5097_v55 = vmul.f32 %v12482_v63, %v5023_v0  ;;  %v5026_v7 = vpop.f32.mrf.mxu0 }
 0x409   : > { %6228 = vrot.lane.b32.xlu0 %v5977_v28, %s10627_s22  ;;  %v5138_v44 = vadd.f32 %v12487_v21, %v5099_v11  ;;  %v6004_v14 = vrot.slane %v6002_v15, 4  ;;  %v6008_v50 = vshll.u32 %v5795_v54, 16  ;;  %v5987_v29 = vsel %vm10820_vm8, %v5982_v30, %v5986_v6  ;;  %5757 = vst.msk [vmem:[#allocation3 + $0x44] sm:$0xf] %vm280_vm5, %v5725_v31  ;;  %v5799_v62 = vld [vmem:[#allocation2 + $0x6c] sm:$0xf] }
 0x40a   : > { %v5996_v9 = vrot.slane %v5995_v5, 4  ;;  %v6013_v25 = vshrl.u32 %v5796_v4, 16  ;;  %v6016_v37 = vshll.u32 %v5796_v4, 16  ;;  %6230 = vrot.lane.b32.xlu1 %v5987_v29, %s10627_s22  ;;  %v5136_v32 = vadd.f32 %v12487_v21, %v5097_v55  ;;  %v5798_v4 = vld [vmem:[#allocation2 + $0x68] sm:$0x1] }
 0x40b   : > { %v5170_v46 = vmax.f32 %v5138_v44, 0.0  ;;  %v6005_v35 = vor.u32 %v6004_v14, %v6000_v10  ;;  %v6010_v2 = vrot.slane %v6008_v50, 5  ;;  %v6022_v27 = vshll.u32 %v5797_v40, 16  ;;  %v5726_v44 = vld [vmem:[#allocation2 + $0x6c] sm:$0xf] }
 0x40c   : > { %v6001_v43 = vsel %vm10820_vm8, %v5996_v9, %v6000_v10  ;;  %v6015_v22 = vrot.slane %v6013_v25, 4  ;;  %v6018_v1 = vrot.slane %v6016_v37, 5  ;;  %v5168_v39 = vmax.f32 %v5136_v32, 0.0  ;;  %v5673_v50 = vld [vmem:[#allocation2 + $0x90] sm:$0xf] }
 0x40d   : > { %6232 = vrot.lane.b32.xlu0 %v6001_v43, %s10627_s22  ;;  %v10397_v6 = vpack.c.bf16 %v5170_v46, %v5170_v46  ;;  %v6006_v57 = vrot.slane %v6005_v35, 4  ;;  %v6026_v56 = vshrl.u32 %v5797_v40, 16  ;;  %v6024_v38 = vrot.slane %v6022_v27, 5  ;;  %5758 = vst.msk [vmem:[#allocation3 + $0x48] sm:$0xf] %vm280_vm5, %v5726_v44 }
 0x40e   : > { %v6019_v53 = vor.u32 %v6018_v1, %v6015_v22  ;;  %v5100_v41 = vmul.f32 %v10474_v23, %v12482_v63  ;;  %v5098_v0 = vmul.f32 %v12482_v63, %v5026_v7  ;;  %v10395_v42 = vpack.c.bf16 %v5168_v39, %v5168_v39  ;;  %v5666_v29 = vld [vmem:[#allocation2 + $0x84] sm:$0xf]  ;;  %v5802_v32 = vld [vmem:[#allocation2 + $0x78] sm:$0xf] }
 0x40f   : > { %v5464_v8 = vshrl.u32 %v10397_v6, 16  ;;  %v5467_v12 = vshll.u32 %v10397_v6, 16  ;;  %v6011_v59 = vsel %vm10820_vm8, %v6006_v57, %v6010_v2  ;;  %v6028_v15 = vrot.slane %v6026_v56, 4  ;;  %v5727_v35 = vld [vmem:[#allocation2 + $0x70] sm:$0xf] }
 0x410   : > { %6234 = vrot.lane.b32.xlu1 %v6011_v59, %s10627_s22  ;;  %v6020_v54 = vrot.slane %v6019_v53, 4  ;;  %v5139_v58 = vadd.f32 %v12487_v21, %v5100_v41  ;;  %v5137_v16 = vadd.f32 %v12487_v21, %v5098_v0  ;;  %v5447_v23 = vshrl.u32 %v10395_v42, 16  ;;  %v5800_v43 = vld [vmem:[#allocation2 + $0x70] sm:$0xf]  ;;  %5759 = vst.msk [vmem:[#allocation3 + $0x4c] sm:$0xf] %vm280_vm5, %v5727_v35 }
 0x411   : > { %v12681_v11 = vrot.slane %v5464_v8, 7  ;;  %v5450_v51 = vshll.u32 %v10395_v42, 16  ;;  %v6032_v63 = vshll.u32 %v5798_v4, 16  ;;  %v6029_v10 = vor.u32 %v6028_v15, %v6024_v38  ;;  %v5728_v1 = vld [vmem:[#allocation2 + $0x78] sm:$0xf] }
 0x412   : > { %v6025_v28 = vsel %vm10820_vm8, %v6020_v54, %v6024_v38  ;;  %v5171_v30 = vmax.f32 %v5139_v58, 0.0  ;;  %v5169_v5 = vmax.f32 %v5137_v16, 0.0  ;;  %v5449_v21 = vrot.slane %v5447_v23, 7  ;;  %v5801_v56 = vld [vmem:[#allocation2 + $0x74] sm:$0x1] }
 0x413   : > { %v5469_v55 = vor.u32 %v5467_v12, %v12681_v11  ;;  %v5470_v14 = vrot.slane %v12681_v11, 4  ;;  %6236 = vrot.lane.b32.xlu0 %v6025_v28, %s10627_s22  ;;  %v6034_v40 = vrot.slane %v6032_v63, 5  ;;  %v6030_v37 = vrot.slane %v6029_v10, 4  ;;  %5760 = vst.msk [vmem:[#allocation3 + $0x50] sm:$0xf] %vm280_vm5, %v5728_v1 }
 0x414   : > { %v10398_v9 = vpack.c.bf16 %v5171_v30, %v5171_v30  ;;  %v10396_v25 = vpack.c.bf16 %v5169_v5, %v5169_v5  ;;  %v6037_v46 = vshrl.u32 %v5799_v62, 16  ;;  %v5452_v7 = vor.u32 %v5450_v51, %v5449_v21  ;;  %v5729_v4 = vld [vmem:[#allocation2 + $0x7c] sm:$0xf]  ;;  %v5677_v54 = vld [vmem:[#allocation2 + $0x98] sm:$0x1] }
 0x415   : > { %v5674_v2 = vsel %vm10947_vm12, %v5469_v55, %v5673_v50  ;;  %v5453_v31 = vrot.slane %v5449_v21, 4  ;;  %v6040_v22 = vshll.u32 %v5799_v62, 16  ;;  %v6035_v38 = vsel %vm10820_vm8, %v6030_v37, %v6034_v40  ;;  %5761 = vst.msk [vmem:[#allocation3 + $0x54] sm:$0xf] %vm280_vm5, %v5729_v4  ;;  %v5670_v28 = vld [vmem:[#allocation2 + $0x8c] sm:$0x1] }
 0x416   : > { %5675 = vst [vmem:[#allocation2 + $0x90] sm:$0xf] %v5674_v2  ;;  %v5472_v27 = vshrl.u32 %v10398_v9, 16  ;;  %v5475_v6 = vshll.u32 %v10398_v9, 16  ;;  %v5455_v39 = vshrl.u32 %v10396_v25, 16  ;;  %v5458_v57 = vshll.u32 %v10396_v25, 16  ;;  %6238 = vrot.lane.b32.xlu1 %v6035_v38, %s10627_s22 }
 0x417   : > { %v5667_v53 = vsel %vm10947_vm12, %v5452_v7, %v5666_v29  ;;  %v6039_v41 = vrot.slane %v6037_v46, 4  ;;  %v6042_v0 = vrot.slane %v6040_v22, 5  ;;  %v6046_v42 = vshll.u32 %v5800_v43, 16  ;;  %v5803_v30 = vld [vmem:[#allocation2 + $0x7c] sm:$0xf] }
 0x418   : > { %5668 = vst [vmem:[#allocation2 + $0x84] sm:$0xf] %v5667_v53  ;;  %v5474_v8 = vrot.slane %v5472_v27, 7  ;;  %v5457_v12 = vrot.slane %v5455_v39, 7  ;;  %v6050_v59 = vshrl.u32 %v5800_v43, 16  ;;  %v6056_v16 = vshll.u32 %v5801_v56, 16 }
 0x419   : > { %v6043_v58 = vor.u32 %v6042_v0, %v6039_v41  ;;  %v6061_v15 = vshrl.u32 %v5802_v32, 16  ;;  %v6064_v11 = vshll.u32 %v5802_v32, 16  ;;  %v6048_v10 = vrot.slane %v6046_v42, 5  ;;  %v5804_v50 = vld [vmem:[#allocation2 + $0x80] sm:$0x1] }
 0x41a   : > { %v5477_v23 = vor.u32 %v5475_v6, %v5474_v8  ;;  %v5479_v51 = vrot.slane %v5474_v8, 4  ;;  %v5460_v63 = vor.u32 %v5458_v57, %v5457_v12  ;;  %v5462_v62 = vrot.slane %v5457_v12, 4  ;;  %v10477_v21 = vpop.f32.mrf.mxu0  ;;  %v12717_v22 = vld [vmem:[%s13958_s2] ss:$0 sm:$0xff] }
 0x41b   : > { %v6044_v5 = vrot.slane %v6043_v58, 4  ;;  %v6052_v44 = vrot.slane %v6050_v59, 4  ;;  %v6058_v55 = vrot.slane %v6056_v16, 5  ;;  %v6066_v32 = vrot.slane %v6064_v11, 5  ;;  %v12725_v4 = vld [vmem:[%s13959_s3] ss:$0 sm:$0xff] }
 0x41c   : > { %v5478_v40 = vsel %vm11225_vm14, %v5470_v14, %v5477_v23  ;;  %v5678_v29 = vsel %vm10712_vm2, %v5479_v51, %v5677_v54  ;;  %v5461_v9 = vsel %vm11225_vm14, %v5453_v31, %v5460_v63  ;;  %v5671_v25 = vsel %vm10712_vm2, %v5462_v62, %v5670_v28  ;;  %v5039_v35 = vpop.f32.mrf.mxu0 }
 0x41d   : > { %5676 = vst.msk [vmem:[#allocation2 + $0x94] sm:$0xf] %vm280_vm5, %v5478_v40  ;;  %5679 = vst [vmem:[#allocation2 + $0x98] sm:$0x1] %v5678_v29  ;;  %v6049_v37 = vsel %vm10820_vm8, %v6044_v5, %v6048_v10  ;;  %v6053_v46 = vor.u32 %v6052_v44, %v6048_v10  ;;  %v6063_v14 = vrot.slane %v6061_v15, 4  ;;  %v6070_v7 = vshll.u32 %v5803_v30, 16 }
 0x41e   : > { %5669 = vst.msk [vmem:[#allocation2 + $0x88] sm:$0xf] %vm280_vm5, %v5461_v9  ;;  %5672 = vst [vmem:[#allocation2 + $0x8c] sm:$0x1] %v5671_v25  ;;  %v12711_v2 = vld [vmem:[#allocation2 + $0x90] sm:$0xf]  ;;  %6240 = vrot.lane.b32.xlu0 %v6049_v37, %s10627_s22  ;;  %v5103_v1 = vmul.f32 %v12717_v22, %v10477_v21  ;;  %v5101_v39 = vmul.f32 %v12717_v22, %v5039_v35  ;;  %v10478_v57 = vpop.f32.mrf.mxu0 }
 0x41f   : > { %v6074_v31 = vshrl.u32 %v5803_v30, 16  ;;  %v6080_v43 = vshll.u32 %v5804_v50, 16  ;;  %v6054_v27 = vrot.slane %v6053_v46, 4  ;;  %v6067_v6 = vor.u32 %v6066_v32, %v6063_v14  ;;  %v5805_v56 = vld [vmem:[#allocation2 + $0x84] sm:$0xf] }
 0x420   : > { %v6109_v53 = vshrl.u32 %v12711_v2, 16  ;;  %v6072_v38 = vrot.slane %v6070_v7, 5  ;;  %v5142_v8 = vadd.f32 %v12725_v4, %v5103_v1  ;;  %v5730_v12 = vld [vmem:[#allocation2 + $0x84] sm:$0xf]  ;;  %v5140_v54 = vadd.f32 %v12725_v4, %v5101_v39  ;;  %v5042_v16 = vpop.f32.mrf.mxu0  ;;  %v5687_v39 = vld [vmem:[#allocation2 + $0xa8] sm:$0xf] }
 0x421   : > { %v6076_v41 = vrot.slane %v6074_v31, 4  ;;  %v6082_v0 = vrot.slane %v6080_v43, 5  ;;  %v6059_v42 = vsel %vm10820_vm8, %v6054_v27, %v6058_v55  ;;  %v6068_v59 = vrot.slane %v6067_v6, 4  ;;  %5762 = vst.msk [vmem:[#allocation3 + $0x58] sm:$0xf] %vm280_vm5, %v5730_v12 }
 0x422   : > { %v5104_v58 = vmul.f32 %v12717_v22, %v10478_v57  ;;  %6242 = vrot.lane.b32.xlu1 %v6059_v42, %s10627_s22  ;;  %v5174_v11 = vmax.f32 %v5142_v8, 0.0  ;;  %v5102_v23 = vmul.f32 %v12717_v22, %v5042_v16  ;;  %v6085_v51 = vshrl.u32 %v5805_v56, 16 }
 0x423   : > { %v6077_v15 = vor.u32 %v6076_v41, %v6072_v38  ;;  %v6073_v63 = vsel %vm10820_vm8, %v6068_v59, %v6072_v38  ;;  %v5172_v62 = vmax.f32 %v5140_v54, 0.0  ;;  %v6088_v30 = vshll.u32 %v5805_v56, 16 }
 0x424   : > { %v5143_v28 = vadd.f32 %v12725_v4, %v5104_v58  ;;  %6244 = vrot.lane.b32.xlu0 %v6073_v63, %s10627_s22  ;;  %v10401_v10 = vpack.c.bf16 %v5174_v11, %v5174_v11  ;;  %v5141_v44 = vadd.f32 %v12725_v4, %v5102_v23  ;;  %v6087_v50 = vrot.slane %v6085_v51, 4  ;;  %v5732_v51 = vld [vmem:[#allocation2 + $0x90] sm:$0xf] }
 0x425   : > { %v6078_v5 = vrot.slane %v6077_v15, 4  ;;  %v5806_v55 = vld [vmem:[#allocation2 + $0x88] sm:$0xf]  ;;  %v10399_v21 = vpack.c.bf16 %v5172_v62, %v5172_v62  ;;  %v6090_v29 = vrot.slane %v6088_v30, 5  ;;  %v5807_v8 = vld [vmem:[#allocation2 + $0x8c] sm:$0x1] }
 0x426   : > { %v5175_v40 = vmax.f32 %v5143_v28, 0.0  ;;  %v6094_v9 = vshll.u32 %v5806_v55, 16  ;;  %v5498_v37 = vshrl.u32 %v10401_v10, 16  ;;  %v5501_v46 = vshll.u32 %v10401_v10, 16  ;;  %v5731_v54 = vld [vmem:[#allocation2 + $0x88] sm:$0xf] }
 0x427   : > { %v6083_v25 = vsel %vm10820_vm8, %v6078_v5, %v6082_v0  ;;  %v5173_v14 = vmax.f32 %v5141_v44, 0.0  ;;  %v5481_v32 = vshrl.u32 %v10399_v21, 16  ;;  %v5484_v35 = vshll.u32 %v10399_v21, 16  ;;  %v5680_v15 = vld [vmem:[#allocation2 + $0x9c] sm:$0xf] }
 0x428   : > { %6246 = vrot.lane.b32.xlu1 %v6083_v25, %s10627_s22  ;;  %v10402_v7 = vpack.c.bf16 %v5175_v40, %v5175_v40  ;;  %v6091_v31 = vor.u32 %v6090_v29, %v6087_v50  ;;  %v5500_v43 = vrot.slane %v5498_v37, 7  ;;  %v6096_v27 = vrot.slane %v6094_v9, 5  ;;  %5763 = vst.msk [vmem:[#allocation3 + $0x5c] sm:$0xf] %vm280_vm5, %v5731_v54  ;;  %v5809_v5 = vld [vmem:[#allocation2 + $0x94] sm:$0xf] }
 0x429   : > { %v10400_v1 = vpack.c.bf16 %v5173_v14, %v5173_v14  ;;  %v6098_v6 = vshrl.u32 %v5806_v55, 16  ;;  %v5483_v57 = vrot.slane %v5481_v32, 7  ;;  %v6104_v30 = vshll.u32 %v5807_v8, 16  ;;  %5764 = vst.msk [vmem:[#allocation3 + $0x60] sm:$0xf] %vm280_vm5, %v5732_v51 }
 0x42a   : > { %v5506_v56 = vshrl.u32 %v10402_v7, 16  ;;  %v5509_v38 = vshll.u32 %v10402_v7, 16  ;;  %v6092_v41 = vrot.slane %v6091_v31, 4  ;;  %v5503_v0 = vor.u32 %v5501_v46, %v5500_v43  ;;  %v5733_v21 = vld [vmem:[#allocation2 + $0x94] sm:$0xf] }
 0x42b   : > { %v5504_v12 = vrot.slane %v5500_v43, 4  ;;  %v5489_v42 = vshrl.u32 %v10400_v1, 16  ;;  %v5492_v59 = vshll.u32 %v10400_v1, 16  ;;  %v5486_v58 = vor.u32 %v5484_v35, %v5483_v57  ;;  %v5691_v40 = vld [vmem:[#allocation2 + $0xb0] sm:$0x1] }
 0x42c   : > { %v5487_v16 = vrot.slane %v5483_v57, 4  ;;  %v5508_v11 = vrot.slane %v5506_v56, 7  ;;  %v6097_v23 = vsel %vm10820_vm8, %v6092_v41, %v6096_v27  ;;  %v5688_v63 = vsel %vm10947_vm12, %v5503_v0, %v5687_v39  ;;  %v5810_v46 = vld [vmem:[#allocation2 + $0x98] sm:$0x1]  ;;  %5765 = vst.msk [vmem:[#allocation3 + $0x64] sm:$0xf] %vm280_vm5, %v5733_v21 }
 0x42d   : > { %v5491_v62 = vrot.slane %v5489_v42, 7  ;;  %6248 = vrot.lane.b32.xlu0 %v6097_v23, %s10627_s22  ;;  %v6100_v28 = vrot.slane %v6098_v6, 4  ;;  %5689 = vst [vmem:[#allocation2 + $0xa8] sm:$0xf] %v5688_v63  ;;  %v5681_v10 = vsel %vm10947_vm12, %v5486_v58, %v5680_v15  ;;  %v6111_v50 = vrot.slane %v6109_v53, 4 }
 0x42e   : > { %v5511_v44 = vor.u32 %v5509_v38, %v5508_v11  ;;  %v5513_v55 = vrot.slane %v5508_v11, 4  ;;  %5682 = vst [vmem:[#allocation2 + $0x9c] sm:$0xf] %v5681_v10  ;;  %v6106_v37 = vrot.slane %v6104_v30, 5  ;;  %v5684_v35 = vld [vmem:[#allocation2 + $0xa4] sm:$0x1] }
 0x42f   : > { %v5494_v29 = vor.u32 %v5492_v59, %v5491_v62  ;;  %v5496_v9 = vrot.slane %v5491_v62, 4  ;;  %v6101_v25 = vor.u32 %v6100_v28, %v6096_v27  ;;  %v6112_v7 = vshll.u32 %v12711_v2, 16 }
 0x430   : > { %v5512_v14 = vsel %vm11225_vm14, %v5504_v12, %v5511_v44  ;;  %v5692_v32 = vsel %vm10712_vm2, %v5513_v55, %v5691_v40  ;;  %v6118_v53 = vshll.u32 %v5809_v5, 16  ;;  %v6122_v27 = vshrl.u32 %v5809_v5, 16 }
 0x431   : > { %5690 = vst.msk [vmem:[#allocation2 + $0xac] sm:$0xf] %vm280_vm5, %v5512_v14  ;;  %5693 = vst [vmem:[#allocation2 + $0xb0] sm:$0x1] %v5692_v32  ;;  %v5495_v31 = vsel %vm11225_vm14, %v5487_v16, %v5494_v29  ;;  %v5685_v43 = vsel %vm10712_vm2, %v5496_v9, %v5684_v35  ;;  %v6102_v1 = vrot.slane %v6101_v25, 4  ;;  %v6114_v6 = vrot.slane %v6112_v7, 5 }
 0x432   : > { %5683 = vst.msk [vmem:[#allocation2 + $0xa0] sm:$0xf] %vm280_vm5, %v5495_v31  ;;  %5686 = vst [vmem:[#allocation2 + $0xa4] sm:$0x1] %v5685_v43  ;;  %v6120_v39 = vrot.slane %v6118_v53, 5  ;;  %v6128_v57 = vshll.u32 %v5810_v46, 16  ;;  %v10481_v41 = vpop.f32.mrf.mxu0 }
 0x433   : > { %v6107_v2 = vsel %vm10820_vm8, %v6102_v1, %v6106_v37  ;;  %v6124_v56 = vrot.slane %v6122_v27, 4  ;;  %v6115_v38 = vor.u32 %v6114_v6, %v6111_v50  ;;  %v5107_v0 = vmul.f32 %v12717_v22, %v10481_v41 }
 0x434   : > { %6250 = vrot.lane.b32.xlu1 %v6107_v2, %s10627_s22  ;;  %v5814_v12 = vld [vmem:[#allocation2 + $0xa8] sm:$0xf]  ;;  %v6130_v59 = vrot.slane %v6128_v57, 5  ;;  %v5055_v54 = vpop.f32.mrf.mxu0 }
 0x435   : > { %v6125_v8 = vor.u32 %v6124_v56, %v6120_v39  ;;  %v6116_v42 = vrot.slane %v6115_v38, 4  ;;  %v5811_v58 = vld [vmem:[#allocation2 + $0x9c] sm:$0xf]  ;;  %v6157_v16 = vshrl.u32 %v5814_v12, 16  ;;  %v6160_v15 = vshll.u32 %v5814_v12, 16 }
 0x436   : > { %v5146_v23 = vadd.f32 %v12725_v4, %v5107_v0  ;;  %v5105_v51 = vmul.f32 %v12717_v22, %v5055_v54  ;;  %v6133_v63 = vshrl.u32 %v5811_v58, 16  ;;  %v5734_v62 = vld [vmem:[#allocation2 + $0x9c] sm:$0xf]  ;;  %v10482_v30 = vpop.f32.mrf.mxu0  ;;  %v6136_v5 = vshll.u32 %v5811_v58, 16 }
 0x437   : > { %v6126_v11 = vrot.slane %v6125_v8, 4  ;;  %v6121_v28 = vsel %vm10820_vm8, %v6116_v42, %v6120_v39  ;;  %v12774_v10 = vrot.slane %v6157_v16, 4  ;;  %v12776_v44 = vrot.slane %v6160_v15, 5  ;;  %5766 = vst.msk [vmem:[#allocation3 + $0x68] sm:$0xf] %vm280_vm5, %v5734_v62 }
 0x438   : > { %6252 = vrot.lane.b32.xlu0 %v6121_v28, %s10627_s22  ;;  %v5178_v50 = vmax.f32 %v5146_v23, 0.0  ;;  %v5144_v21 = vadd.f32 %v12725_v4, %v5105_v51  ;;  %v5108_v40 = vmul.f32 %v12717_v22, %v10482_v30  ;;  %v5058_v25 = vpop.f32.mrf.mxu0  ;;  %v6135_v37 = vrot.slane %v6133_v63, 4  ;;  %v5737_v28 = vld [vmem:[#allocation2 + $0xac] sm:$0xf] }
 0x439   : > { %v6131_v55 = vsel %vm10820_vm8, %v6126_v11, %v6130_v59  ;;  %v5812_v29 = vld [vmem:[#allocation2 + $0xa0] sm:$0xf]  ;;  %v5813_v9 = vld [vmem:[#allocation2 + $0xa4] sm:$0x1]  ;;  %v6138_v46 = vrot.slane %v6136_v5, 5  ;;  %v5106_v31 = vmul.f32 %v12717_v22, %v5058_v25  ;;  %v6163_v23 = vor.u32 %v12776_v44, %v12774_v10 }
 0x43a   : > { %6254 = vrot.lane.b32.xlu1 %v6131_v55, %s10627_s22  ;;  %v6142_v14 = vshll.u32 %v5812_v29, 16  ;;  %v6146_v32 = vshrl.u32 %v5812_v29, 16  ;;  %v10405_v35 = vpack.c.bf16 %v5178_v50, %v5178_v50  ;;  %v5176_v7 = vmax.f32 %v5144_v21, 0.0  ;;  %v5735_v0 = vld [vmem:[#allocation2 + $0xa0] sm:$0xf] }
 0x43b   : > { %v5147_v53 = vadd.f32 %v12725_v4, %v5108_v40  ;;  %v6139_v43 = vor.u32 %v6138_v46, %v6135_v37  ;;  %v6152_v6 = vshll.u32 %v5813_v9, 16  ;;  %v5145_v38 = vadd.f32 %v12725_v4, %v5106_v31  ;;  %5767 = vst.msk [vmem:[#allocation3 + $0x6c] sm:$0xf] %vm280_vm5, %v5735_v0  ;;  %v5736_v22 = vld [vmem:[#allocation2 + $0xa8] sm:$0xf] }
 0x43c   : > { %v6144_v1 = vrot.slane %v6142_v14, 5  ;;  %v6148_v27 = vrot.slane %v6146_v32, 4  ;;  %v5532_v39 = vshrl.u32 %v10405_v35, 16  ;;  %v10403_v57 = vpack.c.bf16 %v5176_v7, %v5176_v7  ;;  %v5815_v11 = vld [vmem:[#allocation2 + $0xac] sm:$0xf] }
 0x43d   : > { %v5179_v2 = vmax.f32 %v5147_v53, 0.0  ;;  %v5535_v56 = vshll.u32 %v10405_v35, 16  ;;  %v6140_v41 = vrot.slane %v6139_v43, 4  ;;  %v6154_v54 = vrot.slane %v6152_v6, 5  ;;  %5768 = vst.msk [vmem:[#allocation3 + $0x70] sm:$0xf] %vm280_vm5, %v5736_v22 }
 0x43e   : > { %v6149_v8 = vor.u32 %v6148_v27, %v6144_v1  ;;  %v5534_v12 = vrot.slane %v5532_v39, 7  ;;  %v5515_v42 = vshrl.u32 %v10403_v57, 16  ;;  %v5177_v58 = vmax.f32 %v5145_v38, 0.0  ;;  %v5701_v5 = vld [vmem:[#allocation2 + $0xc0] sm:$0xf] }
 0x43f   : > { %v10406_v59 = vpack.c.bf16 %v5179_v2, %v5179_v2  ;;  %v6145_v16 = vsel %vm10820_vm8, %v6140_v41, %v6144_v1  ;;  %v5518_v63 = vshll.u32 %v10403_v57, 16  ;;  %5769 = vst.msk [vmem:[#allocation3 + $0x74] sm:$0xf] %vm280_vm5, %v5737_v28  ;;  %v5816_v29 = vld [vmem:[#allocation2 + $0xb0] sm:$0x1]  ;;  %v6164_v37 = vrot.slane %v6163_v23, 4 }
 0x440   : > { %v6150_v15 = vrot.slane %v6149_v8, 4  ;;  %v5537_v4 = vor.u32 %v5535_v56, %v5534_v12  ;;  %v5517_v51 = vrot.slane %v5515_v42, 7  ;;  %6256 = vrot.lane.b32.xlu0 %v6145_v16, %s10627_s22  ;;  %v5538_v30 = vrot.slane %v5534_v12, 4  ;;  %v5694_v9 = vld [vmem:[#allocation2 + $0xb4] sm:$0xf] }
 0x441   : > { %v5540_v62 = vshrl.u32 %v10406_v59, 16  ;;  %v10404_v55 = vpack.c.bf16 %v5177_v58, %v5177_v58  ;;  %v5543_v40 = vshll.u32 %v10406_v59, 16  ;;  %v6166_v46 = vshll.u32 %v5815_v11, 16  ;;  %v5705_v31 = vld [vmem:[#allocation2 + $0xc8] sm:$0x1] }
 0x442   : > { %v6155_v50 = vsel %vm10820_vm8, %v6150_v15, %v6154_v54  ;;  %v5702_v10 = vsel %vm10947_vm12, %v5537_v4, %v5701_v5  ;;  %v5520_v44 = vor.u32 %v5518_v63, %v5517_v51  ;;  %v6170_v14 = vshrl.u32 %v5815_v11, 16  ;;  %v5698_v0 = vld [vmem:[#allocation2 + $0xbc] sm:$0x1] }
 0x443   : > { %v5542_v21 = vrot.slane %v5540_v62, 7  ;;  %6258 = vrot.lane.b32.xlu1 %v6155_v50, %s10627_s22  ;;  %5703 = vst [vmem:[#allocation2 + $0xc0] sm:$0xf] %v5702_v10  ;;  %v5523_v25 = vshrl.u32 %v10404_v55, 16  ;;  %v5526_v53 = vshll.u32 %v10404_v55, 16  ;;  %v6168_v1 = vrot.slane %v6166_v46, 5 }
 0x444   : > { %v5695_v32 = vsel %vm10947_vm12, %v5520_v44, %v5694_v9  ;;  %v6172_v27 = vrot.slane %v6170_v14, 4  ;;  %v6176_v6 = vshll.u32 %v5816_v29, 16  ;;  %v5521_v39 = vrot.slane %v5517_v51, 4  ;;  %v6332_v51 = vld [vmem:[#allocation2] sm:$0xe] }
 0x445   : > { %v5545_v35 = vor.u32 %v5543_v40, %v5542_v21  ;;  %v5547_v7 = vrot.slane %v5542_v21, 4  ;;  %5696 = vst [vmem:[#allocation2 + $0xb4] sm:$0xf] %v5695_v32  ;;  %v5525_v43 = vrot.slane %v5523_v25, 7  ;;  %v6169_v41 = vsel %vm10820_vm8, %v6164_v37, %v6168_v1  ;;  %v6334_v37 = vld [vmem:[#allocation2 + $0x8] sm:$0x1] }
 0x446   : > { %v6209_v56 = vpop.permute.xlu0 %6208  ;;  %v6173_v8 = vor.u32 %v6172_v27, %v6168_v1  ;;  %6260 = vrot.lane.b32.xlu0 %v6169_v41, %s10627_s22  ;;  %v6178_v54 = vrot.slane %v6176_v6, 5  ;;  %v10254_v44 = vrot.slane %v6332_v51, 9  ;;  %v6433_v32 = vrot.slane %v6334_v37, 5  ;;  %v6335_v1 = vld [vmem:[#allocation2 + $0xc] sm:$0xe] }
 0x447   : > { %v5546_v57 = vsel %vm11225_vm14, %v5538_v30, %v5545_v35  ;;  %v5706_v2 = vsel %vm10712_vm2, %v5547_v7, %v5705_v31  ;;  %v5528_v45 = vor.u32 %v5526_v53, %v5525_v43  ;;  %v5530_v38 = vrot.slane %v5525_v43, 4  ;;  %6302 = vst.msk [vmem:[#allocation3 + $0x8] sm:$0xf] %vm2168_vm15, %v6209_v56  ;;  %v6333_v30 = vld [vmem:[#allocation2 + $0x4] sm:$0xf] }
 0x448   : > { %5704 = vst.msk [vmem:[#allocation2 + $0xc4] sm:$0xf] %vm280_vm5, %v5546_v57  ;;  %5707 = vst [vmem:[#allocation2 + $0xc8] sm:$0x1] %v5706_v2  ;;  %v6174_v59 = vrot.slane %v6173_v8, 4  ;;  %v6430_v25 = vrot.slane %v6333_v30, 5 }
 0x449   : > { %v5529_v12 = vsel %vm11225_vm14, %v5521_v39, %v5528_v45  ;;  %v5699_v42 = vsel %vm10712_vm2, %v5530_v38, %v5698_v0  ;;  %v6336_v35 = vld [vmem:[#allocation2 + $0x10] sm:$0xf]  ;;  %v6339_v39 = vld [vmem:[#allocation2 + $0x1c] sm:$0xf]  ;;  %v10255_v56 = vrot.slane %v6335_v1, 9  ;;  %vm9994_vm2 = vcmask 31744  }
 0x44a   : > { %5697 = vst.msk [vmem:[#allocation2 + $0xb8] sm:$0xf] %vm280_vm5, %v5529_v12  ;;  %5700 = vst [vmem:[#allocation2 + $0xbc] sm:$0x1] %v5699_v42  ;;  %v6179_v22 = vsel %vm10820_vm8, %v6174_v59, %v6178_v54  ;;  %v6431_v31 = vsel %vm10827_vm11, %v10254_v44, %v6430_v25  ;;  %v6432_v43 = vrot.slane %v6430_v25, 4  ;;  %v6437_v6 = vrot.slane %v6336_v35, 5 }
 0x44b   : > { %6262 = vrot.lane.b32.xlu1 %v6179_v22, %s10627_s22  ;;  %v6337_v45 = vld [vmem:[#allocation2 + $0x14] sm:$0x1]  ;;  %v6338_v38 = vld [vmem:[#allocation2 + $0x18] sm:$0xe]  ;;  %v6444_v12 = vrot.slane %v6339_v39, 5  ;;  %vm10006_vm12 = vcmask 162816  }
 0x44c   : > { %v6211_v58 = vpop.permute.xlu1 %6210  ;;  %v5817_v16 = vld [vmem:[#allocation2 + $0xb4] sm:$0xf]  ;;  %v6434_v2 = vsel %vm10827_vm11, %v6432_v43, %v6433_v32  ;;  %v6438_v8 = vsel %vm10827_vm11, %v10255_v56, %v6437_v6  ;;  %v6439_v0 = vrot.slane %v6437_v6, 4  ;;  %v6342_v42 = vld [vmem:[#allocation2 + $0x28] sm:$0xf]  ;;  %v6440_v59 = vrot.slane %v6337_v45, 5 }
 0x44d   : > { %6303 = vst.msk [vmem:[#allocation3 + $0xc] sm:$0xf] %vm2168_vm15, %v6211_v58  ;;  %v6181_v15 = vshrl.u32 %v5817_v16, 16  ;;  %v6184_v61 = vshll.u32 %v5817_v16, 16  ;;  %v5738_v11 = vld [vmem:[#allocation2 + $0xb4] sm:$0xf] }
 0x44e   : > { %v6213_v23 = vpop.permute.xlu0 %6212  ;;  %5770 = vst.msk [vmem:[#allocation3 + $0x78] sm:$0xf] %vm280_vm5, %v5738_v11  ;;  %v10256_v54 = vrot.slane %v6338_v38, 9  ;;  %v6340_v22 = vld [vmem:[#allocation2 + $0x20] sm:$0x1]  ;;  %v6441_v16 = vsel %vm10827_vm11, %v6439_v0, %v6440_v59  ;;  %v6451_v11 = vrot.slane %v6342_v42, 5 }
 0x44f   : > { %6304 = vst.msk [vmem:[#allocation3 + $0x10] sm:$0xf] %vm2168_vm15, %v6213_v23  ;;  %v6183_v3 = vrot.slane %v6181_v15, 4  ;;  %v6186_v4 = vrot.slane %v6184_v61, 5  ;;  %v6341_v58 = vld [vmem:[#allocation2 + $0x24] sm:$0xe] }
 0x450   : > { %v6445_v15 = vsel %vm10827_vm11, %v10256_v54, %v6444_v12  ;;  %v6446_v61 = vrot.slane %v6444_v12, 4  ;;  %v6345_v23 = vld [vmem:[#allocation2 + $0x34] sm:$0xf]  ;;  %v6343_v51 = vld [vmem:[#allocation2 + $0x2c] sm:$0x1]  ;;  %vm10009_vm14 = vcmask 195584  }
 0x451   : > { %v5818_v63 = vld [vmem:[#allocation2 + $0xb8] sm:$0xf]  ;;  %v6187_v62 = vor.u32 %v6186_v4, %v6183_v3  ;;  %v5819_v28 = vld [vmem:[#allocation2 + $0xbc] sm:$0x1]  ;;  %v6447_v3 = vrot.slane %v6340_v22, 5  ;;  %v10257_v4 = vrot.slane %v6341_v58, 9 }
 0x452   : > { %v6215_v5 = vpop.permute.xlu1 %6214  ;;  %v6190_v55 = vshll.u32 %v5818_v63, 16  ;;  %v6194_v50 = vshrl.u32 %v5818_v63, 16  ;;  %v5739_v21 = vld [vmem:[#allocation2 + $0xb8] sm:$0xf]  ;;  %v6200_v9 = vshll.u32 %v5819_v28, 16 }
 0x453   : > { %6305 = vst.msk [vmem:[#allocation3 + $0x14] sm:$0xf] %vm2168_vm15, %v6215_v5  ;;  %v6188_v10 = vrot.slane %v6187_v62, 4  ;;  %v6344_v63 = vld [vmem:[#allocation2 + $0x30] sm:$0xe]  ;;  %v6448_v28 = vsel %vm10827_vm11, %v6446_v61, %v6447_v3  ;;  %v6452_v30 = vsel %vm10827_vm11, %v10257_v4, %v6451_v11  ;;  %v6453_v5 = vrot.slane %v6451_v11, 4 }
 0x454   : > { %v6192_v40 = vrot.slane %v6190_v55, 5  ;;  %v6196_v29 = vrot.slane %v6194_v50, 4  ;;  %5771 = vst.msk [vmem:[#allocation3 + $0x7c] sm:$0xf] %vm280_vm5, %v5739_v21  ;;  %v6202_v53 = vrot.slane %v6200_v9, 5  ;;  %v6458_v55 = vrot.slane %v6345_v23, 5 }
 0x455   : > { %v6348_v50 = vld [vmem:[#allocation2 + $0x40] sm:$0xf]  ;;  %v10258_v44 = vrot.slane %v6344_v63, 9  ;;  %v6346_v21 = vld [vmem:[#allocation2 + $0x38] sm:$0x1]  ;;  %vm9997_vm5 = vcmask 64512  }
 0x456   : > { %v6193_v46 = vsel %vm10820_vm8, %v6188_v10, %v6192_v40  ;;  %v6197_v14 = vor.u32 %v6196_v29, %v6192_v40  ;;  %v6454_v10 = vrot.slane %v6343_v51, 5  ;;  %v6347_v40 = vld [vmem:[#allocation2 + $0x3c] sm:$0xe]  ;;  %v6460_v37 = vrot.slane %v6458_v55, 4  ;;  %v6354_v6 = vld [vmem:[#allocation2 + $0x58] sm:$0xf] }
 0x457   : > { %6264 = vrot.lane.b32.xlu0 %v6193_v46, %s10627_s22  ;;  %v6459_v25 = vsel %vm10827_vm11, %v10258_v44, %v6458_v55  ;;  %v6465_v46 = vrot.slane %v6348_v50, 5  ;;  %v6461_v32 = vrot.slane %v6346_v21, 5  ;;  %v10259_v35 = vrot.slane %v6347_v40, 9  ;;  %v6352_v56 = vld [vmem:[#allocation2 + $0x50] sm:$0x1] }
 0x458   : > { %v6198_v7 = vrot.slane %v6197_v14, 4  ;;  %v6455_v9 = vsel %vm10827_vm11, %v6453_v5, %v6454_v10  ;;  %v6351_v14 = vld [vmem:[#allocation2 + $0x4c] sm:$0xf]  ;;  %v6353_v45 = vld [vmem:[#allocation2 + $0x54] sm:$0xe]  ;;  %v6479_v12 = vrot.slane %v6354_v6, 5 }
 0x459   : > { %v6466_v43 = vsel %vm10827_vm11, %v10259_v35, %v6465_v46  ;;  %v6467_v1 = vrot.slane %v6465_v46, 4  ;;  %v6357_v42 = vld [vmem:[#allocation2 + $0x64] sm:$0xf]  ;;  %v6475_v59 = vrot.slane %v6352_v56, 5  ;;  %v10261_v54 = vrot.slane %v6353_v45, 9 }
 0x45a   : > { %v6203_v27 = vsel %vm10820_vm8, %v6198_v7, %v6202_v53  ;;  %v6349_v7 = vld [vmem:[#allocation2 + $0x44] sm:$0x1]  ;;  %v6350_v53 = vld [vmem:[#allocation2 + $0x48] sm:$0xe]  ;;  %v6355_v22 = vld [vmem:[#allocation2 + $0x5c] sm:$0x1] }
 0x45b   : > { %6266 = vrot.lane.b32.xlu1 %v6203_v27, %s10627_s22  ;;  %6540 = vrot.lane.b32.xlu0 %v6431_v31, %s10628_s23  ;;  %v6217_v57 = vpop.permute.xlu0 %6216  ;;  %v6462_v31 = vsel %vm10827_vm11, %v6460_v37, %v6461_v32  ;;  %v6472_v27 = vrot.slane %v6351_v14, 5  ;;  %v6356_v58 = vld [vmem:[#allocation2 + $0x60] sm:$0xe]  ;;  %v6481_v61 = vrot.slane %v6479_v12, 4  ;;  %v6486_v11 = vrot.slane %v6357_v42, 5 }
 0x45c   : > { %6306 = vst.msk [vmem:[#allocation3 + $0x18] sm:$0xf] %vm2168_vm15, %v6217_v57  ;;  %v6468_v57 = vrot.slane %v6349_v7, 5  ;;  %v6360_v23 = vld [vmem:[#allocation2 + $0x70] sm:$0xf]  ;;  %v6482_v3 = vrot.slane %v6355_v22, 5 }
 0x45d   : > { %v6474_v0 = vrot.slane %v6472_v27, 4  ;;  %v10262_v4 = vrot.slane %v6356_v58, 9  ;;  %v6358_v51 = vld [vmem:[#allocation2 + $0x68] sm:$0x1]  ;;  %v6359_v63 = vld [vmem:[#allocation2 + $0x6c] sm:$0xe] }
 0x45e   : > { %v6219_v41 = vpop.permute.xlu1 %6218  ;;  %v6493_v5 = vrot.slane %v6360_v23, 5  ;;  %v6363_v50 = vld [vmem:[#allocation2 + $0x7c] sm:$0xf]  ;;  %v6489_v10 = vrot.slane %v6358_v51, 5  ;;  %v10263_v44 = vrot.slane %v6359_v63, 9 }
 0x45f   : > { %6307 = vst.msk [vmem:[#allocation3 + $0x1c] sm:$0xf] %vm2168_vm15, %v6219_v41  ;;  %6542 = vrot.lane.b32.xlu1 %v6434_v2, %s10628_s23  ;;  %6544 = vrot.lane.b32.xlu0 %v6438_v8, %s10628_s23  ;;  %v10260_v2 = vrot.slane %v6350_v53, 9  ;;  %v6469_v41 = vsel %vm10827_vm11, %v6467_v1, %v6468_v57  ;;  %v6361_v40 = vld [vmem:[#allocation2 + $0x74] sm:$0x1]  ;;  %v6500_v46 = vrot.slane %v6363_v50, 5 }
 0x460   : > { %v6495_v37 = vrot.slane %v6493_v5, 4  ;;  %v6366_v32 = vld [vmem:[#allocation2 + $0x88] sm:$0xf]  ;;  %v6496_v35 = vrot.slane %v6361_v40, 5  ;;  %v6364_v53 = vld [vmem:[#allocation2 + $0x80] sm:$0x1] }
 0x461   : > { %v6473_v8 = vsel %vm10827_vm11, %v10260_v2, %v6472_v27  ;;  %v6502_v6 = vrot.slane %v6500_v46, 4  ;;  %v6369_v57 = vld [vmem:[#allocation2 + $0x94] sm:$0xf]  ;;  %v6503_v2 = vrot.slane %v6364_v53, 5  ;;  %v6370_v58 = vld [vmem:[#allocation2 + $0x98] sm:$0x1] }
 0x462   : > { %v6497_v1 = vsel %vm10827_vm11, %v6495_v37, %v6496_v35  ;;  %v6514_v42 = vrot.slane %v6369_v57, 5  ;;  %v6517_v51 = vrot.slane %v6370_v58, 5  ;;  %v6379_v53 = vld [vmem:[#allocation2 + $0xbc] sm:$0x1] }
 0x463   : > { %6546 = vrot.lane.b32.xlu1 %v6441_v16, %s10628_s23  ;;  %6548 = vrot.lane.b32.xlu0 %v6445_v15, %s10628_s23  ;;  %v6476_v16 = vsel %vm10827_vm11, %v6474_v0, %v6475_v59  ;;  %v6480_v15 = vsel %vm10827_vm11, %v10261_v54, %v6479_v12  ;;  %v6372_v59 = vld [vmem:[#allocation2 + $0xa0] sm:$0xf] }
 0x464   : > { %v6516_v23 = vrot.slane %v6514_v42, 4 }
 0x466   : > { %v6221_v62 = vpop.permute.xlu0 %6220 }
 0x467   : > { %6308 = vst.msk [vmem:[#allocation3 + $0x20] sm:$0xf] %vm2168_vm15, %v6221_v62  ;;  %6550 = vrot.lane.b32.xlu1 %v6448_v28, %s10628_s23  ;;  %6552 = vrot.lane.b32.xlu0 %v6452_v30, %s10628_s23  ;;  %v6483_v62 = vsel %vm10827_vm11, %v6481_v61, %v6482_v3  ;;  %v6487_v28 = vsel %vm10827_vm11, %v10262_v4, %v6486_v11  ;;  %v6488_v30 = vrot.slane %v6486_v11, 4  ;;  %v6521_v3 = vrot.slane %v6372_v59, 5  ;;  %v6375_v4 = vld [vmem:[#allocation2 + $0xac] sm:$0xf] }
 0x468   : > { %v6528_v50 = vrot.slane %v6375_v4, 5  ;;  %v6860_v59 = vld [vmem:[#allocation2 + $0xc] sm:$0xf]  ;;  %v6863_v4 = vld [vmem:[#allocation2 + $0x18] sm:$0xf] }
 0x469   : > { %v6223_v29 = vpop.permute.xlu1 %6222  ;;  %v6912_v58 = vshll.u32 %v6860_v59, 16 }
 0x46a   : > { %6309 = vst.msk [vmem:[#allocation3 + $0x24] sm:$0xf] %vm2168_vm15, %v6223_v29  ;;  %v6362_v29 = vld [vmem:[#allocation2 + $0x78] sm:$0xe] }
 0x46b   : > { %6554 = vrot.lane.b32.xlu1 %v6455_v9, %s10628_s23  ;;  %6556 = vrot.lane.b32.xlu0 %v6459_v25, %s10628_s23  ;;  %v6490_v9 = vsel %vm10827_vm11, %v6488_v30, %v6489_v10  ;;  %v6494_v25 = vsel %vm10827_vm11, %v10263_v44, %v6493_v5  ;;  %v10264_v7 = vrot.slane %v6362_v29, 9  ;;  %v6518_v30 = vsel %vm10827_vm11, %v6516_v23, %v6517_v51  ;;  %v6378_v10 = vld [vmem:[#allocation2 + $0xb8] sm:$0xf]  ;;  %v6376_v29 = vld [vmem:[#allocation2 + $0xb0] sm:$0x1] }
 0x46c   : > { %v6531_v35 = vrot.slane %v6376_v29, 5  ;;  %v6676_v23 = vld [vmem:[#allocation2 + $0x3c] sm:$0xf] }
 0x46d   : > { %v6501_v27 = vsel %vm10827_vm11, %v10264_v7, %v6500_v46  ;;  %v6530_v46 = vrot.slane %v6528_v50, 4  ;;  %v6864_v51 = vld [vmem:[#allocation2 + $0x1c] sm:$0xf] }
 0x46f   : > { %6558 = vrot.lane.b32.xlu1 %v6462_v31, %s10628_s23  ;;  %6560 = vrot.lane.b32.xlu0 %v6466_v43, %s10628_s23  ;;  %v6365_v31 = vld [vmem:[#allocation2 + $0x84] sm:$0xe] }
 0x470   : > { %v6225_v39 = vpop.permute.xlu0 %6224  ;;  %v10265_v56 = vrot.slane %v6365_v31, 9 }
 0x471   : > { %6310 = vst.msk [vmem:[#allocation3 + $0x28] sm:$0xf] %vm2168_vm15, %v6225_v39  ;;  %v6507_v39 = vrot.slane %v6366_v32, 5 }
 0x472   : > { %v6227_v38 = vpop.permute.xlu1 %6226 }
 0x473   : > { %6311 = vst.msk [vmem:[#allocation3 + $0x2c] sm:$0xf] %vm2168_vm15, %v6227_v38  ;;  %6562 = vrot.lane.b32.xlu1 %v6469_v41, %s10628_s23  ;;  %6564 = vrot.lane.b32.xlu0 %v6473_v8, %s10628_s23  ;;  %v6367_v38 = vld [vmem:[#allocation2 + $0x8c] sm:$0x1]  ;;  %v6368_v41 = vld [vmem:[#allocation2 + $0x90] sm:$0xe]  ;;  %v6504_v8 = vsel %vm10827_vm11, %v6502_v6, %v6503_v2  ;;  %v6508_v0 = vsel %vm10827_vm11, %v10265_v56, %v6507_v39 }
 0x474   : > { %v6509_v12 = vrot.slane %v6507_v39, 4  ;;  %v6510_v54 = vrot.slane %v6367_v38, 5  ;;  %v10266_v22 = vrot.slane %v6368_v41, 9  ;;  %v6538_v6 = vrot.slane %v6379_v53, 5  ;;  %v6668_v2 = vld [vmem:[#allocation2 + $0xc] sm:$0xf] }
 0x475   : > { %v6670_v38 = vld [vmem:[#allocation2 + $0x18] sm:$0xf]  ;;  %v6671_v41 = vld [vmem:[#allocation2 + $0x1c] sm:$0xf] }
 0x476   : > { %v6511_v61 = vsel %vm10827_vm11, %v6509_v12, %v6510_v54  ;;  %v6515_v11 = vsel %vm10827_vm11, %v10266_v22, %v6514_v42  ;;  %v6673_v12 = vld [vmem:[#allocation2 + $0x28] sm:$0xf]  ;;  %v6674_v42 = vld [vmem:[#allocation2 + $0x30] sm:$0xf]  ;;  %v6909_v22 = vshrl.u32 %v6860_v59, 16 }
 0x477   : > { %6566 = vrot.lane.b32.xlu1 %v6476_v16, %s10628_s23  ;;  %6568 = vrot.lane.b32.xlu0 %v6480_v15, %s10628_s23  ;;  %v6371_v16 = vld [vmem:[#allocation2 + $0x9c] sm:$0xe]  ;;  %v6861_v54 = vld [vmem:[#allocation2 + $0x10] sm:$0xf] }
 0x478   : > { %v10267_v63 = vrot.slane %v6371_v16, 9  ;;  %v6918_v16 = vshll.u32 %v6861_v54, 16 }
 0x47a   : > { %v6522_v5 = vsel %vm10827_vm11, %v10267_v63, %v6521_v3  ;;  %v6677_v63 = vld [vmem:[#allocation2 + $0x40] sm:$0xf] }
 0x47b   : > { %v6229_v55 = vpop.permute.xlu0 %6228  ;;  %6570 = vrot.lane.b32.xlu1 %v6483_v62, %s10628_s23  ;;  %6572 = vrot.lane.b32.xlu0 %v6487_v28, %s10628_s23  ;;  %v6373_v62 = vld [vmem:[#allocation2 + $0xa4] sm:$0x1]  ;;  %v6374_v28 = vld [vmem:[#allocation2 + $0xa8] sm:$0xe] }
 0x47c   : > { %6312 = vst.msk [vmem:[#allocation3 + $0x30] sm:$0xf] %vm2168_vm15, %v6229_v55  ;;  %v6231_v21 = vpop.permute.xlu1 %6230  ;;  %v6523_v55 = vrot.slane %v6521_v3, 4  ;;  %v10268_v40 = vrot.slane %v6374_v28, 9  ;;  %v6914_v28 = vrot.slane %v6912_v58, 5 }
 0x47d   : > { %6313 = vst.msk [vmem:[#allocation3 + $0x34] sm:$0xf] %vm2168_vm15, %v6231_v21  ;;  %v6524_v21 = vrot.slane %v6373_v62, 5  ;;  %v6911_v62 = vrot.slane %v6909_v22, 4  ;;  %v7420_v58 = vld [vmem:[#allocation2 + $0xc] sm:$0xe] }
 0x47e   : > { %v6529_v37 = vsel %vm10827_vm11, %v10268_v40, %v6528_v50  ;;  %v6933_v50 = vshrl.u32 %v6863_v4, 16  ;;  %v6679_v40 = vld [vmem:[#allocation2 + $0x4c] sm:$0xf] }
 0x47f   : > { %v6233_v14 = vpop.permute.xlu0 %6232  ;;  %6574 = vrot.lane.b32.xlu1 %v6490_v9, %s10628_s23  ;;  %6576 = vrot.lane.b32.xlu0 %v6494_v25, %s10628_s23  ;;  %v6377_v9 = vld [vmem:[#allocation2 + $0xb4] sm:$0xe]  ;;  %v6525_v25 = vsel %vm10827_vm11, %v6523_v55, %v6524_v21  ;;  %v6678_v55 = vld [vmem:[#allocation2 + $0x48] sm:$0xf]  ;;  %v6946_v21 = vshrl.u32 %v6864_v51, 16  ;;  %v6915_v29 = vor.u32 %v6914_v28, %v6911_v62 }
 0x480   : > { %6314 = vst.msk [vmem:[#allocation3 + $0x38] sm:$0xf] %vm2168_vm15, %v6233_v14  ;;  %v6535_v14 = vrot.slane %v6378_v10, 5  ;;  %v10269_v7 = vrot.slane %v6377_v9, 9  ;;  %v6936_v10 = vshll.u32 %v6863_v4, 16 }
 0x481   : > { %v6862_v9 = vld [vmem:[#allocation2 + $0x14] sm:$0x1]  ;;  %v7948_v4 = vld [vmem:[#allocation2 + $0x18] sm:$0xf] }
 0x482   : > { %v6235_v43 = vpop.permute.xlu1 %6234  ;;  %v7423_v28 = vld [vmem:[#allocation2 + $0x18] sm:$0xe] }
 0x483   : > { %6315 = vst.msk [vmem:[#allocation3 + $0x3c] sm:$0xf] %vm2168_vm15, %v6235_v43  ;;  %6578 = vrot.lane.b32.xlu1 %v6497_v1, %s10628_s23  ;;  %6580 = vrot.lane.b32.xlu0 %v6501_v27, %s10628_s23  ;;  %v6532_v43 = vsel %vm10827_vm11, %v6530_v46, %v6531_v35  ;;  %v6536_v1 = vsel %vm10827_vm11, %v10269_v7, %v6535_v14  ;;  %v6537_v27 = vrot.slane %v6535_v14, 4  ;;  %v6680_v46 = vld [vmem:[#allocation2 + $0x54] sm:$0xf]  ;;  %v6935_v14 = vrot.slane %v6933_v50, 4 }
 0x484   : > { %v6948_v7 = vrot.slane %v6946_v21, 4  ;;  %v8000_v50 = vshll.u32 %v7948_v4, 16 }
 0x485   : > { %v6237_v45 = vpop.permute.xlu0 %6236  ;;  %v6539_v57 = vsel %vm10827_vm11, %v6537_v27, %v6538_v6  ;;  %v6682_v27 = vld [vmem:[#allocation2 + $0x60] sm:$0xf]  ;;  %v6916_v6 = vrot.slane %v6915_v29, 4 }
 0x486   : > { %6316 = vst.msk [vmem:[#allocation3 + $0x40] sm:$0xf] %vm2168_vm15, %v6237_v45  ;;  %v6669_v45 = vld [vmem:[#allocation2 + $0x10] sm:$0xf] }
 0x487   : > { %6582 = vrot.lane.b32.xlu1 %v6504_v8, %s10628_s23  ;;  %6584 = vrot.lane.b32.xlu0 %v6508_v0, %s10628_s23  ;;  %v6672_v8 = vld [vmem:[#allocation2 + $0x24] sm:$0xf] }
 0x488   : > { %v6239_v15 = vpop.permute.xlu1 %6238 }
 0x489   : > { %6317 = vst.msk [vmem:[#allocation3 + $0x44] sm:$0xf] %vm2168_vm15, %v6239_v15  ;;  %v6922_v15 = vshrl.u32 %v6861_v54, 16  ;;  %v7424_v54 = vld [vmem:[#allocation2 + $0x1c] sm:$0xf] }
 0x48b   : > { %6586 = vrot.lane.b32.xlu1 %v6511_v61, %s10628_s23  ;;  %6588 = vrot.lane.b32.xlu0 %v6515_v11, %s10628_s23  ;;  %v6675_v11 = vld [vmem:[#allocation2 + $0x34] sm:$0xf] }
 0x48f   : > { %6590 = vrot.lane.b32.xlu1 %v6518_v30, %s10628_s23  ;;  %6592 = vrot.lane.b32.xlu0 %v6522_v5, %s10628_s23  ;;  %v6920_v30 = vrot.slane %v6918_v16, 5  ;;  %v6924_v5 = vrot.slane %v6922_v15, 4  ;;  %v7422_v16 = vld [vmem:[#allocation2 + $0x14] sm:$0x1] }
 0x490   : > { %v6241_v44 = vpop.permute.xlu0 %6240  ;;  %v7521_v62 = vrot.slane %v7422_v16, 5  ;;  %v7758_v16 = vld [vmem:[#allocation2 + $0x24] sm:$0xf] }
 0x491   : > { %6318 = vst.msk [vmem:[#allocation3 + $0x48] sm:$0xf] %vm2168_vm15, %v6241_v44  ;;  %v6942_v44 = vshll.u32 %v6864_v51, 16  ;;  %v10270_v51 = vrot.slane %v7420_v58, 9 }
 0x493   : > { %6594 = vrot.lane.b32.xlu1 %v6525_v25, %s10628_s23  ;;  %6596 = vrot.lane.b32.xlu0 %v6529_v37, %s10628_s23  ;;  %v6925_v25 = vor.u32 %v6924_v5, %v6920_v30  ;;  %v6944_v35 = vrot.slane %v6942_v44, 5  ;;  %v7952_v44 = vld [vmem:[#allocation2 + $0x28] sm:$0xf] }
 0x494   : > { %v6243_v32 = vpop.permute.xlu1 %6242 }
 0x495   : > { %6319 = vst.msk [vmem:[#allocation3 + $0x4c] sm:$0xf] %vm2168_vm15, %v6243_v32  ;;  %v6938_v32 = vrot.slane %v6936_v10, 5  ;;  %v7951_v10 = vld [vmem:[#allocation2 + $0x24] sm:$0xf] }
 0x496   : > { %v6245_v31 = vpop.permute.xlu0 %6244 }
 0x497   : > { %6320 = vst.msk [vmem:[#allocation3 + $0x50] sm:$0xf] %vm2168_vm15, %v6245_v31  ;;  %6598 = vrot.lane.b32.xlu1 %v6532_v43, %s10628_s23  ;;  %6600 = vrot.lane.b32.xlu0 %v6536_v1, %s10628_s23  ;;  %v6928_v31 = vshll.u32 %v6862_v9, 16  ;;  %v6681_v43 = vld [vmem:[#allocation2 + $0x58] sm:$0xf] }
 0x498   : > { %v6865_v1 = vld [vmem:[#allocation2 + $0x20] sm:$0x1] }
 0x49a   : > { %v6247_v39 = vpop.permute.xlu1 %6246 }
 0x49b   : > { %6321 = vst.msk [vmem:[#allocation3 + $0x54] sm:$0xf] %vm2168_vm15, %v6247_v39  ;;  %6602 = vrot.lane.b32.xlu1 %v6539_v57, %s10628_s23  ;;  %6732 = vrot.lane.b32.xlu0 %v6668_v2, %s10631_s27  ;;  %v6926_v39 = vrot.slane %v6925_v25, 4  ;;  %v6939_v57 = vor.u32 %v6938_v32, %v6935_v14  ;;  %v6949_v2 = vor.u32 %v6948_v7, %v6944_v35  ;;  %v10271_v25 = vrot.slane %v7423_v28, 9 }
 0x49c   : > { %v8024_v14 = vshll.u32 %v7951_v10, 16  ;;  %v8030_v32 = vshll.u32 %v7952_v44, 16 }
 0x49d   : > { %v6950_v59 = vrot.slane %v6949_v2, 4 }
 0x49f   : > { %v6249_v56 = vpop.permute.xlu0 %6248  ;;  %6734 = vrot.lane.b32.xlu1 %v6669_v45, %s10631_s27  ;;  %6736 = vrot.lane.b32.xlu0 %v6670_v38, %s10631_s27  ;;  %v6930_v45 = vrot.slane %v6928_v31, 5  ;;  %v6952_v38 = vshll.u32 %v6865_v1, 16 }
 0x4a0   : > { %6322 = vst.msk [vmem:[#allocation3 + $0x58] sm:$0xf] %vm2168_vm15, %v6249_v56  ;;  %v7421_v56 = vld [vmem:[#allocation2 + $0x10] sm:$0xf] }
 0x4a1   : > { %v6954_v22 = vrot.slane %v6952_v38, 5  ;;  %v7756_v38 = vld [vmem:[#allocation2 + $0x18] sm:$0xf] }
 0x4a3   : > { %6738 = vrot.lane.b32.xlu1 %v6671_v41, %s10631_s27  ;;  %6740 = vrot.lane.b32.xlu0 %v6672_v8, %s10631_s27  ;;  %v7518_v41 = vrot.slane %v7421_v56, 5 }
 0x4a5   : > { %v7519_v5 = vsel %vm10827_vm11, %v10270_v51, %v7518_v41  ;;  %v6867_v51 = vld [vmem:[#allocation2 + $0x28] sm:$0xf] }
 0x4a6   : > { %v6251_v0 = vpop.permute.xlu1 %6250 }
 0x4a7   : > { %6323 = vst.msk [vmem:[#allocation3 + $0x5c] sm:$0xf] %vm2168_vm15, %v6251_v0  ;;  %6742 = vrot.lane.b32.xlu1 %v6673_v12, %s10631_s27  ;;  %6744 = vrot.lane.b32.xlu0 %v6674_v42, %s10631_s27  ;;  %v6921_v0 = vsel %vm10820_vm8, %v6916_v6, %v6920_v30  ;;  %v6931_v12 = vsel %vm10820_vm8, %v6926_v39, %v6930_v45  ;;  %v6940_v42 = vrot.slane %v6939_v57, 4  ;;  %v7425_v30 = vld [vmem:[#allocation2 + $0x20] sm:$0x1]  ;;  %v8026_v39 = vrot.slane %v8024_v14, 5 }
 0x4a8   : > { %v12990_v57 = vrot.slane %v8030_v32, 5  ;;  %v7950_v45 = vld [vmem:[#allocation2 + $0x20] sm:$0x1]  ;;  %v6970_v14 = vshrl.u32 %v6867_v51, 16  ;;  %v6869_v32 = vld [vmem:[#allocation2 + $0x30] sm:$0xf] }
 0x4aa   : > { %v6253_v61 = vpop.permute.xlu0 %6252 }
 0x4ab   : > { %6324 = vst.msk [vmem:[#allocation3 + $0x60] sm:$0xf] %vm2168_vm15, %v6253_v61  ;;  %6746 = vrot.lane.b32.xlu1 %v6675_v11, %s10631_s27  ;;  %6748 = vrot.lane.b32.xlu0 %v6676_v23, %s10631_s27  ;;  %v6945_v61 = vsel %vm10820_vm8, %v6940_v42, %v6944_v35  ;;  %v6955_v11 = vsel %vm10820_vm8, %v6950_v59, %v6954_v22  ;;  %v7520_v23 = vrot.slane %v7518_v41, 4  ;;  %v8034_v35 = vshrl.u32 %v7952_v44, 16  ;;  %v7757_v41 = vld [vmem:[#allocation2 + $0x1c] sm:$0xf] }
 0x4ac   : > { %v6255_v3 = vpop.permute.xlu1 %6254  ;;  %v8016_v42 = vshll.u32 %v7950_v45, 16 }
 0x4ad   : > { %6325 = vst.msk [vmem:[#allocation3 + $0x64] sm:$0xf] %vm2168_vm15, %v6255_v3  ;;  %v7525_v3 = vrot.slane %v7424_v54, 5  ;;  %v7522_v21 = vsel %vm10827_vm11, %v7520_v23, %v7521_v62  ;;  %v8036_v2 = vrot.slane %v8034_v35, 4 }
 0x4ae   : > { %v8018_v62 = vrot.slane %v8016_v42, 5 }
 0x4af   : > { %6750 = vrot.lane.b32.xlu1 %v6677_v63, %s10631_s27  ;;  %6752 = vrot.lane.b32.xlu0 %v6678_v55, %s10631_s27  ;;  %v7949_v63 = vld [vmem:[#allocation2 + $0x1c] sm:$0xf]  ;;  %v7997_v55 = vshrl.u32 %v7948_v4, 16  ;;  %v7526_v7 = vsel %vm10827_vm11, %v10271_v25, %v7525_v3  ;;  %v8037_v54 = vor.u32 %v8036_v2, %v12990_v57  ;;  %v6866_v4 = vld [vmem:[#allocation2 + $0x24] sm:$0xf] }
 0x4b0   : > { %v8006_v29 = vshll.u32 %v7949_v63, 16  ;;  %v8010_v9 = vshrl.u32 %v7949_v63, 16  ;;  %v10582_v63 = vld [vmem:[%s13960_s4 + $0x10] ss:$0 sps:$4 sm:$0x33]  }
 0x4b1   : > { %10522 = vmatprep.subr.msk.bf16.mxu1 %vm4905_vm7, %v10582_v63 }
 0x4b2   : > { %v6257_v37 = vpop.permute.xlu0 %6256  ;;  %v8008_v1 = vrot.slane %v8006_v29, 5  ;;  %v6960_v29 = vshll.u32 %v6866_v4, 16 }
 0x4b3   : > { %6326 = vst.msk [vmem:[#allocation3 + $0x68] sm:$0xf] %vm2168_vm15, %v6257_v37  ;;  %6754 = vrot.lane.b32.xlu1 %v6679_v40, %s10631_s27  ;;  %6756 = vrot.lane.b32.xlu0 %v6680_v46, %s10631_s27  ;;  %v7527_v40 = vrot.slane %v7525_v3, 4  ;;  %v7528_v37 = vrot.slane %v7425_v30, 5  ;;  %v8021_v46 = vshrl.u32 %v7951_v10, 16  ;;  %v8038_v30 = vrot.slane %v8037_v54, 4 }
 0x4b4   : > { %v6962_v45 = vrot.slane %v6960_v29, 5 }
 0x4b5   : > { %v6259_v53 = vpop.permute.xlu1 %6258  ;;  %v7529_v31 = vsel %vm10827_vm11, %v7527_v40, %v7528_v37  ;;  %v8023_v6 = vrot.slane %v8021_v46, 4  ;;  %v6957_v40 = vshrl.u32 %v6866_v4, 16  ;;  %v6966_v46 = vshll.u32 %v6867_v51, 16 }
 0x4b6   : > { %6327 = vst.msk [vmem:[#allocation3 + $0x6c] sm:$0xf] %vm2168_vm15, %v6259_v53  ;;  %v7999_v53 = vrot.slane %v7997_v55, 4 }
 0x4b7   : > { %6758 = vrot.lane.b32.xlu1 %v6681_v43, %s10631_s27  ;;  %6760 = vrot.lane.b32.xlu0 %v6682_v27, %s10631_s27  ;;  %v8002_v43 = vrot.slane %v8000_v50, 5  ;;  %v8012_v27 = vrot.slane %v8010_v9, 4  ;;  %v8027_v59 = vor.u32 %v8026_v39, %v8023_v6  ;;  %v9025_v9 = vsel %vm4905_vm7, %v10582_v63, 0 }
 0x4b8   : > { %v6261_v8 = vpop.permute.xlu0 %6260  ;;  %10484 = vmatpush3.bf16.msra.mxu1 %v9025_v9  ;;  %vm10029_vm7 = vcmask 424960  }
 0x4b9   : > { %6328 = vst.msk [vmem:[#allocation3 + $0x70] sm:$0xf] %vm2168_vm15, %v6261_v8  ;;  %v8003_v8 = vor.u32 %v8002_v43, %v7999_v53  ;;  %v8028_v28 = vrot.slane %v8027_v59, 4  ;;  %v10583_v53 = vld [vmem:[%s13960_s4 + $0x8] sm:$0xff]   ;;  %v10584_v59 = vld [vmem:[%s13960_s4] sm:$0xff]  }
 0x4ba   : > { %10485 = vmatprep.subr.bf16.mxu1 %v10583_v53 }
 0x4bb   : > { %7292 = vrot.lane.b32.xlu1 %v6921_v0, %s10632_s28  ;;  %7294 = vrot.lane.b32.xlu0 %v6931_v12, %s10632_s28  ;;  %v8013_v0 = vor.u32 %v8012_v27, %v8008_v1  ;;  %v7953_v12 = vld [vmem:[#allocation2 + $0x2c] sm:$0x1]  ;;  %v8004_v23 = vrot.slane %v8003_v8, 4  ;;  %v6968_v8 = vrot.slane %v6966_v46, 5  ;;  %v7427_v46 = vld [vmem:[#allocation2 + $0x28] sm:$0xf] }
 0x4bc   : > { %10486 = vmatpush3.bf16.msra.mxu1 %v10583_v53  ;;  %v7532_v53 = vrot.slane %v7427_v46, 5 }
 0x4bd   : > { %v6263_v15 = vpop.permute.xlu1 %6262  ;;  %v8014_v3 = vrot.slane %v8013_v0, 4  ;;  %v8009_v25 = vsel %vm10820_vm8, %v8004_v23, %v8008_v1  ;;  %v8510_v1 = vld [vmem:[#allocation2 + $0x20] sm:$0x1]  ;;  %10487 = vmatprep.subr.bf16.mxu1 %v10584_v59 }
 0x4be   : > { %6329 = vst.msk [vmem:[#allocation3 + $0x74] sm:$0xf] %vm2168_vm15, %v6263_v15  ;;  %v8040_v15 = vshll.u32 %v7953_v12, 16  ;;  %v8609_v42 = vrot.slane %v8510_v1, 5 }
 0x4bf   : > { %7296 = vrot.lane.b32.xlu1 %v6945_v61, %s10632_s28  ;;  %7298 = vrot.lane.b32.xlu0 %v6955_v11, %s10632_s28  ;;  %v8509_v61 = vld [vmem:[#allocation2 + $0x1c] sm:$0xf]  ;;  %v7759_v11 = vld [vmem:[#allocation2 + $0x28] sm:$0xf]  ;;  %v8019_v37 = vsel %vm10820_vm8, %v8014_v3, %v8018_v62  ;;  %v6868_v3 = vld [vmem:[#allocation2 + $0x2c] sm:$0x1] }
 0x4c0   : > { %v8606_v55 = vrot.slane %v8509_v61, 5  ;;  %v8042_v44 = vrot.slane %v8040_v15, 5  ;;  %10488 = vmatpush3.bf16.msra.mxu1 %v10584_v59 }
 0x4c2   : > { %v8043_v43 = vsel %vm10820_vm8, %v8038_v30, %v8042_v44  ;;  %v8608_v27 = vrot.slane %v8606_v55, 4 }
 0x4c3   : > { %7628 = vrot.lane.b32.xlu1 %v7519_v5, %s10633_s29  ;;  %7630 = vrot.lane.b32.xlu0 %v7522_v21, %s10633_s29  ;;  %v8508_v5 = vld [vmem:[#allocation2 + $0x18] sm:$0xe]  ;;  %v13003_v21 = vld [vmem:[#allocation2 + $0x28] sm:$0xf] }
 0x4c4   : > { %v10286_v35 = vrot.slane %v8508_v5, 9  ;;  %v8613_v6 = vrot.slane %v13003_v21, 5  ;;  %v8610_v61 = vsel %vm10827_vm11, %v8608_v27, %v8609_v42 }
 0x4c6   : > { %v8607_v54 = vsel %vm10827_vm11, %v10286_v35, %v8606_v55  ;;  %v6976_v55 = vshll.u32 %v6868_v3, 16  ;;  %v7957_v3 = vld [vmem:[#allocation2 + $0x3c] sm:$0xf] }
 0x4c7   : > { %7632 = vrot.lane.b32.xlu1 %v7526_v7, %s10633_s29  ;;  %7634 = vrot.lane.b32.xlu0 %v7529_v31, %s10633_s29  ;;  %v6870_v7 = vld [vmem:[#allocation2 + $0x34] sm:$0xf]  ;;  %v8033_v31 = vsel %vm10820_vm8, %v8028_v28, %v12990_v57  ;;  %v6972_v57 = vrot.slane %v6970_v14, 4 }
 0x4c8   : > { %v6990_v0 = vshll.u32 %v6870_v7, 16  ;;  %v6994_v12 = vshrl.u32 %v6870_v7, 16  ;;  %v6978_v14 = vrot.slane %v6976_v55, 5  ;;  %v8069_v55 = vshrl.u32 %v7957_v3, 16 }
 0x4c9   : > { %v6265_v56 = vpop.permute.xlu0 %6264  ;;  %v6973_v51 = vor.u32 %v6972_v57, %v6968_v8 }
 0x4ca   : > { %6330 = vst.msk [vmem:[#allocation3 + $0x78] sm:$0xf] %vm2168_vm15, %v6265_v56  ;;  %v6959_v56 = vrot.slane %v6957_v40, 4  ;;  %v6992_v62 = vrot.slane %v6990_v0, 5  ;;  %v6996_v28 = vrot.slane %v6994_v12, 4 }
 0x4cb   : > { %7820 = vrot.lane.b32.xlu1 %v7756_v38, %s10634_s30  ;;  %7822 = vrot.lane.b32.xlu0 %v7757_v41, %s10634_s30  ;;  %v6981_v38 = vshrl.u32 %v6869_v32, 16  ;;  %v6984_v41 = vshll.u32 %v6869_v32, 16  ;;  %v6871_v40 = vld [vmem:[#allocation2 + $0x38] sm:$0x1]  ;;  %v6974_v9 = vrot.slane %v6973_v51, 4 }
 0x4cc   : > { %v6963_v23 = vor.u32 %v6962_v45, %v6959_v56  ;;  %v7000_v32 = vshll.u32 %v6871_v40, 16  ;;  %v7428_v56 = vld [vmem:[#allocation2 + $0x2c] sm:$0x1]  ;;  %v7954_v12 = vld [vmem:[#allocation2 + $0x30] sm:$0xf] }
 0x4cd   : > { %v6267_v22 = vpop.permute.xlu1 %6266  ;;  %v6541_v58 = vpop.permute.xlu0 %6540  ;;  %v6983_v4 = vrot.slane %v6981_v38, 4  ;;  %v6986_v63 = vrot.slane %v6984_v41, 5  ;;  %v7534_v41 = vrot.slane %v7532_v53, 4  ;;  %v7535_v59 = vrot.slane %v7428_v56, 5  ;;  %v7959_v56 = vld [vmem:[#allocation2 + $0x44] sm:$0x1] }
 0x4ce   : > { %6331 = vst.msk [vmem:[#allocation3 + $0x7c] sm:$0xf] %vm2168_vm15, %v6267_v22  ;;  %v8511_v22 = vld [vmem:[#allocation2 + $0x24] sm:$0xe]  ;;  %v6964_v29 = vrot.slane %v6963_v23, 4  ;;  %v8045_v23 = vshrl.u32 %v7954_v12, 16 }
 0x4cf   : > { %6636 = vst.msk [vmem:[#allocation3] sm:$0xf] %vm2508_vm0, %v6541_v58  ;;  %7824 = vrot.lane.b32.xlu1 %v7758_v16, %s10634_s30  ;;  %7826 = vrot.lane.b32.xlu0 %v7759_v11, %s10634_s30  ;;  %v8513_v58 = vld [vmem:[#allocation2 + $0x2c] sm:$0x1]  ;;  %v8615_v11 = vrot.slane %v8613_v6, 4  ;;  %v10287_v30 = vrot.slane %v8511_v22, 9 }
 0x4d0   : > { %v8616_v5 = vrot.slane %v8513_v58, 5  ;;  %v7429_v22 = vld [vmem:[#allocation2 + $0x30] sm:$0xe]  ;;  %v7431_v58 = vld [vmem:[#allocation2 + $0x38] sm:$0x1]  ;;  %vm10012_vm15 = vcmask 228352  }
 0x4d1   : > { %v6543_v50 = vpop.permute.xlu1 %6542  ;;  %v6545_v10 = vpop.permute.xlu0 %6544  ;;  %v8614_v44 = vsel %vm10827_vm11, %v10287_v30, %v8613_v6  ;;  %v7430_v6 = vld [vmem:[#allocation2 + $0x34] sm:$0xf]  ;;  %v10273_v30 = vrot.slane %v7429_v22, 9 }
 0x4d2   : > { %6637 = vst.msk [vmem:[#allocation3 + $0x4] sm:$0xf] %vm2508_vm0, %v6543_v50  ;;  %6638 = vst.msk [vmem:[#allocation3 + $0x8] sm:$0xf] %vm2508_vm0, %v6545_v10  ;;  %v8617_v21 = vsel %vm10827_vm11, %v8615_v11, %v8616_v5  ;;  %v7539_v0 = vrot.slane %v7430_v6, 5  ;;  %v7536_v11 = vsel %vm10827_vm11, %v7534_v41, %v7535_v59  ;;  %v7542_v5 = vrot.slane %v7431_v58, 5 }
 0x4d3   : > { %8380 = vrot.lane.b32.xlu1 %v8009_v25, %s10635_s8  ;;  %8382 = vrot.lane.b32.xlu0 %v8019_v37, %s10635_s8  ;;  %v6987_v25 = vor.u32 %v6986_v63, %v6983_v4  ;;  %v6997_v37 = vor.u32 %v6996_v28, %v6992_v62  ;;  %v7958_v4 = vld [vmem:[#allocation2 + $0x40] sm:$0xf]  ;;  %v8048_v63 = vshll.u32 %v7954_v12, 16  ;;  %v7761_v6 = vld [vmem:[#allocation2 + $0x34] sm:$0xf]  ;;  %v8088_v58 = vshll.u32 %v7959_v56, 16 }
 0x4d4   : > { %v7541_v51 = vrot.slane %v7539_v0, 4  ;;  %v7763_v12 = vld [vmem:[#allocation2 + $0x40] sm:$0xf]  ;;  %v6872_v59 = vld [vmem:[#allocation2 + $0x3c] sm:$0xf] }
 0x4d5   : > { %v6547_v39 = vpop.permute.xlu1 %6546  ;;  %v6549_v2 = vpop.permute.xlu0 %6548  ;;  %v6988_v1 = vrot.slane %v6987_v25, 4  ;;  %v6998_v27 = vrot.slane %v6997_v37, 4  ;;  %v8050_v37 = vrot.slane %v8048_v63, 5  ;;  %v8518_v63 = vld [vmem:[#allocation2 + $0x40] sm:$0xf] }
 0x4d6   : > { %6639 = vst.msk [vmem:[#allocation3 + $0xc] sm:$0xf] %vm2508_vm0, %v6547_v39  ;;  %6640 = vst.msk [vmem:[#allocation3 + $0x10] sm:$0xf] %vm2508_vm0, %v6549_v2  ;;  %v7002_v39 = vrot.slane %v7000_v32, 5  ;;  %v7543_v25 = vsel %vm10827_vm11, %v7541_v51, %v7542_v5  ;;  %v8071_v32 = vrot.slane %v8069_v55, 4 }
 0x4d7   : > { %8384 = vrot.lane.b32.xlu1 %v8033_v31, %s10635_s8  ;;  %8386 = vrot.lane.b32.xlu0 %v8043_v43, %s10635_s8  ;;  %v6969_v31 = vsel %vm10820_vm8, %v6964_v29, %v6968_v8  ;;  %v6979_v43 = vsel %vm10820_vm8, %v6974_v9, %v6978_v14  ;;  %v7426_v2 = vld [vmem:[#allocation2 + $0x24] sm:$0xe]  ;;  %v6993_v8 = vsel %vm10820_vm8, %v6988_v1, %v6992_v62  ;;  %v8047_v9 = vrot.slane %v8045_v23, 4  ;;  %v7956_v1 = vld [vmem:[#allocation2 + $0x38] sm:$0x1] }
 0x4d8   : > { %v7003_v57 = vsel %vm10820_vm8, %v6998_v27, %v7002_v39  ;;  %v10272_v42 = vrot.slane %v7426_v2, 9  ;;  %v7540_v29 = vsel %vm10827_vm11, %v10273_v30, %v7539_v0  ;;  %v7760_v27 = vld [vmem:[#allocation2 + $0x30] sm:$0xf]  ;;  %v8517_v56 = vld [vmem:[#allocation2 + $0x3c] sm:$0xe] }
 0x4d9   : > { %v6551_v16 = vpop.permute.xlu1 %6550  ;;  %v6553_v15 = vpop.permute.xlu0 %6552  ;;  %v8051_v39 = vor.u32 %v8050_v37, %v8047_v9  ;;  %v8514_v23 = vld [vmem:[#allocation2 + $0x30] sm:$0xe] }
 0x4da   : > { %6641 = vst.msk [vmem:[#allocation3 + $0x14] sm:$0xf] %vm2508_vm0, %v6551_v16  ;;  %6642 = vst.msk [vmem:[#allocation3 + $0x18] sm:$0xf] %vm2508_vm0, %v6553_v15 }
 0x4db   : > { %8716 = vrot.lane.b32.xlu1 %v8607_v54, %s10636_s13  ;;  %8718 = vrot.lane.b32.xlu0 %v8610_v61, %s10636_s13  ;;  %v7955_v54 = vld [vmem:[#allocation2 + $0x34] sm:$0xf]  ;;  %v7533_v61 = vsel %vm10827_vm11, %v10272_v42, %v7532_v53 }
 0x4dc   : > { %v8054_v62 = vshll.u32 %v7955_v54, 16  ;;  %v8058_v28 = vshrl.u32 %v7955_v54, 16  ;;  %v8515_v42 = vld [vmem:[#allocation2 + $0x34] sm:$0xf]  ;;  %v8052_v54 = vrot.slane %v8051_v39, 4 }
 0x4dd   : > { %v6555_v50 = vpop.permute.xlu1 %6554  ;;  %v6557_v10 = vpop.permute.xlu0 %6556 }
 0x4de   : > { %6643 = vst.msk [vmem:[#allocation3 + $0x1c] sm:$0xf] %vm2508_vm0, %v6555_v50  ;;  %6644 = vst.msk [vmem:[#allocation3 + $0x20] sm:$0xf] %vm2508_vm0, %v6557_v10  ;;  %v8072_v50 = vshll.u32 %v7957_v3, 16  ;;  %v8078_v10 = vshll.u32 %v7958_v4, 16 }
 0x4df   : > { %8720 = vrot.lane.b32.xlu1 %v8614_v44, %s10636_s13  ;;  %8722 = vrot.lane.b32.xlu0 %v8617_v21, %s10636_s13  ;;  %v8082_v44 = vshrl.u32 %v7958_v4, 16  ;;  %v8056_v46 = vrot.slane %v8054_v62, 5  ;;  %v8060_v14 = vrot.slane %v8058_v28, 4  ;;  %v8620_v3 = vrot.slane %v8515_v42, 5 }
 0x4e0   : > { %v7005_v62 = vshrl.u32 %v6872_v59, 16  ;;  %v7008_v28 = vshll.u32 %v6872_v59, 16 }
 0x4e1   : > { %v6559_v35 = vpop.permute.xlu1 %6558  ;;  %v6561_v7 = vpop.permute.xlu0 %6560  ;;  %v8084_v53 = vrot.slane %v8082_v44, 4  ;;  %v8061_v2 = vor.u32 %v8060_v14, %v8056_v46  ;;  %v8057_v5 = vsel %vm10820_vm8, %v8052_v54, %v8056_v46  ;;  %v6875_v44 = vld [vmem:[#allocation2 + $0x48] sm:$0xf]  ;;  %v8622_v37 = vrot.slane %v8620_v3, 4 }
 0x4e2   : > { %6645 = vst.msk [vmem:[#allocation3 + $0x24] sm:$0xf] %vm2508_vm0, %v6559_v35  ;;  %6646 = vst.msk [vmem:[#allocation3 + $0x28] sm:$0xf] %vm2508_vm0, %v6561_v7  ;;  %v8074_v35 = vrot.slane %v8072_v50, 5  ;;  %v13079_v7 = vrot.slane %v8078_v10, 5 }
 0x4e3   : > { %7300 = vrot.lane.b32.xlu1 %v6969_v31, %s10632_s28  ;;  %7302 = vrot.lane.b32.xlu0 %v6979_v43, %s10632_s28  ;;  %v8062_v22 = vrot.slane %v8061_v2, 4  ;;  %v8090_v50 = vrot.slane %v8088_v58, 5  ;;  %v8627_v46 = vrot.slane %v8518_v63, 5 }
 0x4e4   : > { %v8075_v41 = vor.u32 %v8074_v35, %v8071_v32  ;;  %v7007_v35 = vrot.slane %v7005_v62, 4 }
 0x4e5   : > { %v6563_v45 = vpop.permute.xlu1 %6562  ;;  %v6565_v38 = vpop.permute.xlu0 %6564 }
 0x4e6   : > { %6647 = vst.msk [vmem:[#allocation3 + $0x2c] sm:$0xf] %vm2508_vm0, %v6563_v45  ;;  %6648 = vst.msk [vmem:[#allocation3 + $0x30] sm:$0xf] %vm2508_vm0, %v6565_v38  ;;  %v7762_v45 = vld [vmem:[#allocation2 + $0x3c] sm:$0xf] }
 0x4e7   : > { %7304 = vrot.lane.b32.xlu1 %v6993_v8, %s10632_s28  ;;  %7306 = vrot.lane.b32.xlu0 %v7003_v57, %s10632_s28  ;;  %v8064_v38 = vshll.u32 %v7956_v1, 16  ;;  %v8085_v8 = vor.u32 %v8084_v53, %v13079_v7  ;;  %v7010_v53 = vrot.slane %v7008_v28, 5 }
 0x4e9   : > { %v6567_v16 = vpop.permute.xlu1 %6566  ;;  %v6569_v15 = vpop.permute.xlu0 %6568 }
 0x4ea   : > { %6649 = vst.msk [vmem:[#allocation3 + $0x34] sm:$0xf] %vm2508_vm0, %v6567_v16  ;;  %6650 = vst.msk [vmem:[#allocation3 + $0x38] sm:$0xf] %vm2508_vm0, %v6569_v15  ;;  %v6873_v16 = vld [vmem:[#allocation2 + $0x40] sm:$0xf] }
 0x4eb   : > { %7636 = vrot.lane.b32.xlu1 %v7533_v61, %s10633_s29  ;;  %7638 = vrot.lane.b32.xlu0 %v7536_v11, %s10633_s29  ;;  %v8066_v15 = vrot.slane %v8064_v38, 5  ;;  %v8076_v61 = vrot.slane %v8075_v41, 4  ;;  %v8086_v11 = vrot.slane %v8085_v8, 4  ;;  %v7014_v30 = vshll.u32 %v6873_v16, 16 }
 0x4ec   : > { %v7018_v10 = vshrl.u32 %v6873_v16, 16  ;;  %v10289_v16 = vrot.slane %v8517_v56, 9 }
 0x4ed   : > { %v6571_v21 = vpop.permute.xlu1 %6570  ;;  %v6573_v40 = vpop.permute.xlu0 %6572  ;;  %v8067_v55 = vsel %vm10820_vm8, %v8062_v22, %v8066_v15  ;;  %v8091_v9 = vsel %vm10820_vm8, %v8086_v11, %v8090_v50 }
 0x4ee   : > { %6651 = vst.msk [vmem:[#allocation3 + $0x3c] sm:$0xf] %vm2508_vm0, %v6571_v21  ;;  %6652 = vst.msk [vmem:[#allocation3 + $0x40] sm:$0xf] %vm2508_vm0, %v6573_v40  ;;  %v10288_v21 = vrot.slane %v8514_v23, 9  ;;  %v7020_v1 = vrot.slane %v7018_v10, 4 }
 0x4ef   : > { %7640 = vrot.lane.b32.xlu1 %v7540_v29, %s10633_s29  ;;  %7642 = vrot.lane.b32.xlu0 %v7543_v25, %s10633_s29  ;;  %v6876_v40 = vld [vmem:[#allocation2 + $0x4c] sm:$0xf]  ;;  %v8081_v29 = vsel %vm10820_vm8, %v8076_v61, %v13079_v7  ;;  %v8516_v25 = vld [vmem:[#allocation2 + $0x38] sm:$0x1] }
 0x4f0   : > { %v7042_v7 = vshrl.u32 %v6876_v40, 16  ;;  %v8623_v39 = vrot.slane %v8516_v25, 5  ;;  %v8621_v2 = vsel %vm10827_vm11, %v10288_v21, %v8620_v3  ;;  %v8628_v3 = vsel %vm10827_vm11, %v10289_v16, %v8627_v46 }
 0x4f1   : > { %v6575_v31 = vpop.permute.xlu1 %6574  ;;  %v6577_v43 = vpop.permute.xlu0 %6576 }
 0x4f2   : > { %6653 = vst.msk [vmem:[#allocation3 + $0x44] sm:$0xf] %vm2508_vm0, %v6575_v31  ;;  %6654 = vst.msk [vmem:[#allocation3 + $0x48] sm:$0xf] %vm2508_vm0, %v6577_v43  ;;  %v7016_v31 = vrot.slane %v7014_v30, 5  ;;  %v7029_v43 = vshrl.u32 %v6875_v44, 16  ;;  %v8624_v8 = vsel %vm10827_vm11, %v8622_v37, %v8623_v39 }
 0x4f3   : > { %7828 = vrot.lane.b32.xlu1 %v7760_v27, %s10634_s30  ;;  %7830 = vrot.lane.b32.xlu0 %v7761_v6, %s10634_s30  ;;  %v7032_v27 = vshll.u32 %v6875_v44, 16  ;;  %v7038_v6 = vshll.u32 %v6876_v40, 16  ;;  %v7044_v58 = vrot.slane %v7042_v7, 4  ;;  %v7436_v37 = vld [vmem:[#allocation2 + $0x4c] sm:$0xf] }
 0x4f4   : > { %v7031_v42 = vrot.slane %v7029_v43, 4  ;;  %v7021_v59 = vor.u32 %v7020_v1, %v7016_v31  ;;  %v7553_v43 = vrot.slane %v7436_v37, 5  ;;  %v7960_v1 = vld [vmem:[#allocation2 + $0x48] sm:$0xf]  ;;  %v7961_v7 = vld [vmem:[#allocation2 + $0x4c] sm:$0xf] }
 0x4f5   : > { %v6579_v57 = vpop.permute.xlu1 %6578  ;;  %v6581_v0 = vpop.permute.xlu0 %6580  ;;  %v7034_v54 = vrot.slane %v7032_v27, 5  ;;  %v7040_v22 = vrot.slane %v7038_v6, 5  ;;  %v7435_v39 = vld [vmem:[#allocation2 + $0x48] sm:$0xe] }
 0x4f6   : > { %6655 = vst.msk [vmem:[#allocation3 + $0x4c] sm:$0xf] %vm2508_vm0, %v6579_v57  ;;  %6656 = vst.msk [vmem:[#allocation3 + $0x50] sm:$0xf] %vm2508_vm0, %v6581_v0  ;;  %v8629_v57 = vrot.slane %v8627_v46, 4  ;;  %v7011_v0 = vor.u32 %v7010_v53, %v7007_v35  ;;  %v7022_v62 = vrot.slane %v7021_v59, 4 }
 0x4f7   : > { %7832 = vrot.lane.b32.xlu1 %v7762_v45, %s10634_s30  ;;  %7834 = vrot.lane.b32.xlu0 %v7763_v12, %s10634_s30  ;;  %v8519_v45 = vld [vmem:[#allocation2 + $0x44] sm:$0x1]  ;;  %v7035_v28 = vor.u32 %v7034_v54, %v7031_v42  ;;  %v7045_v30 = vor.u32 %v7044_v58, %v7040_v22  ;;  %v10275_v54 = vrot.slane %v7435_v39, 9  ;;  %v7963_v58 = vld [vmem:[#allocation2 + $0x54] sm:$0xf] }
 0x4f8   : > { %v6874_v12 = vld [vmem:[#allocation2 + $0x44] sm:$0x1]  ;;  %v8630_v15 = vrot.slane %v8519_v45, 5  ;;  %v7012_v63 = vrot.slane %v7011_v0, 4  ;;  %v7437_v45 = vld [vmem:[#allocation2 + $0x50] sm:$0x1] }
 0x4f9   : > { %v6583_v4 = vpop.permute.xlu1 %6582  ;;  %v6585_v51 = vpop.permute.xlu0 %6584  ;;  %v7024_v61 = vshll.u32 %v6874_v12, 16  ;;  %v7046_v25 = vrot.slane %v7045_v30, 4  ;;  %v7434_v53 = vld [vmem:[#allocation2 + $0x44] sm:$0x1]  ;;  %v8096_v0 = vshll.u32 %v7960_v1, 16  ;;  %v8102_v12 = vshll.u32 %v7961_v7, 16 }
 0x4fa   : > { %6657 = vst.msk [vmem:[#allocation3 + $0x54] sm:$0xf] %vm2508_vm0, %v6583_v4  ;;  %6658 = vst.msk [vmem:[#allocation3 + $0x58] sm:$0xf] %vm2508_vm0, %v6585_v51  ;;  %v8631_v4 = vsel %vm10827_vm11, %v8629_v57, %v8630_v15  ;;  %v6877_v51 = vld [vmem:[#allocation2 + $0x50] sm:$0x1]  ;;  %v7017_v40 = vsel %vm10820_vm8, %v7012_v63, %v7016_v31 }
 0x4fb   : > { %8388 = vrot.lane.b32.xlu1 %v8057_v5, %s10635_s8  ;;  %8390 = vrot.lane.b32.xlu0 %v8067_v55, %s10635_s8  ;;  %v7433_v5 = vld [vmem:[#allocation2 + $0x40] sm:$0xf]  ;;  %v7026_v55 = vrot.slane %v7024_v61, 5  ;;  %v7048_v50 = vshll.u32 %v6877_v51, 16  ;;  %v7549_v56 = vrot.slane %v7434_v53, 5  ;;  %v7555_v57 = vrot.slane %v7553_v43, 4 }
 0x4fc   : > { %v7546_v21 = vrot.slane %v7433_v5, 5  ;;  %v7556_v16 = vrot.slane %v7437_v45, 5  ;;  %v7964_v15 = vld [vmem:[#allocation2 + $0x58] sm:$0xf]  ;;  %v7554_v61 = vsel %vm10827_vm11, %v10275_v54, %v7553_v43  ;;  %v8098_v51 = vrot.slane %v8096_v0, 5 }
 0x4fd   : > { %v6587_v14 = vpop.permute.xlu1 %6586  ;;  %v6589_v32 = vpop.permute.xlu0 %6588  ;;  %v7050_v46 = vrot.slane %v7048_v50, 5  ;;  %v8104_v63 = vrot.slane %v8102_v12, 5  ;;  %v8120_v30 = vshll.u32 %v7963_v58, 16  ;;  %v8126_v5 = vshll.u32 %v7964_v15, 16  ;;  %v8522_v12 = vld [vmem:[#allocation2 + $0x50] sm:$0x1] }
 0x4fe   : > { %6659 = vst.msk [vmem:[#allocation3 + $0x5c] sm:$0xf] %vm2508_vm0, %v6587_v14  ;;  %6660 = vst.msk [vmem:[#allocation3 + $0x60] sm:$0xf] %vm2508_vm0, %v6589_v32  ;;  %v7432_v14 = vld [vmem:[#allocation2 + $0x3c] sm:$0xe] }
 0x4ff   : > { %8392 = vrot.lane.b32.xlu1 %v8081_v29, %s10635_s8  ;;  %8394 = vrot.lane.b32.xlu0 %v8091_v9, %s10635_s8  ;;  %v7027_v29 = vsel %vm10820_vm8, %v7022_v62, %v7026_v55  ;;  %v7036_v9 = vrot.slane %v7035_v28, 4  ;;  %v7051_v27 = vsel %vm10820_vm8, %v7046_v25, %v7050_v46  ;;  %v7548_v6 = vrot.slane %v7546_v21, 4 }
 0x500   : > { %v8117_v62 = vshrl.u32 %v7963_v58, 16  ;;  %v8130_v55 = vshrl.u32 %v7964_v15, 16  ;;  %v8122_v37 = vrot.slane %v8120_v30, 5  ;;  %v8128_v46 = vrot.slane %v8126_v5, 5 }
 0x501   : > { %v6591_v38 = vpop.permute.xlu1 %6590  ;;  %v6593_v41 = vpop.permute.xlu0 %6592  ;;  %v7041_v31 = vsel %vm10820_vm8, %v7036_v9, %v7040_v22  ;;  %v7550_v59 = vsel %vm10827_vm11, %v7548_v6, %v7549_v56  ;;  %v8106_v22 = vshrl.u32 %v7961_v7, 16  ;;  %v7765_v9 = vld [vmem:[#allocation2 + $0x4c] sm:$0xf]  ;;  %v6878_v56 = vld [vmem:[#allocation2 + $0x54] sm:$0xf] }
 0x502   : > { %6661 = vst.msk [vmem:[#allocation3 + $0x64] sm:$0xf] %vm2508_vm0, %v6591_v38  ;;  %6662 = vst.msk [vmem:[#allocation3 + $0x68] sm:$0xf] %vm2508_vm0, %v6593_v41  ;;  %v8093_v38 = vshrl.u32 %v7960_v1, 16  ;;  %v7056_v54 = vshll.u32 %v6878_v56, 16 }
 0x503   : > { %8724 = vrot.lane.b32.xlu1 %v8621_v2, %s10636_s13  ;;  %8726 = vrot.lane.b32.xlu0 %v8624_v8, %s10636_s13  ;;  %v10274_v2 = vrot.slane %v7432_v14, 9  ;;  %v8108_v28 = vrot.slane %v8106_v22, 4  ;;  %v8132_v14 = vrot.slane %v8130_v55, 4  ;;  %v7766_v1 = vld [vmem:[#allocation2 + $0x54] sm:$0xf] }
 0x505   : > { %v6595_v11 = vpop.permute.xlu1 %6594  ;;  %v6597_v23 = vpop.permute.xlu0 %6596  ;;  %v7547_v42 = vsel %vm10827_vm11, %v10274_v2, %v7546_v21  ;;  %v8109_v25 = vor.u32 %v8108_v28, %v8104_v63  ;;  %v8133_v2 = vor.u32 %v8132_v14, %v8128_v46  ;;  %v8525_v14 = vld [vmem:[#allocation2 + $0x5c] sm:$0x1] }
 0x506   : > { %6663 = vst.msk [vmem:[#allocation3 + $0x6c] sm:$0xf] %vm2508_vm0, %v6595_v11  ;;  %6664 = vst.msk [vmem:[#allocation3 + $0x70] sm:$0xf] %vm2508_vm0, %v6597_v23  ;;  %v8095_v11 = vrot.slane %v8093_v38, 4 }
 0x507   : > { %8728 = vrot.lane.b32.xlu1 %v8628_v3, %s10636_s13  ;;  %8730 = vrot.lane.b32.xlu0 %v8631_v4, %s10636_s13  ;;  %v7557_v4 = vsel %vm10827_vm11, %v7555_v57, %v7556_v16  ;;  %v8110_v7 = vrot.slane %v8109_v25, 4  ;;  %v8134_v15 = vrot.slane %v8133_v2, 4  ;;  %v8644_v2 = vrot.slane %v8525_v14, 5  ;;  %v7440_v14 = vld [vmem:[#allocation2 + $0x5c] sm:$0x1] }
 0x508   : > { %v8099_v21 = vor.u32 %v8098_v51, %v8095_v11  ;;  %v8637_v51 = vrot.slane %v8522_v12, 5 }
 0x509   : > { %v6599_v10 = vpop.permute.xlu1 %6598  ;;  %v6601_v44 = vpop.permute.xlu0 %6600 }
 0x50a   : > { %6665 = vst.msk [vmem:[#allocation3 + $0x74] sm:$0xf] %vm2508_vm0, %v6599_v10  ;;  %6666 = vst.msk [vmem:[#allocation3 + $0x78] sm:$0xf] %vm2508_vm0, %v6601_v44  ;;  %v7764_v44 = vld [vmem:[#allocation2 + $0x48] sm:$0xf] }
 0x50b   : > { %7308 = vrot.lane.b32.xlu1 %v7017_v40, %s10632_s28  ;;  %7310 = vrot.lane.b32.xlu0 %v7027_v29, %s10632_s28  ;;  %v7962_v40 = vld [vmem:[#allocation2 + $0x50] sm:$0x1]  ;;  %v8119_v29 = vrot.slane %v8117_v62, 4  ;;  %v8100_v6 = vrot.slane %v8099_v21, 4 }
 0x50d   : > { %v6603_v32 = vpop.permute.xlu1 %6602  ;;  %v6733_v35 = vpop.permute.xlu0 %6732  ;;  %v8123_v39 = vor.u32 %v8122_v37, %v8119_v29  ;;  %v8105_v22 = vsel %vm10820_vm8, %v8100_v6, %v8104_v63  ;;  %v7058_v63 = vrot.slane %v7056_v54, 5  ;;  %v6882_v29 = vld [vmem:[#allocation2 + $0x64] sm:$0xf]  ;;  %v8523_v37 = vld [vmem:[#allocation2 + $0x54] sm:$0xe] }
 0x50e   : > { %6667 = vst.msk [vmem:[#allocation3 + $0x7c] sm:$0xf] %vm2508_vm0, %v6603_v32  ;;  %v8112_v32 = vshll.u32 %v7962_v40, 16  ;;  %v7086_v6 = vshll.u32 %v6882_v29, 16  ;;  %vm10015_vm0 = vcmask 261120  }
 0x50f   : > { %6828 = vst.msk [vmem:[#allocation3] sm:$0xf] %vm2701_vm1, %v6733_v35  ;;  %7312 = vrot.lane.b32.xlu1 %v7041_v31, %s10632_s28  ;;  %7314 = vrot.lane.b32.xlu0 %v7051_v27, %s10632_s28  ;;  %v7965_v35 = vld [vmem:[#allocation2 + $0x5c] sm:$0x1]  ;;  %v8521_v31 = vld [vmem:[#allocation2 + $0x4c] sm:$0xf] }
 0x510   : > { %v7767_v27 = vld [vmem:[#allocation2 + $0x58] sm:$0xf]  ;;  %v8136_v45 = vshll.u32 %v7965_v35, 16  ;;  %v8114_v38 = vrot.slane %v8112_v32, 5  ;;  %v8124_v16 = vrot.slane %v8123_v39, 4  ;;  %v10291_v39 = vrot.slane %v8523_v37, 9 }
 0x511   : > { %v6735_v41 = vpop.permute.xlu1 %6734  ;;  %v6737_v8 = vpop.permute.xlu0 %6736 }
 0x512   : > { %6829 = vst.msk [vmem:[#allocation3 + $0x4] sm:$0xf] %vm2701_vm1, %v6735_v41  ;;  %6830 = vst.msk [vmem:[#allocation3 + $0x8] sm:$0xf] %vm2701_vm1, %v6737_v8  ;;  %v8520_v41 = vld [vmem:[#allocation2 + $0x48] sm:$0xe]  ;;  %v8115_v58 = vsel %vm10820_vm8, %v8110_v7, %v8114_v38 }
 0x513   : > { %7644 = vrot.lane.b32.xlu1 %v7547_v42, %s10633_s29  ;;  %7646 = vrot.lane.b32.xlu0 %v7550_v59, %s10633_s29  ;;  %v8634_v8 = vrot.slane %v8521_v31, 5  ;;  %v8524_v42 = vld [vmem:[#allocation2 + $0x58] sm:$0xf]  ;;  %v7053_v59 = vshrl.u32 %v6878_v56, 16  ;;  %v8138_v11 = vrot.slane %v8136_v45, 5  ;;  %v7090_v7 = vshrl.u32 %v6882_v29, 16 }
 0x514   : > { %v8641_v62 = vrot.slane %v8524_v42, 5  ;;  %v7088_v42 = vrot.slane %v7086_v6, 5  ;;  %v7563_v6 = vrot.slane %v7440_v14, 5 }
 0x515   : > { %v6739_v23 = vpop.permute.xlu1 %6738  ;;  %v6741_v3 = vpop.permute.xlu0 %6740  ;;  %v7055_v5 = vrot.slane %v7053_v59, 4  ;;  %v7092_v59 = vrot.slane %v7090_v7, 4 }
 0x516   : > { %6831 = vst.msk [vmem:[#allocation3 + $0xc] sm:$0xf] %vm2701_vm1, %v6739_v23  ;;  %6832 = vst.msk [vmem:[#allocation3 + $0x10] sm:$0xf] %vm2701_vm1, %v6741_v3  ;;  %v6881_v23 = vld [vmem:[#allocation2 + $0x60] sm:$0xf]  ;;  %v8642_v38 = vsel %vm10827_vm11, %v10291_v39, %v8641_v62 }
 0x517   : > { %7648 = vrot.lane.b32.xlu1 %v7554_v61, %s10633_s29  ;;  %7650 = vrot.lane.b32.xlu0 %v7557_v4, %s10633_s29  ;;  %v6879_v61 = vld [vmem:[#allocation2 + $0x58] sm:$0xf]  ;;  %v10290_v3 = vrot.slane %v8520_v41, 9  ;;  %v8636_v4 = vrot.slane %v8634_v8, 4  ;;  %v7077_v21 = vshrl.u32 %v6881_v23, 16  ;;  %v7080_v40 = vshll.u32 %v6881_v23, 16 }
 0x518   : > { %v7062_v55 = vshll.u32 %v6879_v61, 16  ;;  %v8643_v35 = vrot.slane %v8641_v62, 4  ;;  %v7443_v39 = vld [vmem:[#allocation2 + $0x68] sm:$0x1] }
 0x519   : > { %v6743_v50 = vpop.permute.xlu1 %6742  ;;  %v6745_v10 = vpop.permute.xlu0 %6744  ;;  %v8638_v25 = vsel %vm10827_vm11, %v8636_v4, %v8637_v51  ;;  %v7079_v31 = vrot.slane %v7077_v21, 4  ;;  %v7439_v4 = vld [vmem:[#allocation2 + $0x58] sm:$0xf]  ;;  %v7966_v21 = vld [vmem:[#allocation2 + $0x60] sm:$0xf] }
 0x51a   : > { %6833 = vst.msk [vmem:[#allocation3 + $0x14] sm:$0xf] %vm2701_vm1, %v6743_v50  ;;  %6834 = vst.msk [vmem:[#allocation3 + $0x18] sm:$0xf] %vm2701_vm1, %v6745_v10  ;;  %v7066_v50 = vshrl.u32 %v6879_v61, 16  ;;  %v8129_v10 = vsel %vm10820_vm8, %v8124_v16, %v8128_v46  ;;  %v8645_v41 = vsel %vm10827_vm11, %v8643_v35, %v8644_v2  ;;  %v8144_v35 = vshll.u32 %v7966_v21, 16 }
 0x51b   : > { %7836 = vrot.lane.b32.xlu1 %v7764_v44, %s10634_s30  ;;  %7838 = vrot.lane.b32.xlu0 %v7765_v9, %s10634_s30  ;;  %v8139_v44 = vsel %vm10820_vm8, %v8134_v15, %v8138_v11  ;;  %v8635_v9 = vsel %vm10827_vm11, %v10290_v3, %v8634_v8  ;;  %v6883_v16 = vld [vmem:[#allocation2 + $0x68] sm:$0x1]  ;;  %v6683_v15 = vld [vmem:[#allocation2 + $0x64] sm:$0xf]  ;;  %v7093_v3 = vor.u32 %v7092_v59, %v7088_v42 }
 0x51c   : > { %v7096_v62 = vshll.u32 %v6883_v16, 16 }
 0x51d   : > { %v6747_v53 = vpop.permute.xlu1 %6746  ;;  %v6749_v43 = vpop.permute.xlu0 %6748 }
 0x51e   : > { %6835 = vst.msk [vmem:[#allocation3 + $0x1c] sm:$0xf] %vm2701_vm1, %v6747_v53  ;;  %6836 = vst.msk [vmem:[#allocation3 + $0x20] sm:$0xf] %vm2701_vm1, %v6749_v43  ;;  %v7059_v53 = vor.u32 %v7058_v63, %v7055_v5  ;;  %v7064_v43 = vrot.slane %v7062_v55, 5 }
 0x51f   : > { %7840 = vrot.lane.b32.xlu1 %v7766_v1, %s10634_s30  ;;  %7842 = vrot.lane.b32.xlu0 %v7767_v27, %s10634_s30  ;;  %v7068_v1 = vrot.slane %v7066_v50, 4  ;;  %v7082_v27 = vrot.slane %v7080_v40, 5  ;;  %v7438_v5 = vld [vmem:[#allocation2 + $0x54] sm:$0xe]  ;;  %v7442_v63 = vld [vmem:[#allocation2 + $0x64] sm:$0xf] }
 0x520   : > { %v7060_v8 = vrot.slane %v7059_v53, 4  ;;  %v7098_v40 = vrot.slane %v7096_v62, 5  ;;  %v10276_v29 = vrot.slane %v7438_v5, 9 }
 0x521   : > { %v6751_v57 = vpop.permute.xlu1 %6750  ;;  %v6753_v0 = vpop.permute.xlu0 %6752  ;;  %v7083_v12 = vor.u32 %v7082_v27, %v7079_v31  ;;  %v7967_v31 = vld [vmem:[#allocation2 + $0x64] sm:$0xf]  ;;  %v7969_v27 = vld [vmem:[#allocation2 + $0x6c] sm:$0xf] }
 0x522   : > { %6837 = vst.msk [vmem:[#allocation3 + $0x24] sm:$0xf] %vm2701_vm1, %v6751_v57  ;;  %6838 = vst.msk [vmem:[#allocation3 + $0x28] sm:$0xf] %vm2701_vm1, %v6753_v0  ;;  %v6880_v57 = vld [vmem:[#allocation2 + $0x5c] sm:$0x1]  ;;  %v7069_v0 = vor.u32 %v7068_v1, %v7064_v43  ;;  %v7065_v61 = vsel %vm10820_vm8, %v7060_v8, %v7064_v43 }
 0x523   : > { %8396 = vrot.lane.b32.xlu1 %v8105_v22, %s10635_s8  ;;  %8398 = vrot.lane.b32.xlu0 %v8115_v58, %s10635_s8  ;;  %v7072_v54 = vshll.u32 %v6880_v57, 16  ;;  %v7084_v23 = vrot.slane %v7083_v12, 4  ;;  %v8150_v8 = vshll.u32 %v7967_v31, 16  ;;  %v8154_v57 = vshrl.u32 %v7967_v31, 16  ;;  %v8527_v31 = vld [vmem:[#allocation2 + $0x64] sm:$0xf] }
 0x524   : > { %v7070_v11 = vrot.slane %v7069_v0, 4  ;;  %v8168_v59 = vshll.u32 %v7969_v27, 16 }
 0x525   : > { %v6755_v28 = vpop.permute.xlu1 %6754  ;;  %v6757_v30 = vpop.permute.xlu0 %6756  ;;  %v7074_v51 = vrot.slane %v7072_v54, 5  ;;  %v7089_v50 = vsel %vm10820_vm8, %v7084_v23, %v7088_v42  ;;  %v8165_v42 = vshrl.u32 %v7969_v27, 16  ;;  %v7570_v54 = vrot.slane %v7443_v39, 5  ;;  %v8526_v39 = vld [vmem:[#allocation2 + $0x60] sm:$0xe] }
 0x526   : > { %6839 = vst.msk [vmem:[#allocation3 + $0x2c] sm:$0xf] %vm2701_vm1, %v6755_v28  ;;  %6840 = vst.msk [vmem:[#allocation3 + $0x30] sm:$0xf] %vm2701_vm1, %v6757_v30  ;;  %v8156_v23 = vrot.slane %v8154_v57, 4 }
 0x527   : > { %8400 = vrot.lane.b32.xlu1 %v8129_v10, %s10635_s8  ;;  %8402 = vrot.lane.b32.xlu0 %v8139_v44, %s10635_s8  ;;  %v7075_v55 = vsel %vm10820_vm8, %v7070_v11, %v7074_v51  ;;  %v7094_v10 = vrot.slane %v7093_v3, 4  ;;  %v7560_v44 = vrot.slane %v7439_v4, 5  ;;  %v8152_v11 = vrot.slane %v8150_v8, 5  ;;  %v7768_v3 = vld [vmem:[#allocation2 + $0x60] sm:$0xf] }
 0x528   : > { %v8167_v4 = vrot.slane %v8165_v42, 4  ;;  %v8170_v51 = vrot.slane %v8168_v59, 5  ;;  %v8648_v8 = vrot.slane %v8527_v31, 5  ;;  %v8529_v42 = vld [vmem:[#allocation2 + $0x6c] sm:$0xe] }
 0x529   : > { %v6759_v32 = vpop.permute.xlu1 %6758  ;;  %v6761_v46 = vpop.permute.xlu0 %6760  ;;  %v7099_v53 = vsel %vm10820_vm8, %v7094_v10, %v7098_v40  ;;  %v7561_v43 = vsel %vm10827_vm11, %v10276_v29, %v7560_v44  ;;  %v7562_v1 = vrot.slane %v7560_v44, 4  ;;  %v7770_v10 = vld [vmem:[#allocation2 + $0x6c] sm:$0xf]  ;;  %v8157_v44 = vor.u32 %v8156_v23, %v8152_v11 }
 0x52a   : > { %6841 = vst.msk [vmem:[#allocation3 + $0x34] sm:$0xf] %vm2701_vm1, %v6759_v32  ;;  %6842 = vst.msk [vmem:[#allocation3 + $0x38] sm:$0xf] %vm2701_vm1, %v6761_v46  ;;  %v7441_v32 = vld [vmem:[#allocation2 + $0x60] sm:$0xe] }
 0x52b   : > { %8732 = vrot.lane.b32.xlu1 %v8635_v9, %s10636_s13  ;;  %8734 = vrot.lane.b32.xlu0 %v8638_v25, %s10636_s13  ;;  %v7567_v9 = vrot.slane %v7442_v63, 5  ;;  %v8141_v46 = vshrl.u32 %v7966_v21, 16  ;;  %v10277_v7 = vrot.slane %v7441_v32, 9  ;;  %v7564_v0 = vsel %vm10827_vm11, %v7562_v1, %v7563_v6  ;;  %v7771_v32 = vld [vmem:[#allocation2 + $0x70] sm:$0xf] }
 0x52c   : > { %v8171_v21 = vor.u32 %v8170_v51, %v8167_v4  ;;  %v8650_v23 = vrot.slane %v8648_v8, 4  ;;  %v10293_v4 = vrot.slane %v8529_v42, 9  ;;  %v6887_v51 = vld [vmem:[#allocation2 + $0x78] sm:$0xf]  ;;  %v6684_v31 = vld [vmem:[#allocation2 + $0x6c] sm:$0xf] }
 0x52d   : > { %v7293_v56 = vpop.permute.xlu1 %7292  ;;  %v7295_v45 = vpop.permute.xlu0 %7294  ;;  %v7569_v2 = vrot.slane %v7567_v9, 4  ;;  %v7568_v12 = vsel %vm10827_vm11, %v10277_v7, %v7567_v9 }
 0x52e   : > { %7388 = vst.msk [vmem:[#allocation3] sm:$0xf] %vm3262_vm3, %v7293_v56  ;;  %7389 = vst.msk [vmem:[#allocation3 + $0x4] sm:$0xf] %vm3262_vm3, %v7295_v45 }
 0x52f   : > { %8736 = vrot.lane.b32.xlu1 %v8642_v38, %s10636_s13  ;;  %8738 = vrot.lane.b32.xlu0 %v8645_v41, %s10636_s13  ;;  %v8143_v38 = vrot.slane %v8141_v46, 4  ;;  %v8146_v41 = vrot.slane %v8144_v35, 5  ;;  %v8158_v35 = vrot.slane %v8157_v44, 4 }
 0x531   : > { %v7297_v22 = vpop.permute.xlu1 %7296  ;;  %v7299_v58 = vpop.permute.xlu0 %7298 }
 0x532   : > { %7390 = vst.msk [vmem:[#allocation3 + $0x8] sm:$0xf] %vm3262_vm3, %v7297_v22  ;;  %7391 = vst.msk [vmem:[#allocation3 + $0xc] sm:$0xf] %vm3262_vm3, %v7299_v58  ;;  %v7970_v22 = vld [vmem:[#allocation2 + $0x70] sm:$0xf] }
 0x533   : > { %6762 = vrot.lane.b32.xlu1 %v6683_v15, %s10631_s27  ;;  %7316 = vrot.lane.b32.xlu0 %v7065_v61, %s10632_s28  ;;  %v7571_v15 = vsel %vm10827_vm11, %v7569_v2, %v7570_v54  ;;  %v8147_v61 = vor.u32 %v8146_v41, %v8143_v38  ;;  %v8174_v62 = vshll.u32 %v7970_v22, 16  ;;  %v8530_v2 = vld [vmem:[#allocation2 + $0x70] sm:$0xf] }
 0x534   : > { %v8655_v59 = vrot.slane %v8530_v2, 5 }
 0x535   : > { %v7629_v28 = vpop.permute.xlu1 %7628  ;;  %v7631_v30 = vpop.permute.xlu0 %7630  ;;  %v8148_v63 = vrot.slane %v8147_v61, 4  ;;  %v8176_v40 = vrot.slane %v8174_v62, 5  ;;  %v8531_v62 = vld [vmem:[#allocation2 + $0x74] sm:$0x1] }
 0x536   : > { %7724 = vst.msk [vmem:[#allocation3] sm:$0xf] %vm3599_vm6, %v7629_v28  ;;  %7725 = vst.msk [vmem:[#allocation3 + $0x4] sm:$0xf] %vm3599_vm6, %v7631_v30  ;;  %v8178_v28 = vshrl.u32 %v7970_v22, 16 }
 0x537   : > { %7318 = vrot.lane.b32.xlu1 %v7075_v55, %s10632_s28  ;;  %7320 = vrot.lane.b32.xlu0 %v7089_v50, %s10632_s28  ;;  %v7968_v55 = vld [vmem:[#allocation2 + $0x68] sm:$0x1]  ;;  %v7769_v50 = vld [vmem:[#allocation2 + $0x64] sm:$0xf]  ;;  %v8153_v46 = vsel %vm10820_vm8, %v8148_v63, %v8152_v11 }
 0x538   : > { %v8180_v29 = vrot.slane %v8178_v28, 4  ;;  %v8160_v9 = vshll.u32 %v7968_v55, 16  ;;  %v8657_v28 = vrot.slane %v8655_v59, 4 }
 0x539   : > { %v7633_v25 = vpop.permute.xlu1 %7632  ;;  %v7635_v37 = vpop.permute.xlu0 %7634 }
 0x53a   : > { %7726 = vst.msk [vmem:[#allocation3 + $0x8] sm:$0xf] %vm3599_vm6, %v7633_v25  ;;  %7727 = vst.msk [vmem:[#allocation3 + $0xc] sm:$0xf] %vm3599_vm6, %v7635_v37  ;;  %v7971_v25 = vld [vmem:[#allocation2 + $0x74] sm:$0x1] }
 0x53b   : > { %7322 = vrot.lane.b32.xlu1 %v7099_v53, %s10632_s28  ;;  %7652 = vrot.lane.b32.xlu0 %v7561_v43, %s10633_s29  ;;  %v8172_v53 = vrot.slane %v8171_v21, 4  ;;  %v8181_v43 = vor.u32 %v8180_v29, %v8176_v40  ;;  %v8184_v1 = vshll.u32 %v7971_v25, 16  ;;  %v8162_v27 = vrot.slane %v8160_v9, 5 }
 0x53c   : > { %v7125_v29 = vshrl.u32 %v6887_v51, 16  ;;  %v7128_v9 = vshll.u32 %v6887_v51, 16  ;;  %v8658_v25 = vrot.slane %v8531_v62, 5 }
 0x53d   : > { %v7821_v56 = vpop.permute.xlu1 %7820  ;;  %v7823_v45 = vpop.permute.xlu0 %7822  ;;  %v8177_v38 = vsel %vm10820_vm8, %v8172_v53, %v8176_v40  ;;  %v8182_v41 = vrot.slane %v8181_v43, 4  ;;  %v8186_v57 = vrot.slane %v8184_v1, 5  ;;  %v8656_v40 = vsel %vm10827_vm11, %v10293_v4, %v8655_v59 }
 0x53e   : > { %7916 = vst.msk [vmem:[#allocation3] sm:$0xf] %vm3793_vm4, %v7821_v56  ;;  %7917 = vst.msk [vmem:[#allocation3 + $0x4] sm:$0xf] %vm3793_vm4, %v7823_v45  ;;  %v6884_v56 = vld [vmem:[#allocation2 + $0x6c] sm:$0xf]  ;;  %v8163_v45 = vsel %vm10820_vm8, %v8158_v35, %v8162_v27  ;;  %v8659_v35 = vsel %vm10827_vm11, %v8657_v28, %v8658_v25 }
 0x53f   : > { %7654 = vrot.lane.b32.xlu1 %v7564_v0, %s10633_s29  ;;  %7656 = vrot.lane.b32.xlu0 %v7568_v12, %s10633_s29  ;;  %v8528_v0 = vld [vmem:[#allocation2 + $0x68] sm:$0x1]  ;;  %v10292_v12 = vrot.slane %v8526_v39, 9  ;;  %v7101_v54 = vshrl.u32 %v6884_v56, 16  ;;  %v7104_v22 = vshll.u32 %v6884_v56, 16  ;;  %v8187_v61 = vsel %vm10820_vm8, %v8182_v41, %v8186_v57 }
 0x540   : > { %v7127_v27 = vrot.slane %v7125_v29, 4  ;;  %v6685_v41 = vld [vmem:[#allocation2 + $0x70] sm:$0xf] }
 0x541   : > { %v7825_v58 = vpop.permute.xlu1 %7824  ;;  %v7827_v16 = vpop.permute.xlu0 %7826  ;;  %v8649_v11 = vsel %vm10827_vm11, %v10292_v12, %v8648_v8  ;;  %v6686_v8 = vld [vmem:[#allocation2 + $0x78] sm:$0xf] }
 0x542   : > { %7918 = vst.msk [vmem:[#allocation3 + $0x8] sm:$0xf] %vm3793_vm4, %v7825_v58  ;;  %7919 = vst.msk [vmem:[#allocation3 + $0xc] sm:$0xf] %vm3793_vm4, %v7827_v16 }
 0x543   : > { %7658 = vrot.lane.b32.xlu1 %v7571_v15, %s10633_s29  ;;  %7844 = vrot.lane.b32.xlu0 %v7768_v3, %s10634_s30  ;;  %v6885_v15 = vld [vmem:[#allocation2 + $0x70] sm:$0xf]  ;;  %v8651_v3 = vrot.slane %v8528_v0, 5 }
 0x544   : > { %v7110_v63 = vshll.u32 %v6885_v15, 16  ;;  %v7114_v44 = vshrl.u32 %v6885_v15, 16 }
 0x545   : > { %v8381_v30 = vpop.permute.xlu1 %8380  ;;  %v8383_v5 = vpop.permute.xlu0 %8382  ;;  %v8652_v21 = vsel %vm10827_vm11, %v8650_v23, %v8651_v3  ;;  %v7445_v3 = vld [vmem:[#allocation2 + $0x70] sm:$0xf] }
 0x546   : > { %8476 = vst.msk [vmem:[#allocation3] sm:$0xf] %vm4354_vm9, %v8381_v30  ;;  %8477 = vst.msk [vmem:[#allocation3 + $0x4] sm:$0xf] %vm4354_vm9, %v8383_v5  ;;  %v7103_v30 = vrot.slane %v7101_v54, 4  ;;  %v7106_v5 = vrot.slane %v7104_v22, 5 }
 0x547   : > { %7846 = vrot.lane.b32.xlu1 %v7769_v50, %s10634_s30  ;;  %7848 = vrot.lane.b32.xlu0 %v7770_v10, %s10634_s30  ;;  %v7116_v1 = vrot.slane %v7114_v44, 4  ;;  %v7972_v44 = vld [vmem:[#allocation2 + $0x78] sm:$0xf] }
 0x548   : > { %v7107_v43 = vor.u32 %v7106_v5, %v7103_v30  ;;  %v7444_v30 = vld [vmem:[#allocation2 + $0x6c] sm:$0xe]  ;;  %v7448_v5 = vld [vmem:[#allocation2 + $0x7c] sm:$0xf] }
 0x549   : > { %v8385_v37 = vpop.permute.xlu1 %8384  ;;  %v8387_v14 = vpop.permute.xlu0 %8386  ;;  %v7581_v29 = vrot.slane %v7448_v5, 5 }
 0x54a   : > { %8478 = vst.msk [vmem:[#allocation3 + $0x8] sm:$0xf] %vm4354_vm9, %v8385_v37  ;;  %8479 = vst.msk [vmem:[#allocation3 + $0xc] sm:$0xf] %vm4354_vm9, %v8387_v14  ;;  %v6888_v37 = vld [vmem:[#allocation2 + $0x7c] sm:$0xf] }
 0x54b   : > { %7850 = vrot.lane.b32.xlu1 %v7771_v32, %s10634_s30  ;;  %8404 = vrot.lane.b32.xlu0 %v8153_v46, %s10635_s8  ;;  %v7112_v14 = vrot.slane %v7110_v63, 5  ;;  %v7138_v39 = vshrl.u32 %v6888_v37, 16 }
 0x54d   : > { %v8717_v6 = vpop.permute.xlu1 %8716  ;;  %v8719_v7 = vpop.permute.xlu0 %8718  ;;  %v7117_v57 = vor.u32 %v7116_v1, %v7112_v14  ;;  %v7140_v42 = vrot.slane %v7138_v39, 4  ;;  %v7973_v1 = vld [vmem:[#allocation2 + $0x7c] sm:$0xf]  ;;  %v7583_v39 = vrot.slane %v7581_v29, 4 }
 0x54e   : > { %8812 = vst.msk [vmem:[#allocation3] sm:$0xf] %vm4691_vm10, %v8717_v6  ;;  %8813 = vst.msk [vmem:[#allocation3 + $0x4] sm:$0xf] %vm4691_vm10, %v8719_v7  ;;  %v7130_v6 = vrot.slane %v7128_v9, 5  ;;  %v7134_v7 = vshll.u32 %v6888_v37, 16 }
 0x54f   : > { %8406 = vrot.lane.b32.xlu1 %v8163_v45, %s10635_s8  ;;  %8408 = vrot.lane.b32.xlu0 %v8177_v38, %s10635_s8  ;;  %v7108_v45 = vrot.slane %v7107_v43, 4  ;;  %v6886_v38 = vld [vmem:[#allocation2 + $0x74] sm:$0x1] }
 0x550   : > { %v7131_v0 = vor.u32 %v7130_v6, %v7127_v27  ;;  %v7136_v12 = vrot.slane %v7134_v7, 5  ;;  %v7120_v59 = vshll.u32 %v6886_v38, 16  ;;  %v7446_v37 = vld [vmem:[#allocation2 + $0x74] sm:$0x1]  ;;  %v7449_v7 = vld [vmem:[#allocation2 + $0x80] sm:$0x1] }
 0x551   : > { %v8721_v58 = vpop.permute.xlu1 %8720  ;;  %v8723_v16 = vpop.permute.xlu0 %8722  ;;  %v7113_v15 = vsel %vm10820_vm8, %v7108_v45, %v7112_v14  ;;  %v7447_v14 = vld [vmem:[#allocation2 + $0x78] sm:$0xe]  ;;  %v7577_v27 = vrot.slane %v7446_v37, 5 }
 0x552   : > { %8814 = vst.msk [vmem:[#allocation3 + $0x8] sm:$0xf] %vm4691_vm10, %v8721_v58  ;;  %8815 = vst.msk [vmem:[#allocation3 + $0xc] sm:$0xf] %vm4691_vm10, %v8723_v16  ;;  %v6889_v58 = vld [vmem:[#allocation2 + $0x80] sm:$0x1]  ;;  %v7141_v23 = vor.u32 %v7140_v42, %v7136_v12 }
 0x553   : > { %8410 = vrot.lane.b32.xlu1 %v8187_v61, %s10635_s8  ;;  %8740 = vrot.lane.b32.xlu0 %v8649_v11, %s10636_s13  ;;  %v6687_v16 = vld [vmem:[#allocation2 + $0x7c] sm:$0xf]  ;;  %v7118_v61 = vrot.slane %v7117_v57, 4  ;;  %v7132_v11 = vrot.slane %v7131_v0, 4  ;;  %v7122_v4 = vrot.slane %v7120_v59, 5  ;;  %v7144_v51 = vshll.u32 %v6889_v58, 16 }
 0x554   : > { %v10279_v6 = vrot.slane %v7447_v14, 9  ;;  %v7584_v59 = vrot.slane %v7449_v7, 5  ;;  %v8533_v14 = vld [vmem:[#allocation2 + $0x7c] sm:$0xf]  ;;  %v8536_v7 = vld [vmem:[#allocation2 + $0x88] sm:$0xf] }
 0x555   : > { %v7301_v55 = vpop.permute.xlu1 %7300  ;;  %v7303_v50 = vpop.permute.xlu0 %7302  ;;  %v10585_v10 = vld [vmem:[#allocation3] sm:$0xff]   ;;  %v7123_v63 = vsel %vm10820_vm8, %v7118_v61, %v7122_v4 }
 0x556   : > { %7392 = vst.msk [vmem:[#allocation3 + $0x10] sm:$0xf] %vm3262_vm3, %v7301_v55  ;;  %7393 = vst.msk [vmem:[#allocation3 + $0x14] sm:$0xf] %vm3262_vm3, %v7303_v50  ;;  %10489 = vmatprep.mubr.msk.bf16.mxu1 %vm4856_vm13, %v10585_v10  ;;  %v7137_v55 = vsel %vm10820_vm8, %v7132_v11, %v7136_v12  ;;  %v7142_v50 = vrot.slane %v7141_v23, 4  ;;  %v7574_v10 = vrot.slane %v7445_v3, 5  ;;  %v7582_v0 = vsel %vm10827_vm11, %v10279_v6, %v7581_v29 }
 0x557   : > { %8742 = vrot.lane.b32.xlu1 %v8652_v21, %s10636_s13  ;;  %8744 = vrot.lane.b32.xlu0 %v8656_v40, %s10636_s13  ;;  %v7146_v21 = vrot.slane %v7144_v51, 5  ;;  %v10278_v40 = vrot.slane %v7444_v30, 9  ;;  %v7772_v23 = vld [vmem:[#allocation2 + $0x78] sm:$0xf]  ;;  %v8662_v6 = vrot.slane %v8533_v14, 5 }
 0x558   : > { %v7576_v43 = vrot.slane %v7574_v10, 4 }
 0x559   : > { %v7305_v32 = vpop.permute.xlu1 %7304  ;;  %v7307_v46 = vpop.permute.xlu0 %7306  ;;  %v10586_v53 = vld [vmem:[#allocation3 + $0x8] sm:$0xff]  }
 0x55a   : > { %7394 = vst.msk [vmem:[#allocation3 + $0x18] sm:$0xf] %vm3262_vm3, %v7305_v32  ;;  %7395 = vst.msk [vmem:[#allocation3 + $0x1c] sm:$0xf] %vm3262_vm3, %v7307_v46  ;;  %10490 = vmatmul.mubr.msk.bf16.vlgmr.msra.gmra.mxu1 %vm4856_vm13, %v10586_v53  ;;  %v8189_v32 = vshrl.u32 %v7972_v44, 16  ;;  %v8192_v46 = vshll.u32 %v7972_v44, 16  ;;  %v7575_v53 = vsel %vm10827_vm11, %v10278_v40, %v7574_v10  ;;  %v7578_v57 = vsel %vm10827_vm11, %v7576_v43, %v7577_v27 }
 0x55b   : > { %8746 = vrot.lane.b32.xlu1 %v8659_v35, %s10636_s13  ;;  %6764 = vrot.lane.b32.xlu0 %v6684_v31, %s10631_s27  ;;  %v7147_v35 = vsel %vm10820_vm8, %v7142_v50, %v7146_v21  ;;  %v7975_v31 = vld [vmem:[#allocation2 + $0x84] sm:$0xf] }
 0x55c   : > { %v8191_v45 = vrot.slane %v8189_v32, 4  ;;  %v8194_v38 = vrot.slane %v8192_v46, 5  ;;  %v8213_v12 = vshrl.u32 %v7975_v31, 16  ;;  %v8216_v42 = vshll.u32 %v7975_v31, 16  ;;  %v7774_v50 = vld [vmem:[#allocation2 + $0x84] sm:$0xf] }
 0x55d   : > { %v7637_v2 = vpop.permute.xlu1 %7636  ;;  %v7639_v56 = vpop.permute.xlu0 %7638  ;;  %v7775_v32 = vld [vmem:[#allocation2 + $0x88] sm:$0xf]  ;;  %v8532_v31 = vld [vmem:[#allocation2 + $0x78] sm:$0xe] }
 0x55e   : > { %7728 = vst.msk [vmem:[#allocation3 + $0x10] sm:$0xf] %vm3599_vm6, %v7637_v2  ;;  %7729 = vst.msk [vmem:[#allocation3 + $0x14] sm:$0xf] %vm3599_vm6, %v7639_v56  ;;  %v8215_v3 = vrot.slane %v8213_v12, 4  ;;  %v8218_v4 = vrot.slane %v8216_v42, 5 }
 0x55f   : > { %6766 = vrot.lane.b32.xlu1 %v6685_v41, %s10631_s27  ;;  %6768 = vrot.lane.b32.xlu0 %v6686_v8, %s10631_s27  ;;  %v8198_v41 = vshll.u32 %v7973_v1, 16  ;;  %v8202_v8 = vshrl.u32 %v7973_v1, 16  ;;  %v10294_v12 = vrot.slane %v8532_v31, 9  ;;  %v8664_v42 = vrot.slane %v8662_v6, 4 }
 0x560   : > { %v8219_v44 = vor.u32 %v8218_v4, %v8215_v3  ;;  %v6891_v4 = vld [vmem:[#allocation2 + $0x88] sm:$0xf] }
 0x561   : > { %v7641_v54 = vpop.permute.xlu1 %7640  ;;  %v7643_v22 = vpop.permute.xlu0 %7642  ;;  %v8200_v61 = vrot.slane %v8198_v41, 5  ;;  %v8204_v11 = vrot.slane %v8202_v8, 4 }
 0x562   : > { %7730 = vst.msk [vmem:[#allocation3 + $0x18] sm:$0xf] %vm3599_vm6, %v7641_v54  ;;  %7731 = vst.msk [vmem:[#allocation3 + $0x1c] sm:$0xf] %vm3599_vm6, %v7643_v22  ;;  %v7976_v54 = vld [vmem:[#allocation2 + $0x88] sm:$0xf] }
 0x563   : > { %6770 = vrot.lane.b32.xlu1 %v6687_v16, %s10631_s27  ;;  %7324 = vrot.lane.b32.xlu0 %v7113_v15, %s10632_s28  ;;  %v7585_v16 = vsel %vm10827_vm11, %v7583_v39, %v7584_v59  ;;  %v8195_v15 = vor.u32 %v8194_v38, %v8191_v45  ;;  %v8222_v51 = vshll.u32 %v7976_v54, 16  ;;  %v8205_v10 = vor.u32 %v8204_v11, %v8200_v61  ;;  %v6890_v39 = vld [vmem:[#allocation2 + $0x84] sm:$0xf] }
 0x564   : > { %v8535_v59 = vld [vmem:[#allocation2 + $0x84] sm:$0xe] }
 0x565   : > { %v7829_v62 = vpop.permute.xlu1 %7828  ;;  %v7831_v28 = vpop.permute.xlu0 %7830  ;;  %v8196_v5 = vrot.slane %v8195_v15, 4  ;;  %v8224_v21 = vrot.slane %v8222_v51, 5  ;;  %v6893_v51 = vld [vmem:[#allocation2 + $0x90] sm:$0xf] }
 0x566   : > { %7920 = vst.msk [vmem:[#allocation3 + $0x10] sm:$0xf] %vm3793_vm4, %v7829_v62  ;;  %7921 = vst.msk [vmem:[#allocation3 + $0x14] sm:$0xf] %vm3793_vm4, %v7831_v28  ;;  %v8226_v62 = vshrl.u32 %v7976_v54, 16  ;;  %v8669_v54 = vrot.slane %v8536_v7, 5 }
 0x567   : > { %7326 = vrot.lane.b32.xlu1 %v7123_v63, %s10632_s28  ;;  %7328 = vrot.lane.b32.xlu0 %v7137_v55, %s10632_s28  ;;  %v7974_v63 = vld [vmem:[#allocation2 + $0x80] sm:$0x1]  ;;  %v7773_v55 = vld [vmem:[#allocation2 + $0x7c] sm:$0xf]  ;;  %v8201_v46 = vsel %vm10820_vm8, %v8196_v5, %v8200_v61  ;;  %v7152_v61 = vshll.u32 %v6890_v39, 16 }
 0x568   : > { %v8228_v40 = vrot.slane %v8226_v62, 4  ;;  %v8208_v29 = vshll.u32 %v7974_v63, 16 }
 0x569   : > { %v7833_v9 = vpop.permute.xlu1 %7832  ;;  %v7835_v25 = vpop.permute.xlu0 %7834 }
 0x56a   : > { %7922 = vst.msk [vmem:[#allocation3 + $0x18] sm:$0xf] %vm3793_vm4, %v7833_v9  ;;  %7923 = vst.msk [vmem:[#allocation3 + $0x1c] sm:$0xf] %vm3793_vm4, %v7835_v25  ;;  %v7977_v9 = vld [vmem:[#allocation2 + $0x8c] sm:$0x1]  ;;  %v8229_v43 = vor.u32 %v8228_v40, %v8224_v21 }
 0x56b   : > { %7330 = vrot.lane.b32.xlu1 %v7147_v35, %s10632_s28  ;;  %7660 = vrot.lane.b32.xlu0 %v7575_v53, %s10633_s29  ;;  %v8206_v35 = vrot.slane %v8205_v10, 4  ;;  %v8220_v53 = vrot.slane %v8219_v44, 4  ;;  %v8232_v1 = vshll.u32 %v7977_v9, 16  ;;  %v8210_v27 = vrot.slane %v8208_v29, 5  ;;  %v6894_v29 = vld [vmem:[#allocation2 + $0x94] sm:$0xf] }
 0x56c   : > { %v8230_v8 = vrot.slane %v8229_v43, 4  ;;  %v7154_v10 = vrot.slane %v7152_v61, 5  ;;  %v7158_v44 = vshll.u32 %v6891_v4, 16  ;;  %v7162_v40 = vshrl.u32 %v6891_v4, 16 }
 0x56d   : > { %v8389_v2 = vpop.permute.xlu1 %8388  ;;  %v8391_v56 = vpop.permute.xlu0 %8390  ;;  %v8211_v38 = vsel %vm10820_vm8, %v8206_v35, %v8210_v27  ;;  %v8225_v41 = vsel %vm10820_vm8, %v8220_v53, %v8224_v21  ;;  %v7173_v9 = vshrl.u32 %v6893_v51, 16  ;;  %v7182_v43 = vshll.u32 %v6894_v29, 16 }
 0x56e   : > { %8480 = vst.msk [vmem:[#allocation3 + $0x10] sm:$0xf] %vm4354_vm9, %v8389_v2  ;;  %8481 = vst.msk [vmem:[#allocation3 + $0x14] sm:$0xf] %vm4354_vm9, %v8391_v56  ;;  %v7160_v53 = vrot.slane %v7158_v44, 5  ;;  %v7164_v31 = vrot.slane %v7162_v40, 4 }
 0x56f   : > { %7662 = vrot.lane.b32.xlu1 %v7578_v57, %s10633_s29  ;;  %7664 = vrot.lane.b32.xlu0 %v7582_v0, %s10633_s29  ;;  %v8234_v57 = vrot.slane %v8232_v1, 5  ;;  %v8534_v0 = vld [vmem:[#allocation2 + $0x80] sm:$0x1]  ;;  %v6688_v1 = vld [vmem:[#allocation2 + $0x84] sm:$0xf]  ;;  %v7175_v27 = vrot.slane %v7173_v9, 4 }
 0x570   : > { %v8665_v3 = vrot.slane %v8534_v0, 5  ;;  %v7186_v7 = vshrl.u32 %v6894_v29, 16  ;;  %v7184_v0 = vrot.slane %v7182_v43, 5  ;;  %v7978_v44 = vld [vmem:[#allocation2 + $0x90] sm:$0xf] }
 0x571   : > { %v8393_v22 = vpop.permute.xlu1 %8392  ;;  %v8395_v58 = vpop.permute.xlu0 %8394  ;;  %v8235_v11 = vsel %vm10820_vm8, %v8230_v8, %v8234_v57  ;;  %v7165_v8 = vor.u32 %v7164_v31, %v7160_v53  ;;  %v7452_v29 = vld [vmem:[#allocation2 + $0x8c] sm:$0x1]  ;;  %v8237_v43 = vshrl.u32 %v7978_v44, 16 }
 0x572   : > { %8482 = vst.msk [vmem:[#allocation3 + $0x18] sm:$0xf] %vm4354_vm9, %v8393_v22  ;;  %8483 = vst.msk [vmem:[#allocation3 + $0x1c] sm:$0xf] %vm4354_vm9, %v8395_v58  ;;  %v7149_v22 = vshrl.u32 %v6890_v39, 16  ;;  %v8666_v62 = vsel %vm10827_vm11, %v8664_v42, %v8665_v3  ;;  %v7591_v31 = vrot.slane %v7452_v29, 5 }
 0x573   : > { %7666 = vrot.lane.b32.xlu1 %v7585_v16, %s10633_s29  ;;  %7852 = vrot.lane.b32.xlu0 %v7772_v23, %s10634_s30  ;;  %v8663_v23 = vsel %vm10827_vm11, %v10294_v12, %v8662_v6  ;;  %v7188_v12 = vrot.slane %v7186_v7, 4  ;;  %v7455_v7 = vld [vmem:[#allocation2 + $0x98] sm:$0x1] }
 0x575   : > { %v8725_v28 = vpop.permute.xlu1 %8724  ;;  %v8727_v30 = vpop.permute.xlu0 %8726 }
 0x576   : > { %8816 = vst.msk [vmem:[#allocation3 + $0x10] sm:$0xf] %vm4691_vm10, %v8725_v28  ;;  %8817 = vst.msk [vmem:[#allocation3 + $0x14] sm:$0xf] %vm4691_vm10, %v8727_v30  ;;  %v10295_v28 = vrot.slane %v8535_v59, 9 }
 0x577   : > { %7854 = vrot.lane.b32.xlu1 %v7773_v55, %s10634_s30  ;;  %7856 = vrot.lane.b32.xlu0 %v7774_v50, %s10634_s30  ;;  %v8537_v30 = vld [vmem:[#allocation2 + $0x8c] sm:$0x1]  ;;  %v8671_v55 = vrot.slane %v8669_v54, 4  ;;  %v7151_v50 = vrot.slane %v7149_v22, 4  ;;  %v6895_v22 = vld [vmem:[#allocation2 + $0x98] sm:$0x1] }
 0x578   : > { %v8670_v21 = vsel %vm10827_vm11, %v10295_v28, %v8669_v54  ;;  %v7192_v4 = vshll.u32 %v6895_v22, 16  ;;  %v7450_v28 = vld [vmem:[#allocation2 + $0x84] sm:$0xe] }
 0x579   : > { %v8729_v25 = vpop.permute.xlu1 %8728  ;;  %v8731_v37 = vpop.permute.xlu0 %8730  ;;  %v7155_v35 = vor.u32 %v7154_v10, %v7151_v50  ;;  %v7453_v10 = vld [vmem:[#allocation2 + $0x90] sm:$0xe]  ;;  %v10280_v40 = vrot.slane %v7450_v28, 9 }
 0x57a   : > { %8818 = vst.msk [vmem:[#allocation3 + $0x18] sm:$0xf] %vm4691_vm10, %v8729_v25  ;;  %8819 = vst.msk [vmem:[#allocation3 + $0x1c] sm:$0xf] %vm4691_vm10, %v8731_v37  ;;  %v7176_v25 = vshll.u32 %v6893_v51, 16  ;;  %v8672_v37 = vrot.slane %v8537_v30, 5 }
 0x57b   : > { %7858 = vrot.lane.b32.xlu1 %v7775_v32, %s10634_s30  ;;  %8412 = vrot.lane.b32.xlu0 %v8201_v46, %s10635_s8 }
 0x57c   : > { %v8673_v46 = vsel %vm10827_vm11, %v8671_v55, %v8672_v37  ;;  %v7178_v6 = vrot.slane %v7176_v25, 5 }
 0x57d   : > { %v7309_v2 = vpop.permute.xlu1 %7308  ;;  %v7311_v56 = vpop.permute.xlu0 %7310  ;;  %v10587_v45 = vld [vmem:[#allocation3 + $0x10] sm:$0xff]  }
 0x57e   : > { %7396 = vst.msk [vmem:[#allocation3 + $0x20] sm:$0xf] %vm3262_vm3, %v7309_v2  ;;  %7397 = vst.msk [vmem:[#allocation3 + $0x24] sm:$0xf] %vm3262_vm3, %v7311_v56  ;;  %10493 = vmatprep.mubr.msk.bf16.mxu1 %vm4856_vm13, %v10587_v45  ;;  %v7156_v56 = vrot.slane %v7155_v35, 4  ;;  %v7179_v57 = vor.u32 %v7178_v6, %v7175_v27 }
 0x57f   : > { %8414 = vrot.lane.b32.xlu1 %v8211_v38, %s10635_s8  ;;  %8416 = vrot.lane.b32.xlu0 %v8225_v41, %s10635_s8  ;;  %v6892_v45 = vld [vmem:[#allocation2 + $0x8c] sm:$0x1]  ;;  %v6689_v38 = vld [vmem:[#allocation2 + $0x88] sm:$0xf]  ;;  %v6690_v41 = vld [vmem:[#allocation2 + $0x90] sm:$0xf] }
 0x580   : > { %v7168_v42 = vshll.u32 %v6892_v45, 16  ;;  %v7180_v61 = vrot.slane %v7179_v57, 4  ;;  %v7981_v27 = vld [vmem:[#allocation2 + $0x9c] sm:$0xf] }
 0x581   : > { %v7313_v58 = vpop.permute.xlu1 %7312  ;;  %v7315_v16 = vpop.permute.xlu0 %7314  ;;  %v10588_v15 = vld [vmem:[#allocation3 + $0x18] sm:$0xff]  }
 0x582   : > { %7398 = vst.msk [vmem:[#allocation3 + $0x28] sm:$0xf] %vm3262_vm3, %v7313_v58  ;;  %7399 = vst.msk [vmem:[#allocation3 + $0x2c] sm:$0xf] %vm3262_vm3, %v7315_v16  ;;  %10494 = vmatmul.mubr.msk.bf16.gmra.mxu1 %vm4856_vm13, %v10588_v15  ;;  %v6691_v58 = vld [vmem:[#allocation2 + $0x94] sm:$0xf]  ;;  %v7161_v16 = vsel %vm10820_vm8, %v7156_v56, %v7160_v53  ;;  %v7185_v55 = vsel %vm10820_vm8, %v7180_v61, %v7184_v0 }
 0x583   : > { %8418 = vrot.lane.b32.xlu1 %v8235_v11, %s10635_s8  ;;  %8748 = vrot.lane.b32.xlu0 %v8663_v23, %s10636_s13  ;;  %v7166_v15 = vrot.slane %v7165_v8, 4  ;;  %v7189_v11 = vor.u32 %v7188_v12, %v7184_v0  ;;  %v7451_v23 = vld [vmem:[#allocation2 + $0x88] sm:$0xf]  ;;  %v7170_v3 = vrot.slane %v7168_v42, 5  ;;  %v7979_v53 = vld [vmem:[#allocation2 + $0x94] sm:$0xf] }
 0x584   : > { %v7588_v30 = vrot.slane %v7451_v23, 5  ;;  %v8239_v8 = vrot.slane %v8237_v43, 4  ;;  %v7982_v0 = vld [vmem:[#allocation2 + $0xa0] sm:$0xf]  ;;  %v8261_v12 = vshrl.u32 %v7981_v27, 16  ;;  %v8264_v42 = vshll.u32 %v7981_v27, 16 }
 0x585   : > { %v7645_v5 = vpop.permute.xlu1 %7644  ;;  %v7647_v63 = vpop.permute.xlu0 %7646  ;;  %v7190_v50 = vrot.slane %v7189_v11, 4  ;;  %v8270_v61 = vshll.u32 %v7982_v0, 16  ;;  %v7776_v11 = vld [vmem:[#allocation2 + $0x90] sm:$0xf] }
 0x586   : > { %7732 = vst.msk [vmem:[#allocation3 + $0x20] sm:$0xf] %vm3599_vm6, %v7645_v5  ;;  %7733 = vst.msk [vmem:[#allocation3 + $0x24] sm:$0xf] %vm3599_vm6, %v7647_v63  ;;  %v7454_v5 = vld [vmem:[#allocation2 + $0x94] sm:$0xf]  ;;  %v7171_v63 = vsel %vm10820_vm8, %v7166_v15, %v7170_v3  ;;  %v7589_v35 = vsel %vm10827_vm11, %v10280_v40, %v7588_v30 }
 0x587   : > { %8750 = vrot.lane.b32.xlu1 %v8666_v62, %s10636_s13  ;;  %8752 = vrot.lane.b32.xlu0 %v8670_v21, %s10636_s13  ;;  %v7194_v21 = vrot.slane %v7192_v4, 5  ;;  %v7595_v9 = vrot.slane %v7454_v5, 5  ;;  %v8263_v3 = vrot.slane %v8261_v12, 4  ;;  %v8266_v4 = vrot.slane %v8264_v42, 5 }
 0x589   : > { %v7649_v14 = vpop.permute.xlu1 %7648  ;;  %v7651_v32 = vpop.permute.xlu0 %7650  ;;  %v7597_v45 = vrot.slane %v7595_v9, 4 }
 0x58a   : > { %7734 = vst.msk [vmem:[#allocation3 + $0x28] sm:$0xf] %vm3599_vm6, %v7649_v14  ;;  %7735 = vst.msk [vmem:[#allocation3 + $0x2c] sm:$0xf] %vm3599_vm6, %v7651_v32  ;;  %v7590_v14 = vrot.slane %v7588_v30, 4  ;;  %v10281_v32 = vrot.slane %v7453_v10, 9 }
 0x58b   : > { %8754 = vrot.lane.b32.xlu1 %v8673_v46, %s10636_s13  ;;  %6772 = vrot.lane.b32.xlu0 %v6688_v1, %s10631_s27  ;;  %v7195_v46 = vsel %vm10820_vm8, %v7190_v50, %v7194_v21  ;;  %v8240_v1 = vshll.u32 %v7978_v44, 16  ;;  %v7778_v50 = vld [vmem:[#allocation2 + $0x9c] sm:$0xf]  ;;  %v8267_v21 = vor.u32 %v8266_v4, %v8263_v3  ;;  %v6899_v3 = vld [vmem:[#allocation2 + $0xa8] sm:$0xf] }
 0x58c   : > { %v7596_v6 = vsel %vm10827_vm11, %v10281_v32, %v7595_v9  ;;  %v7592_v56 = vsel %vm10827_vm11, %v7590_v14, %v7591_v31  ;;  %v7983_v9 = vld [vmem:[#allocation2 + $0xa4] sm:$0x1]  ;;  %v7779_v32 = vld [vmem:[#allocation2 + $0xa0] sm:$0xf] }
 0x58d   : > { %v7837_v39 = vpop.permute.xlu1 %7836  ;;  %v7839_v2 = vpop.permute.xlu0 %7838  ;;  %v8242_v57 = vrot.slane %v8240_v1, 5  ;;  %v8539_v1 = vld [vmem:[#allocation2 + $0x94] sm:$0xf]  ;;  %v8280_v27 = vshll.u32 %v7983_v9, 16 }
 0x58e   : > { %7924 = vst.msk [vmem:[#allocation3 + $0x20] sm:$0xf] %vm3793_vm4, %v7837_v39  ;;  %7925 = vst.msk [vmem:[#allocation3 + $0x24] sm:$0xf] %vm3793_vm4, %v7839_v2 }
 0x58f   : > { %6774 = vrot.lane.b32.xlu1 %v6689_v38, %s10631_s27  ;;  %6776 = vrot.lane.b32.xlu0 %v6690_v41, %s10631_s27  ;;  %v8246_v38 = vshll.u32 %v7979_v53, 16  ;;  %v8250_v41 = vshrl.u32 %v7979_v53, 16  ;;  %v8243_v23 = vor.u32 %v8242_v57, %v8239_v8  ;;  %v8268_v53 = vrot.slane %v8267_v21, 4  ;;  %v6896_v8 = vld [vmem:[#allocation2 + $0x9c] sm:$0xf] }
 0x590   : > { %v8282_v57 = vrot.slane %v8280_v27, 5 }
 0x591   : > { %v7841_v59 = vpop.permute.xlu1 %7840  ;;  %v7843_v54 = vpop.permute.xlu0 %7842  ;;  %v8252_v15 = vrot.slane %v8250_v41, 4  ;;  %v8244_v10 = vrot.slane %v8243_v23, 4  ;;  %v8676_v41 = vrot.slane %v8539_v1, 5  ;;  %v6897_v23 = vld [vmem:[#allocation2 + $0xa0] sm:$0xf] }
 0x592   : > { %7926 = vst.msk [vmem:[#allocation3 + $0x28] sm:$0xf] %vm3793_vm4, %v7841_v59  ;;  %7927 = vst.msk [vmem:[#allocation3 + $0x2c] sm:$0xf] %vm3793_vm4, %v7843_v54  ;;  %v7598_v59 = vrot.slane %v7455_v7, 5 }
 0x593   : > { %6778 = vrot.lane.b32.xlu1 %v6691_v58, %s10631_s27  ;;  %7332 = vrot.lane.b32.xlu0 %v7161_v16, %s10632_s28  ;;  %v8248_v16 = vrot.slane %v8246_v38, 5 }
 0x594   : > { %v7599_v58 = vsel %vm10827_vm11, %v7597_v45, %v7598_v59 }
 0x595   : > { %v8397_v51 = vpop.permute.xlu1 %8396  ;;  %v8399_v62 = vpop.permute.xlu0 %8398  ;;  %v8253_v44 = vor.u32 %v8252_v15, %v8248_v16 }
 0x596   : > { %8484 = vst.msk [vmem:[#allocation3 + $0x20] sm:$0xf] %vm4354_vm9, %v8397_v51  ;;  %8485 = vst.msk [vmem:[#allocation3 + $0x24] sm:$0xf] %vm4354_vm9, %v8399_v62  ;;  %v8274_v51 = vshrl.u32 %v7982_v0, 16 }
 0x597   : > { %7334 = vrot.lane.b32.xlu1 %v7171_v63, %s10632_s28  ;;  %7336 = vrot.lane.b32.xlu0 %v7185_v55, %s10632_s28  ;;  %v7980_v62 = vld [vmem:[#allocation2 + $0x98] sm:$0x1]  ;;  %v8272_v63 = vrot.slane %v8270_v61, 5  ;;  %v7777_v55 = vld [vmem:[#allocation2 + $0x94] sm:$0xf] }
 0x598   : > { %v8276_v40 = vrot.slane %v8274_v51, 4  ;;  %v8256_v29 = vshll.u32 %v7980_v62, 16  ;;  %v8543_v62 = vld [vmem:[#allocation2 + $0xa4] sm:$0x1] }
 0x599   : > { %v8401_v25 = vpop.permute.xlu1 %8400  ;;  %v8403_v37 = vpop.permute.xlu0 %8402  ;;  %v8273_v45 = vsel %vm10820_vm8, %v8268_v53, %v8272_v63  ;;  %v8686_v9 = vrot.slane %v8543_v62, 5  ;;  %v7456_v62 = vld [vmem:[#allocation2 + $0x9c] sm:$0xe] }
 0x59a   : > { %8486 = vst.msk [vmem:[#allocation3 + $0x28] sm:$0xf] %vm4354_vm9, %v8401_v25  ;;  %8487 = vst.msk [vmem:[#allocation3 + $0x2c] sm:$0xf] %vm4354_vm9, %v8403_v37  ;;  %v8277_v43 = vor.u32 %v8276_v40, %v8272_v63  ;;  %v8258_v31 = vrot.slane %v8256_v29, 5  ;;  %v7221_v40 = vshrl.u32 %v6899_v3, 16 }
 0x59b   : > { %7338 = vrot.lane.b32.xlu1 %v7195_v46, %s10632_s28  ;;  %7668 = vrot.lane.b32.xlu0 %v7589_v35, %s10633_s29  ;;  %v8249_v46 = vsel %vm10820_vm8, %v8244_v10, %v8248_v16  ;;  %v8254_v35 = vrot.slane %v8253_v44, 4  ;;  %v7200_v16 = vshll.u32 %v6896_v8, 16  ;;  %v7210_v10 = vshrl.u32 %v6897_v23, 16 }
 0x59c   : > { %v8278_v38 = vrot.slane %v8277_v43, 4  ;;  %v7224_v29 = vshll.u32 %v6899_v3, 16  ;;  %v6692_v43 = vld [vmem:[#allocation2 + $0x9c] sm:$0xf]  ;;  %v7223_v1 = vrot.slane %v7221_v40, 4 }
 0x59d   : > { %v8733_v39 = vpop.permute.xlu1 %8732  ;;  %v8735_v2 = vpop.permute.xlu0 %8734  ;;  %v7212_v53 = vrot.slane %v7210_v10, 4  ;;  %v7459_v40 = vld [vmem:[#allocation2 + $0xa8] sm:$0xe] }
 0x59e   : > { %8820 = vst.msk [vmem:[#allocation3 + $0x20] sm:$0xf] %vm4691_vm10, %v8733_v39  ;;  %8821 = vst.msk [vmem:[#allocation3 + $0x24] sm:$0xf] %vm4691_vm10, %v8735_v2  ;;  %v8538_v39 = vld [vmem:[#allocation2 + $0x90] sm:$0xe]  ;;  %v8283_v15 = vsel %vm10820_vm8, %v8278_v38, %v8282_v57 }
 0x59f   : > { %7670 = vrot.lane.b32.xlu1 %v7592_v56, %s10633_s29  ;;  %7672 = vrot.lane.b32.xlu0 %v7596_v6, %s10633_s29  ;;  %v8542_v2 = vld [vmem:[#allocation2 + $0xa0] sm:$0xf]  ;;  %v8259_v56 = vsel %vm10820_vm8, %v8254_v35, %v8258_v31  ;;  %v10296_v0 = vrot.slane %v8538_v39, 9  ;;  %v7226_v31 = vrot.slane %v7224_v29, 5  ;;  %v6694_v38 = vld [vmem:[#allocation2 + $0xa8] sm:$0xf] }
 0x5a0   : > { %v8683_v12 = vrot.slane %v8542_v2, 5  ;;  %v6693_v2 = vld [vmem:[#allocation2 + $0xa0] sm:$0xf] }
 0x5a1   : > { %v8737_v54 = vpop.permute.xlu1 %8736  ;;  %v8739_v22 = vpop.permute.xlu0 %8738  ;;  %v8677_v61 = vsel %vm10827_vm11, %v10296_v0, %v8676_v41 }
 0x5a2   : > { %8822 = vst.msk [vmem:[#allocation3 + $0x28] sm:$0xf] %vm4691_vm10, %v8737_v54  ;;  %8823 = vst.msk [vmem:[#allocation3 + $0x2c] sm:$0xf] %vm4691_vm10, %v8739_v22  ;;  %v8540_v54 = vld [vmem:[#allocation2 + $0x98] sm:$0x1] }
 0x5a3   : > { %7674 = vrot.lane.b32.xlu1 %v7599_v58, %s10633_s29  ;;  %7860 = vrot.lane.b32.xlu0 %v7776_v11, %s10634_s30  ;;  %v8541_v22 = vld [vmem:[#allocation2 + $0x9c] sm:$0xe]  ;;  %v7197_v58 = vshrl.u32 %v6896_v8, 16  ;;  %v8678_v11 = vrot.slane %v8676_v41, 4  ;;  %v8679_v4 = vrot.slane %v8540_v54, 5  ;;  %v7227_v8 = vor.u32 %v7226_v31, %v7223_v1 }
 0x5a4   : > { %v10297_v51 = vrot.slane %v8541_v22, 9  ;;  %v6901_v54 = vld [vmem:[#allocation2 + $0xb0] sm:$0x1]  ;;  %v6695_v22 = vld [vmem:[#allocation2 + $0xac] sm:$0xf]  ;;  %v10283_v1 = vrot.slane %v7459_v40, 9 }
 0x5a5   : > { %v6763_v28 = vpop.permute.xlu1 %6762  ;;  %v7317_v30 = vpop.permute.xlu0 %7316  ;;  %v10589_v5 = vld [vmem:[#allocation3 + $0x20] sm:$0xff]   ;;  %v7199_v63 = vrot.slane %v7197_v58, 4  ;;  %v8680_v44 = vsel %vm10827_vm11, %v8678_v11, %v8679_v4  ;;  %v7457_v11 = vld [vmem:[#allocation2 + $0xa0] sm:$0xf]  ;;  %v7240_v3 = vshll.u32 %v6901_v54, 16 }
 0x5a6   : > { %6843 = vst.msk [vmem:[#allocation3 + $0x3c] sm:$0xf] %vm2701_vm1, %v6763_v28  ;;  %10497 = vmatprep.mubr.msk.bf16.mxu1 %vm4856_vm13, %v10589_v5  ;;  %v8685_v28 = vrot.slane %v8683_v12, 4  ;;  %v8684_v21 = vsel %vm10827_vm11, %v10297_v51, %v8683_v12  ;;  %v7987_v31 = vld [vmem:[#allocation2 + $0xb4] sm:$0xf] }
 0x5a7   : > { %7400 = vst.msk [vmem:[#allocation3 + $0x30] sm:$0xf] %vm3262_vm3, %v7317_v30  ;;  %7862 = vrot.lane.b32.xlu1 %v7777_v55, %s10634_s30  ;;  %7864 = vrot.lane.b32.xlu0 %v7778_v50, %s10634_s30  ;;  %v7202_v55 = vrot.slane %v7200_v16, 5  ;;  %v7206_v50 = vshll.u32 %v6897_v23, 16  ;;  %v7242_v10 = vrot.slane %v7240_v3, 5 }
 0x5a9   : > { %v7319_v25 = vpop.permute.xlu1 %7318  ;;  %v7321_v37 = vpop.permute.xlu0 %7320  ;;  %v10590_v14 = vld [vmem:[#allocation3 + $0x28] sm:$0xff]   ;;  %v7208_v35 = vrot.slane %v7206_v50, 5  ;;  %v7984_v50 = vld [vmem:[#allocation2 + $0xa8] sm:$0xf] }
 0x5aa   : > { %7401 = vst.msk [vmem:[#allocation3 + $0x34] sm:$0xf] %vm3262_vm3, %v7319_v25  ;;  %7402 = vst.msk [vmem:[#allocation3 + $0x38] sm:$0xf] %vm3262_vm3, %v7321_v37  ;;  %10498 = vmatmul.mubr.msk.bf16.gmra.mxu1 %vm4856_vm13, %v10590_v14  ;;  %v6900_v25 = vld [vmem:[#allocation2 + $0xac] sm:$0xf] }
 0x5ab   : > { %7866 = vrot.lane.b32.xlu1 %v7779_v32, %s10634_s30  ;;  %8420 = vrot.lane.b32.xlu0 %v8249_v46, %s10635_s8  ;;  %v8687_v32 = vsel %vm10827_vm11, %v8685_v28, %v8686_v9  ;;  %v7203_v46 = vor.u32 %v7202_v55, %v7199_v63  ;;  %v7230_v27 = vshll.u32 %v6900_v25, 16  ;;  %v7602_v28 = vrot.slane %v7457_v11, 5  ;;  %v7460_v55 = vld [vmem:[#allocation2 + $0xac] sm:$0xf]  ;;  %v7780_v11 = vld [vmem:[#allocation2 + $0xa8] sm:$0xf] }
 0x5ad   : > { %v7323_v6 = vpop.permute.xlu1 %7322  ;;  %v7653_v7 = vpop.permute.xlu0 %7652  ;;  %v7204_v41 = vrot.slane %v7203_v46, 4  ;;  %v7232_v57 = vrot.slane %v7230_v27, 5  ;;  %v7461_v27 = vld [vmem:[#allocation2 + $0xb0] sm:$0x1] }
 0x5ae   : > { %7403 = vst.msk [vmem:[#allocation3 + $0x3c] sm:$0xf] %vm3262_vm3, %v7323_v6  ;;  %v7234_v6 = vshrl.u32 %v6900_v25, 16  ;;  %v7604_v25 = vrot.slane %v7602_v28, 4 }
 0x5af   : > { %7736 = vst.msk [vmem:[#allocation3 + $0x30] sm:$0xf] %vm3599_vm6, %v7653_v7  ;;  %8422 = vrot.lane.b32.xlu1 %v8259_v56, %s10635_s8  ;;  %8424 = vrot.lane.b32.xlu0 %v8273_v45, %s10635_s8  ;;  %v6898_v56 = vld [vmem:[#allocation2 + $0xa4] sm:$0x1]  ;;  %v7213_v45 = vor.u32 %v7212_v53, %v7208_v35  ;;  %v7209_v58 = vsel %vm10820_vm8, %v7204_v41, %v7208_v35  ;;  %v8285_v35 = vshrl.u32 %v7984_v50, 16  ;;  %v8288_v53 = vshll.u32 %v7984_v50, 16 }
 0x5b0   : > { %v7236_v0 = vrot.slane %v7234_v6, 4  ;;  %v7216_v12 = vshll.u32 %v6898_v56, 16  ;;  %v7782_v50 = vld [vmem:[#allocation2 + $0xb4] sm:$0xf] }
 0x5b1   : > { %v7655_v42 = vpop.permute.xlu1 %7654  ;;  %v7657_v59 = vpop.permute.xlu0 %7656  ;;  %v7214_v16 = vrot.slane %v7213_v45, 4  ;;  %v8287_v41 = vrot.slane %v8285_v35, 4 }
 0x5b2   : > { %7737 = vst.msk [vmem:[#allocation3 + $0x34] sm:$0xf] %vm3599_vm6, %v7655_v42  ;;  %7738 = vst.msk [vmem:[#allocation3 + $0x38] sm:$0xf] %vm3599_vm6, %v7657_v59  ;;  %v7218_v23 = vrot.slane %v7216_v12, 5  ;;  %v8312_v12 = vshll.u32 %v7987_v31, 16 }
 0x5b3   : > { %8426 = vrot.lane.b32.xlu1 %v8283_v15, %s10635_s8  ;;  %8756 = vrot.lane.b32.xlu0 %v8677_v61, %s10636_s13  ;;  %v7228_v15 = vrot.slane %v7227_v8, 4  ;;  %v7237_v61 = vor.u32 %v7236_v0, %v7232_v57  ;;  %v8290_v8 = vrot.slane %v8288_v53, 5  ;;  %v8309_v0 = vshrl.u32 %v7987_v31, 16 }
 0x5b5   : > { %v7659_v30 = vpop.permute.xlu1 %7658  ;;  %v7845_v5 = vpop.permute.xlu0 %7844  ;;  %v7238_v63 = vrot.slane %v7237_v61, 4  ;;  %v8311_v3 = vrot.slane %v8309_v0, 4 }
 0x5b6   : > { %7739 = vst.msk [vmem:[#allocation3 + $0x3c] sm:$0xf] %vm3599_vm6, %v7659_v30  ;;  %v7219_v30 = vsel %vm10820_vm8, %v7214_v16, %v7218_v23  ;;  %v8291_v23 = vor.u32 %v8290_v8, %v8287_v41  ;;  %v8548_v41 = vld [vmem:[#allocation2 + $0xb8] sm:$0xf]  ;;  %v6902_v8 = vld [vmem:[#allocation2 + $0xb4] sm:$0xf] }
 0x5b7   : > { %7928 = vst.msk [vmem:[#allocation3 + $0x30] sm:$0xf] %vm3793_vm4, %v7845_v5  ;;  %8758 = vrot.lane.b32.xlu1 %v8680_v44, %s10636_s13  ;;  %8760 = vrot.lane.b32.xlu0 %v8684_v21, %s10636_s13  ;;  %v7233_v5 = vsel %vm10820_vm8, %v7228_v15, %v7232_v57  ;;  %v10282_v44 = vrot.slane %v7456_v62, 9  ;;  %v7458_v21 = vld [vmem:[#allocation2 + $0xa4] sm:$0x1] }
 0x5b8   : > { %v7988_v57 = vld [vmem:[#allocation2 + $0xb8] sm:$0xf]  ;;  %v7781_v62 = vld [vmem:[#allocation2 + $0xac] sm:$0xf] }
 0x5b9   : > { %v7847_v37 = vpop.permute.xlu1 %7846  ;;  %v7849_v14 = vpop.permute.xlu0 %7848  ;;  %v7603_v46 = vsel %vm10827_vm11, %v10282_v44, %v7602_v28  ;;  %v8318_v61 = vshll.u32 %v7988_v57, 16 }
 0x5ba   : > { %7929 = vst.msk [vmem:[#allocation3 + $0x34] sm:$0xf] %vm3793_vm4, %v7847_v37  ;;  %7930 = vst.msk [vmem:[#allocation3 + $0x38] sm:$0xf] %vm3793_vm4, %v7849_v14  ;;  %v7609_v37 = vrot.slane %v7460_v55, 5 }
 0x5bb   : > { %8762 = vrot.lane.b32.xlu1 %v8687_v32, %s10636_s13  ;;  %6780 = vrot.lane.b32.xlu0 %v6692_v43, %s10631_s27  ;;  %v7985_v14 = vld [vmem:[#allocation2 + $0xac] sm:$0xf]  ;;  %v7243_v32 = vsel %vm10820_vm8, %v7238_v63, %v7242_v10  ;;  %v7605_v43 = vrot.slane %v7458_v21, 5  ;;  %v7986_v63 = vld [vmem:[#allocation2 + $0xb0] sm:$0x1]  ;;  %v8292_v10 = vrot.slane %v8291_v23, 4 }
 0x5bc   : > { %v8294_v6 = vshll.u32 %v7985_v14, 16  ;;  %v7610_v45 = vsel %vm10827_vm11, %v10283_v1, %v7609_v37  ;;  %v8320_v21 = vrot.slane %v8318_v61, 5  ;;  %v6903_v61 = vld [vmem:[#allocation2 + $0xb8] sm:$0xf]  ;;  %v7248_v23 = vshll.u32 %v6902_v8, 16 }
 0x5bd   : > { %v7851_v7 = vpop.permute.xlu1 %7850  ;;  %v8405_v39 = vpop.permute.xlu0 %8404  ;;  %v7606_v56 = vsel %vm10827_vm11, %v7604_v25, %v7605_v43 }
 0x5be   : > { %7931 = vst.msk [vmem:[#allocation3 + $0x3c] sm:$0xf] %vm3793_vm4, %v7851_v7  ;;  %v8298_v7 = vshrl.u32 %v7985_v14, 16  ;;  %v8545_v14 = vld [vmem:[#allocation2 + $0xac] sm:$0xf] }
 0x5bf   : > { %8488 = vst.msk [vmem:[#allocation3 + $0x30] sm:$0xf] %vm4354_vm9, %v8405_v39  ;;  %6782 = vrot.lane.b32.xlu1 %v6693_v2, %s10631_s27  ;;  %6784 = vrot.lane.b32.xlu0 %v6694_v38, %s10631_s27  ;;  %v7611_v38 = vrot.slane %v7609_v37, 4  ;;  %v7989_v37 = vld [vmem:[#allocation2 + $0xbc] sm:$0x1] }
 0x5c0   : > { %v8300_v54 = vrot.slane %v8298_v7, 4  ;;  %v8328_v31 = vshll.u32 %v7989_v37, 16 }
 0x5c1   : > { %v8407_v42 = vpop.permute.xlu1 %8406  ;;  %v8409_v59 = vpop.permute.xlu0 %8408 }
 0x5c2   : > { %8489 = vst.msk [vmem:[#allocation3 + $0x34] sm:$0xf] %vm4354_vm9, %v8407_v42  ;;  %8490 = vst.msk [vmem:[#allocation3 + $0x38] sm:$0xf] %vm4354_vm9, %v8409_v59  ;;  %v7612_v42 = vrot.slane %v7461_v27, 5  ;;  %v8296_v59 = vrot.slane %v8294_v6, 5 }
 0x5c3   : > { %6786 = vrot.lane.b32.xlu1 %v6695_v22, %s10631_s27  ;;  %7340 = vrot.lane.b32.xlu0 %v7209_v58, %s10632_s28  ;;  %v8690_v27 = vrot.slane %v8545_v14, 5 }
 0x5c4   : > { %v7613_v16 = vsel %vm10827_vm11, %v7611_v38, %v7612_v42  ;;  %v8301_v55 = vor.u32 %v8300_v54, %v8296_v59  ;;  %v8546_v38 = vld [vmem:[#allocation2 + $0xb0] sm:$0x1]  ;;  %v8547_v42 = vld [vmem:[#allocation2 + $0xb4] sm:$0xe] }
 0x5c5   : > { %v8411_v4 = vpop.permute.xlu1 %8410  ;;  %v8741_v51 = vpop.permute.xlu0 %8740 }
 0x5c6   : > { %8491 = vst.msk [vmem:[#allocation3 + $0x3c] sm:$0xf] %vm4354_vm9, %v8411_v4  ;;  %v8314_v4 = vrot.slane %v8312_v12, 5  ;;  %v8302_v35 = vrot.slane %v8301_v55, 4  ;;  %v8692_v12 = vrot.slane %v8690_v27, 4  ;;  %v7254_v55 = vshll.u32 %v6903_v61, 16 }
 0x5c7   : > { %8824 = vst.msk [vmem:[#allocation3 + $0x30] sm:$0xf] %vm4691_vm10, %v8741_v51  ;;  %7342 = vrot.lane.b32.xlu1 %v7219_v30, %s10632_s28  ;;  %7344 = vrot.lane.b32.xlu0 %v7233_v5, %s10632_s28  ;;  %v8322_v51 = vshrl.u32 %v7988_v57, 16  ;;  %v8330_v57 = vrot.slane %v8328_v31, 5 }
 0x5c8   : > { %v8315_v44 = vor.u32 %v8314_v4, %v8311_v3  ;;  %v10299_v3 = vrot.slane %v8547_v42, 9  ;;  %v6905_v4 = vld [vmem:[#allocation2 + $0xc0] sm:$0xf] }
 0x5c9   : > { %v8743_v29 = vpop.permute.xlu1 %8742  ;;  %v8745_v9 = vpop.permute.xlu0 %8744  ;;  %v8324_v40 = vrot.slane %v8322_v51, 4 }
 0x5ca   : > { %8825 = vst.msk [vmem:[#allocation3 + $0x34] sm:$0xf] %vm4691_vm10, %v8743_v29  ;;  %8826 = vst.msk [vmem:[#allocation3 + $0x38] sm:$0xf] %vm4691_vm10, %v8745_v9  ;;  %v8304_v29 = vshll.u32 %v7986_v63, 16  ;;  %v8316_v53 = vrot.slane %v8315_v44, 4 }
 0x5cb   : > { %7346 = vrot.lane.b32.xlu1 %v7243_v32, %s10632_s28  ;;  %7676 = vrot.lane.b32.xlu0 %v7603_v46, %s10633_s29  ;;  %v7783_v32 = vld [vmem:[#allocation2 + $0xb8] sm:$0xf]  ;;  %v8297_v46 = vsel %vm10820_vm8, %v8292_v10, %v8296_v59  ;;  %v8325_v43 = vor.u32 %v8324_v40, %v8320_v21  ;;  %v7250_v44 = vrot.slane %v7248_v23, 5  ;;  %v7269_v40 = vshrl.u32 %v6905_v4, 16 }
 0x5cc   : > { %v8306_v1 = vrot.slane %v8304_v29, 5  ;;  %v7272_v29 = vshll.u32 %v6905_v4, 16 }
 0x5cd   : > { %v8747_v39 = vpop.permute.xlu1 %8746  ;;  %v6765_v2 = vpop.permute.xlu0 %6764 }
 0x5ce   : > { %8827 = vst.msk [vmem:[#allocation3 + $0x3c] sm:$0xf] %vm4691_vm10, %v8747_v39  ;;  %v8544_v39 = vld [vmem:[#allocation2 + $0xa8] sm:$0xe]  ;;  %v7274_v31 = vrot.slane %v7272_v29, 5 }
 0x5cf   : > { %6844 = vst.msk [vmem:[#allocation3 + $0x40] sm:$0xf] %vm2701_vm1, %v6765_v2  ;;  %7678 = vrot.lane.b32.xlu1 %v7606_v56, %s10633_s29  ;;  %7680 = vrot.lane.b32.xlu0 %v7610_v45, %s10633_s29  ;;  %v8307_v2 = vsel %vm10820_vm8, %v8302_v35, %v8306_v1  ;;  %v8321_v56 = vsel %vm10820_vm8, %v8316_v53, %v8320_v21  ;;  %v8326_v45 = vrot.slane %v8325_v43, 4  ;;  %v10298_v0 = vrot.slane %v8544_v39, 9  ;;  %v6906_v21 = vld [vmem:[#allocation2 + $0xc4] sm:$0xf] }
 0x5d0   : > { %v7278_v35 = vshll.u32 %v6906_v21, 16  ;;  %v6696_v53 = vld [vmem:[#allocation2 + $0xb4] sm:$0xf]  ;;  %v7271_v1 = vrot.slane %v7269_v40, 4  ;;  %v6697_v39 = vld [vmem:[#allocation2 + $0xb8] sm:$0xf] }
 0x5d1   : > { %v6767_v22 = vpop.permute.xlu1 %6766  ;;  %v6769_v58 = vpop.permute.xlu0 %6768  ;;  %v10591_v15 = vld [vmem:[#allocation3 + $0x30] sm:$0xff]  }
 0x5d2   : > { %6845 = vst.msk [vmem:[#allocation3 + $0x44] sm:$0xf] %vm2701_vm1, %v6767_v22  ;;  %6846 = vst.msk [vmem:[#allocation3 + $0x48] sm:$0xf] %vm2701_vm1, %v6769_v58  ;;  %10501 = vmatprep.mubr.msk.bf16.mxu1 %vm4856_vm13, %v10591_v15  ;;  %v8693_v22 = vrot.slane %v8546_v38, 5  ;;  %v8697_v58 = vrot.slane %v8548_v41, 5  ;;  %v8691_v15 = vsel %vm10827_vm11, %v10298_v0, %v8690_v27  ;;  %v7275_v41 = vor.u32 %v7274_v31, %v7271_v1 }
 0x5d3   : > { %7682 = vrot.lane.b32.xlu1 %v7613_v16, %s10633_s29  ;;  %7868 = vrot.lane.b32.xlu0 %v7780_v11, %s10634_s30  ;;  %v8331_v16 = vsel %vm10820_vm8, %v8326_v45, %v8330_v57  ;;  %v7245_v11 = vshrl.u32 %v6902_v8, 16  ;;  %v7282_v27 = vshrl.u32 %v6906_v21, 16  ;;  %v6698_v45 = vld [vmem:[#allocation2 + $0xc0] sm:$0xf]  ;;  %v7280_v8 = vrot.slane %v7278_v35, 5 }
 0x5d4   : > { %v8694_v51 = vsel %vm10827_vm11, %v8692_v12, %v8693_v22  ;;  %v8699_v63 = vrot.slane %v8697_v58, 4  ;;  %v7465_v21 = vld [vmem:[#allocation2 + $0xc0] sm:$0xe]  ;;  %v7991_v1 = vld [vmem:[#allocation2 + $0xc4] sm:$0xf] }
 0x5d5   : > { %v6771_v28 = vpop.permute.xlu1 %6770  ;;  %v7325_v30 = vpop.permute.xlu0 %7324  ;;  %v10592_v5 = vld [vmem:[#allocation3 + $0x38] sm:$0xff]   ;;  %v7247_v10 = vrot.slane %v7245_v11, 4  ;;  %v7284_v57 = vrot.slane %v7282_v27, 4  ;;  %v7467_v31 = vld [vmem:[#allocation2 + $0xc8] sm:$0x1] }
 0x5d6   : > { %6847 = vst.msk [vmem:[#allocation3 + $0x4c] sm:$0xf] %vm2701_vm1, %v6771_v28  ;;  %10502 = vmatmul.mubr.msk.bf16.gmra.mxu1 %vm4856_vm13, %v10592_v5  ;;  %v8698_v5 = vsel %vm10827_vm11, %v10299_v3, %v8697_v58 }
 0x5d7   : > { %7404 = vst.msk [vmem:[#allocation3 + $0x40] sm:$0xf] %vm3262_vm3, %v7325_v30  ;;  %7870 = vrot.lane.b32.xlu1 %v7781_v62, %s10634_s30  ;;  %7872 = vrot.lane.b32.xlu0 %v7782_v50, %s10634_s30  ;;  %v8549_v62 = vld [vmem:[#allocation2 + $0xbc] sm:$0x1]  ;;  %v7258_v50 = vshrl.u32 %v6903_v61, 16  ;;  %v7251_v43 = vor.u32 %v7250_v44, %v7247_v10 }
 0x5d8   : > { %v7463_v61 = vld [vmem:[#allocation2 + $0xb8] sm:$0xf]  ;;  %v7464_v44 = vld [vmem:[#allocation2 + $0xbc] sm:$0x1] }
 0x5d9   : > { %v7327_v9 = vpop.permute.xlu1 %7326  ;;  %v7329_v25 = vpop.permute.xlu0 %7328  ;;  %v7252_v38 = vrot.slane %v7251_v43, 4  ;;  %v10285_v43 = vrot.slane %v7465_v21, 9 }
 0x5da   : > { %7405 = vst.msk [vmem:[#allocation3 + $0x44] sm:$0xf] %vm3262_vm3, %v7327_v9  ;;  %7406 = vst.msk [vmem:[#allocation3 + $0x48] sm:$0xf] %vm3262_vm3, %v7329_v25  ;;  %v8700_v9 = vrot.slane %v8549_v62, 5  ;;  %v7616_v62 = vrot.slane %v7463_v61, 5 }
 0x5db   : > { %7874 = vrot.lane.b32.xlu1 %v7783_v32, %s10634_s30  ;;  %8428 = vrot.lane.b32.xlu0 %v8297_v46, %s10635_s8  ;;  %v7256_v32 = vrot.slane %v7254_v55, 5  ;;  %v7260_v46 = vrot.slane %v7258_v50, 4  ;;  %v7990_v55 = vld [vmem:[#allocation2 + $0xc0] sm:$0xf] }
 0x5dc   : > { %v8701_v14 = vsel %vm10827_vm11, %v8699_v63, %v8700_v9  ;;  %v7466_v63 = vld [vmem:[#allocation2 + $0xc4] sm:$0xf]  ;;  %v7618_v9 = vrot.slane %v7616_v62, 4  ;;  %v8336_v35 = vshll.u32 %v7990_v55, 16 }
 0x5dd   : > { %v7331_v6 = vpop.permute.xlu1 %7330  ;;  %v7661_v7 = vpop.permute.xlu0 %7660  ;;  %v7257_v22 = vsel %vm10820_vm8, %v7252_v38, %v7256_v32  ;;  %v7994_v38 = vld [vmem:[#allocation2 + $0xd0] sm:$0xf] }
 0x5de   : > { %7407 = vst.msk [vmem:[#allocation3 + $0x4c] sm:$0xf] %vm3262_vm3, %v7331_v6 }
 0x5df   : > { %7740 = vst.msk [vmem:[#allocation3 + $0x40] sm:$0xf] %vm3599_vm6, %v7661_v7  ;;  %8430 = vrot.lane.b32.xlu1 %v8307_v2, %s10635_s8  ;;  %8432 = vrot.lane.b32.xlu0 %v8321_v56, %s10635_s8  ;;  %v6904_v2 = vld [vmem:[#allocation2 + $0xbc] sm:$0x1]  ;;  %v7261_v56 = vor.u32 %v7260_v46, %v7256_v32  ;;  %v8333_v46 = vshrl.u32 %v7990_v55, 16 }
 0x5e0   : > { %v7264_v0 = vshll.u32 %v6904_v2, 16 }
 0x5e1   : > { %v7663_v59 = vpop.permute.xlu1 %7662  ;;  %v7665_v54 = vpop.permute.xlu0 %7664  ;;  %v7262_v58 = vrot.slane %v7261_v56, 4 }
 0x5e2   : > { %7741 = vst.msk [vmem:[#allocation3 + $0x44] sm:$0xf] %vm3599_vm6, %v7663_v59  ;;  %7742 = vst.msk [vmem:[#allocation3 + $0x48] sm:$0xf] %vm3599_vm6, %v7665_v54  ;;  %v6907_v59 = vld [vmem:[#allocation2 + $0xc8] sm:$0x1] }
 0x5e3   : > { %8434 = vrot.lane.b32.xlu1 %v8331_v16, %s10635_s8  ;;  %8764 = vrot.lane.b32.xlu0 %v8691_v15, %s10636_s13  ;;  %v6699_v54 = vld [vmem:[#allocation2 + $0xc4] sm:$0xf]  ;;  %v7276_v16 = vrot.slane %v7275_v41, 4  ;;  %v7285_v15 = vor.u32 %v7284_v57, %v7280_v8  ;;  %v7266_v11 = vrot.slane %v7264_v0, 5  ;;  %v7288_v23 = vshll.u32 %v6907_v59, 16 }
 0x5e4   : > { %v8335_v41 = vrot.slane %v8333_v46, 4  ;;  %v8342_v57 = vshll.u32 %v7991_v1, 16  ;;  %v8346_v0 = vshrl.u32 %v7991_v1, 16 }
 0x5e5   : > { %v7667_v28 = vpop.permute.xlu1 %7666  ;;  %v7853_v30 = vpop.permute.xlu0 %7852  ;;  %v7290_v50 = vrot.slane %v7288_v23, 5 }
 0x5e6   : > { %7743 = vst.msk [vmem:[#allocation3 + $0x4c] sm:$0xf] %vm3599_vm6, %v7667_v28  ;;  %v7267_v28 = vsel %vm10820_vm8, %v7262_v58, %v7266_v11  ;;  %v7784_v11 = vld [vmem:[#allocation2 + $0xc0] sm:$0xf] }
 0x5e7   : > { %7932 = vst.msk [vmem:[#allocation3 + $0x40] sm:$0xf] %vm3793_vm4, %v7853_v30  ;;  %8766 = vrot.lane.b32.xlu1 %v8694_v51, %s10636_s13  ;;  %8768 = vrot.lane.b32.xlu0 %v8698_v5, %s10636_s13  ;;  %v7462_v51 = vld [vmem:[#allocation2 + $0xb4] sm:$0xe]  ;;  %v7281_v30 = vsel %vm10820_vm8, %v7276_v16, %v7280_v8  ;;  %v7286_v5 = vrot.slane %v7285_v15, 4  ;;  %v8338_v8 = vrot.slane %v8336_v35, 5 }
 0x5e8   : > { %v10284_v10 = vrot.slane %v7462_v51, 9  ;;  %v7786_v51 = vld [vmem:[#allocation2 + $0xcc] sm:$0xf] }
 0x5e9   : > { %v7855_v25 = vpop.permute.xlu1 %7854  ;;  %v7857_v37 = vpop.permute.xlu0 %7856  ;;  %v8339_v23 = vor.u32 %v8338_v8, %v8335_v41 }
 0x5ea   : > { %7933 = vst.msk [vmem:[#allocation3 + $0x44] sm:$0xf] %vm3793_vm4, %v7855_v25  ;;  %7934 = vst.msk [vmem:[#allocation3 + $0x48] sm:$0xf] %vm3793_vm4, %v7857_v37  ;;  %v7623_v25 = vrot.slane %v7466_v63, 5  ;;  %v7617_v32 = vsel %vm10827_vm11, %v10284_v10, %v7616_v62 }
 0x5eb   : > { %8770 = vrot.lane.b32.xlu1 %v8701_v14, %s10636_s13  ;;  %6788 = vrot.lane.b32.xlu0 %v6696_v53, %s10631_s27  ;;  %v7993_v37 = vld [vmem:[#allocation2 + $0xcc] sm:$0xf]  ;;  %v7291_v14 = vsel %vm10820_vm8, %v7286_v5, %v7290_v50  ;;  %v7619_v53 = vrot.slane %v7464_v44, 5  ;;  %v7992_v62 = vld [vmem:[#allocation2 + $0xc8] sm:$0x1]  ;;  %v8340_v21 = vrot.slane %v8339_v23, 4 }
 0x5ec   : > { %v8357_v27 = vshrl.u32 %v7993_v37, 16  ;;  %v7624_v56 = vsel %vm10827_vm11, %v10285_v43, %v7623_v25  ;;  %v7995_v10 = vld [vmem:[#allocation2 + $0xd4] sm:$0x1]  ;;  %v7785_v44 = vld [vmem:[#allocation2 + $0xc4] sm:$0xf] }
 0x5ed   : > { %v7859_v6 = vpop.permute.xlu1 %7858  ;;  %v8413_v7 = vpop.permute.xlu0 %8412  ;;  %v7620_v2 = vsel %vm10827_vm11, %v7618_v9, %v7619_v53  ;;  %v8352_v9 = vshll.u32 %v7992_v62, 16  ;;  %v8551_v43 = vld [vmem:[#allocation2 + $0xc4] sm:$0xf] }
 0x5ee   : > { %7935 = vst.msk [vmem:[#allocation3 + $0x4c] sm:$0xf] %vm3793_vm4, %v7859_v6  ;;  %v8360_v6 = vshll.u32 %v7993_v37, 16  ;;  %v8704_v41 = vrot.slane %v8551_v43, 5 }
 0x5ef   : > { %8492 = vst.msk [vmem:[#allocation3 + $0x40] sm:$0xf] %vm4354_vm9, %v8413_v7  ;;  %6790 = vrot.lane.b32.xlu1 %v6697_v39, %s10631_s27  ;;  %6792 = vrot.lane.b32.xlu0 %v6698_v45, %s10631_s27  ;;  %v7625_v45 = vrot.slane %v7623_v25, 4  ;;  %v8354_v1 = vrot.slane %v8352_v9, 5 }
 0x5f0   : > { %v8362_v59 = vrot.slane %v8360_v6, 5 }
 0x5f1   : > { %v8415_v12 = vpop.permute.xlu1 %8414  ;;  %v8417_v42 = vpop.permute.xlu0 %8416 }
 0x5f2   : > { %8493 = vst.msk [vmem:[#allocation3 + $0x44] sm:$0xf] %vm4354_vm9, %v8415_v12  ;;  %8494 = vst.msk [vmem:[#allocation3 + $0x48] sm:$0xf] %vm4354_vm9, %v8417_v42  ;;  %v7626_v12 = vrot.slane %v7467_v31, 5  ;;  %v8359_v42 = vrot.slane %v8357_v27, 4 }
 0x5f3   : > { %6794 = vrot.lane.b32.xlu1 %v6699_v54, %s10631_s27  ;;  %7348 = vrot.lane.b32.xlu0 %v7257_v22, %s10632_s28  ;;  %v8366_v54 = vshll.u32 %v7994_v38, 16  ;;  %v8370_v22 = vshrl.u32 %v7994_v38, 16 }
 0x5f4   : > { %v7627_v61 = vsel %vm10827_vm11, %v7625_v45, %v7626_v12  ;;  %v8553_v45 = vld [vmem:[#allocation2 + $0xcc] sm:$0xe] }
 0x5f5   : > { %v8419_v3 = vpop.permute.xlu1 %8418  ;;  %v8749_v4 = vpop.permute.xlu0 %8748  ;;  %v8372_v5 = vrot.slane %v8370_v22, 4  ;;  %v10301_v12 = vrot.slane %v8553_v45, 9  ;;  %v8555_v22 = vld [vmem:[#allocation2 + $0xd4] sm:$0x1] }
 0x5f6   : > { %8495 = vst.msk [vmem:[#allocation3 + $0x4c] sm:$0xf] %vm4354_vm9, %v8419_v3  ;;  %v8344_v3 = vrot.slane %v8342_v57, 5 }
 0x5f7   : > { %8828 = vst.msk [vmem:[#allocation3 + $0x40] sm:$0xf] %vm4691_vm10, %v8749_v4  ;;  %7350 = vrot.lane.b32.xlu1 %v7267_v28, %s10632_s28  ;;  %7352 = vrot.lane.b32.xlu0 %v7281_v30, %s10632_s28  ;;  %v8348_v4 = vrot.slane %v8346_v0, 4  ;;  %v8363_v28 = vor.u32 %v8362_v59, %v8359_v42  ;;  %v8368_v30 = vrot.slane %v8366_v54, 5  ;;  %v8552_v54 = vld [vmem:[#allocation2 + $0xc8] sm:$0x1] }
 0x5f8   : > { %v8345_v35 = vsel %vm10820_vm8, %v8340_v21, %v8344_v3  ;;  %v8707_v26 = vrot.slane %v8552_v54, 5 }
 0x5f9   : > { %v8751_v40 = vpop.permute.xlu1 %8750  ;;  %v8753_v29 = vpop.permute.xlu0 %8752  ;;  %v8364_v25 = vrot.slane %v8363_v28, 4  ;;  %v8373_v37 = vor.u32 %v8372_v5, %v8368_v30 }
 0x5fa   : > { %8829 = vst.msk [vmem:[#allocation3 + $0x44] sm:$0xf] %vm4691_vm10, %v8751_v40  ;;  %8830 = vst.msk [vmem:[#allocation3 + $0x48] sm:$0xf] %vm4691_vm10, %v8753_v29  ;;  %v8349_v40 = vor.u32 %v8348_v4, %v8344_v3  ;;  %v7787_v29 = vld [vmem:[#allocation2 + $0xd0] sm:$0xf] }
 0x5fb   : > { %7354 = vrot.lane.b32.xlu1 %v7291_v14, %s10632_s28  ;;  %7684 = vrot.lane.b32.xlu0 %v7617_v32, %s10633_s29  ;;  %v8376_v14 = vshll.u32 %v7995_v10, 16  ;;  %v8369_v31 = vsel %vm10820_vm8, %v8364_v25, %v8368_v30  ;;  %v8374_v27 = vrot.slane %v8373_v37, 4 }
 0x5fc   : > { %v8350_v53 = vrot.slane %v8349_v40, 4 }
 0x5fd   : > { %v8755_v7 = vpop.permute.xlu1 %8754  ;;  %v6773_v39 = vpop.permute.xlu0 %6772  ;;  %v8378_v6 = vrot.slane %v8376_v14, 5 }
 0x5fe   : > { %8831 = vst.msk [vmem:[#allocation3 + $0x4c] sm:$0xf] %vm4691_vm10, %v8755_v7  ;;  %v8355_v38 = vsel %vm10820_vm8, %v8350_v53, %v8354_v1 }
 0x5ff   : > { %6848 = vst.msk [vmem:[#allocation3 + $0x50] sm:$0xf] %vm2701_vm1, %v6773_v39  ;;  %7686 = vrot.lane.b32.xlu1 %v7620_v2, %s10633_s29  ;;  %7688 = vrot.lane.b32.xlu0 %v7624_v56, %s10633_s29  ;;  %v8550_v2 = vld [vmem:[#allocation2 + $0xc0] sm:$0xe]  ;;  %v8554_v56 = vld [vmem:[#allocation2 + $0xd0] sm:$0xf]  ;;  %v8379_v8 = vsel %vm10820_vm8, %v8374_v27, %v8378_v6 }
 0x600   : > { %v10300_v57 = vrot.slane %v8550_v2, 9  ;;  %v8711_v0 = vrot.slane %v8554_v56, 5  ;;  %vm10000_vm8 = vcmask 97280  }
 0x601   : > { %v6775_v58 = vpop.permute.xlu1 %6774  ;;  %v6777_v16 = vpop.permute.xlu0 %6776  ;;  %v10593_v15 = vld [vmem:[#allocation3 + $0x40] sm:$0xff]  }
 0x602   : > { %6849 = vst.msk [vmem:[#allocation3 + $0x54] sm:$0xf] %vm2701_vm1, %v6775_v58  ;;  %6850 = vst.msk [vmem:[#allocation3 + $0x58] sm:$0xf] %vm2701_vm1, %v6777_v16  ;;  %10505 = vmatprep.mubr.msk.bf16.mxu1 %vm4856_vm13, %v10593_v15  ;;  %v8705_v58 = vsel %vm10827_vm11, %v10300_v57, %v8704_v41  ;;  %v8706_v16 = vrot.slane %v8704_v41, 4  ;;  %v8713_v15 = vrot.slane %v8711_v0, 4 }
 0x603   : > { %7690 = vrot.lane.b32.xlu1 %v7627_v61, %s10633_s29  ;;  %7876 = vrot.lane.b32.xlu0 %v7784_v11, %s10634_s30  ;;  %v8714_v61 = vrot.slane %v8555_v22, 5  ;;  %v8712_v11 = vsel %vm10827_vm11, %v10301_v12, %v8711_v0 }
 0x604   : > { %v8708_v4 = vsel %vm10827_vm11, %v8706_v16, %v8707_v26 }
 0x605   : > { %v6779_v63 = vpop.permute.xlu1 %6778  ;;  %v7333_v55 = vpop.permute.xlu0 %7332  ;;  %v10594_v50 = vld [vmem:[#allocation3 + $0x48] sm:$0xff]  }
 0x606   : > { %6851 = vst.msk [vmem:[#allocation3 + $0x5c] sm:$0xf] %vm2701_vm1, %v6779_v63  ;;  %10506 = vmatmul.mubr.msk.bf16.gmra.mxu1 %vm4856_vm13, %v10594_v50 }
 0x607   : > { %7408 = vst.msk [vmem:[#allocation3 + $0x50] sm:$0xf] %vm3262_vm3, %v7333_v55  ;;  %7878 = vrot.lane.b32.xlu1 %v7785_v44, %s10634_s30  ;;  %7880 = vrot.lane.b32.xlu0 %v7786_v51, %s10634_s30  ;;  %v8715_v51 = vsel %vm10827_vm11, %v8713_v15, %v8714_v61  ;;  %vm10003_vm11 = vcmask 130048  }
 0x609   : > { %v7335_v32 = vpop.permute.xlu1 %7334  ;;  %v7337_v46 = vpop.permute.xlu0 %7336 }
 0x60a   : > { %7409 = vst.msk [vmem:[#allocation3 + $0x54] sm:$0xf] %vm3262_vm3, %v7335_v32  ;;  %7410 = vst.msk [vmem:[#allocation3 + $0x58] sm:$0xf] %vm3262_vm3, %v7337_v46 }
 0x60b   : > { %7882 = vrot.lane.b32.xlu1 %v7787_v29, %s10634_s30  ;;  %8436 = vrot.lane.b32.xlu0 %v8345_v35, %s10635_s8 }
 0x60d   : > { %v7339_v7 = vpop.permute.xlu1 %7338  ;;  %v7669_v39 = vpop.permute.xlu0 %7668 }
 0x60e   : > { %7411 = vst.msk [vmem:[#allocation3 + $0x5c] sm:$0xf] %vm3262_vm3, %v7339_v7 }
 0x60f   : > { %7744 = vst.msk [vmem:[#allocation3 + $0x50] sm:$0xf] %vm3599_vm6, %v7669_v39  ;;  %8438 = vrot.lane.b32.xlu1 %v8355_v38, %s10635_s8  ;;  %8440 = vrot.lane.b32.xlu0 %v8369_v31, %s10635_s8 }
 0x611   : > { %v7671_v42 = vpop.permute.xlu1 %7670  ;;  %v7673_v59 = vpop.permute.xlu0 %7672 }
 0x612   : > { %7745 = vst.msk [vmem:[#allocation3 + $0x54] sm:$0xf] %vm3599_vm6, %v7671_v42  ;;  %7746 = vst.msk [vmem:[#allocation3 + $0x58] sm:$0xf] %vm3599_vm6, %v7673_v59 }
 0x613   : > { %8442 = vrot.lane.b32.xlu1 %v8379_v8, %s10635_s8  ;;  %8772 = vrot.lane.b32.xlu0 %v8705_v58, %s10636_s13 }
 0x615   : > { %v7675_v23 = vpop.permute.xlu1 %7674  ;;  %v7861_v3 = vpop.permute.xlu0 %7860 }
 0x616   : > { %7747 = vst.msk [vmem:[#allocation3 + $0x5c] sm:$0xf] %vm3599_vm6, %v7675_v23 }
 0x617   : > { %7936 = vst.msk [vmem:[#allocation3 + $0x50] sm:$0xf] %vm3793_vm4, %v7861_v3  ;;  %8774 = vrot.lane.b32.xlu1 %v8708_v4, %s10636_s13  ;;  %8776 = vrot.lane.b32.xlu0 %v8712_v11, %s10636_s13 }
 0x619   : > { %v7863_v62 = vpop.permute.xlu1 %7862  ;;  %v7865_v28 = vpop.permute.xlu0 %7864 }
 0x61a   : > { %7937 = vst.msk [vmem:[#allocation3 + $0x54] sm:$0xf] %vm3793_vm4, %v7863_v62  ;;  %7938 = vst.msk [vmem:[#allocation3 + $0x58] sm:$0xf] %vm3793_vm4, %v7865_v28  ;;  %v10491_v3 = vpop.f32.mrf.mxu1 }
 0x61b   : > { %8778 = vrot.lane.b32.xlu1 %v8715_v51, %s10636_s13 }
 0x61c   : > { %v9061_v62 = vpop.f32.mrf.mxu1 }
 0x61d   : > { %v7867_v30 = vpop.permute.xlu1 %7866  ;;  %v8421_v5 = vpop.permute.xlu0 %8420 }
 0x61e   : > { %7939 = vst.msk [vmem:[#allocation3 + $0x5c] sm:$0xf] %vm3793_vm4, %v7867_v30 }
 0x61f   : > { %8496 = vst.msk [vmem:[#allocation3 + $0x50] sm:$0xf] %vm4354_vm9, %v8421_v5  ;;  %v13648_v5 = vpop.f32.mrf.mxu1 }
 0x621   : > { %v8423_v63 = vpop.permute.xlu1 %8422  ;;  %v8425_v55 = vpop.permute.xlu0 %8424 }
 0x622   : > { %8497 = vst.msk [vmem:[#allocation3 + $0x54] sm:$0xf] %vm4354_vm9, %v8423_v63  ;;  %8498 = vst.msk [vmem:[#allocation3 + $0x58] sm:$0xf] %vm4354_vm9, %v8425_v55 }
 0x625   : > { %v8427_v36 = vpop.permute.xlu1 %8426  ;;  %v8757_v50 = vpop.permute.xlu0 %8756 }
 0x626   : > { %8499 = vst.msk [vmem:[#allocation3 + $0x5c] sm:$0xf] %vm4354_vm9, %v8427_v36  ;;  %v13652_v36 = vpop.f32.mrf.mxu1 }
 0x627   : > { %8832 = vst.msk [vmem:[#allocation3 + $0x50] sm:$0xf] %vm4691_vm10, %v8757_v50 }
 0x629   : > { %v8759_v10 = vpop.permute.xlu1 %8758  ;;  %v8761_v44 = vpop.permute.xlu0 %8760 }
 0x62a   : > { %8833 = vst.msk [vmem:[#allocation3 + $0x54] sm:$0xf] %vm4691_vm10, %v8759_v10  ;;  %8834 = vst.msk [vmem:[#allocation3 + $0x58] sm:$0xf] %vm4691_vm10, %v8761_v44 }
 0x62d   : > { %v8763_v21 = vpop.permute.xlu1 %8762  ;;  %v6781_v40 = vpop.permute.xlu0 %6780 }
 0x62e   : > { %8835 = vst.msk [vmem:[#allocation3 + $0x5c] sm:$0xf] %vm4691_vm10, %v8763_v21 }
 0x62f   : > { %6852 = vst.msk [vmem:[#allocation3 + $0x60] sm:$0xf] %vm2701_vm1, %v6781_v40 }
 0x631   : > { %v6783_v29 = vpop.permute.xlu1 %6782  ;;  %v6785_v9 = vpop.permute.xlu0 %6784  ;;  %v10595_v25 = vld [vmem:[#allocation3 + $0x50] sm:$0xff]  }
 0x632   : > { %6853 = vst.msk [vmem:[#allocation3 + $0x64] sm:$0xf] %vm2701_vm1, %v6783_v29  ;;  %6854 = vst.msk [vmem:[#allocation3 + $0x68] sm:$0xf] %vm2701_vm1, %v6785_v9  ;;  %10509 = vmatprep.mubr.msk.bf16.mxu1 %vm4856_vm13, %v10595_v25 }
 0x635   : > { %v6787_v37 = vpop.permute.xlu1 %6786  ;;  %v7341_v14 = vpop.permute.xlu0 %7340  ;;  %v10596_v32 = vld [vmem:[#allocation3 + $0x58] sm:$0xff]  }
 0x636   : > { %6855 = vst.msk [vmem:[#allocation3 + $0x6c] sm:$0xf] %vm2701_vm1, %v6787_v37  ;;  %10510 = vmatmul.mubr.msk.bf16.gmra.mxu1 %vm4856_vm13, %v10596_v32 }
 0x637   : > { %7412 = vst.msk [vmem:[#allocation3 + $0x60] sm:$0xf] %vm3262_vm3, %v7341_v14 }
 0x639   : > { %v7343_v46 = vpop.permute.xlu1 %7342  ;;  %v7345_v35 = vpop.permute.xlu0 %7344 }
 0x63a   : > { %7413 = vst.msk [vmem:[#allocation3 + $0x64] sm:$0xf] %vm3262_vm3, %v7343_v46  ;;  %7414 = vst.msk [vmem:[#allocation3 + $0x68] sm:$0xf] %vm3262_vm3, %v7345_v35 }
 0x63d   : > { %v7347_v53 = vpop.permute.xlu1 %7346  ;;  %v7677_v43 = vpop.permute.xlu0 %7676 }
 0x63e   : > { %7415 = vst.msk [vmem:[#allocation3 + $0x6c] sm:$0xf] %vm3262_vm3, %v7347_v53  ;;  %v13671_v53 = vld [vmem:[%s13961_s5] ss:$0 sm:$0xff] }
 0x63f   : > { %7748 = vst.msk [vmem:[#allocation3 + $0x60] sm:$0xf] %vm3599_vm6, %v7677_v43 }
 0x641   : > { %v7679_v1 = vpop.permute.xlu1 %7678  ;;  %v7681_v31 = vpop.permute.xlu0 %7680 }
 0x642   : > { %7749 = vst.msk [vmem:[#allocation3 + $0x64] sm:$0xf] %vm3599_vm6, %v7679_v1  ;;  %7750 = vst.msk [vmem:[#allocation3 + $0x68] sm:$0xf] %vm3599_vm6, %v7681_v31  ;;  %v10495_v50 = vpop.f32.mrf.mxu1  ;;  %v9195_v31 = vmul.f32 %v13671_v53, %v9061_v62 }
 0x644   : > { %v9077_v21 = vpop.f32.mrf.mxu1 }
 0x645   : > { %v7683_v27 = vpop.permute.xlu1 %7682  ;;  %v7869_v6 = vpop.permute.xlu0 %7868  ;;  %v9199_v43 = vmul.f32 %v13671_v53, %v9077_v21  ;;  %v14037_v21 = vld [vmem:[#allocation15_spill] sm:$0xff] }
 0x646   : > { %7751 = vst.msk [vmem:[#allocation3 + $0x6c] sm:$0xf] %vm3599_vm6, %v7683_v27  ;;  %v13660_v9 = vpop.f32.mrf.mxu1  ;;  %v9201_v27 = vmul.f32 %v10495_v50, %v13671_v53 }
 0x647   : > { %7940 = vst.msk [vmem:[#allocation3 + $0x60] sm:$0xf] %vm3793_vm4, %v7869_v6 }
 0x648   : > { %v13664_v14 = vpop.f32.mrf.mxu1 }
 0x649   : > { %v7871_v7 = vpop.permute.xlu1 %7870  ;;  %v7873_v39 = vpop.permute.xlu0 %7872 }
 0x64a   : > { %7941 = vst.msk [vmem:[#allocation3 + $0x64] sm:$0xf] %vm3793_vm4, %v7871_v7  ;;  %7942 = vst.msk [vmem:[#allocation3 + $0x68] sm:$0xf] %vm3793_vm4, %v7873_v39  ;;  %v13680_v7 = vld [vmem:[%s13962_s6] ss:$0 sm:$0xff]  ;;  %v9197_v39 = vmul.f32 %v10491_v3, %v13671_v53 }
 0x64d   : > { %v7875_v2 = vpop.permute.xlu1 %7874  ;;  %v8429_v56 = vpop.permute.xlu0 %8428 }
 0x64e   : > { %7943 = vst.msk [vmem:[#allocation3 + $0x6c] sm:$0xf] %vm3793_vm4, %v7875_v2  ;;  %v9238_v2 = vadd.f32 %v13680_v7, %v9199_v43 }
 0x64f   : > { %8500 = vst.msk [vmem:[#allocation3 + $0x60] sm:$0xf] %vm4354_vm9, %v8429_v56 }
 0x651   : > { %v8431_v45 = vpop.permute.xlu1 %8430  ;;  %v8433_v38 = vpop.permute.xlu0 %8432 }
 0x652   : > { %8501 = vst.msk [vmem:[#allocation3 + $0x64] sm:$0xf] %vm4354_vm9, %v8431_v45  ;;  %8502 = vst.msk [vmem:[#allocation3 + $0x68] sm:$0xf] %vm4354_vm9, %v8433_v38  ;;  %v9234_v45 = vadd.f32 %v13680_v7, %v9195_v31  ;;  %v9240_v38 = vadd.f32 %v13680_v7, %v9201_v27 }
 0x655   : > { %v8435_v41 = vpop.permute.xlu1 %8434  ;;  %v8765_v8 = vpop.permute.xlu0 %8764 }
 0x656   : > { %8503 = vst.msk [vmem:[#allocation3 + $0x6c] sm:$0xf] %vm4354_vm9, %v8435_v41 }
 0x657   : > { %8836 = vst.msk [vmem:[#allocation3 + $0x60] sm:$0xf] %vm4691_vm10, %v8765_v8 }
 0x659   : > { %v8767_v57 = vpop.permute.xlu1 %8766  ;;  %v8769_v0 = vpop.permute.xlu0 %8768 }
 0x65a   : > { %8837 = vst.msk [vmem:[#allocation3 + $0x64] sm:$0xf] %vm4691_vm10, %v8767_v57  ;;  %8838 = vst.msk [vmem:[#allocation3 + $0x68] sm:$0xf] %vm4691_vm10, %v8769_v0  ;;  %v9236_v57 = vadd.f32 %v13680_v7, %v9197_v39  ;;  %v9270_v0 = vadd.f32 %v9238_v2, %v11002_v13 }
 0x65d   : > { %v8771_v12 = vpop.permute.xlu1 %8770  ;;  %v6789_v42 = vpop.permute.xlu0 %6788 }
 0x65e   : > { %8839 = vst.msk [vmem:[#allocation3 + $0x6c] sm:$0xf] %vm4691_vm10, %v8771_v12 }
 0x65f   : > { %6856 = vst.msk [vmem:[#allocation3 + $0x70] sm:$0xf] %vm2701_vm1, %v6789_v42 }
 0x661   : > { %v6791_v59 = vpop.permute.xlu1 %6790  ;;  %v6793_v54 = vpop.permute.xlu0 %6792  ;;  %v10597_v22 = vld [vmem:[#allocation3 + $0x60] sm:$0xff]  }
 0x662   : > { %6857 = vst.msk [vmem:[#allocation3 + $0x74] sm:$0xf] %vm2701_vm1, %v6791_v59  ;;  %6858 = vst.msk [vmem:[#allocation3 + $0x78] sm:$0xf] %vm2701_vm1, %v6793_v54  ;;  %10513 = vmatprep.mubr.msk.bf16.mxu1 %vm4856_vm13, %v10597_v22  ;;  %v9266_v59 = vadd.f32 %v9234_v45, %v10986_v47  ;;  %v9272_v54 = vadd.f32 %v9240_v38, %v11005_v52 }
 0x665   : > { %v6795_v58 = vpop.permute.xlu1 %6794  ;;  %v7349_v16 = vpop.permute.xlu0 %7348  ;;  %v10598_v26 = vld [vmem:[#allocation3 + $0x68] sm:$0xff]  }
 0x666   : > { %6859 = vst.msk [vmem:[#allocation3 + $0x7c] sm:$0xf] %vm2701_vm1, %v6795_v58  ;;  %10514 = vmatmul.mubr.msk.bf16.gmra.mxu1 %vm4856_vm13, %v10598_v26  ;;  %v9302_v26 = vmax.f32 %v9270_v0, 0.0  ;;  %v14039_v0 = vld [vmem:[#allocation5_spill] sm:$0xff]  ;;  %vm10020_vm1 = vcmask 326656  }
 0x667   : > { %7416 = vst.msk [vmem:[#allocation3 + $0x70] sm:$0xf] %vm3262_vm3, %v7349_v16  ;;  %v9268_v16 = vadd.f32 %v9236_v57, %v10989_v48  ;;  %v14036_v48 = vld [vmem:[#allocation16_spill] sm:$0xff]  ;;  %v9200_v57 = vmul.f32 %v13671_v53, %v13664_v14 }
 0x669   : > { %v7351_v15 = vpop.permute.xlu1 %7350  ;;  %v7353_v61 = vpop.permute.xlu0 %7352 }
 0x66a   : > { %7417 = vst.msk [vmem:[#allocation3 + $0x74] sm:$0xf] %vm3262_vm3, %v7351_v15  ;;  %7418 = vst.msk [vmem:[#allocation3 + $0x78] sm:$0xf] %vm3262_vm3, %v7353_v61  ;;  %v10499_v35 = vpop.f32.mrf.mxu1 }
 0x66b   : > { %v9205_v8 = vmul.f32 %v10499_v35, %v13671_v53 }
 0x66c   : > { %v9093_v6 = vpop.f32.mrf.mxu1 }
 0x66d   : > { %v7355_v11 = vpop.permute.xlu1 %7354  ;;  %v7685_v23 = vpop.permute.xlu0 %7684  ;;  %v9203_v12 = vmul.f32 %v13671_v53, %v9093_v6  ;;  %v9244_v58 = vadd.f32 %v13680_v7, %v9205_v8 }
 0x66e   : > { %7419 = vst.msk [vmem:[#allocation3 + $0x7c] sm:$0xf] %vm3262_vm3, %v7355_v11  ;;  %v10500_v41 = vpop.f32.mrf.mxu1  ;;  %v9298_v11 = vmax.f32 %v9266_v59, 0.0  ;;  %vm10023_vm3 = vcmask 359424  }
 0x66f   : > { %7752 = vst.msk [vmem:[#allocation3 + $0x70] sm:$0xf] %vm3599_vm6, %v7685_v23  ;;  %v9242_v61 = vadd.f32 %v13680_v7, %v9203_v12  ;;  %v9304_v23 = vmax.f32 %v9272_v54, 0.0  ;;  %v9276_v47 = vadd.f32 %v9244_v58, %v11011_v18  ;;  %v9206_v14 = vmul.f32 %v10500_v41, %v13671_v53 }
 0x670   : > { %v9096_v22 = vpop.f32.mrf.mxu1  ;;  %v9330_v62 = vcombine.low %v9298_v11, %v9302_v26  ;;  %v9331_v38 = vcombine.high %v9298_v11, %v9302_v26  ;;  %v9202_v26 = vmul.f32 %v13660_v9, %v13671_v53 }
 0x671   : > { %v7687_v4 = vpop.permute.xlu1 %7686  ;;  %v7689_v51 = vpop.permute.xlu0 %7688 }
 0x672   : > { %7753 = vst.msk [vmem:[#allocation3 + $0x74] sm:$0xf] %vm3599_vm6, %v7687_v4  ;;  %7754 = vst.msk [vmem:[#allocation3 + $0x78] sm:$0xf] %vm3599_vm6, %v7689_v51  ;;  %v9300_v51 = vmax.f32 %v9268_v16, 0.0  ;;  %v9196_v16 = vmul.f32 %v13671_v53, %v13652_v36 }
 0x674   : > { %v9346_v50 = vcombine.low %v9300_v51, %v9304_v23 }
 0x675   : > { %v7691_v28 = vpop.permute.xlu1 %7690  ;;  %v7877_v30 = vpop.permute.xlu0 %7876 }
 0x676   : > { %7755 = vst.msk [vmem:[#allocation3 + $0x7c] sm:$0xf] %vm3599_vm6, %v7691_v28  ;;  %v14035_v28 = vld [vmem:[#allocation14_spill] sm:$0xff]  ;;  %vm10026_vm6 = vcmask 392192  }
 0x677   : > { %7944 = vst.msk [vmem:[#allocation3 + $0x70] sm:$0xf] %vm3793_vm4, %v7877_v30  ;;  %v9274_v30 = vadd.f32 %v9242_v61, %v14035_v28  ;;  %v9245_v28 = vadd.f32 %v13680_v7, %v9206_v14 }
 0x679   : > { %v7879_v63 = vpop.permute.xlu1 %7878  ;;  %v7881_v55 = vpop.permute.xlu0 %7880 }
 0x67a   : > { %7945 = vst.msk [vmem:[#allocation3 + $0x74] sm:$0xf] %vm3793_vm4, %v7879_v63  ;;  %7946 = vst.msk [vmem:[#allocation3 + $0x78] sm:$0xf] %vm3793_vm4, %v7881_v55 }
 0x67d   : > { %v7883_v10 = vpop.permute.xlu1 %7882  ;;  %v8437_v44 = vpop.permute.xlu0 %8436 }
 0x67e   : > { %7947 = vst.msk [vmem:[#allocation3 + $0x7c] sm:$0xf] %vm3793_vm4, %v7883_v10  ;;  %v9308_v10 = vmax.f32 %v9276_v47, 0.0  ;;  %vm10032_vm4 = vcmask 457728  }
 0x67f   : > { %8504 = vst.msk [vmem:[#allocation3 + $0x70] sm:$0xf] %vm4354_vm9, %v8437_v44 }
 0x681   : > { %v8439_v40 = vpop.permute.xlu1 %8438  ;;  %v8441_v29 = vpop.permute.xlu0 %8440 }
 0x682   : > { %8505 = vst.msk [vmem:[#allocation3 + $0x74] sm:$0xf] %vm4354_vm9, %v8439_v40  ;;  %8506 = vst.msk [vmem:[#allocation3 + $0x78] sm:$0xf] %vm4354_vm9, %v8441_v29  ;;  %v14038_v29 = vld [vmem:[#allocation4_spill] sm:$0xff] }
 0x683   : > { %v9354_v35 = vrot.slane %v9346_v50, %v14038_v29  ;;  %v9345_v36 = vrot.slane %v9331_v38, %v14038_v29 }
 0x685   : > { %v8443_v25 = vpop.permute.xlu1 %8442  ;;  %v8773_v37 = vpop.permute.xlu0 %8772 }
 0x686   : > { %8507 = vst.msk [vmem:[#allocation3 + $0x7c] sm:$0xf] %vm4354_vm9, %v8443_v25  ;;  %v9338_v25 = vrot.slane %v9330_v62, %v14038_v29  ;;  %v9241_v62 = vadd.f32 %v13680_v7, %v9202_v26  ;;  %vm10035_vm9 = vcmask 490496  }
 0x687   : > { %8840 = vst.msk [vmem:[#allocation3 + $0x70] sm:$0xf] %vm4691_vm10, %v8773_v37  ;;  %v9306_v37 = vmax.f32 %v9274_v30, 0.0 }
 0x688   : > { %v9395_v8 = vcombine.high %v9338_v25, %v9354_v35 }
 0x689   : > { %v8775_v32 = vpop.permute.xlu1 %8774  ;;  %v8777_v46 = vpop.permute.xlu0 %8776 }
 0x68a   : > { %8841 = vst.msk [vmem:[#allocation3 + $0x74] sm:$0xf] %vm4691_vm10, %v8775_v32  ;;  %8842 = vst.msk [vmem:[#allocation3 + $0x78] sm:$0xf] %vm4691_vm10, %v8777_v46  ;;  %v9409_v9 = vrot.slane %v9395_v8, %v14039_v0 }
 0x68d   : > { %v8779_v1 = vpop.permute.xlu1 %8778 }
 0x68e   : > { %8843 = vst.msk [vmem:[#allocation3 + $0x7c] sm:$0xf] %vm4691_vm10, %v8779_v1  ;;  %v9394_v1 = vcombine.low %v9338_v25, %v9354_v35  ;;  %v9273_v25 = vadd.f32 %v9241_v62, %v11296_v19  ;;  %vm10038_vm10 = vcmask 523264  }
 0x690   : > { %v13713_v12 = vrot.slane %v9394_v1, %v14039_v0  ;;  %v9305_v1 = vmax.f32 %v9273_v25, 0.0 }
 0x691   : > { %v10599_v56 = vld [vmem:[#allocation3 + $0x70] sm:$0xff]  }
 0x692   : > { %10517 = vmatprep.mubr.msk.bf16.mxu1 %vm4856_vm13, %v10599_v56 }
 0x695   : > { %v10600_v42 = vld [vmem:[#allocation3 + $0x78] sm:$0xff]  }
 0x696   : > { %10518 = vmatmul.mubr.msk.bf16.gmra.mxu1 %vm4856_vm13, %v10600_v42  ;;  %v10503_v15 = vpop.f32.mrf.mxu1  ;;  %v9204_v42 = vmul.f32 %v13671_v53, %v9096_v22 }
 0x697   : > { %v9209_v13 = vmul.f32 %v10503_v15, %v13671_v53  ;;  %v9347_v15 = vcombine.high %v9300_v51, %v9304_v23  ;;  %v9239_v23 = vadd.f32 %v13680_v7, %v9200_v57  ;;  %v9235_v51 = vadd.f32 %v13680_v7, %v9196_v16 }
 0x698   : > { %v9109_v3 = vpop.f32.mrf.mxu1  ;;  %v9243_v41 = vadd.f32 %v13680_v7, %v9204_v42 }
 0x699   : > { %v9248_v52 = vadd.f32 %v13680_v7, %v9209_v13  ;;  %v9207_v4 = vmul.f32 %v13671_v53, %v9109_v3  ;;  %v9198_v3 = vmul.f32 %v13648_v5, %v13671_v53  ;;  %v9361_v5 = vrot.slane %v9347_v15, %v14038_v29 }
 0x69a   : > { %v10504_v18 = vpop.f32.mrf.mxu1 }
 0x69b   : > { %v9280_v63 = vadd.f32 %v9248_v52, %v14036_v48  ;;  %v9246_v55 = vadd.f32 %v13680_v7, %v9207_v4  ;;  %v9210_v54 = vmul.f32 %v10504_v18, %v13671_v53  ;;  %v9410_v50 = vcombine.low %v9345_v36, %v9361_v5 }
 0x69c   : > { %v9112_v31 = vpop.f32.mrf.mxu1  ;;  %v9277_v18 = vadd.f32 %v9245_v28, %v11304_v24 }
 0x69d   : > { %v9312_v44 = vmax.f32 %v9280_v63, 0.0  ;;  %v9278_v40 = vadd.f32 %v9246_v55, %v14037_v21  ;;  %v9208_v45 = vmul.f32 %v13671_v53, %v9112_v31  ;;  %v9249_v52 = vadd.f32 %v13680_v7, %v9210_v54 }
 0x69e   : > { %v9237_v55 = vadd.f32 %v13680_v7, %v9198_v3 }
 0x69f   : > { %v9378_v32 = vcombine.low %v9308_v10, %v9312_v44  ;;  %v9310_v46 = vmax.f32 %v9278_v40, 0.0  ;;  %v9379_v59 = vcombine.high %v9308_v10, %v9312_v44  ;;  %v9247_v13 = vadd.f32 %v13680_v7, %v9208_v45 }
 0x6a0   : > { %v9271_v10 = vadd.f32 %v9239_v23, %v11292_v34  ;;  %v9275_v44 = vadd.f32 %v9243_v41, %v11300_v49  ;;  %v9281_v21 = vadd.f32 %v9249_v52, %v11318_v20  ;;  %v9267_v40 = vadd.f32 %v9235_v51, %v11277_v33 }
 0x6a1   : > { %v9362_v43 = vcombine.low %v9306_v37, %v9310_v46  ;;  %v9386_v27 = vrot.slane %v9378_v32, %v14038_v29  ;;  %v9363_v39 = vcombine.high %v9306_v37, %v9310_v46  ;;  %v9393_v47 = vrot.slane %v9379_v59, %v14038_v29 }
 0x6a2   : > { %v9279_v48 = vadd.f32 %v9247_v13, %v11314_v17  ;;  %v9269_v46 = vadd.f32 %v9237_v55, %v11281_v60  ;;  %v9303_v35 = vmax.f32 %v9271_v10, 0.0  ;;  %v9307_v34 = vmax.f32 %v9275_v44, 0.0 }
 0x6a3   : > { %v9370_v6 = vrot.slane %v9362_v43, %v14038_v29  ;;  %v9377_v61 = vrot.slane %v9363_v39, %v14038_v29  ;;  %v9313_v43 = vmax.f32 %v9281_v21, 0.0  ;;  %v9418_v49 = vrot.slane %v9410_v50, %v14039_v0 }
 0x6a4   : > { %v9311_v37 = vmax.f32 %v9279_v48, 0.0  ;;  %v9299_v20 = vmax.f32 %v9267_v40, 0.0  ;;  %v9309_v33 = vmax.f32 %v9277_v18, 0.0  ;;  %v9301_v24 = vmax.f32 %v9269_v46, 0.0 }
 0x6a5   : > { %v9426_v2 = vcombine.low %v9370_v6, %v9386_v27  ;;  %v9427_v56 = vcombine.high %v9370_v6, %v9386_v27  ;;  %v9442_v30 = vcombine.low %v9377_v61, %v9393_v47  ;;  %v9443_v31 = vcombine.high %v9377_v61, %v9393_v47 }
 0x6a6   : > { %v9634_v19 = vcombine.low %v9307_v34, %v9311_v37  ;;  %v9411_v6 = vcombine.high %v9345_v36, %v9361_v5  ;;  %v9602_v39 = vcombine.low %v9299_v20, %v9303_v35  ;;  %v9618_v60 = vcombine.low %v9301_v24, %v9305_v1 }
 0x6a7   : > { %v13718_v58 = vrot.slane %v9426_v2, %v14039_v0  ;;  %v9441_v11 = vrot.slane %v9427_v56, %v14039_v0  ;;  %v9450_v32 = vrot.slane %v9442_v30, %v14039_v0  ;;  %v9650_v2 = vcombine.low %v9309_v33, %v9313_v43 }
 0x6a8   : > { %v9642_v56 = vrot.slane %v9634_v19, %v14038_v29  ;;  %v9457_v38 = vrot.slane %v9443_v31, %v14039_v0  ;;  %v9610_v8 = vrot.slane %v9602_v39, %v14038_v29  ;;  %v9425_v42 = vrot.slane %v9411_v6, %v14039_v0 }
 0x6a9   : > { %v9459_v22 = vcombine.high %v13713_v12, %v13718_v58  ;;  %v9458_v4 = vcombine.low %v13713_v12, %v13718_v58  ;;  %v9460_v63 = vcombine.low %v9409_v9, %v9441_v11  ;;  %v9461_v17 = vcombine.high %v9409_v9, %v9441_v11 }
 0x6aa   : > { %v9462_v27 = vcombine.low %v9418_v49, %v9450_v32  ;;  %v9463_v45 = vcombine.high %v9418_v49, %v9450_v32  ;;  %v9658_v57 = vrot.slane %v9650_v2, %v14038_v29  ;;  %v9626_v59 = vrot.slane %v9618_v60, %v14038_v29 }
 0x6ab   : > { %9876 = vrot.lane.b32.xlu0 %v9459_v22, %s10627_s22  ;;  %v9464_v16 = vcombine.low %v9425_v42, %v9457_v38  ;;  %v9465_v26 = vcombine.high %v9425_v42, %v9457_v38  ;;  %v9635_v13 = vcombine.high %v9307_v34, %v9311_v37  ;;  %v9603_v3 = vcombine.high %v9299_v20, %v9303_v35 }
 0x6ac   : > { %v9698_v54 = vcombine.low %v9642_v56, %v9658_v57  ;;  %v9666_v15 = vcombine.low %v9610_v8, %v9626_v59  ;;  %v9699_v22 = vcombine.high %v9642_v56, %v9658_v57  ;;  %v9667_v36 = vcombine.high %v9610_v8, %v9626_v59 }
 0x6ad   : > { %v9651_v23 = vcombine.high %v9309_v33, %v9313_v43  ;;  %v9619_v9 = vcombine.high %v9301_v24, %v9305_v1  ;;  %v9649_v41 = vrot.slane %v9635_v13, %v14038_v29  ;;  %v9617_v51 = vrot.slane %v9603_v3, %v14038_v29 }
 0x6ae   : > { %v9706_v14 = vrot.slane %v9698_v54, %v14039_v0  ;;  %v9674_v61 = vrot.slane %v9666_v15, %v14039_v0  ;;  %v9713_v52 = vrot.slane %v9699_v22, %v14039_v0  ;;  %v9681_v62 = vrot.slane %v9667_v36, %v14039_v0 }
 0x6af   : > { %9884 = vrot.lane.b32.xlu0 %v9460_v63, %s10628_s23  ;;  %v9665_v5 = vrot.slane %v9651_v23, %v14038_v29  ;;  %v9633_v28 = vrot.slane %v9619_v9, %v14038_v29 }
 0x6b0   : > { %v9730_v11 = vcombine.low %v9674_v61, %v9706_v14  ;;  %v9731_v47 = vcombine.high %v9674_v61, %v9706_v14  ;;  %v9732_v48 = vcombine.low %v9681_v62, %v9713_v52  ;;  %v9733_v55 = vcombine.high %v9681_v62, %v9713_v52 }
 0x6b1   : > { %v9714_v30 = vcombine.low %v9649_v41, %v9665_v5  ;;  %v9682_v63 = vcombine.low %v9617_v51, %v9633_v28  ;;  %v9715_v44 = vcombine.high %v9649_v41, %v9665_v5  ;;  %v9683_v40 = vcombine.high %v9617_v51, %v9633_v28  ;;  %v14040_v51 = vld [vmem:[#allocation8_spill] sm:$0xff] }
 0x6b3   : > { %9892 = vrot.lane.b32.xlu0 %v9461_v17, %s10631_s27  ;;  %v9722_v50 = vrot.slane %v9714_v30, %v14039_v0  ;;  %v9690_v10 = vrot.slane %v9682_v63, %v14039_v0  ;;  %v9729_v18 = vrot.slane %v9715_v44, %v14039_v0  ;;  %v9697_v37 = vrot.slane %v9683_v40, %v14039_v0  ;;  %v14041_v63 = vld [vmem:[#allocation6_spill] sm:$0xff] }
 0x6b5   : > { %v9734_v21 = vcombine.low %v9690_v10, %v9722_v50  ;;  %v9735_v25 = vcombine.high %v9690_v10, %v9722_v50  ;;  %v9736_v17 = vcombine.low %v9697_v37, %v9729_v18  ;;  %v9737_v32 = vcombine.high %v9697_v37, %v9729_v18  ;;  %v14042_v50 = vld [vmem:[#allocation9_spill] sm:$0xff]  ;;  %v14043_v18 = vld [vmem:[#allocation7_spill] sm:$0xff] }
 0x6b7   : > { %9900 = vrot.lane.b32.xlu0 %v9462_v27, %s10632_s28 }
 0x6bb   : > { %9908 = vrot.lane.b32.xlu0 %v9463_v45, %s10633_s29 }
 0x6bf   : > { %9916 = vrot.lane.b32.xlu0 %v9464_v16, %s10634_s30 }
 0x6c3   : > { %9924 = vrot.lane.b32.xlu0 %v9465_v26, %s10635_s8 }
 0x6c6   : > { %v10507_v49 = vpop.f32.mrf.mxu1 }
 0x6c7   : > { %9932 = vrot.lane.b32.xlu0 %v9730_v11, %s10636_s13  ;;  %v9213_v58 = vmul.f32 %v10507_v49, %v13671_v53 }
 0x6c8   : > { %v9125_v1 = vpop.f32.mrf.mxu1 }
 0x6c9   : > { %v9211_v15 = vmul.f32 %v13671_v53, %v9125_v1  ;;  %v9252_v52 = vadd.f32 %v13680_v7, %v9213_v58 }
 0x6ca   : > { %v13788_v31 = vpop.f32.mrf.mxu1 }
 0x6cb   : > { %9940 = vrot.lane.b32.xlu0 %v9731_v47, %s10637_s9  ;;  %v9250_v3 = vadd.f32 %v13680_v7, %v9211_v15  ;;  %v9284_v37 = vadd.f32 %v9252_v52, %v14043_v18 }
 0x6cc   : > { %v13790_v27 = vpop.f32.mrf.mxu1 }
 0x6cf   : > { %9948 = vrot.lane.b32.xlu0 %v9732_v48, %s10638_s10 }
 0x6d3   : > { %9956 = vrot.lane.b32.xlu0 %v9733_v55, %s10639_s11  ;;  %v9282_v55 = vadd.f32 %v9250_v3, %v14041_v63 }
 0x6d7   : > { %9964 = vrot.lane.b32.xlu0 %v9734_v21, %s10640_s12 }
 0x6db   : > { %9972 = vrot.lane.b32.xlu0 %v9735_v25, %s10641_s14 }
 0x6df   : > { %9980 = vrot.lane.b32.xlu0 %v9736_v17, %s10642_s15 }
 0x6e3   : > { %9988 = vrot.lane.b32.xlu0 %v9737_v32, %s10643_s16 }
 0x6f6   : > { %v10511_v24 = vpop.f32.mrf.mxu1 }
 0x6f7   : > { %v9217_v26 = vmul.f32 %v10511_v24, %v13671_v53 }
 0x6f8   : > { %v9141_v39 = vpop.f32.mrf.mxu1 }
 0x6f9   : > { %v9215_v42 = vmul.f32 %v13671_v53, %v9141_v39  ;;  %v9256_v36 = vadd.f32 %v13680_v7, %v9217_v26  ;;  %v14047_v26 = vld [vmem:[#allocation12_spill] sm:$0xff] }
 0x6fa   : > { %v13792_v60 = vpop.f32.mrf.mxu1 }
 0x6fb   : > { %v9288_v10 = vadd.f32 %v9256_v36, %v14042_v50 }
 0x6fc   : > { %v13794_v45 = vpop.f32.mrf.mxu1 }
 0x6fd   : > { %v9320_v1 = vmax.f32 %v9288_v10, 0.0 }
 0x71d   : > { %v9877_v46 = vpop.permute.xlu0 %9876 }
 0x71e   : > { %v9995_v57 = vsel %vm9994_vm2, %v9458_v4, %v9877_v46  ;;  %v9254_v4 = vadd.f32 %v13680_v7, %v9215_v42 }
 0x720   : > { %v9286_v5 = vadd.f32 %v9254_v4, %v14040_v51 }
 0x721   : > { %v9885_v35 = vpop.permute.xlu0 %9884 }
 0x722   : > { %v9998_v59 = vsel %vm9997_vm5, %v9995_v57, %v9885_v35  ;;  %v9318_v17 = vmax.f32 %v9286_v5, 0.0  ;;  %v14046_v57 = vld [vmem:[#allocation13_spill] sm:$0xff] }
 0x725   : > { %v9893_v34 = vpop.permute.xlu0 %9892 }
 0x726   : > { %v10515_v8 = vpop.f32.mrf.mxu1  ;;  %v10001_v16 = vsel %vm10000_vm8, %v9998_v59, %v9893_v34 }
 0x727   : > { %v9221_v41 = vmul.f32 %v10515_v8, %v13671_v53 }
 0x728   : > { %v9157_v14 = vpop.f32.mrf.mxu1 }
 0x729   : > { %v9901_v43 = vpop.permute.xlu0 %9900  ;;  %v9219_v30 = vmul.f32 %v13671_v53, %v9157_v14  ;;  %v9260_v40 = vadd.f32 %v13680_v7, %v9221_v41 }
 0x72a   : > { %v10004_v61 = vsel %vm10003_vm11, %v10001_v16, %v9901_v43  ;;  %v13813_v23 = vpop.f32.mrf.mxu1 }
 0x72b   : > { %v9258_v34 = vadd.f32 %v13680_v7, %v9219_v30  ;;  %v9216_v30 = vmul.f32 %v13671_v53, %v13794_v45  ;;  %v9222_v45 = vmul.f32 %v13813_v23, %v13671_v53 }
 0x72c   : > { %v9160_v44 = vpop.f32.mrf.mxu1 }
 0x72d   : > { %v9909_v20 = vpop.permute.xlu0 %9908  ;;  %v9220_v63 = vmul.f32 %v13671_v53, %v9160_v44 }
 0x72e   : > { %v10007_v12 = vsel %vm10006_vm12, %v10004_v61, %v9909_v20  ;;  %v9314_v20 = vmax.f32 %v9282_v55, 0.0 }
 0x72f   : > { %v9259_v23 = vadd.f32 %v13680_v7, %v9220_v63 }
 0x731   : > { %v9917_v33 = vpop.permute.xlu0 %9916 }
 0x732   : > { %v10010_v13 = vsel %vm10009_vm14, %v10007_v12, %v9917_v33 }
 0x735   : > { %v9925_v19 = vpop.permute.xlu0 %9924 }
 0x736   : > { %v10013_v11 = vsel %vm10012_vm15, %v10010_v13, %v9925_v19  ;;  %v14044_v19 = vld [vmem:[#allocation11_spill] sm:$0xff] }
 0x737   : > { %v9292_v24 = vadd.f32 %v9260_v40, %v14044_v19 }
 0x739   : > { %v9933_v6 = vpop.permute.xlu0 %9932  ;;  %v9324_v16 = vmax.f32 %v9292_v24, 0.0 }
 0x73a   : > { %v10016_v9 = vsel %vm10015_vm0, %v10013_v11, %v9933_v6 }
 0x73d   : > { %v9941_v2 = vpop.permute.xlu0 %9940 }
 0x73e   : > { %v10018_v47 = vsel %vm4856_vm13, %v10016_v9, %v9941_v2  ;;  %v9316_v2 = vmax.f32 %v9284_v37, 0.0 }
 0x740   : > { %v9483_v40 = vcombine.high %v9316_v2, %v9320_v1 }
 0x741   : > { %v9949_v56 = vpop.permute.xlu0 %9948 }
 0x742   : > { %v10021_v62 = vsel %vm10020_vm1, %v10018_v47, %v9949_v56  ;;  %v9466_v56 = vcombine.low %v9314_v20, %v9318_v17 }
 0x744   : > { %v9474_v61 = vrot.slane %v9466_v56, %v14038_v29 }
 0x745   : > { %v9957_v38 = vpop.permute.xlu0 %9956 }
 0x746   : > { %v10024_v48 = vsel %vm10023_vm3, %v10021_v62, %v9957_v38  ;;  %v14045_v38 = vld [vmem:[#allocation10_spill] sm:$0xff]  ;;  %v9467_v62 = vcombine.high %v9314_v20, %v9318_v17  ;;  %v9261_v20 = vadd.f32 %v13680_v7, %v9222_v45 }
 0x747   : > { %v9290_v8 = vadd.f32 %v9258_v34, %v14045_v38  ;;  %v14050_v38 = vld [vmem:[#allocation21_spill] sm:$0xff] }
 0x749   : > { %v9965_v54 = vpop.permute.xlu0 %9964  ;;  %v9322_v58 = vmax.f32 %v9290_v8, 0.0  ;;  %v9291_v8 = vadd.f32 %v9259_v23, %v14050_v38 }
 0x74a   : > { %v10027_v21 = vsel %vm10026_vm6, %v10024_v48, %v9965_v54  ;;  %v9482_v54 = vcombine.low %v9316_v2, %v9320_v1  ;;  %v14049_v2 = vld [vmem:[#allocation19_spill] sm:$0xff] }
 0x74d   : > { %v9973_v22 = vpop.permute.xlu0 %9972 }
 0x74e   : > { %v10030_v25 = vsel %vm10029_vm7, %v10027_v21, %v9973_v22  ;;  %v9490_v22 = vrot.slane %v9482_v54, %v14038_v29  ;;  %v9212_v21 = vmul.f32 %v13671_v53, %v13790_v27  ;;  %v9481_v27 = vrot.slane %v9467_v62, %v14038_v29 }
 0x750   : > { %v9530_v3 = vcombine.low %v9474_v61, %v9490_v22 }
 0x751   : > { %v9981_v28 = vpop.permute.xlu0 %9980 }
 0x752   : > { %v10033_v32 = vsel %vm10032_vm4, %v10030_v25, %v9981_v28  ;;  %v9531_v28 = vcombine.high %v9474_v61, %v9490_v22  ;;  %v13857_v48 = vrot.slane %v9530_v3, %v14039_v0  ;;  %v9218_v25 = vmul.f32 %v13792_v60, %v13671_v53 }
 0x753   : > { %v9323_v22 = vmax.f32 %v9291_v8, 0.0 }
 0x754   : > { %v9545_v60 = vrot.slane %v9531_v28, %v14039_v0 }
 0x755   : > { %v9989_v46 = vpop.permute.xlu0 %9988 }
 0x756   : > { %v10519_v35 = vpop.f32.mrf.mxu1  ;;  %v10036_v43 = vsel %vm10035_vm9, %v10033_v32, %v9989_v46  ;;  %v9214_v32 = vmul.f32 %v13788_v31, %v13671_v53  ;;  %v9255_v46 = vadd.f32 %v13680_v7, %v9216_v30  ;;  %v9257_v31 = vadd.f32 %v13680_v7, %v9218_v25 }
 0x757   : > { %v9225_v49 = vmul.f32 %v10519_v35, %v13671_v53  ;;  %10039 = vst.msk [vmem:[%s13833_s19] sm:$0xff] %vm10038_vm10, %v10036_v43 }
 0x758   : > { %v9173_v33 = vpop.f32.mrf.mxu1  ;;  %v9287_v56 = vadd.f32 %v9255_v46, %v14049_v2 }
 0x759   : > { %v9264_v6 = vadd.f32 %v13680_v7, %v9225_v49  ;;  %v9223_v39 = vmul.f32 %v13671_v53, %v9173_v33  ;;  %v9251_v49 = vadd.f32 %v13680_v7, %v9212_v21  ;;  %v14048_v33 = vld [vmem:[#allocation23_spill] sm:$0xff] }
 0x75a   : > { %v10520_v12 = vpop.f32.mrf.mxu1 }
 0x75b   : > { %v9296_v42 = vadd.f32 %v9264_v6, %v14046_v57  ;;  %v9262_v59 = vadd.f32 %v13680_v7, %v9223_v39  ;;  %v9226_v50 = vmul.f32 %v10520_v12, %v13671_v53  ;;  %v9253_v6 = vadd.f32 %v13680_v7, %v9214_v32  ;;  %v14051_v57 = vld [vmem:[#allocation24_spill] sm:$0xff] }
 0x75c   : > { %v9176_v36 = vpop.f32.mrf.mxu1 }
 0x75d   : > { %v9328_v15 = vmax.f32 %v9296_v42, 0.0  ;;  %v9294_v14 = vadd.f32 %v9262_v59, %v14047_v26  ;;  %v9224_v5 = vmul.f32 %v13671_v53, %v9176_v36  ;;  %v9265_v34 = vadd.f32 %v13680_v7, %v9226_v50  ;;  %v14052_v59 = vld [vmem:[#allocation17_spill] sm:$0xff]  ;;  %v14054_v26 = vld [vmem:[#allocation22_spill] sm:$0xff] }
 0x75e   : > { %v9497_v53 = vrot.slane %v9483_v40, %v14038_v29  ;;  %v9283_v54 = vadd.f32 %v9251_v49, %v14052_v59 }
 0x75f   : > { %v9514_v4 = vcombine.low %v9324_v16, %v9328_v15  ;;  %v9326_v13 = vmax.f32 %v9294_v14, 0.0  ;;  %v9515_v55 = vcombine.high %v9324_v16, %v9328_v15  ;;  %v9263_v44 = vadd.f32 %v13680_v7, %v9224_v5  ;;  %v14053_v16 = vld [vmem:[#allocation20_spill] sm:$0xff]  ;;  %v14055_v7 = vld [vmem:[#allocation18_spill] sm:$0xff] }
 0x760   : > { %v9546_v39 = vcombine.low %v9481_v27, %v9497_v53  ;;  %v9297_v42 = vadd.f32 %v9265_v34, %v14051_v57  ;;  %v9289_v15 = vadd.f32 %v9257_v31, %v14053_v16  ;;  %v9293_v14 = vadd.f32 %v9261_v20, %v14054_v26 }
 0x761   : > { %v9498_v11 = vcombine.low %v9322_v58, %v9326_v13  ;;  %v9522_v9 = vrot.slane %v9514_v4, %v14038_v29  ;;  %v9499_v47 = vcombine.high %v9322_v58, %v9326_v13  ;;  %v9529_v35 = vrot.slane %v9515_v55, %v14038_v29 }
 0x762   : > { %v9295_v19 = vadd.f32 %v9263_v44, %v14048_v33  ;;  %v9285_v4 = vadd.f32 %v9253_v6, %v14055_v7  ;;  %v9319_v13 = vmax.f32 %v9287_v56, 0.0  ;;  %v9554_v3 = vrot.slane %v9546_v39, %v14039_v0 }
 0x763   : > { %v9506_v41 = vrot.slane %v9498_v11, %v14038_v29  ;;  %v9513_v18 = vrot.slane %v9499_v47, %v14038_v29  ;;  %v9329_v11 = vmax.f32 %v9297_v42, 0.0  ;;  %v9315_v36 = vmax.f32 %v9283_v54, 0.0 }
 0x764   : > { %v9327_v61 = vmax.f32 %v9295_v19, 0.0  ;;  %v9317_v5 = vmax.f32 %v9285_v4, 0.0  ;;  %v9547_v62 = vcombine.high %v9481_v27, %v9497_v53 }
 0x765   : > { %v9562_v52 = vcombine.low %v9506_v41, %v9522_v9  ;;  %v9563_v51 = vcombine.high %v9506_v41, %v9522_v9  ;;  %v9578_v1 = vcombine.low %v9513_v18, %v9529_v35  ;;  %v9321_v9 = vmax.f32 %v9289_v15, 0.0 }
 0x766   : > { %v9325_v41 = vmax.f32 %v9293_v14, 0.0  ;;  %v9579_v47 = vcombine.high %v9513_v18, %v9529_v35  ;;  %v9738_v28 = vcombine.low %v9315_v36, %v9319_v13  ;;  %v9561_v45 = vrot.slane %v9547_v62, %v14039_v0 }
 0x767   : > { %v13862_v10 = vrot.slane %v9562_v52, %v14039_v0  ;;  %v9577_v17 = vrot.slane %v9563_v51, %v14039_v0  ;;  %v9586_v58 = vrot.slane %v9578_v1, %v14039_v0  ;;  %v9770_v52 = vcombine.low %v9323_v22, %v9327_v61 }
 0x768   : > { %v9786_v30 = vcombine.low %v9325_v41, %v9329_v11  ;;  %v9754_v63 = vcombine.low %v9317_v5, %v9321_v9  ;;  %v9593_v21 = vrot.slane %v9579_v47, %v14039_v0  ;;  %v9746_v40 = vrot.slane %v9738_v28, %v14038_v29 }
 0x769   : > { %v9595_v37 = vcombine.high %v13857_v48, %v13862_v10  ;;  %v9594_v43 = vcombine.low %v13857_v48, %v13862_v10  ;;  %v9596_v24 = vcombine.low %v9545_v60, %v9577_v17  ;;  %v9597_v12 = vcombine.high %v9545_v60, %v9577_v17 }
 0x76a   : > { %v9598_v51 = vcombine.low %v9554_v3, %v9586_v58  ;;  %v9778_v55 = vrot.slane %v9770_v52, %v14038_v29  ;;  %v9599_v50 = vcombine.high %v9554_v3, %v9586_v58  ;;  %v9794_v25 = vrot.slane %v9786_v30, %v14038_v29 }
 0x76b   : > { %9878 = vrot.lane.b32.xlu1 %v9595_v37, %s10627_s22  ;;  %v9762_v18 = vrot.slane %v9754_v63, %v14038_v29  ;;  %v9600_v37 = vcombine.low %v9561_v45, %v9593_v21  ;;  %v9601_v32 = vcombine.high %v9561_v45, %v9593_v21  ;;  %v9771_v60 = vcombine.high %v9323_v22, %v9327_v61 }
 0x76c   : > { %v9834_v44 = vcombine.low %v9778_v55, %v9794_v25  ;;  %v9835_v23 = vcombine.high %v9778_v55, %v9794_v25  ;;  %v9739_v34 = vcombine.high %v9315_v36, %v9319_v13  ;;  %v9787_v53 = vcombine.high %v9325_v41, %v9329_v11 }
 0x76d   : > { %v9802_v17 = vcombine.low %v9746_v40, %v9762_v18  ;;  %v9803_v49 = vcombine.high %v9746_v40, %v9762_v18  ;;  %v9755_v31 = vcombine.high %v9317_v5, %v9321_v9  ;;  %v9785_v20 = vrot.slane %v9771_v60, %v14038_v29 }
 0x76e   : > { %v9842_v27 = vrot.slane %v9834_v44, %v14039_v0  ;;  %v9849_v33 = vrot.slane %v9835_v23, %v14039_v0  ;;  %v9753_v19 = vrot.slane %v9739_v34, %v14038_v29 }
 0x76f   : > { %9886 = vrot.lane.b32.xlu1 %v9596_v24, %s10628_s23  ;;  %v9810_v46 = vrot.slane %v9802_v17, %v14039_v0  ;;  %v9801_v24 = vrot.slane %v9787_v53, %v14038_v29  ;;  %v9817_v6 = vrot.slane %v9803_v49, %v14039_v0  ;;  %v9769_v39 = vrot.slane %v9755_v31, %v14038_v29 }
 0x771   : > { %v9866_v35 = vcombine.low %v9810_v46, %v9842_v27  ;;  %v9867_v1 = vcombine.high %v9810_v46, %v9842_v27  ;;  %v9850_v2 = vcombine.low %v9785_v20, %v9801_v24  ;;  %v9868_v56 = vcombine.low %v9817_v6, %v9849_v33 }
 0x772   : > { %v9818_v38 = vcombine.low %v9753_v19, %v9769_v39  ;;  %v9869_v8 = vcombine.high %v9817_v6, %v9849_v33  ;;  %v9851_v59 = vcombine.high %v9785_v20, %v9801_v24  ;;  %v9819_v16 = vcombine.high %v9753_v19, %v9769_v39 }
 0x773   : > { %9894 = vrot.lane.b32.xlu1 %v9597_v12, %s10631_s27  ;;  %v9858_v57 = vrot.slane %v9850_v2, %v14039_v0 }
 0x774   : > { %v9826_v42 = vrot.slane %v9818_v38, %v14039_v0  ;;  %v9865_v29 = vrot.slane %v9851_v59, %v14039_v0  ;;  %v9833_v26 = vrot.slane %v9819_v16, %v14039_v0 }
 0x776   : > { %v9870_v54 = vcombine.low %v9826_v42, %v9858_v57  ;;  %v9871_v15 = vcombine.high %v9826_v42, %v9858_v57  ;;  %v9872_v14 = vcombine.low %v9833_v26, %v9865_v29  ;;  %v9873_v61 = vcombine.high %v9833_v26, %v9865_v29 }
 0x777   : > { %9902 = vrot.lane.b32.xlu1 %v9598_v51, %s10632_s28 }
 0x77b   : > { %9910 = vrot.lane.b32.xlu1 %v9599_v50, %s10633_s29 }
 0x77f   : > { %9918 = vrot.lane.b32.xlu1 %v9600_v37, %s10634_s30 }
 0x783   : > { %9926 = vrot.lane.b32.xlu1 %v9601_v32, %s10635_s8 }
 0x787   : > { %9934 = vrot.lane.b32.xlu1 %v9866_v35, %s10636_s13 }
 0x78b   : > { %9942 = vrot.lane.b32.xlu1 %v9867_v1, %s10637_s9 }
 0x78f   : > { %9950 = vrot.lane.b32.xlu1 %v9868_v56, %s10638_s10 }
 0x793   : > { %9958 = vrot.lane.b32.xlu1 %v9869_v8, %s10639_s11 }
 0x797   : > { %9966 = vrot.lane.b32.xlu1 %v9870_v54, %s10640_s12 }
 0x79b   : > { %9974 = vrot.lane.b32.xlu1 %v9871_v15, %s10641_s14 }
 0x79f   : > { %9982 = vrot.lane.b32.xlu1 %v9872_v14, %s10642_s15 }
 0x7a3   : > { %9990 = vrot.lane.b32.xlu1 %v9873_v61, %s10643_s16 }
 0x7dd   : > { %v9879_v12 = vpop.permute.xlu1 %9878 }
 0x7de   : > { %v9996_v0 = vsel %vm9994_vm2, %v9594_v43, %v9879_v12 }
 0x7e1   : > { %v9887_v58 = vpop.permute.xlu1 %9886 }
 0x7e2   : > { %v9999_v47 = vsel %vm9997_vm5, %v9996_v0, %v9887_v58 }
 0x7e5   : > { %v9895_v7 = vpop.permute.xlu1 %9894 }
 0x7e6   : > { %v10002_v51 = vsel %vm10000_vm8, %v9999_v47, %v9895_v7 }
 0x7e9   : > { %v9903_v4 = vpop.permute.xlu1 %9902 }
 0x7ea   : > { %v10005_v5 = vsel %vm10003_vm11, %v10002_v51, %v9903_v4 }
 0x7ed   : > { %v9911_v13 = vpop.permute.xlu1 %9910 }
 0x7ee   : > { %v10008_v62 = vsel %vm10006_vm12, %v10005_v5, %v9911_v13 }
 0x7f1   : > { %v9919_v22 = vpop.permute.xlu1 %9918 }
 0x7f2   : > { %v10011_v28 = vsel %vm10009_vm14, %v10008_v62, %v9919_v22 }
 0x7f5   : > { %v9927_v11 = vpop.permute.xlu1 %9926 }
 0x7f6   : > { %v10014_v63 = vsel %vm10012_vm15, %v10011_v28, %v9927_v11 }
 0x7f9   : > { %v9935_v3 = vpop.permute.xlu1 %9934 }
 0x7fa   : > { %v10017_v55 = vsel %vm10015_vm0, %v10014_v63, %v9935_v3 }
 0x7fd   : > { %v9943_v36 = vpop.permute.xlu1 %9942 }
 0x7fe   : > { %v10019_v48 = vsel %vm4856_vm13, %v10017_v55, %v9943_v36 }
 0x801   : > { %v9951_v9 = vpop.permute.xlu1 %9950 }
 0x802   : > { %v10022_v10 = vsel %vm10020_vm1, %v10019_v48, %v9951_v9 }
 0x805   : > { %v9959_v41 = vpop.permute.xlu1 %9958 }
 0x806   : > { %v10025_v50 = vsel %vm10023_vm3, %v10022_v10, %v9959_v41 }
 0x809   : > { %v9967_v52 = vpop.permute.xlu1 %9966 }
 0x80a   : > { %v10028_v21 = vsel %vm10026_vm6, %v10025_v50, %v9967_v52 }
 0x80d   : > { %v9975_v30 = vpop.permute.xlu1 %9974 }
 0x80e   : > { %v10031_v40 = vsel %vm10029_vm7, %v10028_v21, %v9975_v30 }
 0x811   : > { %v9983_v43 = vpop.permute.xlu1 %9982 }
 0x812   : > { %v10034_v25 = vsel %vm10032_vm4, %v10031_v40, %v9983_v43 }
 0x815   : > { %v9991_v45 = vpop.permute.xlu1 %9990 }
 0x816   : > { %v10037_v18 = vsel %vm10035_vm9, %v10034_v25, %v9991_v45 }
 0x817   : > { %10040 = vst.msk [vmem:[%s13833_s19 + $0x8] sm:$0xff] %vm10038_vm10, %v10037_v18 }
 0x818 PF: > { %s17_s24 = sadd.s32 1, %s10609_s24  }
 0x819   : > { %p14_p4 = scmp.ge.s32.totalorder %s17_s24, 4  }
 0x81b   :  { %16 = sbr.rel (!%p14_p4) target bundleno = 1 (0x1), region = 81 }

</bundles_post_ra>
